<compile_context>
chip_gen: v5e
topology: v5e:2x2
jax: 0.10.0
libtpu: 0.0.40
codegen_flags: <defaults>
</compile_context>

<pallas_src>
import numpy as np
import jax
import jax.numpy as jnp
from jax import lax
from jax.experimental import pallas as pl
from jax.experimental.pallas import tpu as pltpu

LANES = 128  # padded channel width (full lane dim)


# ----------------------------------------------------------------------------
# Parameter setup glue (plain JAX): spectral normalization of conv weights.
# TODO(synk): spectral-norm power iteration stays in plain JAX (parameter
#             prep); only the forward hot path runs inside the Pallas kernel.
# ----------------------------------------------------------------------------
def _spectral_norm(w, key, n_iter=1, eps=1e-12):
    w_mat = w.reshape(w.shape[0], -1)
    u = jax.random.normal(key, (w_mat.shape[0],), dtype=w.dtype)
    u = u / (jnp.linalg.norm(u) + eps)
    v = None
    for _ in range(n_iter):
        v = w_mat.T @ u
        v = v / (jnp.linalg.norm(v) + eps)
        u = w_mat @ v
        u = u / (jnp.linalg.norm(u) + eps)
    sigma = u @ (w_mat @ v)
    return w / sigma


# ----------------------------------------------------------------------------
# Pallas kernel
# ----------------------------------------------------------------------------
def _make_kernel(H, W, PAD):
    HW = H * W
    HWP = HW + 2 * PAD          # rows in the padded tap slab
    Cp = LANES
    K3 = 3 * Cp                 # fused contraction width (3 column taps)

    def conv3x3_into_acc(act, slab_ref, w_ref, b_ref, acc_ref, mask_l, mask_r):
        """3x3 same-padding conv of act (HW, Cp) f32; result left in acc_ref."""
        # Column-shifted copies (zeroed at the left/right image borders).
        xm1 = pltpu.roll(act, shift=1, axis=0) * mask_l        # act[r - 1]
        xp1 = pltpu.roll(act, shift=HW - 1, axis=0) * mask_r   # act[r + 1]

        # Interior rows of the three aligned 128-lane sections (sx = -1/0/+1);
        # a single f32->bf16 cast per section at store time.
        slab_ref[PAD:PAD + HW, 0:Cp] = xm1.astype(jnp.bfloat16)
        slab_ref[PAD:PAD + HW, Cp:2 * Cp] = act.astype(jnp.bfloat16)
        slab_ref[PAD:PAD + HW, 2 * Cp:K3] = xp1.astype(jnp.bfloat16)

        # Bias-initialized accumulator + 3 fused dots (taps on K, K = 3*Cp).
        acc_ref[...] = jnp.broadcast_to(b_ref[...], (HW, Cp))
        for ky in range(3):                       # sy = ky - 1, aligned slice
            start = PAD + (ky - 1) * W
            acc_ref[...] += jnp.dot(slab_ref[start:start + HW, :], w_ref[ky],
                                    preferred_element_type=jnp.float32)

    def kernel(x_ref, ws_ref, bs_ref, w1_ref, b1_ref, w2_ref, b2_ref,
               ml_ref, mr_ref, pool_ref, o_ref, slab_ref, acc_ref, y_ref):
        mask_l = ml_ref[...]                      # (HW, 1) f32, col >= 1
        mask_r = mr_ref[...]                      # (HW, 1) f32, col <= W-2

        # Zero only the top/bottom pad rows of the shared slab, every step
        # (megacore-safe: each core's private scratch is initialized by the
        # steps it actually runs).  Interior rows are overwritten per conv.
        zpad = jnp.zeros((PAD, K3), jnp.bfloat16)
        slab_ref[0:PAD, :] = zpad
        slab_ref[PAD + HW:HWP, :] = zpad

        x = x_ref[...]                            # (HW, Cp) f32

        # ---- shortcut branch: 1x1 conv (no activation) ----------------------
        y_ref[...] = jnp.dot(x.astype(jnp.bfloat16), ws_ref[...],
                             preferred_element_type=jnp.float32) + bs_ref[...]

        # ---- right branch: relu -> conv3x3 -> relu -> conv3x3 ----------------
        conv3x3_into_acc(jnp.maximum(x, 0.0), slab_ref, w1_ref, b1_ref,
                         acc_ref, mask_l, mask_r)
        r1 = acc_ref[...]                         # read before acc_ref is reused
        conv3x3_into_acc(jnp.maximum(r1, 0.0), slab_ref, w2_ref, b2_ref,
                         acc_ref, mask_l, mask_r)

        # ---- sum of branches + 2x2 average pool (one bf16 MXU dot) ----------
        y16 = (y_ref[...] + acc_ref[...]).astype(jnp.bfloat16)   # (HW, Cp)
        o_ref[...] = jnp.dot(pool_ref[...], y16,
                             preferred_element_type=jnp.float32).astype(o_ref.dtype)

    return kernel


# ----------------------------------------------------------------------------
# Wrapper: NCHW in / NCHW out, same semantics as the PyTorch module forward.
# ----------------------------------------------------------------------------
def resblock_down(x_nchw, ws4, bs, w14, b1, w24, b2):
    N, Cin, H, W = x_nchw.shape
    Cout = ws4.shape[0]
    assert H % 2 == 0 and W % 2 == 0, "2x2 avg-pool needs even H, W"
    assert W % 8 == 0, "row-shift slab slices assume sublane-aligned W"
    assert Cin <= LANES and Cout <= LANES  # TODO(synk): tile channels > 128

    Cp = LANES
    HW = H * W
    Ho, Wo = H // 2, W // 2
    HWo = Ho * Wo
    PAD = max(8, W)                # >= W and multiple of 8 (W % 8 == 0)
    HWP = HW + 2 * PAD

    # ---- layout conversion + channel padding to 128 lanes (glue) ------------
    x_flat = jnp.transpose(x_nchw, (0, 2, 3, 1)).reshape(N, HW, Cin)
    x_p = jnp.pad(x_flat, ((0, 0), (0, 0), (0, Cp - Cin))).astype(jnp.float32)

    ws_p = jnp.zeros((Cp, Cp), jnp.float32).at[:Cin, :Cout].set(
        ws4.reshape(Cout, Cin).T).astype(jnp.bfloat16)

    def pack3x3(w_oihw, cin):
        # OIHW -> per kernel-row ky a (3*Cp, Cp) matrix whose row blocks are
        # the kx = 0,1,2 taps, matching the slab's lane sections.
        wt = jnp.transpose(w_oihw, (2, 3, 1, 0))                 # (3,3,cin,Cout)
        wp = jnp.zeros((3, 3, Cp, Cp), jnp.float32).at[:, :, :cin, :Cout].set(wt)
        return wp.reshape(3, 3 * Cp, Cp).astype(jnp.bfloat16)

    w1_p = pack3x3(w14, Cin)
    w2_p = pack3x3(w24, Cout)

    def pad_bias(b):
        return jnp.zeros((1, Cp), jnp.float32).at[0, :Cout].set(b)

    bs_p, b1_p, b2_p = pad_bias(bs), pad_bias(b1), pad_bias(b2)

    # grid-invariant column-border masks for the +-1 column shifts
    col = np.arange(HW) % W
    mask_l = jnp.asarray((col >= 1).astype(np.float32).reshape(HW, 1))
    mask_r = jnp.asarray((col <= W - 2).astype(np.float32).reshape(HW, 1))

    # block-diagonal 2x2 average-pool selector (0.25 is exact in bf16)
    P = np.zeros((HWo, HW), np.float32)
    for ho in range(Ho):
        for wo in range(Wo):
            r0 = 2 * ho * W + 2 * wo
            o = ho * Wo + wo
            P[o, r0] = P[o, r0 + 1] = P[o, r0 + W] = P[o, r0 + W + 1] = 0.25
    pool = jnp.asarray(P, jnp.bfloat16)

    kernel = _make_kernel(H, W, PAD)

    out_p = pl.pallas_call(
        kernel,
        out_shape=jax.ShapeDtypeStruct((N, HWo, Cp), jnp.float32),
        grid_spec=pltpu.PrefetchScalarGridSpec(
            num_scalar_prefetch=0,
            grid=(N,),
            in_specs=[
                pl.BlockSpec((None, HW, Cp), lambda b: (b, 0, 0)),   # x
                pl.BlockSpec((Cp, Cp), lambda b: (0, 0)),            # shortcut W
                pl.BlockSpec((1, Cp), lambda b: (0, 0)),             # shortcut b
                pl.BlockSpec((3, 3 * Cp, Cp), lambda b: (0, 0, 0)),  # conv_right1 W
                pl.BlockSpec((1, Cp), lambda b: (0, 0)),             # conv_right1 b
                pl.BlockSpec((3, 3 * Cp, Cp), lambda b: (0, 0, 0)),  # conv_right2 W
                pl.BlockSpec((1, Cp), lambda b: (0, 0)),             # conv_right2 b
                pl.BlockSpec((HW, 1), lambda b: (0, 0)),             # mask_l
                pl.BlockSpec((HW, 1), lambda b: (0, 0)),             # mask_r
                pl.BlockSpec((HWo, HW), lambda b: (0, 0)),           # pool selector
            ],
            out_specs=pl.BlockSpec((None, HWo, Cp), lambda b: (b, 0, 0)),
            scratch_shapes=[
                pltpu.VMEM((HWP, 3 * Cp), jnp.bfloat16),  # shared padded tap slab
                pltpu.VMEM((HW, Cp), jnp.float32),        # conv accumulator
                pltpu.VMEM((HW, Cp), jnp.float32),        # shortcut / branch sum
            ],
        ),
        compiler_params=pltpu.CompilerParams(
            dimension_semantics=("parallel",),
            vmem_limit_bytes=32 * 1024 * 1024,
        ),
    )(x_p, ws_p, bs_p, w1_p, b1_p, w2_p, b2_p, mask_l, mask_r, pool)

    out = out_p[:, :, :Cout].reshape(N, Ho, Wo, Cout)
    return jnp.transpose(out, (0, 3, 1, 2))


# ----------------------------------------------------------------------------
# Pure-JAX f32 reference (NCHW, mirrors the PyTorch forward) for checking.
# ----------------------------------------------------------------------------
def _ref_forward(x, ws4, bs, w14, b1, w24, b2):
    dn = ('NCHW', 'OIHW', 'NCHW')

    def conv(x, w, b, pad):
        y = lax.conv_general_dilated(x, w, (1, 1), [(pad, pad), (pad, pad)],
                                     dimension_numbers=dn,
                                     precision=lax.Precision.HIGHEST)
        return y + b.reshape(1, -1, 1, 1)

    def pool(x):
        N, C, H, W = x.shape
        return x.reshape(N, C, H // 2, 2, W // 2, 2).mean(axis=(3, 5))

    out_short = pool(conv(x, ws4, bs, 0))
    out = jnp.maximum(x, 0.0)
    out = conv(out, w14, b1, 1)
    out = jnp.maximum(out, 0.0)
    out = conv(out, w24, b2, 1)
    out = pool(out)
    return out_short + out


if __name__ == "__main__":
    key = jax.random.PRNGKey(0)

    # (N, Cin, Cout, H, W): primary small case + non-square / wider variants
    test_shapes = [
        (2, 4, 8, 16, 16),
        (2, 4, 8, 8, 16),
        (1, 8, 16, 16, 32),
    ]

    for t, (N, Cin, Cout, H, W) in enumerate(test_shapes):
        keys = jax.random.split(jax.random.fold_in(key, t), 10)

        x = jax.random.normal(keys[0], (N, Cin, H, W), jnp.float32)

        # deterministic parameters (PyTorch OIHW shapes), spectral-normalized
        ws4 = _spectral_norm(
            0.3 * jax.random.normal(keys[1], (Cout, Cin, 1, 1), jnp.float32), keys[2])
        w14 = _spectral_norm(
            0.3 * jax.random.normal(keys[3], (Cout, Cin, 3, 3), jnp.float32), keys[4])
        w24 = _spectral_norm(
            0.3 * jax.random.normal(keys[5], (Cout, Cout, 3, 3), jnp.float32), keys[6])
        bs = 0.1 * jax.random.normal(keys[7], (Cout,), jnp.float32)
        b1 = 0.1 * jax.random.normal(keys[8], (Cout,), jnp.float32)
        b2 = 0.1 * jax.random.normal(keys[9], (Cout,), jnp.float32)

        out = jax.block_until_ready(resblock_down(x, ws4, bs, w14, b1, w24, b2))
        ref = _ref_forward(x, ws4, bs, w14, b1, w24, b2)

        # tolerance sized for bf16 MXU operands with f32 accumulation
        np.testing.assert_allclose(np.asarray(out), np.asarray(ref),
                                   rtol=2e-2, atol=2e-2)

    print("KERNEL_OK")
</pallas_src>

<mosaic_0001>
module attributes {stable_mosaic.version = 11 : i64} {
  func.func @kernel(%arg0: i32, %arg1: memref<1x256x128xf32, #tpu.memory_space<vmem>>, %arg2: memref<128x128xbf16, #tpu.memory_space<vmem>>, %arg3: memref<1x128xf32, #tpu.memory_space<vmem>>, %arg4: memref<3x384x128xbf16, #tpu.memory_space<vmem>>, %arg5: memref<1x128xf32, #tpu.memory_space<vmem>>, %arg6: memref<3x384x128xbf16, #tpu.memory_space<vmem>>, %arg7: memref<1x128xf32, #tpu.memory_space<vmem>>, %arg8: memref<256x1xf32, #tpu.memory_space<vmem>>, %arg9: memref<256x1xf32, #tpu.memory_space<vmem>>, %arg10: memref<64x256xbf16, #tpu.memory_space<vmem>>, %arg11: memref<1x64x128xf32, #tpu.memory_space<vmem>>, %arg12: memref<288x384xbf16, #tpu.memory_space<vmem>>, %arg13: memref<256x128xf32, #tpu.memory_space<vmem>>, %arg14: memref<256x128xf32, #tpu.memory_space<vmem>>) attributes {dimension_semantics = [#tpu.dimension_semantics<parallel>], iteration_bounds = array<i64: 2>, scalar_prefetch = 0 : i64, scratch_operands = 3 : i64, tpu.core_type = #tpu.core_type<tc>, window_params = [{transform_indices = @transform_0, window_bounds = array<i64: 1, 256, 128>}, {pipeline_mode = #tpu.pipeline_mode<synchronous>, transform_indices = @transform_1, window_bounds = array<i64: 128, 128>}, {pipeline_mode = #tpu.pipeline_mode<synchronous>, transform_indices = @transform_2, window_bounds = array<i64: 1, 128>}, {pipeline_mode = #tpu.pipeline_mode<synchronous>, transform_indices = @transform_3, window_bounds = array<i64: 3, 384, 128>}, {pipeline_mode = #tpu.pipeline_mode<synchronous>, transform_indices = @transform_4, window_bounds = array<i64: 1, 128>}, {pipeline_mode = #tpu.pipeline_mode<synchronous>, transform_indices = @transform_5, window_bounds = array<i64: 3, 384, 128>}, {pipeline_mode = #tpu.pipeline_mode<synchronous>, transform_indices = @transform_6, window_bounds = array<i64: 1, 128>}, {pipeline_mode = #tpu.pipeline_mode<synchronous>, transform_indices = @transform_7, window_bounds = array<i64: 256, 1>}, {pipeline_mode = #tpu.pipeline_mode<synchronous>, transform_indices = @transform_8, window_bounds = array<i64: 256, 1>}, {pipeline_mode = #tpu.pipeline_mode<synchronous>, transform_indices = @transform_9, window_bounds = array<i64: 64, 256>}, {transform_indices = @transform_10, window_bounds = array<i64: 1, 64, 128>}]} {
    %c0 = arith.constant 0 : index
    %c0_0 = arith.constant 0 : index
    %0 = vector.load %arg8[%c0, %c0_0] : memref<256x1xf32, #tpu.memory_space<vmem>>, vector<256x1xf32>
    %c0_1 = arith.constant 0 : index
    %c0_2 = arith.constant 0 : index
    %1 = vector.load %arg9[%c0_1, %c0_2] : memref<256x1xf32, #tpu.memory_space<vmem>>, vector<256x1xf32>
    %cst = arith.constant 0.000000e+00 : bf16
    %2 = vector.broadcast %cst : bf16 to vector<16x384xbf16>
    %c0_3 = arith.constant 0 : index
    %c0_4 = arith.constant 0 : index
    %3 = vector.load %arg12[%c0_3, %c0_4] : memref<288x384xbf16, #tpu.memory_space<vmem>>, vector<16x384xbf16>
    tpu.vector_store %arg12[%c0_3, %c0_4], %2 {strides = array<i32>} : memref<288x384xbf16, #tpu.memory_space<vmem>>, vector<16x384xbf16>,
    %c272 = arith.constant 272 : index
    %c0_5 = arith.constant 0 : index
    %4 = vector.load %arg12[%c272, %c0_5] : memref<288x384xbf16, #tpu.memory_space<vmem>>, vector<16x384xbf16>
    tpu.vector_store %arg12[%c272, %c0_5], %2 {strides = array<i32>} : memref<288x384xbf16, #tpu.memory_space<vmem>>, vector<16x384xbf16>,
    %c0_6 = arith.constant 0 : index
    %c0_7 = arith.constant 0 : index
    %c0_8 = arith.constant 0 : index
    %5 = vector.load %arg1[%c0_6, %c0_7, %c0_8] : memref<1x256x128xf32, #tpu.memory_space<vmem>>, vector<1x256x128xf32>
    %6 = vector.shape_cast %5 : vector<1x256x128xf32> to vector<256x128xf32>
    %7 = arith.truncf %6 : vector<256x128xf32> to vector<256x128xbf16>
    %c0_9 = arith.constant 0 : index
    %c0_10 = arith.constant 0 : index
    %8 = vector.load %arg2[%c0_9, %c0_10] : memref<128x128xbf16, #tpu.memory_space<vmem>>, vector<128x128xbf16>
    %cst_11 = arith.constant dense<0.000000e+00> : vector<256x128xf32>
    %9 = tpu.matmul %7, %8, %cst_11 {dimension_numbers = #tpu.dot_dimension_numbers<[1], [0], [0], [1], [0, 0, 1, 1], [], []>} : vector<256x128xbf16>, vector<128x128xbf16>, vector<256x128xf32> -> vector<256x128xf32>
    %c0_12 = arith.constant 0 : index
    %c0_13 = arith.constant 0 : index
    %10 = vector.load %arg3[%c0_12, %c0_13] : memref<1x128xf32, #tpu.memory_space<vmem>>, vector<1x128xf32>
    %11 = vector.broadcast %10 : vector<1x128xf32> to vector<256x128xf32>
    %12 = arith.addf %9, %11 : vector<256x128xf32>
    %c0_14 = arith.constant 0 : index
    %c0_15 = arith.constant 0 : index
    %13 = vector.load %arg14[%c0_14, %c0_15] : memref<256x128xf32, #tpu.memory_space<vmem>>, vector<256x128xf32>
    tpu.vector_store %arg14[%c0_14, %c0_15], %12 {strides = array<i32>} : memref<256x128xf32, #tpu.memory_space<vmem>>, vector<256x128xf32>,
    %cst_16 = arith.constant 0.000000e+00 : f32
    %14 = vector.broadcast %cst_16 : f32 to vector<256x128xf32>
    %15 = arith.maximumf %6, %14 : vector<256x128xf32>
    %c1_i32 = arith.constant 1 : i32
    %16 = tpu.dynamic_rotate %15 by %c1_i32 dim 0 : vector<256x128xf32>, i32 -> vector<256x128xf32>
    %17 = vector.broadcast %0 : vector<256x1xf32> to vector<256x128xf32>
    %18 = arith.mulf %16, %17 : vector<256x128xf32>
    %c255_i32 = arith.constant 255 : i32
    %19 = tpu.dynamic_rotate %15 by %c255_i32 dim 0 : vector<256x128xf32>, i32 -> vector<256x128xf32>
    %20 = vector.broadcast %1 : vector<256x1xf32> to vector<256x128xf32>
    %21 = arith.mulf %19, %20 : vector<256x128xf32>
    %22 = arith.truncf %18 : vector<256x128xf32> to vector<256x128xbf16>
    %c16 = arith.constant 16 : index
    %c0_17 = arith.constant 0 : index
    %23 = vector.load %arg12[%c16, %c0_17] : memref<288x384xbf16, #tpu.memory_space<vmem>>, vector<256x128xbf16>
    tpu.vector_store %arg12[%c16, %c0_17], %22 {strides = array<i32>} : memref<288x384xbf16, #tpu.memory_space<vmem>>, vector<256x128xbf16>,
    %24 = arith.truncf %15 : vector<256x128xf32> to vector<256x128xbf16>
    %c16_18 = arith.constant 16 : index
    %c128 = arith.constant 128 : index
    %25 = vector.load %arg12[%c16_18, %c128] : memref<288x384xbf16, #tpu.memory_space<vmem>>, vector<256x128xbf16>
    tpu.vector_store %arg12[%c16_18, %c128], %24 {strides = array<i32>} : memref<288x384xbf16, #tpu.memory_space<vmem>>, vector<256x128xbf16>,
    %26 = arith.truncf %21 : vector<256x128xf32> to vector<256x128xbf16>
    %c16_19 = arith.constant 16 : index
    %c256 = arith.constant 256 : index
    %27 = vector.load %arg12[%c16_19, %c256] : memref<288x384xbf16, #tpu.memory_space<vmem>>, vector<256x128xbf16>
    tpu.vector_store %arg12[%c16_19, %c256], %26 {strides = array<i32>} : memref<288x384xbf16, #tpu.memory_space<vmem>>, vector<256x128xbf16>,
    %c0_20 = arith.constant 0 : index
    %c0_21 = arith.constant 0 : index
    %28 = vector.load %arg5[%c0_20, %c0_21] : memref<1x128xf32, #tpu.memory_space<vmem>>, vector<1x128xf32>
    %29 = vector.shape_cast %28 : vector<1x128xf32> to vector<1x128xf32>
    %30 = vector.broadcast %29 : vector<1x128xf32> to vector<256x128xf32>
    %c0_22 = arith.constant 0 : index
    %c0_23 = arith.constant 0 : index
    %31 = vector.load %arg13[%c0_22, %c0_23] : memref<256x128xf32, #tpu.memory_space<vmem>>, vector<256x128xf32>
    tpu.vector_store %arg13[%c0_22, %c0_23], %30 {strides = array<i32>} : memref<256x128xf32, #tpu.memory_space<vmem>>, vector<256x128xf32>,
    %c0_24 = arith.constant 0 : index
    %c0_25 = arith.constant 0 : index
    %32 = vector.load %arg13[%c0_24, %c0_25] : memref<256x128xf32, #tpu.memory_space<vmem>>, vector<256x128xf32>
    %c0_26 = arith.constant 0 : index
    %c0_27 = arith.constant 0 : index
    %33 = vector.load %arg12[%c0_26, %c0_27] : memref<288x384xbf16, #tpu.memory_space<vmem>>, vector<256x384xbf16>
    %c0_28 = arith.constant 0 : index
    %c0_29 = arith.constant 0 : index
    %c0_30 = arith.constant 0 : index
    %34 = vector.load %arg4[%c0_28, %c0_29, %c0_30] : memref<3x384x128xbf16, #tpu.memory_space<vmem>>, vector<1x384x128xbf16>
    %35 = vector.shape_cast %34 : vector<1x384x128xbf16> to vector<384x128xbf16>
    %cst_31 = arith.constant dense<0.000000e+00> : vector<256x128xf32>
    %36 = tpu.matmul %33, %35, %cst_31 {dimension_numbers = #tpu.dot_dimension_numbers<[1], [0], [0], [1], [0, 0, 1, 1], [], []>} : vector<256x384xbf16>, vector<384x128xbf16>, vector<256x128xf32> -> vector<256x128xf32>
    %37 = arith.addf %32, %36 : vector<256x128xf32>
    %c0_32 = arith.constant 0 : index
    %c0_33 = arith.constant 0 : index
    %38 = vector.load %arg13[%c0_32, %c0_33] : memref<256x128xf32, #tpu.memory_space<vmem>>, vector<256x128xf32>
    tpu.vector_store %arg13[%c0_32, %c0_33], %37 {strides = array<i32>} : memref<256x128xf32, #tpu.memory_space<vmem>>, vector<256x128xf32>,
    %c0_34 = arith.constant 0 : index
    %c0_35 = arith.constant 0 : index
    %39 = vector.load %arg13[%c0_34, %c0_35] : memref<256x128xf32, #tpu.memory_space<vmem>>, vector<256x128xf32>
    %c16_36 = arith.constant 16 : index
    %c0_37 = arith.constant 0 : index
    %40 = vector.load %arg12[%c16_36, %c0_37] : memref<288x384xbf16, #tpu.memory_space<vmem>>, vector<256x384xbf16>
    %c1 = arith.constant 1 : index
    %c0_38 = arith.constant 0 : index
    %c0_39 = arith.constant 0 : index
    %41 = vector.load %arg4[%c1, %c0_38, %c0_39] : memref<3x384x128xbf16, #tpu.memory_space<vmem>>, vector<1x384x128xbf16>
    %42 = vector.shape_cast %41 : vector<1x384x128xbf16> to vector<384x128xbf16>
    %cst_40 = arith.constant dense<0.000000e+00> : vector<256x128xf32>
    %43 = tpu.matmul %40, %42, %cst_40 {dimension_numbers = #tpu.dot_dimension_numbers<[1], [0], [0], [1], [0, 0, 1, 1], [], []>} : vector<256x384xbf16>, vector<384x128xbf16>, vector<256x128xf32> -> vector<256x128xf32>
    %44 = arith.addf %39, %43 : vector<256x128xf32>
    %c0_41 = arith.constant 0 : index
    %c0_42 = arith.constant 0 : index
    %45 = vector.load %arg13[%c0_41, %c0_42] : memref<256x128xf32, #tpu.memory_space<vmem>>, vector<256x128xf32>
    tpu.vector_store %arg13[%c0_41, %c0_42], %44 {strides = array<i32>} : memref<256x128xf32, #tpu.memory_space<vmem>>, vector<256x128xf32>,
    %c0_43 = arith.constant 0 : index
    %c0_44 = arith.constant 0 : index
    %46 = vector.load %arg13[%c0_43, %c0_44] : memref<256x128xf32, #tpu.memory_space<vmem>>, vector<256x128xf32>
    %c32 = arith.constant 32 : index
    %c0_45 = arith.constant 0 : index
    %47 = vector.load %arg12[%c32, %c0_45] : memref<288x384xbf16, #tpu.memory_space<vmem>>, vector<256x384xbf16>
    %c2 = arith.constant 2 : index
    %c0_46 = arith.constant 0 : index
    %c0_47 = arith.constant 0 : index
    %48 = vector.load %arg4[%c2, %c0_46, %c0_47] : memref<3x384x128xbf16, #tpu.memory_space<vmem>>, vector<1x384x128xbf16>
    %49 = vector.shape_cast %48 : vector<1x384x128xbf16> to vector<384x128xbf16>
    %cst_48 = arith.constant dense<0.000000e+00> : vector<256x128xf32>
    %50 = tpu.matmul %47, %49, %cst_48 {dimension_numbers = #tpu.dot_dimension_numbers<[1], [0], [0], [1], [0, 0, 1, 1], [], []>} : vector<256x384xbf16>, vector<384x128xbf16>, vector<256x128xf32> -> vector<256x128xf32>
    %51 = arith.addf %46, %50 : vector<256x128xf32>
    %c0_49 = arith.constant 0 : index
    %c0_50 = arith.constant 0 : index
    %52 = vector.load %arg13[%c0_49, %c0_50] : memref<256x128xf32, #tpu.memory_space<vmem>>, vector<256x128xf32>
    tpu.vector_store %arg13[%c0_49, %c0_50], %51 {strides = array<i32>} : memref<256x128xf32, #tpu.memory_space<vmem>>, vector<256x128xf32>,
    %c0_51 = arith.constant 0 : index
    %c0_52 = arith.constant 0 : index
    %53 = vector.load %arg13[%c0_51, %c0_52] : memref<256x128xf32, #tpu.memory_space<vmem>>, vector<256x128xf32>
    %cst_53 = arith.constant 0.000000e+00 : f32
    %54 = vector.broadcast %cst_53 : f32 to vector<256x128xf32>
    %55 = arith.maximumf %53, %54 : vector<256x128xf32>
    %c1_i32_54 = arith.constant 1 : i32
    %56 = tpu.dynamic_rotate %55 by %c1_i32_54 dim 0 : vector<256x128xf32>, i32 -> vector<256x128xf32>
    %57 = vector.broadcast %0 : vector<256x1xf32> to vector<256x128xf32>
    %58 = arith.mulf %56, %57 : vector<256x128xf32>
    %c255_i32_55 = arith.constant 255 : i32
    %59 = tpu.dynamic_rotate %55 by %c255_i32_55 dim 0 : vector<256x128xf32>, i32 -> vector<256x128xf32>
    %60 = vector.broadcast %1 : vector<256x1xf32> to vector<256x128xf32>
    %61 = arith.mulf %59, %60 : vector<256x128xf32>
    %62 = arith.truncf %58 : vector<256x128xf32> to vector<256x128xbf16>
    %c16_56 = arith.constant 16 : index
    %c0_57 = arith.constant 0 : index
    %63 = vector.load %arg12[%c16_56, %c0_57] : memref<288x384xbf16, #tpu.memory_space<vmem>>, vector<256x128xbf16>
    tpu.vector_store %arg12[%c16_56, %c0_57], %62 {strides = array<i32>} : memref<288x384xbf16, #tpu.memory_space<vmem>>, vector<256x128xbf16>,
    %64 = arith.truncf %55 : vector<256x128xf32> to vector<256x128xbf16>
    %c16_58 = arith.constant 16 : index
    %c128_59 = arith.constant 128 : index
    %65 = vector.load %arg12[%c16_58, %c128_59] : memref<288x384xbf16, #tpu.memory_space<vmem>>, vector<256x128xbf16>
    tpu.vector_store %arg12[%c16_58, %c128_59], %64 {strides = array<i32>} : memref<288x384xbf16, #tpu.memory_space<vmem>>, vector<256x128xbf16>,
    %66 = arith.truncf %61 : vector<256x128xf32> to vector<256x128xbf16>
    %c16_60 = arith.constant 16 : index
    %c256_61 = arith.constant 256 : index
    %67 = vector.load %arg12[%c16_60, %c256_61] : memref<288x384xbf16, #tpu.memory_space<vmem>>, vector<256x128xbf16>
    tpu.vector_store %arg12[%c16_60, %c256_61], %66 {strides = array<i32>} : memref<288x384xbf16, #tpu.memory_space<vmem>>, vector<256x128xbf16>,
    %c0_62 = arith.constant 0 : index
    %c0_63 = arith.constant 0 : index
    %68 = vector.load %arg7[%c0_62, %c0_63] : memref<1x128xf32, #tpu.memory_space<vmem>>, vector<1x128xf32>
    %69 = vector.shape_cast %68 : vector<1x128xf32> to vector<1x128xf32>
    %70 = vector.broadcast %69 : vector<1x128xf32> to vector<256x128xf32>
    %c0_64 = arith.constant 0 : index
    %c0_65 = arith.constant 0 : index
    %71 = vector.load %arg13[%c0_64, %c0_65] : memref<256x128xf32, #tpu.memory_space<vmem>>, vector<256x128xf32>
    tpu.vector_store %arg13[%c0_64, %c0_65], %70 {strides = array<i32>} : memref<256x128xf32, #tpu.memory_space<vmem>>, vector<256x128xf32>,
    %c0_66 = arith.constant 0 : index
    %c0_67 = arith.constant 0 : index
    %72 = vector.load %arg13[%c0_66, %c0_67] : memref<256x128xf32, #tpu.memory_space<vmem>>, vector<256x128xf32>
    %c0_68 = arith.constant 0 : index
    %c0_69 = arith.constant 0 : index
    %73 = vector.load %arg12[%c0_68, %c0_69] : memref<288x384xbf16, #tpu.memory_space<vmem>>, vector<256x384xbf16>
    %c0_70 = arith.constant 0 : index
    %c0_71 = arith.constant 0 : index
    %c0_72 = arith.constant 0 : index
    %74 = vector.load %arg6[%c0_70, %c0_71, %c0_72] : memref<3x384x128xbf16, #tpu.memory_space<vmem>>, vector<1x384x128xbf16>
    %75 = vector.shape_cast %74 : vector<1x384x128xbf16> to vector<384x128xbf16>
    %cst_73 = arith.constant dense<0.000000e+00> : vector<256x128xf32>
    %76 = tpu.matmul %73, %75, %cst_73 {dimension_numbers = #tpu.dot_dimension_numbers<[1], [0], [0], [1], [0, 0, 1, 1], [], []>} : vector<256x384xbf16>, vector<384x128xbf16>, vector<256x128xf32> -> vector<256x128xf32>
    %77 = arith.addf %72, %76 : vector<256x128xf32>
    %c0_74 = arith.constant 0 : index
    %c0_75 = arith.constant 0 : index
    %78 = vector.load %arg13[%c0_74, %c0_75] : memref<256x128xf32, #tpu.memory_space<vmem>>, vector<256x128xf32>
    tpu.vector_store %arg13[%c0_74, %c0_75], %77 {strides = array<i32>} : memref<256x128xf32, #tpu.memory_space<vmem>>, vector<256x128xf32>,
    %c0_76 = arith.constant 0 : index
    %c0_77 = arith.constant 0 : index
    %79 = vector.load %arg13[%c0_76, %c0_77] : memref<256x128xf32, #tpu.memory_space<vmem>>, vector<256x128xf32>
    %c16_78 = arith.constant 16 : index
    %c0_79 = arith.constant 0 : index
    %80 = vector.load %arg12[%c16_78, %c0_79] : memref<288x384xbf16, #tpu.memory_space<vmem>>, vector<256x384xbf16>
    %c1_80 = arith.constant 1 : index
    %c0_81 = arith.constant 0 : index
    %c0_82 = arith.constant 0 : index
    %81 = vector.load %arg6[%c1_80, %c0_81, %c0_82] : memref<3x384x128xbf16, #tpu.memory_space<vmem>>, vector<1x384x128xbf16>
    %82 = vector.shape_cast %81 : vector<1x384x128xbf16> to vector<384x128xbf16>
    %cst_83 = arith.constant dense<0.000000e+00> : vector<256x128xf32>
    %83 = tpu.matmul %80, %82, %cst_83 {dimension_numbers = #tpu.dot_dimension_numbers<[1], [0], [0], [1], [0, 0, 1, 1], [], []>} : vector<256x384xbf16>, vector<384x128xbf16>, vector<256x128xf32> -> vector<256x128xf32>
    %84 = arith.addf %79, %83 : vector<256x128xf32>
    %c0_84 = arith.constant 0 : index
    %c0_85 = arith.constant 0 : index
    %85 = vector.load %arg13[%c0_84, %c0_85] : memref<256x128xf32, #tpu.memory_space<vmem>>, vector<256x128xf32>
    tpu.vector_store %arg13[%c0_84, %c0_85], %84 {strides = array<i32>} : memref<256x128xf32, #tpu.memory_space<vmem>>, vector<256x128xf32>,
    %c0_86 = arith.constant 0 : index
    %c0_87 = arith.constant 0 : index
    %86 = vector.load %arg13[%c0_86, %c0_87] : memref<256x128xf32, #tpu.memory_space<vmem>>, vector<256x128xf32>
    %c32_88 = arith.constant 32 : index
    %c0_89 = arith.constant 0 : index
    %87 = vector.load %arg12[%c32_88, %c0_89] : memref<288x384xbf16, #tpu.memory_space<vmem>>, vector<256x384xbf16>
    %c2_90 = arith.constant 2 : index
    %c0_91 = arith.constant 0 : index
    %c0_92 = arith.constant 0 : index
    %88 = vector.load %arg6[%c2_90, %c0_91, %c0_92] : memref<3x384x128xbf16, #tpu.memory_space<vmem>>, vector<1x384x128xbf16>
    %89 = vector.shape_cast %88 : vector<1x384x128xbf16> to vector<384x128xbf16>
    %cst_93 = arith.constant dense<0.000000e+00> : vector<256x128xf32>
    %90 = tpu.matmul %87, %89, %cst_93 {dimension_numbers = #tpu.dot_dimension_numbers<[1], [0], [0], [1], [0, 0, 1, 1], [], []>} : vector<256x384xbf16>, vector<384x128xbf16>, vector<256x128xf32> -> vector<256x128xf32>
    %91 = arith.addf %86, %90 : vector<256x128xf32>
    %c0_94 = arith.constant 0 : index
    %c0_95 = arith.constant 0 : index
    %92 = vector.load %arg13[%c0_94, %c0_95] : memref<256x128xf32, #tpu.memory_space<vmem>>, vector<256x128xf32>
    tpu.vector_store %arg13[%c0_94, %c0_95], %91 {strides = array<i32>} : memref<256x128xf32, #tpu.memory_space<vmem>>, vector<256x128xf32>,
    %c0_96 = arith.constant 0 : index
    %c0_97 = arith.constant 0 : index
    %93 = vector.load %arg14[%c0_96, %c0_97] : memref<256x128xf32, #tpu.memory_space<vmem>>, vector<256x128xf32>
    %c0_98 = arith.constant 0 : index
    %c0_99 = arith.constant 0 : index
    %94 = vector.load %arg13[%c0_98, %c0_99] : memref<256x128xf32, #tpu.memory_space<vmem>>, vector<256x128xf32>
    %95 = arith.addf %93, %94 : vector<256x128xf32>
    %96 = arith.truncf %95 : vector<256x128xf32> to vector<256x128xbf16>
    %c0_100 = arith.constant 0 : index
    %c0_101 = arith.constant 0 : index
    %97 = vector.load %arg10[%c0_100, %c0_101] : memref<64x256xbf16, #tpu.memory_space<vmem>>, vector<64x256xbf16>
    %cst_102 = arith.constant dense<0.000000e+00> : vector<64x128xf32>
    %98 = tpu.matmul %97, %96, %cst_102 {dimension_numbers = #tpu.dot_dimension_numbers<[1], [0], [0], [1], [0, 0, 1, 1], [], []>} : vector<64x256xbf16>, vector<256x128xbf16>, vector<64x128xf32> -> vector<64x128xf32>
    %c0_103 = arith.constant 0 : index
    %c0_104 = arith.constant 0 : index
    %c0_105 = arith.constant 0 : index
    %99 = vector.load %arg11[%c0_103, %c0_104, %c0_105] : memref<1x64x128xf32, #tpu.memory_space<vmem>>, vector<1x64x128xf32>
    %100 = vector.shape_cast %99 : vector<1x64x128xf32> to vector<64x128xf32>
    %101 = vector.shape_cast %98 : vector<64x128xf32> to vector<1x64x128xf32>
    tpu.vector_store %arg11[%c0_103, %c0_104, %c0_105], %101 {strides = array<i32>} : memref<1x64x128xf32, #tpu.memory_space<vmem>>, vector<1x64x128xf32>,
    return
  }
  func.func @transform_0(%arg0: i32) -> (i32, i32, i32) {
    %c0_i32 = arith.constant 0 : i32
    %c0_i32_0 = arith.constant 0 : i32
    %c0_i32_1 = arith.constant 0 : i32
    return %arg0, %c0_i32, %c0_i32_0 : i32, i32, i32
  }
  func.func @transform_1(%arg0: i32) -> (i32, i32) {
    %c0_i32 = arith.constant 0 : i32
    %c0_i32_0 = arith.constant 0 : i32
    %c0_i32_1 = arith.constant 0 : i32
    return %c0_i32, %c0_i32_0 : i32, i32
  }
  func.func @transform_2(%arg0: i32) -> (i32, i32) {
    %c0_i32 = arith.constant 0 : i32
    %c0_i32_0 = arith.constant 0 : i32
    %c0_i32_1 = arith.constant 0 : i32
    return %c0_i32, %c0_i32_0 : i32, i32
  }
  func.func @transform_3(%arg0: i32) -> (i32, i32, i32) {
    %c0_i32 = arith.constant 0 : i32
    %c0_i32_0 = arith.constant 0 : i32
    %c0_i32_1 = arith.constant 0 : i32
    %c0_i32_2 = arith.constant 0 : i32
    return %c0_i32, %c0_i32_0, %c0_i32_1 : i32, i32, i32
  }
  func.func @transform_4(%arg0: i32) -> (i32, i32) {
    %c0_i32 = arith.constant 0 : i32
    %c0_i32_0 = arith.constant 0 : i32
    %c0_i32_1 = arith.constant 0 : i32
    return %c0_i32, %c0_i32_0 : i32, i32
  }
  func.func @transform_5(%arg0: i32) -> (i32, i32, i32) {
    %c0_i32 = arith.constant 0 : i32
    %c0_i32_0 = arith.constant 0 : i32
    %c0_i32_1 = arith.constant 0 : i32
    %c0_i32_2 = arith.constant 0 : i32
    return %c0_i32, %c0_i32_0, %c0_i32_1 : i32, i32, i32
  }
  func.func @transform_6(%arg0: i32) -> (i32, i32) {
    %c0_i32 = arith.constant 0 : i32
    %c0_i32_0 = arith.constant 0 : i32
    %c0_i32_1 = arith.constant 0 : i32
    return %c0_i32, %c0_i32_0 : i32, i32
  }
  func.func @transform_7(%arg0: i32) -> (i32, i32) {
    %c0_i32 = arith.constant 0 : i32
    %c0_i32_0 = arith.constant 0 : i32
    %c0_i32_1 = arith.constant 0 : i32
    return %c0_i32, %c0_i32_0 : i32, i32
  }
  func.func @transform_8(%arg0: i32) -> (i32, i32) {
    %c0_i32 = arith.constant 0 : i32
    %c0_i32_0 = arith.constant 0 : i32
    %c0_i32_1 = arith.constant 0 : i32
    return %c0_i32, %c0_i32_0 : i32, i32
  }
  func.func @transform_9(%arg0: i32) -> (i32, i32) {
    %c0_i32 = arith.constant 0 : i32
    %c0_i32_0 = arith.constant 0 : i32
    %c0_i32_1 = arith.constant 0 : i32
    return %c0_i32, %c0_i32_0 : i32, i32
  }
  func.func @transform_10(%arg0: i32) -> (i32, i32, i32) {
    %c0_i32 = arith.constant 0 : i32
    %c0_i32_0 = arith.constant 0 : i32
    %c0_i32_1 = arith.constant 0 : i32
    return %arg0, %c0_i32, %c0_i32_0 : i32, i32, i32
  }
}

</mosaic_0001>

<bundles_post_ra>
// kernel: tpu_custom_call.1
= control target key start
LH: loop header
LB: loop body
LE: loop exit
PB: predicated region body
PF: predicated region fallthrough
CT: control target
= control target key end

     0   :  { %s13302_s0 = inlined_call_operand.vmem [shape: f32[2,256,128], index: 0, kind: input, shape index: {}]   ;;  %s13303_s1 = inlined_call_operand.hbm [shape: bf16[128,128], index: 1, kind: input, shape index: {}]   ;;  %s13304_s2 = inlined_call_operand.vmem [shape: f32[1,128], index: 2, kind: input, shape index: {}]   ;;  %s13305_s3 = inlined_call_operand.hbm [shape: bf16[3,384,128], index: 3, kind: input, shape index: {}]   ;;  %s13306_s4 = inlined_call_operand.vmem [shape: f32[1,128], index: 4, kind: input, shape index: {}]   ;;  %s13307_s5 = inlined_call_operand.hbm [shape: bf16[3,384,128], index: 5, kind: input, shape index: {}]   ;;  %s13308_s6 = inlined_call_operand.vmem [shape: f32[1,128], index: 6, kind: input, shape index: {}]   ;;  %s13309_s7 = inlined_call_operand.vmem [shape: f32[256,1], index: 7, kind: input, shape index: {}]   ;;  %s13310_s8 = inlined_call_operand.vmem [shape: f32[256,1], index: 8, kind: input, shape index: {}]   ;;  %s13311_s9 = inlined_call_operand.hbm [shape: bf16[64,256], index: 9, kind: input, shape index: {}]   ;;  %s13312_s10 = inlined_call_operand.hbm [shape: f32[2,64,128], index: 10, kind: output, shape index: {}]  }
   0x1   :  { %13414 = sst [smem:[#allocation146_spill]] %s13303_s1 }
   0x2   :  { %13415 = sst [smem:[#allocation147_spill]] %s13305_s3 }
   0x3   :  { %15 = vsyncpa [#allocation6], 0 }
   0x4   :  { %16 = vsyncpa [#allocation9], 0 }
   0x5   :  { %17 = vsyncpa [#allocation12], 0 }
   0x6   :  { %18 = vsyncpa [#allocation7], 0 }
   0x7   :  { %20 = vsyncpa [#allocation7 + $0x1], 0  ;;  %s10236_s13 = smov 0   ;;  %s10238_s14 = smov 0  }
   0x8   :  { %s10240_s15 = smov 0   ;;  %s10242_s16 = smov 0  }
   0x9 LB: > { %13416 = sst [smem:[#allocation18_spill]] %s10164_s15  ;;  %s10257_s17 = sadd.s32 4294967295, %s10168_s16   ;;  %s10168_s16 = sphi %s10242_s16, %s13985_s16   ;;  %s10164_s15 = sphi %s10240_s15, %s13987_s15   ;;  %s10160_s14 = sphi %s10238_s14, %s13989_s14   ;;  %s10156_s13 = sphi %s10236_s13, %s13988_s13  }
   0xa   : > { %s7594_s18 = sadd.s32 4294967294, %s10168_s16   ;;  %s10261_s19 = sadd.s32 1, %s10168_s16  }
   0xb   : > { %13417 = sst [smem:[#allocation19_spill]] %s10261_s19  ;;  %s248_s20 = sadd.s32 1, %s10164_s15 }
   0xc   : > { %s245_s21 = ssub.s32 %s10168_s16, %s10261_s19  ;;  %p258_p0 = scmp.ne.s32.totalorder %s10164_s15, %s10160_s14 }
   0xd   : > { %p246_p1 = scmp.eq.s32.totalorder %s245_s21, 0  ;;  %p259_p2 = scmp.eq.s32.totalorder %s10257_s17, 1 }
   0xe   : > { %p264_p3 = scmp.ne.s32.totalorder %s10160_s14, %s10156_s13  ;;  %p265_p4 = scmp.eq.s32.totalorder %s7594_s18, 1 }
   0xf   : > { %s10272_s22 = scalar_select %p246_p1, %s10164_s15, %s248_s20  }
  0x10   : > { %p10274_p5 = por %p259_p2, %p258_p0  ;;  %p10278_p6 = por %p265_p4, %p264_p3 }
  0x11   : > { %13418 = sst [smem:[#allocation20_spill]] %s10272_s22  ;;  %p7595_p7 = scmp.ge.s32.totalorder %s10168_s16, 1 }
  0x12   : > { %s13420_s24 = scalar_select %p10278_p6, 1, 0 }
  0x13   : > { %p272_p8 = scmp.lt.s32.totalorder %s10168_s16, 3  ;;  %p9915_p9 = scmp.eq.s32.totalorder %s10257_s17, 0 }
  0x14   : > { %13421 = sst [smem:[#allocation21_spill]] %s13420_s24  ;;  %s10170_s18 = smov [#allocation8]  }
  0x15   : > { %p10285_p10 = pnand %p7595_p7, %p272_p8  ;;  %s13423_s3 = sld [smem:[#allocation147_spill]] }
  0x16   : > { %s13424_s1 = sld [smem:[#allocation146_spill]]  ;;  %s302_s20 = sshll.u32 %s10170_s18, 4  ;;  %s303_s20 = int_to_ptr.vmem [resolvable:$true] %s302_s20 }
  0x17   : > { %p9898_p11 = pneg %p10285_p10  ;;  %s10171_s21 = smov 64  }
  0x18   : > { %s10172_s26 = smov 4   ;;  %s10173_s27 = smov [#allocation5]  }
  0x19   : > { %p10299_p12 = pnand %p9915_p9, %p9898_p11  ;;  %s340_s15 = sshll.u32 %s13311_s9, 4  ;;  %s341_s15 = int_to_ptr.hbm [resolvable:$true] %s340_s15 }
  0x1a   : > { %s10174_s19 = smov [#allocation10]   ;;  %s10177_s29 = smov 8  }
  0x1b   : > { %s300_s28 = sshll.u32 %s13423_s3, 4  ;;  %s285_s3 = sshll.u32 %s10173_s27, 4  ;;  %s301_s28 = int_to_ptr.hbm [resolvable:$true] %s300_s28  ;;  %s286_s3 = int_to_ptr.vmem [resolvable:$true] %s285_s3 }
  0x1c   : > { %s283_s11 = sshll.u32 %s13424_s1, 4  ;;  %s317_s1 = sshll.u32 %s13307_s5, 4  ;;  %s284_s11 = int_to_ptr.hbm [resolvable:$true] %s283_s11  ;;  %s318_s1 = int_to_ptr.hbm [resolvable:$true] %s317_s1 }
  0x1d   : > { %9904 = dma.hbm_to_vmem [thread:$0]  (!%p10299_p12), %s301_s28, 9216, %s303_s20, [#allocation9], %s10171_s21, %s10171_s21, %s10172_s26  }
  0x1e   : > { %9901 = dma.hbm_to_vmem [thread:$0]  (!%p10299_p12), %s284_s11, 1024, %s286_s3, [#allocation6], %s10171_s21, %s10171_s21, %s10172_s26  }
  0x1f   : > { %s319_s24 = sshll.u32 %s10174_s19, 4  ;;  %s10175_s28 = smov [#allocation11]   ;;  %s320_s24 = int_to_ptr.vmem [resolvable:$true] %s319_s24 }
  0x20   : > { %9907 = dma.hbm_to_vmem [thread:$0]  (!%p10299_p12), %s318_s1, 9216, %s320_s24, [#allocation9], %s10171_s21, %s10171_s21, %s10172_s26  }
  0x21   : > { %s342_s20 = sshll.u32 %s10175_s28, 4  ;;  %s10176_s27 = smov 128   ;;  %s343_s20 = int_to_ptr.vmem [resolvable:$true] %s342_s20 }
  0x22   : > { %9910 = dma.hbm_to_vmem [thread:$0]  (!%p10299_p12), %s341_s15, 1024, %s343_s20, [#allocation12], %s10176_s27, %s10176_s27, %s10177_s29  }
  0x23   : > { %366 = sbr.rel (%p10285_p10) target bundleno = 2157 (0x86d), region = 60 }
  0x28   : > { %10139 = dma.done.wait (%p9915_p9), [#allocation6], 1024  }
  0x29   : > { %10141 = vsyncadd (%p9915_p9), [#allocation6], 4294966272 }
  0x2a   : > { %10143 = dma.done.wait (%p9915_p9), [#allocation9], 18432  }
  0x2b   : > { %10145 = vsyncadd (%p9915_p9), [#allocation9], 4294948864 }
  0x2c   : > { %10147 = dma.done.wait (%p9915_p9), [#allocation12], 1024  }
  0x2d   : > { %10149 = vsyncadd (%p9915_p9), [#allocation12], 4294966272  ;;  %v10178_v0 = vmov 0   ;;  %p420_p13 = scmp.lt.s32.totalorder %s10257_s17, 1  ;;  %v430_v1 = vld [vmem:[%s13309_s7 + $0x20] sm:$0xff]  ;;  %v428_v2 = vld [vmem:[%s13309_s7 + $0x10] sm:$0xff] }
  0x2e   : > { %9969 = vset.pattern.permute.xlu2 %v10178_v0  ;;  %490 = vst [vmem:[#allocation2] sm:$0xff] %v10178_v0  ;;  %9968 = vset.pattern.permute.xlu1 %v10178_v0  ;;  %v426_v3 = vld [vmem:[%s13309_s7] sm:$0xff]  ;;  %v9414_v4 = vld [vmem:[#allocation5 + $0x38] sm:$0xff]  ;;  %v429_v9 = vld [vmem:[%s13309_s7 + $0x18] sm:$0xff]  ;;  %s417_s30 = sand.u32 1, %s10160_s14   ;;  %s9855_s28 = sshll.u32 %s10257_s17, 6 }
  0x2f   : > { %491 = vst [vmem:[#allocation2 + $0x8] sm:$0xf] %v10178_v0  ;;  %9967 = vset.pattern.permute.xlu0 %v10178_v0  ;;  %s421_s25 = scalar_select %p420_p13, %s10257_s17, 1  ;;  %856 = vperm.xlu2 %9969, %v430_v1   ;;  %v10342_v5 = vld [vmem:[#allocation8 + $0x78] sm:$0xff]  ;;  %v9413_v6 = vld [vmem:[#allocation5 + $0x30] sm:$0xff]  ;;  %v9412_v11 = vld [vmem:[#allocation5 + $0x28] sm:$0xff] }
  0x30   : > { %492 = vst [vmem:[#allocation2 + $0xc] sm:$0xff] %v10178_v0  ;;  %846 = vperm.xlu1 %9968, %v428_v2   ;;  %836 = vperm.xlu0 %9967, %v426_v3   ;;  %v10345_v7 = vld [vmem:[#allocation8 + $0x70] sm:$0xff]  ;;  %v431_v8 = vld [vmem:[%s13309_s7 + $0x28] sm:$0xff]  ;;  %v10357_v12 = vld [vmem:[#allocation8 + $0x68] sm:$0xff]  ;;  %s7487_s1 = scalar_lea.hbm %s13312_s10, %s9855_s28  ;;  %s7476_s19 = scalar_lea.sflag [#allocation7], %s417_s30 }
  0x31   : > { %493 = vst [vmem:[#allocation2 + $0x14] sm:$0xf] %v10178_v0  ;;  %614 = vmatpush.bf16.msra.mxu0 %v9414_v4  ;;  %2144 = vmatpush.bf16.msra.mxu2 %v10342_v5  ;;  %s9406_s11 = sshll.u32 %s421_s25, 8  ;;  %v427_v10 = vld [vmem:[%s13309_s7 + $0x8] sm:$0xff]  ;;  %v9411_v15 = vld [vmem:[#allocation5 + $0x20] sm:$0xff]  ;;  %v434_v21 = vld [vmem:[%s13309_s7 + $0x40] sm:$0xff] }
  0x32   : > { %494 = vst [vmem:[#allocation2 + $0x198] sm:$0xff] %v10178_v0  ;;  %9856 = vmatpush.bf16.msra.mxu3 %v9414_v4  ;;  %s10362_s29 = scalar_lea.vmem %s13302_s0, %s9406_s11  ;;  %v10371_v16 = vld [vmem:[#allocation8 + $0x60] sm:$0xff]  ;;  %v433_v22 = vld [vmem:[%s13309_s7 + $0x38] sm:$0xff]  ;;  %v9410_v24 = vld [vmem:[#allocation5 + $0x18] sm:$0xff]  ;;  %s7490_s15 = sshll.u32 %s7487_s1, 4  ;;  %s7491_s15 = int_to_ptr.hbm [resolvable:$true] %s7490_s15 }
  0x33   : > { %495 = vst [vmem:[#allocation2 + $0x1a0] sm:$0xf] %v10178_v0  ;;  %v10365_v13 = vld [vmem:[%s10362_s29] sm:$0xff]  ;;  %v10368_v14 = vld [vmem:[%s10362_s29 + $0x8] sm:$0xff]  ;;  %v432_v23 = vld [vmem:[%s13309_s7 + $0x30] sm:$0xff]  ;;  %s10108_s22 = sshra.s32 %s7491_s15, 4  ;;  %s10109_s22 = int_to_ptr.hbm [resolvable:$true] %s10108_s22 }
  0x34   : > { %496 = vst [vmem:[#allocation2 + $0x1a4] sm:$0xff] %v10178_v0  ;;  %v10374_v17 = vmax.f32 %v10365_v13, 0.0  ;;  %v10377_v18 = vmax.f32 %v10368_v14, 0.0  ;;  %v10393_v25 = vld [vmem:[#allocation8 + $0x58] sm:$0xff]  ;;  %v10396_v26 = vld [vmem:[%s10362_s29 + $0x10] sm:$0xff]  ;;  %v10399_v27 = vld [vmem:[%s10362_s29 + $0x18] sm:$0xff]  ;;  %v530_v45 = vpack.c.bf16 %v10368_v14, %v10365_v13  ;;  %p10115_p3 = scmp.lt.s32.totalorder %s10109_s22, %s13312_s10 }
  0x35   : > { %497 = vst [vmem:[#allocation2 + $0x1ac] sm:$0xf] %v10178_v0  ;;  %615 = vmatpush.bf16.msra.mxu0 %v9413_v6  ;;  %2145 = vmatpush.bf16.msra.mxu2 %v10345_v7  ;;  %v10402_v28 = vmax.f32 %v10396_v26, 0.0  ;;  %v10405_v29 = vmax.f32 %v10399_v27, 0.0  ;;  %v9409_v30 = vld [vmem:[#allocation5 + $0x10] sm:$0xff]  ;;  %v437_v34 = vld [vmem:[%s13309_s7 + $0x58] sm:$0xff]  ;;  %v531_v61 = vpack.c.bf16 %v10399_v27, %v10396_v26 }
  0x36   : > { %9857 = vmatpush.bf16.msra.mxu3 %v9413_v6  ;;  %v1347_v19 = vpack.c.bf16 %v10374_v17, %v10374_v17  ;;  %v1348_v20 = vpack.c.bf16 %v10377_v18, %v10377_v18  ;;  %v10408_v31 = vld [vmem:[#allocation8 + $0x50] sm:$0xff]  ;;  %v436_v35 = vld [vmem:[%s13309_s7 + $0x50] sm:$0xff]  ;;  %v435_v36 = vld [vmem:[%s13309_s7 + $0x48] sm:$0xff]  ;;  %s10110_s24 = scalar_lea.hbm %s10109_s22, 64  ;;  %s10114_s11 = scalar_lea.hbm %s13312_s10, 128 }
  0x37   : > { %861 = vperm.xlu2 %9969, %v431_v8   ;;  %v1349_v32 = vpack.c.bf16 %v10402_v28, %v10402_v28  ;;  %v1350_v33 = vpack.c.bf16 %v10405_v29, %v10405_v29  ;;  %v9408_v37 = vld [vmem:[#allocation5 + $0x8] sm:$0xff]  ;;  %v9407_v39 = vld [vmem:[#allocation5] sm:$0xff]  ;;  %v9415_v41 = vld [vmem:[#allocation2 + $0x4] sm:$0xf]  ;;  %p10111_p0 = scmp.ne.s32.totalorder %s10109_s22, %s10110_s24  ;;  %p10116_p4 = scmp.lt.s32.totalorder %s10114_s11, %s10110_s24 }
  0x38   : > { %851 = vperm.xlu1 %9968, %v429_v9   ;;  %841 = vperm.xlu0 %9967, %v427_v10   ;;  %1379 = vst [vmem:[#allocation2 + $0x1c] sm:$0xf] %v1347_v19  ;;  %v10424_v38 = vld [vmem:[#allocation8 + $0x48] sm:$0xff]  ;;  %v10427_v40 = vld [vmem:[#allocation8 + $0x40] sm:$0xff]  ;;  %v439_v44 = vld [vmem:[%s13309_s7 + $0x68] sm:$0xff] }
  0x39   : > { %616 = vmatpush.bf16.msra.mxu0 %v9412_v11  ;;  %2146 = vmatpush.bf16.msra.mxu2 %v10357_v12  ;;  %1380 = vst [vmem:[#allocation2 + $0x28] sm:$0xf] %v1348_v20  ;;  %v7645_v42 = vld [vmem:[#allocation2 + $0xc] sm:$0xf0]  ;;  %v438_v46 = vld [vmem:[%s13309_s7 + $0x60] sm:$0xff]  ;;  %v10445_v49 = vld [vmem:[%s10362_s29 + $0x28] sm:$0xff]  ;;  %p10112_p1 = pnand %p10111_p0, %p10274_p5  ;;  %p10117_p7 = por %p10116_p4, %p10115_p3 }
  0x3a   : > { %9858 = vmatpush.bf16.msra.mxu3 %v9412_v11  ;;  %1381 = vst [vmem:[#allocation2 + $0x34] sm:$0xf] %v1349_v32  ;;  %v440_v43 = vld [vmem:[%s13309_s7 + $0x70] sm:$0xff]  ;;  %v7648_v47 = vor.u32 %v9415_v41, %v7645_v42  ;;  %v10442_v48 = vld [vmem:[%s10362_s29 + $0x20] sm:$0xff]  ;;  %v10451_v51 = vmax.f32 %v10445_v49, 0.0  ;;  %v443_v54 = vld [vmem:[%s13309_s7 + $0x88] sm:$0xff] }
  0x3b   : > { %1382 = vst [vmem:[#allocation2 + $0x40] sm:$0xf] %v1350_v33  ;;  %v10448_v50 = vmax.f32 %v10442_v48, 0.0  ;;  %v442_v55 = vld [vmem:[%s13309_s7 + $0x80] sm:$0xff]  ;;  %v441_v56 = vld [vmem:[%s13309_s7 + $0x78] sm:$0xff]  ;;  %v444_v59 = vld [vmem:[%s13309_s7 + $0x90] sm:$0xff]  ;;  %p10113_p2 = pneg %p10112_p1 }
  0x3c   : > { %v1352_v53 = vpack.c.bf16 %v10451_v51, %v10451_v51  ;;  %v453_v60 = vld [vmem:[%s13309_s7 + $0xd8] sm:$0xff]  ;;  %v452_v62 = vld [vmem:[%s13309_s7 + $0xd0] sm:$0xff]  ;;  %v9470_v4 = vld [vmem:[#allocation8 + $0x38] sm:$0xff] }
  0x3d   : > { %617 = vmatpush.bf16.msra.mxu0 %v9411_v15  ;;  %2147 = vmatpush.bf16.msra.mxu2 %v10371_v16  ;;  %v1351_v52 = vpack.c.bf16 %v10448_v50, %v10448_v50  ;;  %v10478_v0 = vld [vmem:[%s10362_s29 + $0x30] sm:$0xff]  ;;  %v10481_v1 = vld [vmem:[%s10362_s29 + $0x38] sm:$0xff]  ;;  %v455_v9 = vld [vmem:[%s13309_s7 + $0xe8] sm:$0xff]  ;;  %p10118_p8 = pnand %p10117_p7, %p10113_p2 }
  0x3e   : > { %9859 = vmatpush.bf16.msra.mxu3 %v9411_v15  ;;  %1384 = vst [vmem:[#allocation2 + $0x58] sm:$0xf] %v1352_v53  ;;  %v10484_v2 = vmax.f32 %v10478_v0, 0.0  ;;  %v10487_v3 = vmax.f32 %v10481_v1, 0.0  ;;  %2055 = vmatpush.bf16.msra.mxu1 %v9470_v4  ;;  %v454_v10 = vld [vmem:[%s13309_s7 + $0xe0] sm:$0xff]  ;;  %v445_v13 = vld [vmem:[%s13309_s7 + $0x98] sm:$0xff] }
  0x3f   : > { %876 = vperm.xlu2 %9969, %v434_v21   ;;  %1383 = vst [vmem:[#allocation2 + $0x4c] sm:$0xf] %v1351_v52  ;;  %v9418_v57 = vld [vmem:[#allocation2 + $0x1c] sm:$0xf]  ;;  %v9469_v11 = vld [vmem:[#allocation8 + $0x30] sm:$0xff]  ;;  %v448_v20 = vld [vmem:[%s13309_s7 + $0xb0] sm:$0xff] }
  0x40   : > { %871 = vperm.xlu1 %9968, %v433_v22   ;;  %866 = vperm.xlu0 %9967, %v432_v23   ;;  %v7657_v58 = vld [vmem:[#allocation2 + $0x24] sm:$0xf0]  ;;  %v1353_v6 = vpack.c.bf16 %v10484_v2, %v10484_v2  ;;  %v1354_v8 = vpack.c.bf16 %v10487_v3, %v10487_v3  ;;  %v9468_v14 = vld [vmem:[#allocation8 + $0x28] sm:$0xff]  ;;  %v532_v22 = vpack.c.bf16 %v10445_v49, %v10442_v48  ;;  %v446_v23 = vld [vmem:[%s13309_s7 + $0xa0] sm:$0xff] }
  0x41   : > { %618 = vmatpush.bf16.msra.mxu0 %v9410_v24  ;;  %2148 = vmatpush.bf16.msra.mxu2 %v10393_v25  ;;  %v7660_v63 = vor.u32 %v9418_v57, %v7657_v58  ;;  %v9421_v15 = vld [vmem:[#allocation2 + $0x34] sm:$0xf]  ;;  %v447_v21 = vld [vmem:[%s13309_s7 + $0xa8] sm:$0xff]  ;;  %v10514_v27 = vld [vmem:[%s10362_s29 + $0x40] sm:$0xff]  ;;  %v533_v48 = vpack.c.bf16 %v10481_v1, %v10478_v0 }
  0x42   : > { %9860 = vmatpush.bf16.msra.mxu3 %v9410_v24  ;;  %1385 = vst [vmem:[#allocation2 + $0x64] sm:$0xf] %v1353_v6  ;;  %2056 = vmatpush.bf16.msra.mxu1 %v9469_v11  ;;  %v7669_v19 = vld [vmem:[#allocation2 + $0x3c] sm:$0xf0]  ;;  %v9467_v26 = vld [vmem:[#allocation8 + $0x20] sm:$0xff]  ;;  %v10520_v32 = vmax.f32 %v10514_v27, 0.0 }
  0x43   : > { %1386 = vst [vmem:[#allocation2 + $0x70] sm:$0xf] %v1354_v8  ;;  %v7672_v24 = vor.u32 %v9421_v15, %v7669_v19  ;;  %v449_v41 = vld [vmem:[%s13309_s7 + $0xb8] sm:$0xff]  ;;  %v9465_v42 = vld [vmem:[#allocation8 + $0x10] sm:$0xff]  ;;  %v9463_v53 = vld [vmem:[#allocation8] sm:$0xff] }
  0x44   : > { %v458_v49 = vld [vmem:[%s13310_s8] sm:$0xff]  ;;  %v10568_v1 = vld [vmem:[%s10362_s29 + $0xf8] sm:$0xff]  ;;  %v463_v6 = vld [vmem:[%s13310_s8 + $0x28] sm:$0xff] }
  0x45   : > { %619 = vmatpush.bf16.msra.mxu0 %v9409_v30  ;;  %2149 = vmatpush.bf16.msra.mxu2 %v10408_v31  ;;  %v7643_v57 = vld [vmem:[#allocation2] sm:$0xf]  ;;  %v10594_v19 = vld [vmem:[%s10362_s29 + $0x68] sm:$0xff] }
  0x46   : > { %9861 = vmatpush.bf16.msra.mxu3 %v9409_v30  ;;  %2057 = vmatpush.bf16.msra.mxu1 %v9468_v14  ;;  %v10517_v30 = vld [vmem:[%s10362_s29 + $0x48] sm:$0xff]  ;;  %v462_v8 = vld [vmem:[%s13310_s8 + $0x20] sm:$0xff] }
  0x47   : > { %891 = vperm.xlu2 %9969, %v437_v34   ;;  %v10523_v33 = vmax.f32 %v10517_v30, 0.0  ;;  %v9466_v34 = vld [vmem:[#allocation8 + $0x18] sm:$0xff] }
  0x48   : > { %886 = vperm.xlu1 %9968, %v436_v35   ;;  %881 = vperm.xlu0 %9967, %v435_v36   ;;  %v1355_v35 = vpack.c.bf16 %v10520_v32, %v10520_v32 }
  0x49   : > { %620 = vmatpush.bf16.msra.mxu0 %v9408_v37  ;;  %2150 = vmatpush.bf16.msra.mxu2 %v10424_v38  ;;  %v1356_v36 = vpack.c.bf16 %v10523_v33, %v10523_v33 }
  0x4a   : > { %9862 = vmatpush.bf16.msra.mxu3 %v9408_v37  ;;  %2058 = vmatpush.bf16.msra.mxu1 %v9467_v26  ;;  %v451_v37 = vld [vmem:[%s13309_s7 + $0xc8] sm:$0xff]  ;;  %1387 = vst [vmem:[#allocation2 + $0x7c] sm:$0xf] %v1355_v35  ;;  %v466_v35 = vld [vmem:[%s13310_s8 + $0x40] sm:$0xff] }
  0x4b   : > { %1388 = vst [vmem:[#allocation2 + $0x88] sm:$0xf] %v1356_v36  ;;  %v465_v36 = vld [vmem:[%s13310_s8 + $0x38] sm:$0xff] }
  0x4d   : > { %621 = vmatpush.bf16.msra.mxu0 %v9407_v39  ;;  %2151 = vmatpush.bf16.msra.mxu2 %v10427_v40 }
  0x4e   : > { %9863 = vmatpush.bf16.msra.mxu3 %v9407_v39  ;;  %v450_v39 = vld [vmem:[%s13309_s7 + $0xc0] sm:$0xff]  ;;  %2059 = vmatpush.bf16.msra.mxu1 %v9466_v34 }
  0x4f   : > { %906 = vperm.xlu2 %9969, %v440_v43   ;;  %v9464_v43 = vld [vmem:[#allocation8 + $0x8] sm:$0xff] }
  0x50   : > { %901 = vperm.xlu1 %9968, %v439_v44   ;;  %896 = vperm.xlu0 %9967, %v438_v46   ;;  %v9424_v44 = vld [vmem:[#allocation2 + $0x4c] sm:$0xf]  ;;  %v460_v46 = vld [vmem:[%s13310_s8 + $0x10] sm:$0xff] }
  0x51   : > { %622 = vmatmul.bf16.vlgmr.msra.gmra.mxu0 %v530_v45  ;;  %2152 = vmatmul.bf16.vlgmr.msra.gmra.mxu2 %v7648_v47  ;;  %v7681_v45 = vld [vmem:[#allocation2 + $0x54] sm:$0xf0]  ;;  %v459_v47 = vld [vmem:[%s13310_s8 + $0x8] sm:$0xff] }
  0x52   : > { %9864 = vmatpush.bf16.msrb.mxu3 %v9470_v4  ;;  %2060 = vmatpush.bf16.msra.mxu1 %v9465_v42  ;;  %v7684_v52 = vor.u32 %v9424_v44, %v7681_v45  ;;  %v771_v4 = vrot.slane %v10448_v50, 7 }
  0x56   : > { %9865 = vmatpush.bf16.msrb.mxu3 %v9469_v11  ;;  %2061 = vmatpush.bf16.msra.mxu1 %v9464_v43  ;;  %v10582_v11 = vmax.f32 %v10568_v1, 0.0 }
  0x57   : > { %921 = vperm.xlu2 %9969, %v443_v54   ;;  %v799_v54 = vlaneseq }
  0x58   : > { %916 = vperm.xlu1 %9968, %v442_v55   ;;  %911 = vperm.xlu0 %9967, %v441_v56   ;;  %v10550_v55 = vld [vmem:[%s10362_s29 + $0x50] sm:$0xff]  ;;  %v10553_v56 = vld [vmem:[%s10362_s29 + $0x58] sm:$0xff] }
  0x59   : > { %v10556_v58 = vmax.f32 %v10550_v55, 0.0 }
  0x5a   : > { %9866 = vmatpush.bf16.msrb.mxu3 %v9468_v14  ;;  %2062 = vmatpush.bf16.msra.mxu1 %v9463_v53  ;;  %v1378_v14 = vpack.c.bf16 %v10582_v11, %v10582_v11 }
  0x5c   : > { %1410 = vst [vmem:[#allocation2 + $0x190] sm:$0xf] %v1378_v14 }
  0x5e   : > { %9867 = vmatpush.bf16.msrb.mxu3 %v9467_v26 }
  0x5f   : > { %926 = vperm.xlu2 %9969, %v444_v59   ;;  %v10559_v59 = vmax.f32 %v10553_v56, 0.0 }
  0x60   : > { %971 = vperm.xlu1 %9968, %v453_v60   ;;  %966 = vperm.xlu0 %9967, %v452_v62   ;;  %v9416_v60 = vld [vmem:[#allocation2 + $0x8] sm:$0xf0]  ;;  %v10561_v62 = vshrl.u32 %v799_v54, 7  ;;  %v13319_v54 = vrot.slane %v10520_v32, 7 }
  0x61   : > { %627 = vmatmul.bf16.gmra.mxu0 %v531_v61  ;;  %2157 = vmatmul.bf16.gmra.mxu2 %v7660_v63  ;;  %v7644_v61 = vor.u32 %v9416_v60, %v7643_v57  ;;  %v1357_v63 = vpack.c.bf16 %v10556_v58, %v10556_v58  ;;  %v1358_v0 = vpack.c.bf16 %v10559_v59, %v10559_v59 }
  0x62   : > { %9868 = vmatpush.bf16.msrb.mxu3 %v9466_v34  ;;  %13426 = vst [vmem:[#allocation22_spill] sm:$0xff] %v10561_v62  ;;  %vm801_vm0 = vcmp.lt.s32.totalorder %v10561_v62, 1  ;;  %vm1058_vm1 = vcmp.lt.s32.totalorder %v10561_v62, 7 }
  0x63   : > { %1389 = vst [vmem:[#allocation2 + $0x94] sm:$0xf] %v1357_v63  ;;  %2063 = vmatmul.bf16.vlgmr.msra.gmra.mxu1 %v7644_v61  ;;  %v469_v61 = vld [vmem:[%s13310_s8 + $0x58] sm:$0xff]  ;;  %v468_v63 = vld [vmem:[%s13310_s8 + $0x50] sm:$0xff] }
  0x64   : > { %1390 = vst [vmem:[#allocation2 + $0xa0] sm:$0xf] %v1358_v0 }
  0x66   : > { %9869 = vmatpush.bf16.msrb.mxu3 %v9465_v42 }
  0x67   : > { %981 = vperm.xlu2 %9969, %v455_v9   ;;  %v461_v9 = vld [vmem:[%s13310_s8 + $0x18] sm:$0xff] }
  0x68   : > { %976 = vperm.xlu1 %9968, %v454_v10   ;;  %931 = vperm.xlu0 %9967, %v445_v13   ;;  %v770_v10 = vrot.slane %v10405_v29, 7 }
  0x6a   : > { %9870 = vmatpush.bf16.msrb.mxu3 %v9464_v43  ;;  %v829_v13 = vsel %vm801_vm0, %v770_v10, %v771_v4  ;;  %v13321_v43 = vrot.slane %v10451_v51, 7 }
  0x6e   : > { %9871 = vmatpush.bf16.msrb.mxu3 %v9463_v53 }
  0x6f   : > { %946 = vperm.xlu2 %9969, %v448_v20   ;;  %v10597_v20 = vld [vmem:[%s10362_s29 + $0x70] sm:$0xff] }
  0x70   : > { %941 = vperm.xlu1 %9968, %v447_v21   ;;  %936 = vperm.xlu0 %9967, %v446_v23   ;;  %v7693_v23 = vld [vmem:[#allocation2 + $0x6c] sm:$0xf0]  ;;  %v10604_v26 = vmax.f32 %v10597_v20, 0.0 }
  0x71   : > { %632 = vmatmul.bf16.gmra.mxu0 %v532_v22  ;;  %2162 = vmatmul.bf16.gmra.mxu2 %v7672_v24  ;;  %v9427_v22 = vld [vmem:[#allocation2 + $0x64] sm:$0xf]  ;;  %v10601_v24 = vmax.f32 %v10594_v19, 0.0 }
  0x72   : > { %v7696_v42 = vor.u32 %v9427_v22, %v7693_v23  ;;  %v1361_v44 = vpack.c.bf16 %v10604_v26, %v10604_v26  ;;  %v7705_v22 = vld [vmem:[#allocation2 + $0x84] sm:$0xf0]  ;;  %v10674_v23 = vld [vmem:[%s10362_s29 + $0x90] sm:$0xff] }
  0x74   : > { %1393 = vst [vmem:[#allocation2 + $0xc4] sm:$0xf] %v1361_v44  ;;  %v535_v44 = vpack.c.bf16 %v10553_v56, %v10550_v55 }
  0x77   : > { %961 = vperm.xlu2 %9969, %v451_v37   ;;  %v534_v37 = vpack.c.bf16 %v10517_v30, %v10514_v27  ;;  %v828_v27 = vsel %vm801_vm0, %v771_v4, %v13321_v43  ;;  %v10627_v30 = vld [vmem:[%s10362_s29 + $0x60] sm:$0xff]  ;;  %v467_v4 = vld [vmem:[%s13310_s8 + $0x48] sm:$0xff] }
  0x78   : > { %956 = vperm.xlu1 %9968, %v450_v39   ;;  %951 = vperm.xlu0 %9967, %v449_v41   ;;  %v1360_v39 = vpack.c.bf16 %v10601_v24, %v10601_v24  ;;  %v464_v41 = vld [vmem:[%s13310_s8 + $0x30] sm:$0xff]  ;;  %v10630_v45 = vmax.f32 %v10627_v30, 0.0 }
  0x7a   : > { %1392 = vst [vmem:[#allocation2 + $0xb8] sm:$0xf] %v1360_v39 }
  0x7f   : > { %1103 = vperm.xlu2 %9969, %v460_v46  }
  0x80   : > { %1098 = vperm.xlu1 %9968, %v459_v47   ;;  %1093 = vperm.xlu0 %9967, %v458_v49   ;;  %v10635_v47 = vld [vmem:[%s10362_s29 + $0x80] sm:$0xff] }
  0x81   : > { %637 = vmatmul.bf16.gmra.mxu0 %v533_v48  ;;  %2167 = vmatmul.bf16.gmra.mxu2 %v7684_v52  ;;  %v10638_v48 = vld [vmem:[%s10362_s29 + $0x88] sm:$0xff]  ;;  %v1359_v52 = vpack.c.bf16 %v10630_v45, %v10630_v45  ;;  %v10644_v53 = vmax.f32 %v10635_v47, 0.0 }
  0x82   : > { %v10648_v57 = vmax.f32 %v10638_v48, 0.0 }
  0x83   : > { %1391 = vst [vmem:[#allocation2 + $0xac] sm:$0xf] %v1359_v52  ;;  %v1363_v0 = vpack.c.bf16 %v10644_v53, %v10644_v53  ;;  %v470_v52 = vld [vmem:[%s13310_s8 + $0x60] sm:$0xff] }
  0x85   : > { %1395 = vst [vmem:[#allocation2 + $0xdc] sm:$0xf] %v1363_v0  ;;  %v526_v0 = vld [vmem:[%s10362_s29 + $0xe0] sm:$0xff] }
  0x87   : > { %1118 = vperm.xlu2 %9969, %v463_v6   ;;  %v13324_v6 = vrot.slane %v10487_v3, 7 }
  0x88   : > { %1113 = vperm.xlu1 %9968, %v462_v8   ;;  %1108 = vperm.xlu0 %9967, %v461_v9   ;;  %v1364_v8 = vpack.c.bf16 %v10648_v57, %v10648_v57 }
  0x89   : > { %v10591_v15 = vpop.permute.xlu2 %856  ;;  %v825_v9 = vsel %vm801_vm0, %v13324_v6, %v13319_v54  ;;  %v13322_v54 = vrot.slane %v10604_v26, 7  ;;  %v478_v6 = vld [vmem:[%s13310_s8 + $0xa0] sm:$0xff] }
  0x8a   : > { %13427 = vst [vmem:[#allocation23_spill] sm:$0xff] %v10591_v15  ;;  %v998_v21 = vmul.f32 %v10591_v15, %v829_v13 }
  0x8b   : > { %1396 = vst [vmem:[#allocation2 + $0xe8] sm:$0xf] %v1364_v8  ;;  %v10709_v8 = vld [vmem:[%s10362_s29 + $0x78] sm:$0xff] }
  0x8c   : > { %v1287_v34 = vpack.c.bf16 %v998_v21, %v998_v21  ;;  %v9430_v21 = vld [vmem:[#allocation2 + $0x7c] sm:$0xf] }
  0x8e   : > { %1319 = vst [vmem:[#allocation2 + $0x48] sm:$0xf] %v1287_v34  ;;  %v13320_v34 = vrot.slane %v10556_v58, 7 }
  0x8f   : > { %1133 = vperm.xlu2 %9969, %v466_v35   ;;  %v13317_v35 = vrot.slane %v10559_v59, 7 }
  0x90   : > { %1128 = vperm.xlu1 %9968, %v465_v36   ;;  %1123 = vperm.xlu0 %9967, %v464_v41   ;;  %v769_v36 = vrot.slane %v10402_v28, 7  ;;  %v472_v41 = vld [vmem:[%s13310_s8 + $0x70] sm:$0xff] }
  0x91   : > { %642 = vmatmul.bf16.gmra.mxu0 %v534_v37  ;;  %2172 = vmatmul.bf16.gmra.mxu2 %v7696_v42  ;;  %v10632_v46 = vpop.permute.xlu2 %861  ;;  %v10680_v37 = vmax.f32 %v10674_v23, 0.0  ;;  %v471_v42 = vld [vmem:[%s13310_s8 + $0x68] sm:$0xff]  ;;  %v822_v55 = vsel %vm801_vm0, %v13320_v34, %v13317_v35 }
  0x92   : > { %13428 = vst [vmem:[#allocation24_spill] sm:$0xff] %v10632_v46  ;;  %v999_v49 = vmul.f32 %v10632_v46, %v828_v27  ;;  %v767_v27 = vrot.slane %v10374_v17, 7 }
  0x94   : > { %v1288_v60 = vpack.c.bf16 %v999_v49, %v999_v49  ;;  %v13318_v49 = vrot.slane %v10582_v11, 7 }
  0x96   : > { %1320 = vst [vmem:[#allocation2 + $0x54] sm:$0xf] %v1288_v60  ;;  %v7708_v60 = vor.u32 %v9430_v21, %v7705_v22  ;;  %v833_v21 = vsel %vm801_vm0, %v13318_v49, %v767_v27  ;;  %v10720_v22 = vmax.f32 %v10709_v8, 0.0 }
  0x97   : > { %1148 = vperm.xlu2 %9969, %v469_v61   ;;  %v768_v61 = vrot.slane %v10377_v18, 7 }
  0x98   : > { %1143 = vperm.xlu1 %9968, %v468_v63   ;;  %1138 = vperm.xlu0 %9967, %v467_v4   ;;  %v1365_v63 = vpack.c.bf16 %v10680_v37, %v10680_v37  ;;  %v527_v4 = vld [vmem:[%s10362_s29 + $0xe8] sm:$0xff] }
  0x99   : > { %v10670_v13 = vpop.permute.xlu2 %876  ;;  %v831_v56 = vsel %vm801_vm0, %v768_v61, %v769_v36 }
  0x9a   : > { %13429 = vst [vmem:[#allocation25_spill] sm:$0xff] %v10670_v13  ;;  %v1002_v14 = vmul.f32 %v10670_v13, %v825_v9  ;;  %v10711_v9 = vmax.f32 %v526_v0, 0.0  ;;  %v13442_v13 = vrot.slane %v10680_v37, 7 }
  0x9b   : > { %1397 = vst [vmem:[#allocation2 + $0xf4] sm:$0xf] %v1365_v63 }
  0x9c   : > { %v1291_v39 = vpack.c.bf16 %v1002_v14, %v1002_v14  ;;  %v10713_v14 = vmax.f32 %v527_v4, 0.0  ;;  %v1375_v63 = vpack.c.bf16 %v10711_v9, %v10711_v9 }
  0x9e   : > { %1323 = vst [vmem:[#allocation2 + $0x78] sm:$0xf] %v1291_v39  ;;  %v544_v39 = vpack.c.bf16 %v527_v4, %v526_v0  ;;  %v1362_v0 = vpack.c.bf16 %v10720_v22, %v10720_v22  ;;  %v13323_v4 = vrot.slane %v10601_v24, 7 }
  0x9f   : > { %1163 = vperm.xlu2 %9969, %v472_v41   ;;  %1407 = vst [vmem:[#allocation2 + $0x16c] sm:$0xf] %v1375_v63  ;;  %v10750_v63 = vld [vmem:[%s10362_s29 + $0xa8] sm:$0xff] }
  0xa0   : > { %1158 = vperm.xlu1 %9968, %v471_v42   ;;  %1153 = vperm.xlu0 %9967, %v470_v52   ;;  %1394 = vst [vmem:[#allocation2 + $0xd0] sm:$0xf] %v1362_v0 }
  0xa1   : > { %647 = vmatmul.bf16.gmra.mxu0 %v535_v44  ;;  %2177 = vmatmul.bf16.gmra.mxu2 %v7708_v60  ;;  %v10722_v41 = vpop.permute.xlu2 %891  ;;  %v1376_v44 = vpack.c.bf16 %v10713_v14, %v10713_v14 }
  0xa2   : > { %13430 = vst [vmem:[#allocation26_spill] sm:$0xff] %v10722_v41  ;;  %v10724_v42 = vpop.permute.xlu1 %846  ;;  %v1005_v52 = vmul.f32 %v10722_v41, %v822_v55  ;;  %v10732_v49 = vpop.permute.xlu0 %836  ;;  %692 = vmatmul.bf16.vlgmr.msra.gmra.mxu3 %v544_v39  ;;  %v474_v39 = vld [vmem:[%s13310_s8 + $0x80] sm:$0xff] }
  0xa3   : > { %13431 = vst [vmem:[#allocation27_spill] sm:$0xff] %v10724_v42  ;;  %v996_v35 = vmul.f32 %v10724_v42, %v831_v56  ;;  %v994_v60 = vmul.f32 %v10732_v49, %v833_v21  ;;  %9872 = vmatpush.bf16.msra.mxu3 %v10342_v5  ;;  %v475_v56 = vld [vmem:[%s13310_s8 + $0x88] sm:$0xff]  ;;  %v473_v21 = vld [vmem:[%s13310_s8 + $0x78] sm:$0xff]  ;;  %v10753_v5 = vld [vmem:[%s10362_s29 + $0xb0] sm:$0xff]  ;;  %v13337_v42 = vrot.slane %v10713_v14, 7 }
  0xa4   : > { %13432 = vst [vmem:[#allocation28_spill] sm:$0xff] %v10732_v49  ;;  %v1294_v55 = vpack.c.bf16 %v1005_v52, %v1005_v52  ;;  %v832_v52 = vsel %vm801_vm0, %v767_v27, %v768_v61  ;;  %v10771_v0 = vmax.f32 %v10753_v5, 0.0  ;;  %v7717_v27 = vld [vmem:[#allocation2 + $0x9c] sm:$0xf0]  ;;  %v477_v49 = vld [vmem:[%s13310_s8 + $0x98] sm:$0xff] }
  0xa5   : > { %v1285_v34 = vpack.c.bf16 %v996_v35, %v996_v35  ;;  %v1283_v43 = vpack.c.bf16 %v994_v60, %v994_v60  ;;  %1408 = vst [vmem:[#allocation2 + $0x178] sm:$0xf] %v1376_v44  ;;  %v819_v35 = vsel %vm801_vm0, %v13323_v4, %v13322_v54  ;;  %v830_v44 = vsel %vm801_vm0, %v769_v36, %v770_v10  ;;  %v9433_v36 = vld [vmem:[#allocation2 + $0x94] sm:$0xf] }
  0xa6   : > { %1326 = vst [vmem:[#allocation2 + $0x9c] sm:$0xf] %v1294_v55  ;;  %v13326_v54 = vrot.slane %v10648_v57, 7 }
  0xa7   : > { %1317 = vst [vmem:[#allocation2 + $0x30] sm:$0xf] %v1285_v34  ;;  %1178 = vperm.xlu2 %9969, %v475_v56   ;;  %v10768_v34 = vmax.f32 %v10750_v63, 0.0  ;;  %9873 = vmatpush.bf16.msra.mxu3 %v10345_v7 }
  0xa8   : > { %1173 = vperm.xlu1 %9968, %v474_v39   ;;  %1315 = vst [vmem:[#allocation2 + $0x18] sm:$0xf] %v1283_v43  ;;  %1168 = vperm.xlu0 %9967, %v473_v21   ;;  %v1369_v39 = vpack.c.bf16 %v10771_v0, %v10771_v0 }
  0xa9   : > { %v10774_v60 = vpop.permute.xlu2 %906  ;;  %v1368_v61 = vpack.c.bf16 %v10768_v34, %v10768_v34 }
  0xaa   : > { %13433 = vst [vmem:[#allocation29_spill] sm:$0xff] %v10774_v60  ;;  %v10776_v55 = vpop.permute.xlu1 %851  ;;  %v1008_v56 = vmul.f32 %v10774_v60, %v819_v35  ;;  %v10780_v43 = vpop.permute.xlu0 %841  ;;  %v773_v35 = vrot.slane %v10484_v2, 7 }
  0xab   : > { %13434 = vst [vmem:[#allocation30_spill] sm:$0xff] %v10776_v55  ;;  %v997_v10 = vmul.f32 %v10776_v55, %v830_v44  ;;  %v995_v7 = vmul.f32 %v10780_v43, %v832_v52  ;;  %v536_v52 = vpack.c.bf16 %v10594_v19, %v10627_v30  ;;  %9874 = vmatpush.bf16.msra.mxu3 %v10357_v12  ;;  %v13436_v19 = vrot.slane %v10644_v53, 7  ;;  %v482_v55 = vld [vmem:[%s13310_s8 + $0xc0] sm:$0xff] }
  0xac   : > { %13435 = vst [vmem:[#allocation31_spill] sm:$0xff] %v10780_v43  ;;  %v1297_v4 = vpack.c.bf16 %v1008_v56, %v1008_v56  ;;  %v476_v56 = vld [vmem:[%s13310_s8 + $0x90] sm:$0xff]  ;;  %v13437_v30 = vrot.slane %v10487_v3, 7 }
  0xad   : > { %v1286_v44 = vpack.c.bf16 %v997_v10, %v997_v10  ;;  %1400 = vst [vmem:[#allocation2 + $0x118] sm:$0xf] %v1368_v61  ;;  %v1284_v21 = vpack.c.bf16 %v995_v7, %v995_v7  ;;  %v7720_v10 = vor.u32 %v9433_v36, %v7717_v27  ;;  %v816_v12 = vsel %vm801_vm0, %v13436_v19, %v13326_v54  ;;  %v528_v7 = vld [vmem:[%s10362_s29 + $0xf0] sm:$0xff]  ;;  %v10819_v36 = vld [vmem:[%s10362_s29 + $0xc0] sm:$0xff] }
  0xae   : > { %1401 = vst [vmem:[#allocation2 + $0x124] sm:$0xf] %v1369_v39  ;;  %v826_v61 = vsel %vm801_vm0, %v773_v35, %v13437_v30 }
  0xaf   : > { %1329 = vst [vmem:[#allocation2 + $0xc0] sm:$0xf] %v1297_v4  ;;  %1193 = vperm.xlu2 %9969, %v478_v6   ;;  %v13438_v6 = vrot.slane %v10451_v51, 7  ;;  %v545_v4 = vpack.c.bf16 %v10568_v1, %v528_v7  ;;  %9875 = vmatpush.bf16.msra.mxu3 %v10371_v16  ;;  %v776_v1 = vrot.slane %v10523_v33, 7  ;;  %v10844_v16 = vmax.f32 %v10819_v36, 0.0 }
  0xb0   : > { %1318 = vst [vmem:[#allocation2 + $0x3c] sm:$0xf] %v1286_v44  ;;  %1188 = vperm.xlu1 %9968, %v477_v49   ;;  %1183 = vperm.xlu0 %9967, %v476_v56   ;;  %v10825_v44 = vmax.f32 %v528_v7, 0.0 }
  0xb1   : > { %1316 = vst [vmem:[#allocation2 + $0x24] sm:$0xf] %v1284_v21  ;;  %652 = vmatmul.bf16.gmra.mxu0 %v536_v52  ;;  %v827_v49 = vsel %vm801_vm0, %v13438_v6, %v773_v35  ;;  %2182 = vmatmul.bf16.gmra.mxu2 %v7720_v10  ;;  %v10821_v27 = vpop.permute.xlu2 %921  ;;  %v10828_v21 = vld [vmem:[%s10362_s29 + $0xc8] sm:$0xff]  ;;  %v10837_v10 = vld [vmem:[%s10362_s29 + $0xd0] sm:$0xff] }
  0xb2   : > { %13439 = vst [vmem:[#allocation32_spill] sm:$0xff] %v10821_v27  ;;  %v10823_v39 = vpop.permute.xlu1 %871  ;;  %v1011_v52 = vmul.f32 %v10821_v27, %v816_v12  ;;  %v10833_v56 = vpop.permute.xlu0 %866  ;;  %697 = vmatmul.bf16.gmra.mxu3 %v545_v4  ;;  %v1377_v7 = vpack.c.bf16 %v10825_v44, %v10825_v44  ;;  %v10847_v12 = vld [vmem:[%s10362_s29 + $0xd8] sm:$0xff]  ;;  %v10856_v54 = vmax.f32 %v10828_v21, 0.0  ;;  %v479_v27 = vld [vmem:[%s13310_s8 + $0xa8] sm:$0xff] }
  0xb3   : > { %13440 = vst [vmem:[#allocation33_spill] sm:$0xff] %v10823_v39  ;;  %v1001_v35 = vmul.f32 %v10823_v39, %v826_v61  ;;  %v1000_v19 = vmul.f32 %v10833_v56, %v827_v49  ;;  %v481_v4 = vld [vmem:[%s13310_s8 + $0xb8] sm:$0xff]  ;;  %v480_v49 = vld [vmem:[%s13310_s8 + $0xb0] sm:$0xff]  ;;  %9876 = vmatpush.bf16.msra.mxu3 %v10393_v25  ;;  %v10870_v41 = vmax.f32 %v10847_v12, 0.0  ;;  %v13443_v39 = vrot.slane %v10648_v57, 7 }
  0xb4   : > { %13441 = vst [vmem:[#allocation34_spill] sm:$0xff] %v10833_v56  ;;  %v1300_v61 = vpack.c.bf16 %v1011_v52, %v1011_v52  ;;  %v1371_v52 = vpack.c.bf16 %v10844_v16, %v10844_v16  ;;  %v1372_v60 = vpack.c.bf16 %v10856_v54, %v10856_v54  ;;  %v13444_v25 = vrot.slane %v10556_v58, 7 }
  0xb5   : > { %v1290_v6 = vpack.c.bf16 %v1001_v35, %v1001_v35  ;;  %v1289_v30 = vpack.c.bf16 %v1000_v19, %v1000_v19  ;;  %1409 = vst [vmem:[#allocation2 + $0x184] sm:$0xf] %v1377_v7  ;;  %v10864_v35 = vmax.f32 %v10837_v10, 0.0  ;;  %v7655_v19 = vld [vmem:[#allocation2 + $0x18] sm:$0xf]  ;;  %v815_v56 = vsel %vm801_vm0, %v13443_v39, %v13442_v13 }
  0xb6   : > { %1332 = vst [vmem:[#allocation2 + $0xe4] sm:$0xf] %v1300_v61  ;;  %v823_v61 = vsel %vm801_vm0, %v776_v1, %v13444_v25  ;;  %v1374_v13 = vpack.c.bf16 %v10870_v41, %v10870_v41  ;;  %v9436_v25 = vld [vmem:[#allocation2 + $0xac] sm:$0xf] }
  0xb7   : > { %1322 = vst [vmem:[#allocation2 + $0x6c] sm:$0xf] %v1290_v6  ;;  %1208 = vperm.xlu2 %9969, %v481_v4   ;;  %v1373_v46 = vpack.c.bf16 %v10864_v35, %v10864_v35  ;;  %v13445_v4 = vrot.slane %v10520_v32, 7  ;;  %9877 = vmatpush.bf16.msra.mxu3 %v10408_v31 }
  0xb8   : > { %1203 = vperm.xlu1 %9968, %v480_v49   ;;  %v9419_v7 = vld [vmem:[#allocation2 + $0x20] sm:$0xf0]  ;;  %1321 = vst [vmem:[#allocation2 + $0x60] sm:$0xf] %v1289_v30  ;;  %1198 = vperm.xlu0 %9967, %v479_v27  }
  0xb9   : > { %v7656_v6 = vor.u32 %v9419_v7, %v7655_v19  ;;  %v824_v49 = vsel %vm801_vm0, %v13445_v4, %v776_v1  ;;  %v10890_v39 = vpop.permute.xlu2 %926  ;;  %1403 = vst [vmem:[#allocation2 + $0x13c] sm:$0xf] %v1371_v52  ;;  %v7729_v7 = vld [vmem:[#allocation2 + $0xb4] sm:$0xf0]  ;;  %v779_v52 = vrot.slane %v10630_v45, 7 }
  0xba   : > { %13446 = vst [vmem:[#allocation35_spill] sm:$0xff] %v10890_v39  ;;  %v10892_v15 = vpop.permute.xlu1 %886  ;;  %v1012_v27 = vmul.f32 %v10890_v39, %v815_v56  ;;  %v10897_v19 = vpop.permute.xlu0 %881  ;;  %v10900_v1 = vld [vmem:[%s10362_s29 + $0x98] sm:$0xff]  ;;  %v484_v56 = vld [vmem:[%s13310_s8 + $0xd0] sm:$0xff]  ;;  %v13456_v39 = vrot.slane %v10604_v26, 7 }
  0xbb   : > { %13447 = vst [vmem:[#allocation36_spill] sm:$0xff] %v10892_v15  ;;  %2068 = vmatmul.bf16.gmra.mxu1 %v7656_v6  ;;  %v1004_v30 = vmul.f32 %v10892_v15, %v823_v61  ;;  %v1003_v4 = vmul.f32 %v10897_v19, %v824_v49  ;;  %v537_v61 = vpack.c.bf16 %v10709_v8, %v10597_v20  ;;  %v13449_v20 = vrot.slane %v10711_v9, 7 }
  0xbc   : > { %13448 = vst [vmem:[#allocation37_spill] sm:$0xff] %v10897_v19  ;;  %v1301_v31 = vpack.c.bf16 %v1012_v27, %v1012_v27  ;;  %v10918_v27 = vmax.f32 %v10900_v1, 0.0  ;;  %9878 = vmatpush.bf16.msra.mxu3 %v10424_v38 }
  0xbd   : > { %1404 = vst [vmem:[#allocation2 + $0x148] sm:$0xf] %v1372_v60  ;;  %v1293_v6 = vpack.c.bf16 %v1004_v30, %v1004_v30  ;;  %v483_v60 = vld [vmem:[%s13310_s8 + $0xc8] sm:$0xff]  ;;  %v1292_v49 = vpack.c.bf16 %v1003_v4, %v1003_v4  ;;  %v804_v8 = vsel %vm801_vm0, %v13449_v20, %v13337_v42  ;;  %v13451_v30 = vrot.slane %v10559_v59, 7 }
  0xbe   : > { %1405 = vst [vmem:[#allocation2 + $0x154] sm:$0xf] %v1373_v46  ;;  %v7732_v46 = vor.u32 %v9436_v25, %v7729_v7  ;;  %v1366_v38 = vpack.c.bf16 %v10918_v27, %v10918_v27  ;;  %v13455_v42 = vrot.slane %v10644_v53, 7 }
  0xbf   : > { %1406 = vst [vmem:[#allocation2 + $0x160] sm:$0xf] %v1374_v13  ;;  %1223 = vperm.xlu2 %9969, %v484_v56   ;;  %v13450_v13 = vrot.slane %v10601_v24, 7  ;;  %v821_v7 = vsel %vm801_vm0, %v13451_v30, %v779_v52  ;;  %v485_v30 = vld [vmem:[%s13310_s8 + $0xd8] sm:$0xff] }
  0xc0   : > { %1333 = vst [vmem:[#allocation2 + $0xf0] sm:$0xf] %v1301_v31  ;;  %1218 = vperm.xlu1 %9968, %v483_v60   ;;  %1213 = vperm.xlu0 %9967, %v482_v55  }
  0xc1   : > { %1325 = vst [vmem:[#allocation2 + $0x90] sm:$0xf] %v1293_v6  ;;  %v820_v25 = vsel %vm801_vm0, %v779_v52, %v13450_v13  ;;  %657 = vmatmul.bf16.gmra.mxu0 %v537_v61  ;;  %2187 = vmatmul.bf16.gmra.mxu2 %v7732_v46  ;;  %v10937_v4 = vpop.permute.xlu2 %981  ;;  %v10942_v6 = vld [vmem:[%s10362_s29 + $0xa0] sm:$0xff]  ;;  %v13342_v52 = vrot.slane %v10768_v34, 7  ;;  %v782_v46 = vrot.slane %v10720_v22, 7 }
  0xc2   : > { %1324 = vst [vmem:[#allocation2 + $0x84] sm:$0xf] %v1292_v49  ;;  %v10939_v31 = vpop.permute.xlu1 %901  ;;  %9879 = vmatpush.bf16.msra.mxu3 %v10427_v40  ;;  %v1023_v56 = vmul.f32 %v10937_v4, %v804_v8  ;;  %v10947_v60 = vpop.permute.xlu0 %896  ;;  %v13341_v49 = vrot.slane %v10771_v0, 7  ;;  %v487_v40 = vld [vmem:[%s13310_s8 + $0xe8] sm:$0xff]  ;;  %v486_v8 = vld [vmem:[%s13310_s8 + $0xe0] sm:$0xff] }
  0xc3   : > { %13452 = vst [vmem:[#allocation38_spill] sm:$0xff] %v10937_v4  ;;  %v1007_v55 = vmul.f32 %v10939_v31, %v820_v25  ;;  %v1006_v61 = vmul.f32 %v10947_v60, %v821_v7  ;;  %v10960_v25 = vmax.f32 %v10942_v6, 0.0  ;;  %v7667_v7 = vld [vmem:[#allocation2 + $0x30] sm:$0xf]  ;;  %v817_v4 = vsel %vm801_vm0, %v782_v46, %v13455_v42 }
  0xc4   : > { %13453 = vst [vmem:[#allocation39_spill] sm:$0xff] %v10939_v31  ;;  %v1312_v20 = vpack.c.bf16 %v1023_v56, %v1023_v56  ;;  %v9422_v56 = vld [vmem:[#allocation2 + $0x38] sm:$0xf0] }
  0xc5   : > { %1398 = vst [vmem:[#allocation2 + $0x100] sm:$0xf] %v1366_v38  ;;  %v1296_v13 = vpack.c.bf16 %v1007_v55, %v1007_v55  ;;  %v1295_v38 = vpack.c.bf16 %v1006_v61, %v1006_v61  ;;  %v1367_v55 = vpack.c.bf16 %v10960_v25, %v10960_v25  ;;  %v811_v61 = vsel %vm801_vm0, %v13342_v52, %v13341_v49  ;;  %v10986_v31 = vld [vmem:[%s10362_s29 + $0xb8] sm:$0xff]  ;;  %s7606_s29 = sshll.u32 %s417_s30, 6 }
  0xc6   : > { %13454 = vst [vmem:[#allocation40_spill] sm:$0xff] %v10947_v60  ;;  %v793_v52 = vrot.slane %v10864_v35, 7  ;;  %s419_s18 = scalar_lea.vmem [#allocation13], %s7606_s29 }
  0xc7   : > { %1344 = vst [vmem:[#allocation2 + $0x174] sm:$0xf] %v1312_v20  ;;  %1238 = vperm.xlu2 %9969, %v487_v40   ;;  %v7668_v20 = vor.u32 %v9422_v56, %v7667_v7  ;;  %v7741_v7 = vld [vmem:[#allocation2 + $0xcc] sm:$0xf0]  ;;  %v538_v56 = vpack.c.bf16 %v10638_v48, %v10635_v47  ;;  %v13461_v47 = vrot.slane %v10844_v16, 7  ;;  %s7488_s3 = sshll.u32 %s419_s18, 4  ;;  %s7489_s3 = int_to_ptr.vmem [resolvable:$true] %s7488_s3 }
  0xc8   : > { %1328 = vst [vmem:[#allocation2 + $0xb4] sm:$0xf] %v1296_v13  ;;  %1233 = vperm.xlu1 %9968, %v486_v8   ;;  %1228 = vperm.xlu0 %9967, %v485_v30   ;;  %v818_v13 = vsel %vm801_vm0, %v13456_v39, %v782_v46  ;;  %v9439_v30 = vld [vmem:[#allocation2 + $0xc4] sm:$0xf]  ;;  %v792_v46 = vrot.slane %v10856_v54, 7 }
  0xc9   : > { %1327 = vst [vmem:[#allocation2 + $0xa8] sm:$0xf] %v1295_v38  ;;  %v10981_v40 = vpop.permute.xlu2 %946 }
  0xca   : > { %13457 = vst [vmem:[#allocation41_spill] sm:$0xff] %v10981_v40  ;;  %v10983_v8 = vpop.permute.xlu1 %916  ;;  %v1016_v49 = vmul.f32 %v10981_v40, %v811_v61  ;;  %v10990_v38 = vpop.permute.xlu0 %911  ;;  %v457_v61 = vld [vmem:[%s13309_s7 + $0xf8] sm:$0xff]  ;;  %v808_v48 = vsel %vm801_vm0, %v13461_v47, %v792_v46 }
  0xcb   : > { %13458 = vst [vmem:[#allocation42_spill] sm:$0xff] %v10983_v8  ;;  %2073 = vmatmul.bf16.gmra.mxu1 %v7668_v20  ;;  %v1010_v42 = vmul.f32 %v10983_v8, %v817_v4  ;;  %v1009_v39 = vmul.f32 %v10990_v38, %v818_v13  ;;  %v488_v4 = vld [vmem:[%s13310_s8 + $0xf0] sm:$0xff]  ;;  %v11006_v13 = vmax.f32 %v10986_v31, 0.0 }
  0xcc   : > { %1399 = vst [vmem:[#allocation2 + $0x10c] sm:$0xf] %v1367_v55  ;;  %v794_v55 = vrot.slane %v10870_v41, 7  ;;  %v1305_v60 = vpack.c.bf16 %v1016_v49, %v1016_v49  ;;  %v456_v49 = vld [vmem:[%s13309_s7 + $0xf0] sm:$0xff] }
  0xcd   : > { %13459 = vst [vmem:[#allocation43_spill] sm:$0xff] %v10990_v38  ;;  %v1299_v20 = vpack.c.bf16 %v1010_v42, %v1010_v42  ;;  %v1298_v40 = vpack.c.bf16 %v1009_v39, %v1009_v39  ;;  %v7744_v42 = vor.u32 %v9439_v30, %v7741_v7  ;;  %v1370_v38 = vpack.c.bf16 %v11006_v13, %v11006_v13 }
  0xce   : > { %v11008_v8 = vpop.f32.mrf.mxu0  ;;  %1337 = vst [vmem:[#allocation2 + $0x120] sm:$0xf] %v1305_v60  ;;  %v806_v39 = vsel %vm801_vm0, %v793_v52, %v794_v55  ;;  %v807_v60 = vsel %vm801_vm0, %v792_v46, %v793_v52 }
  0xcf   : > { %13460 = vst [vmem:[#allocation44_spill] sm:$0xff] %v11008_v8  ;;  %1243 = vperm.xlu2 %9969, %v488_v4   ;;  %v9425_v8 = vld [vmem:[#allocation2 + $0x50] sm:$0xf0] }
  0xd0   : > { %1331 = vst [vmem:[#allocation2 + $0xd8] sm:$0xf] %v1299_v20  ;;  %991 = vperm.xlu1 %9968, %v457_v61   ;;  %986 = vperm.xlu0 %9967, %v456_v49  }
  0xd1   : > { %1330 = vst [vmem:[#allocation2 + $0xcc] sm:$0xf] %v1298_v40  ;;  %662 = vmatmul.bf16.gmra.mxu0 %v538_v56  ;;  %2192 = vmatmul.bf16.gmra.mxu2 %v7744_v42  ;;  %v11023_v30 = vpop.permute.xlu2 %961  ;;  %v13350_v40 = vrot.slane %v10402_v28, 1  ;;  %v13349_v56 = vrot.slane %v10405_v29, 1 }
  0xd2   : > { %13462 = vst [vmem:[#allocation45_spill] sm:$0xff] %v11023_v30  ;;  %v11025_v7 = vpop.permute.xlu1 %971  ;;  %v1019_v20 = vmul.f32 %v11023_v30, %v808_v48  ;;  %v11029_v61 = vpop.permute.xlu0 %966 }
  0xd3   : > { %13463 = vst [vmem:[#allocation46_spill] sm:$0xff] %v11025_v7  ;;  %v1021_v4 = vmul.f32 %v11025_v7, %v806_v39  ;;  %v1020_v47 = vmul.f32 %v11029_v61, %v807_v60  ;;  %v489_v39 = vld [vmem:[%s13310_s8 + $0xf8] sm:$0xff]  ;;  %v7679_v60 = vld [vmem:[#allocation2 + $0x48] sm:$0xf]  ;;  %v13467_v7 = vrot.slane %v10680_v37, 7 }
  0xd4   : > { %1402 = vst [vmem:[#allocation2 + $0x130] sm:$0xf] %v1370_v38  ;;  %v1308_v49 = vpack.c.bf16 %v1019_v20, %v1019_v20  ;;  %v11034_v46 = vpop.f32.mrf.mxu2  ;;  %v786_v38 = vrot.slane %v10918_v27, 7  ;;  %v1087_v20 = vsel %vm1058_vm1, %v13350_v40, %v13349_v56 }
  0xd5   : > { %13464 = vst [vmem:[#allocation47_spill] sm:$0xff] %v11029_v61  ;;  %v1310_v52 = vpack.c.bf16 %v1021_v4, %v1021_v4  ;;  %v1309_v42 = vpack.c.bf16 %v1020_v47, %v1020_v47  ;;  %v13466_v4 = vrot.slane %v10711_v9, 7 }
  0xd6   : > { %v11038_v48 = vpop.f32.mrf.mxu0  ;;  %1340 = vst [vmem:[#allocation2 + $0x144] sm:$0xf] %v1308_v49  ;;  %v814_v49 = vsel %vm801_vm0, %v13467_v7, %v786_v38  ;;  %v787_v7 = vrot.slane %v10960_v25, 7 }
  0xd7   : > { %13465 = vst [vmem:[#allocation48_spill] sm:$0xff] %v11038_v48  ;;  %v805_v47 = vsel %vm801_vm0, %v794_v55, %v13466_v4  ;;  %v7680_v48 = vor.u32 %v9425_v8, %v7679_v60  ;;  %v9442_v55 = vld [vmem:[#allocation2 + $0xdc] sm:$0xf]  ;;  %v13356_v60 = vrot.slane %v10484_v2, 1 }
  0xd8   : > { %1342 = vst [vmem:[#allocation2 + $0x15c] sm:$0xf] %v1310_v52  ;;  %1248 = vperm.xlu0 %9967, %v489_v39   ;;  %v13357_v39 = vrot.slane %v10451_v51, 1 }
  0xd9   : > { %1341 = vst [vmem:[#allocation2 + $0x150] sm:$0xf] %v1309_v42  ;;  %v11057_v52 = vpop.permute.xlu2 %1103  ;;  %v7753_v42 = vld [vmem:[#allocation2 + $0xe4] sm:$0xf0] }
  0xda   : > { %13468 = vst [vmem:[#allocation49_spill] sm:$0xff] %v11057_v52  ;;  %v11059_v61 = vpop.permute.xlu1 %976  ;;  %v1253_v56 = vmul.f32 %v11057_v52, %v1087_v20  ;;  %v11063_v30 = vpop.permute.xlu0 %931 }
  0xdb   : > { %13469 = vst [vmem:[#allocation50_spill] sm:$0xff] %v11059_v61  ;;  %2078 = vmatmul.bf16.gmra.mxu1 %v7680_v48  ;;  %v1022_v40 = vmul.f32 %v11059_v61, %v805_v47  ;;  %v1013_v8 = vmul.f32 %v11063_v30, %v814_v49  ;;  %v539_v48 = vpack.c.bf16 %v10900_v1, %v10674_v23 }
  0xdc   : > { %13470 = vst [vmem:[#allocation51_spill] sm:$0xff] %v11063_v30  ;;  %v1413_v4 = vpack.c.bf16 %v1253_v56, %v1253_v56  ;;  %v11069_v19 = vpop.f32.mrf.mxu2  ;;  %v7756_v61 = vor.u32 %v9442_v55, %v7753_v42  ;;  %v13472_v56 = vrot.slane %v10768_v34, 7  ;;  %v813_v55 = vsel %vm801_vm0, %v786_v38, %v787_v7 }
  0xdd   : > { %v1311_v15 = vpack.c.bf16 %v1022_v40, %v1022_v40  ;;  %v1302_v20 = vpack.c.bf16 %v1013_v8, %v1013_v8  ;;  %v1084_v40 = vsel %vm1058_vm1, %v13357_v39, %v13356_v60  ;;  %v9486_v39 = vld [vmem:[#allocation8 + $0xb8] sm:$0xff] }
  0xde   : > { %v11073_v47 = vpop.f32.mrf.mxu0  ;;  %1445 = vst [vmem:[#allocation2 + $0x38] sm:$0xf] %v1413_v4  ;;  %v812_v23 = vsel %vm801_vm0, %v787_v7, %v13472_v56 }
  0xdf   : > { %13471 = vst [vmem:[#allocation52_spill] sm:$0xff] %v11073_v47  ;;  %v9458_v52 = vld [vmem:[#allocation2 + $0x158] sm:$0xf0]  ;;  %v9485_v47 = vld [vmem:[#allocation8 + $0xb0] sm:$0xff] }
  0xe0   : > { %1343 = vst [vmem:[#allocation2 + $0x168] sm:$0xf] %v1311_v15  ;;  %v7811_v49 = vld [vmem:[#allocation2 + $0x150] sm:$0xf] }
  0xe1   : > { %1334 = vst [vmem:[#allocation2 + $0xfc] sm:$0xf] %v1302_v20  ;;  %667 = vmatmul.bf16.gmra.mxu0 %v539_v48  ;;  %v7812_v1 = vor.u32 %v9458_v52, %v7811_v49  ;;  %2197 = vmatmul.bf16.gmra.mxu2 %v7756_v61  ;;  %v11087_v15 = vpop.permute.xlu2 %1118  ;;  %v13359_v52 = vrot.slane %v10520_v32, 1  ;;  %v13358_v48 = vrot.slane %v10523_v33, 1  ;;  %v790_v61 = vrot.slane %v11006_v13, 7 }
  0xe2   : > { %13473 = vst [vmem:[#allocation53_spill] sm:$0xff] %v11087_v15  ;;  %v11089_v42 = vpop.permute.xlu1 %941  ;;  %v1256_v8 = vmul.f32 %v11087_v15, %v1084_v40  ;;  %v11093_v60 = vpop.permute.xlu0 %936 }
  0xe3   : > { %13474 = vst [vmem:[#allocation54_spill] sm:$0xff] %v11089_v42  ;;  %2133 = vmatmul.bf16.vlgmr.msrb.gmra.mxu3 %v7812_v1  ;;  %v1015_v4 = vmul.f32 %v11089_v42, %v812_v23  ;;  %v1014_v20 = vmul.f32 %v11093_v60, %v813_v55  ;;  %v7691_v23 = vld [vmem:[#allocation2 + $0x60] sm:$0xf]  ;;  %v9428_v1 = vld [vmem:[#allocation2 + $0x68] sm:$0xf0]  ;;  %v1081_v55 = vsel %vm1058_vm1, %v13359_v52, %v13358_v48 }
  0xe4   : > { %13475 = vst [vmem:[#allocation55_spill] sm:$0xff] %v11093_v60  ;;  %v1416_v38 = vpack.c.bf16 %v1256_v8, %v1256_v8  ;;  %v11099_v49 = vpop.f32.mrf.mxu2  ;;  %2233 = vmatpush.bf16.msrb.mxu3 %v9486_v39  ;;  %v13477_v8 = vrot.slane %v10844_v16, 7  ;;  %v9483_v60 = vld [vmem:[#allocation8 + $0xa0] sm:$0xff] }
  0xe5   : > { %v1304_v7 = vpack.c.bf16 %v1015_v4, %v1015_v4  ;;  %v1303_v56 = vpack.c.bf16 %v1014_v20, %v1014_v20  ;;  %v7692_v4 = vor.u32 %v9428_v1, %v7691_v23  ;;  %v13478_v20 = vrot.slane %v10771_v0, 7  ;;  %v9484_v23 = vld [vmem:[#allocation8 + $0xa8] sm:$0xff] }
  0xe6   : > { %v11101_v40 = vpop.f32.mrf.mxu0  ;;  %1448 = vst [vmem:[#allocation2 + $0x5c] sm:$0xf] %v1416_v38  ;;  %v809_v39 = vsel %vm801_vm0, %v790_v61, %v13477_v8  ;;  %v9445_v8 = vld [vmem:[#allocation2 + $0xf4] sm:$0xf] }
  0xe7   : > { %13476 = vst [vmem:[#allocation56_spill] sm:$0xff] %v11101_v40  ;;  %v810_v38 = vsel %vm801_vm0, %v13478_v20, %v790_v61  ;;  %v1027_v61 = vrot.slane %v10377_v18, 1  ;;  %v13483_v18 = vrot.slane %v10630_v45, 1 }
  0xe8   : > { %1336 = vst [vmem:[#allocation2 + $0x114] sm:$0xf] %v1304_v7  ;;  %2234 = vmatpush.bf16.msrb.mxu3 %v9485_v47  ;;  %v9461_v47 = vld [vmem:[#allocation2 + $0x170] sm:$0xf0] }
  0xe9   : > { %1335 = vst [vmem:[#allocation2 + $0x108] sm:$0xf] %v1303_v56  ;;  %v11117_v7 = vpop.permute.xlu2 %1133  ;;  %v7765_v56 = vld [vmem:[#allocation2 + $0xfc] sm:$0xf0] }
  0xea   : > { %13479 = vst [vmem:[#allocation57_spill] sm:$0xff] %v11117_v7  ;;  %v11119_v40 = vpop.permute.xlu1 %956  ;;  %v1259_v48 = vmul.f32 %v11117_v7, %v1081_v55  ;;  %v11123_v42 = vpop.permute.xlu0 %951  ;;  %v540_v55 = vpack.c.bf16 %v10750_v63, %v10942_v6  ;;  %v13485_v63 = vrot.slane %v10402_v28, 1  ;;  %v9542_v28 = vld [vmem:[#allocation8 + $0xf8] sm:$0xff] }
  0xeb   : > { %13480 = vst [vmem:[#allocation58_spill] sm:$0xff] %v11119_v40  ;;  %2083 = vmatmul.bf16.gmra.mxu1 %v7692_v4  ;;  %v1018_v52 = vmul.f32 %v11119_v40, %v809_v39  ;;  %v1017_v1 = vmul.f32 %v11123_v42, %v810_v38  ;;  %v13366_v39 = vrot.slane %v10374_v17, 1  ;;  %v7823_v38 = vld [vmem:[#allocation2 + $0x168] sm:$0xf]  ;;  %2931 = vmatpush.bf16.msrb.mxu0 %v9542_v28  ;;  %v9541_v28 = vld [vmem:[#allocation8 + $0xf0] sm:$0xff] }
  0xec   : > { %13481 = vst [vmem:[#allocation59_spill] sm:$0xff] %v11123_v42  ;;  %v1419_v20 = vpack.c.bf16 %v1259_v48, %v1259_v48  ;;  %v11129_v4 = vpop.f32.mrf.mxu2  ;;  %2235 = vmatpush.bf16.msrb.mxu3 %v9484_v23  ;;  %v7768_v42 = vor.u32 %v9445_v8, %v7765_v56  ;;  %v1088_v6 = vsel %vm1058_vm1, %v1027_v61, %v13485_v63  ;;  %v1030_v63 = vrot.slane %v10448_v50, 1  ;;  %v9431_v50 = vld [vmem:[#allocation2 + $0x80] sm:$0xf0] }
  0xed   : > { %v1307_v30 = vpack.c.bf16 %v1018_v52, %v1018_v52  ;;  %v1306_v40 = vpack.c.bf16 %v1017_v1, %v1017_v1  ;;  %v13484_v52 = vrot.slane %v10559_v59, 1  ;;  %v7824_v23 = vor.u32 %v9461_v47, %v7823_v38  ;;  %v9482_v38 = vld [vmem:[#allocation8 + $0x98] sm:$0xff] }
  0xee   : > { %v11134_v7 = vpop.f32.mrf.mxu0  ;;  %1451 = vst [vmem:[#allocation2 + $0x80] sm:$0xf] %v1419_v20  ;;  %v9558_v20 = vld [vmem:[#allocation8 + $0x178] sm:$0xff] }
  0xef   : > { %13482 = vst [vmem:[#allocation60_spill] sm:$0xff] %v11134_v7  ;;  %v1078_v48 = vsel %vm1058_vm1, %v13484_v52, %v13483_v18  ;;  %v13369_v52 = vrot.slane %v10720_v22, 1  ;;  %3109 = vmatpush.bf16.msrb.mxu2 %v9558_v20  ;;  %v9557_v20 = vld [vmem:[#allocation8 + $0x170] sm:$0xff]  ;;  %2932 = vmatpush.bf16.msrb.mxu0 %v9541_v28 }
  0xf0   : > { %1339 = vst [vmem:[#allocation2 + $0x138] sm:$0xf] %v1307_v30  ;;  %v1089_v30 = vsel %vm1058_vm1, %v13366_v39, %v1027_v61  ;;  %2236 = vmatpush.bf16.msrb.mxu3 %v9483_v60  ;;  %v13368_v61 = vrot.slane %v11006_v13, 1  ;;  %v13367_v60 = vrot.slane %v10844_v16, 1  ;;  %v7703_v39 = vld [vmem:[#allocation2 + $0x78] sm:$0xf] }
  0xf1   : > { %1338 = vst [vmem:[#allocation2 + $0x12c] sm:$0xf] %v1306_v40  ;;  %672 = vmatmul.bf16.gmra.mxu0 %v540_v55  ;;  %2202 = vmatmul.bf16.gmra.mxu2 %v7768_v42  ;;  %v11152_v56 = vpop.permute.xlu2 %1148 }
  0xf2   : > { %13486 = vst [vmem:[#allocation61_spill] sm:$0xff] %v11152_v56  ;;  %v11154_v1 = vpop.permute.xlu1 %1098  ;;  %v1262_v40 = vmul.f32 %v11152_v56, %v1078_v48  ;;  %v11158_v55 = vpop.permute.xlu0 %1093  ;;  %v1033_v56 = vrot.slane %v10487_v3, 1  ;;  %v13497_v3 = vrot.slane %v10680_v37, 1 }
  0xf3   : > { %13487 = vst [vmem:[#allocation62_spill] sm:$0xff] %v11154_v1  ;;  %2138 = vmatmul.bf16.gmra.mxu3 %v7824_v23  ;;  %v1252_v47 = vmul.f32 %v11154_v1, %v1088_v6  ;;  %v1251_v42 = vmul.f32 %v11158_v55, %v1089_v30  ;;  %v11174_v30 = vsel %vm1058_vm1, %v13368_v61, %v13367_v60  ;;  %v13491_v60 = vrot.slane %v10451_v51, 1  ;;  %v9556_v51 = vld [vmem:[#allocation8 + $0x168] sm:$0xff]  ;;  %v9479_v1 = vld [vmem:[#allocation8 + $0x80] sm:$0xff] }
  0xf4   : > { %13488 = vst [vmem:[#allocation63_spill] sm:$0xff] %v11158_v55  ;;  %v1422_v48 = vpack.c.bf16 %v1262_v40, %v1262_v40  ;;  %v11166_v6 = vpop.f32.mrf.mxu2  ;;  %2237 = vmatpush.bf16.msrb.mxu3 %v9482_v38  ;;  %v9481_v40 = vld [vmem:[#allocation8 + $0x90] sm:$0xff]  ;;  %3110 = vmatpush.bf16.msrb.mxu2 %v9557_v20 }
  0xf5   : > { %v1412_v23 = vpack.c.bf16 %v1252_v47, %v1252_v47  ;;  %v1411_v8 = vpack.c.bf16 %v1251_v42, %v1251_v42  ;;  %v13490_v47 = vrot.slane %v10604_v26, 1  ;;  %v1085_v38 = vsel %vm1058_vm1, %v1030_v63, %v13491_v60  ;;  %v7813_v20 = vld [vmem:[#allocation2 + $0x15c] sm:$0xf0] }
  0xf6   : > { %v11176_v18 = vpop.f32.mrf.mxu0  ;;  %1454 = vst [vmem:[#allocation2 + $0xa4] sm:$0xf] %v1422_v48  ;;  %v7704_v42 = vor.u32 %v9431_v50, %v7703_v39  ;;  %v13492_v48 = vrot.slane %v10405_v29, 1  ;;  %v7777_v39 = vld [vmem:[#allocation2 + $0x114] sm:$0xf0] }
  0xf7   : > { %13489 = vst [vmem:[#allocation64_spill] sm:$0xff] %v11176_v18  ;;  %v1075_v7 = vsel %vm1058_vm1, %v13490_v47, %v13369_v52  ;;  %v9448_v47 = vld [vmem:[#allocation2 + $0x10c] sm:$0xf]  ;;  %v9540_v52 = vld [vmem:[#allocation8 + $0xe8] sm:$0xff]  ;;  %v9457_v29 = vld [vmem:[#allocation2 + $0x154] sm:$0xf] }
  0xf8   : > { %1444 = vst [vmem:[#allocation2 + $0x2c] sm:$0xf] %v1412_v23  ;;  %v1086_v23 = vsel %vm1058_vm1, %v13492_v48, %v1030_v63  ;;  %2238 = vmatpush.bf16.msrb.mxu3 %v9481_v40  ;;  %v9480_v50 = vld [vmem:[#allocation8 + $0x88] sm:$0xff]  ;;  %2933 = vmatpush.bf16.msrb.mxu0 %v9540_v52  ;;  %v9555_v40 = vld [vmem:[#allocation8 + $0x160] sm:$0xff]  ;;  %v7816_v48 = vor.u32 %v9457_v29, %v7813_v20  ;;  %v13498_v52 = vrot.slane %v10648_v57, 1  ;;  %v9538_v29 = vld [vmem:[#allocation8 + $0xd8] sm:$0xff] }
  0xf9   : > { %1443 = vst [vmem:[#allocation2 + $0x20] sm:$0xf] %v1411_v8  ;;  %v11192_v61 = vpop.permute.xlu2 %1163  ;;  %3111 = vmatpush.bf16.msrb.mxu2 %v9556_v51  ;;  %v1036_v20 = vrot.slane %v10556_v58, 1 }
  0xfa   : > { %13493 = vst [vmem:[#allocation65_spill] sm:$0xff] %v11192_v61  ;;  %v11194_v18 = vpop.permute.xlu1 %1113  ;;  %v1265_v60 = vmul.f32 %v11192_v61, %v1075_v7  ;;  %v11198_v8 = vpop.permute.xlu0 %1108  ;;  %v1072_v51 = vsel %vm1058_vm1, %v13498_v52, %v13497_v3  ;;  %v7715_v52 = vld [vmem:[#allocation2 + $0x90] sm:$0xf] }
  0xfb   : > { %13494 = vst [vmem:[#allocation66_spill] sm:$0xff] %v11194_v18  ;;  %2088 = vmatmul.bf16.gmra.mxu1 %v7704_v42  ;;  %v1255_v28 = vmul.f32 %v11194_v18, %v1085_v38  ;;  %v1254_v63 = vmul.f32 %v11198_v8, %v1086_v23  ;;  %v541_v38 = vpack.c.bf16 %v10986_v31, %v10753_v5  ;;  %v13499_v5 = vrot.slane %v10520_v32, 1  ;;  %v9554_v32 = vld [vmem:[#allocation8 + $0x158] sm:$0xff] }
  0xfc   : > { %13495 = vst [vmem:[#allocation67_spill] sm:$0xff] %v11198_v8  ;;  %v1425_v42 = vpack.c.bf16 %v1265_v60, %v1265_v60  ;;  %v11204_v61 = vpop.f32.mrf.mxu2  ;;  %2239 = vmatpush.bf16.msrb.mxu3 %v9480_v50  ;;  %v7780_v23 = vor.u32 %v9448_v47, %v7777_v39  ;;  %v9539_v8 = vld [vmem:[#allocation8 + $0xe0] sm:$0xff]  ;;  %v13500_v47 = vrot.slane %v10484_v2, 1  ;;  %v13377_v2 = vrot.slane %v10960_v25, 1 }
  0xfd   : > { %v1415_v7 = vpack.c.bf16 %v1255_v28, %v1255_v28  ;;  %v1414_v15 = vpack.c.bf16 %v1254_v63, %v1254_v63  ;;  %v1082_v31 = vsel %vm1058_vm1, %v1033_v56, %v13499_v5  ;;  %2934 = vmatpush.bf16.msrb.mxu0 %v9539_v8  ;;  %3112 = vmatpush.bf16.msrb.mxu2 %v9555_v40  ;;  %v2064_v63 = vpop.f32.mrf.mxu1  ;;  %v9553_v5 = vld [vmem:[#allocation8 + $0x150] sm:$0xff] }
  0xfe   : > { %v11208_v18 = vpop.f32.mrf.mxu0  ;;  %1457 = vst [vmem:[#allocation2 + $0xc8] sm:$0xf] %v1425_v42  ;;  %v1083_v60 = vsel %vm1058_vm1, %v13500_v47, %v1033_v56  ;;  %v11237_v40 = vadd.f32 %v11034_v46, %v2064_v63  ;;  %v13505_v46 = vrot.slane %v10559_v59, 1  ;;  %v9552_v63 = vld [vmem:[#allocation8 + $0x148] sm:$0xff] }
  0xff   : > { %13496 = vst [vmem:[#allocation68_spill] sm:$0xff] %v11208_v18 }
 0x100   : > { %1447 = vst [vmem:[#allocation2 + $0x50] sm:$0xf] %v1415_v7  ;;  %2240 = vmatpush.bf16.msrb.mxu3 %v9479_v1  ;;  %v13376_v1 = vrot.slane %v10768_v34, 1 }
 0x101   : > { %1446 = vst [vmem:[#allocation2 + $0x44] sm:$0xf] %v1414_v15  ;;  %677 = vmatmul.bf16.gmra.mxu0 %v541_v38  ;;  %2207 = vmatmul.bf16.gmra.mxu2 %v7780_v23  ;;  %v11224_v28 = vpop.permute.xlu2 %1178  ;;  %v9434_v38 = vld [vmem:[#allocation2 + $0x98] sm:$0xf0] }
 0x102   : > { %13501 = vst [vmem:[#allocation69_spill] sm:$0xff] %v11224_v28  ;;  %v11226_v39 = vpop.permute.xlu1 %1128  ;;  %v1268_v50 = vmul.f32 %v11224_v28, %v1072_v51  ;;  %v11230_v15 = vpop.permute.xlu0 %1123  ;;  %2935 = vmatpush.bf16.msrb.mxu0 %v9538_v29  ;;  %3113 = vmatpush.bf16.msrb.mxu2 %v9554_v32  ;;  %v9537_v51 = vld [vmem:[#allocation8 + $0xd0] sm:$0xff]  ;;  %v1069_v58 = vsel %vm1058_vm1, %v13377_v2, %v13376_v1  ;;  %v9551_v1 = vld [vmem:[#allocation8 + $0x140] sm:$0xff] }
 0x103   : > { %13502 = vst [vmem:[#allocation70_spill] sm:$0xff] %v11226_v39  ;;  %2222 = vmatmul.bf16.vlgmr.msra.gmra.mxu3 %v7816_v48  ;;  %v1258_v8 = vmul.f32 %v11226_v39, %v1082_v31  ;;  %v1257_v56 = vmul.f32 %v11230_v15, %v1083_v60  ;;  %v1079_v31 = vsel %vm1058_vm1, %v1036_v20, %v13505_v46  ;;  %v13506_v60 = vrot.slane %v10523_v33, 1  ;;  %v9506_v28 = vld [vmem:[#allocation2 + $0xb0] sm:$0xf0] }
 0x104   : > { %13503 = vst [vmem:[#allocation71_spill] sm:$0xff] %v11230_v15  ;;  %v1428_v48 = vpack.c.bf16 %v1268_v50, %v1268_v50  ;;  %v11239_v7 = vpop.f32.mrf.mxu2  ;;  %v7716_v47 = vor.u32 %v9434_v38, %v7715_v52  ;;  %v7789_v38 = vld [vmem:[#allocation2 + $0x12c] sm:$0xf0]  ;;  %v7825_v52 = vld [vmem:[#allocation2 + $0x174] sm:$0xf0] }
 0x105   : > { %v1418_v42 = vpack.c.bf16 %v1258_v8, %v1258_v8  ;;  %v1417_v23 = vpack.c.bf16 %v1257_v56, %v1257_v56  ;;  %v1080_v29 = vsel %vm1058_vm1, %v13506_v60, %v1036_v20  ;;  %v9536_v8 = vld [vmem:[#allocation8 + $0xc8] sm:$0xff]  ;;  %v1039_v20 = vrot.slane %v10601_v24, 1  ;;  %v9535_v60 = vld [vmem:[#allocation8 + $0xc0] sm:$0xff] }
 0x106   : > { %v11241_v3 = vpop.f32.mrf.mxu0  ;;  %1460 = vst [vmem:[#allocation2 + $0xec] sm:$0xf] %v1428_v48  ;;  %2936 = vmatpush.bf16.msrb.mxu0 %v9537_v51  ;;  %3114 = vmatpush.bf16.msrb.mxu2 %v9553_v5 }
 0x107   : > { %13504 = vst [vmem:[#allocation72_spill] sm:$0xff] %v11241_v3 }
 0x108   : > { %1450 = vst [vmem:[#allocation2 + $0x74] sm:$0xf] %v1418_v42  ;;  %v9451_v42 = vld [vmem:[#allocation2 + $0x124] sm:$0xf] }
 0x109   : > { %1449 = vst [vmem:[#allocation2 + $0x68] sm:$0xf] %v1417_v23  ;;  %v11257_v32 = vpop.permute.xlu2 %1193  ;;  %v9460_v23 = vld [vmem:[#allocation2 + $0x16c] sm:$0xf] }
 0x10a   : > { %13507 = vst [vmem:[#allocation73_spill] sm:$0xff] %v11257_v32  ;;  %v11259_v50 = vpop.permute.xlu1 %1143  ;;  %v1271_v59 = vmul.f32 %v11257_v32, %v1069_v58  ;;  %v11263_v48 = vpop.permute.xlu0 %1138  ;;  %2937 = vmatpush.bf16.msrb.mxu0 %v9536_v8  ;;  %3115 = vmatpush.bf16.msrb.mxu2 %v9552_v63  ;;  %v7828_v2 = vor.u32 %v9460_v23, %v7825_v52  ;;  %v13513_v63 = vrot.slane %v10630_v45, 1  ;;  %v13379_v45 = vrot.slane %v10864_v35, 1 }
 0x10b   : > { %13508 = vst [vmem:[#allocation74_spill] sm:$0xff] %v11259_v50  ;;  %2093 = vmatmul.bf16.gmra.mxu1 %v7716_v47  ;;  %v1261_v56 = vmul.f32 %v11259_v50, %v1079_v31  ;;  %v1260_v33 = vmul.f32 %v11263_v48, %v1080_v29  ;;  %v7792_v31 = vor.u32 %v9451_v42, %v7789_v38  ;;  %v13511_v29 = vrot.slane %v10604_v26, 1 }
 0x10c   : > { %13509 = vst [vmem:[#allocation75_spill] sm:$0xff] %v11263_v48  ;;  %v1431_v51 = vpack.c.bf16 %v1271_v59, %v1271_v59  ;;  %v11267_v46 = vpop.f32.mrf.mxu2  ;;  %v13512_v8 = vpack.c.bf16 %v10828_v21, %v10819_v36  ;;  %v1077_v59 = vsel %vm1058_vm1, %v13513_v63, %v1039_v20  ;;  %v13378_v21 = vrot.slane %v10870_v41, 1 }
 0x10d   : > { %v1421_v5 = vpack.c.bf16 %v1261_v56, %v1261_v56  ;;  %v1420_v47 = vpack.c.bf16 %v1260_v33, %v1260_v33  ;;  %v1076_v24 = vsel %vm1058_vm1, %v1039_v20, %v13511_v29  ;;  %v1042_v33 = vrot.slane %v10644_v53, 1 }
 0x10e   : > { %v11269_v58 = vpop.f32.mrf.mxu0  ;;  %1463 = vst [vmem:[#allocation2 + $0x110] sm:$0xf] %v1431_v51  ;;  %2938 = vmatpush.bf16.msrb.mxu0 %v9535_v60  ;;  %3116 = vmatpush.bf16.msrb.mxu2 %v9551_v1  ;;  %v13518_v53 = vrot.slane %v10648_v57, 1  ;;  %v13519_v29 = vrot.slane %v10720_v22, 1  ;;  %v9417_v22 = vld [vmem:[#allocation2 + $0x10] sm:$0xf0] }
 0x10f   : > { %13510 = vst [vmem:[#allocation76_spill] sm:$0xff] %v11269_v58 }
 0x110   : > { %1453 = vst [vmem:[#allocation2 + $0x98] sm:$0xf] %v1421_v5  ;;  %v9437_v5 = vld [vmem:[#allocation2 + $0xb0] sm:$0xf0] }
 0x111   : > { %1452 = vst [vmem:[#allocation2 + $0x8c] sm:$0xf] %v1420_v47  ;;  %682 = vmatmul.bf16.gmra.mxu0 %v13512_v8  ;;  %2212 = vmatmul.bf16.gmra.mxu2 %v7792_v31  ;;  %v11282_v56 = vpop.permute.xlu2 %1208  ;;  %v1063_v47 = vsel %vm1058_vm1, %v13379_v45, %v13378_v21  ;;  %v1073_v31 = vsel %vm1058_vm1, %v1042_v33, %v13518_v53 }
 0x112   : > { %13514 = vst [vmem:[#allocation77_spill] sm:$0xff] %v11282_v56  ;;  %v11284_v42 = vpop.permute.xlu1 %1158  ;;  %v1274_v26 = vmul.f32 %v11282_v56, %v11174_v30  ;;  %v11289_v38 = vpop.permute.xlu0 %1153  ;;  %v7727_v30 = vld [vmem:[#allocation2 + $0xa8] sm:$0xf]  ;;  %v9503_v56 = vld [vmem:[#allocation2 + $0x98] sm:$0xf0] }
 0x113   : > { %13515 = vst [vmem:[#allocation78_spill] sm:$0xff] %v11284_v42  ;;  %2227 = vmatmul.bf16.gmra.mxu3 %v7828_v2  ;;  %v1264_v1 = vmul.f32 %v11284_v42, %v1076_v24  ;;  %v1263_v36 = vmul.f32 %v11289_v38, %v1077_v59  ;;  %v7728_v60 = vor.u32 %v9437_v5, %v7727_v30  ;;  %v1045_v30 = vrot.slane %v10918_v27, 1 }
 0x114   : > { %13516 = vst [vmem:[#allocation79_spill] sm:$0xff] %v11289_v38  ;;  %v1434_v23 = vpack.c.bf16 %v1274_v26, %v1274_v26  ;;  %v11295_v20 = vpop.f32.mrf.mxu2  ;;  %v1074_v24 = vsel %vm1058_vm1, %v13519_v29, %v1042_v33  ;;  %v1056_v33 = vrot.slane %v10825_v44, 1  ;;  %v13524_v27 = vrot.slane %v10960_v25, 1 }
 0x115   : > { %v1424_v52 = vpack.c.bf16 %v1264_v1, %v1264_v1  ;;  %v1423_v2 = vpack.c.bf16 %v1263_v36, %v1263_v36  ;;  %v9454_v1 = vld [vmem:[#allocation2 + $0x13c] sm:$0xf]  ;;  %v7801_v36 = vld [vmem:[#allocation2 + $0x144] sm:$0xf0] }
 0x116   : > { %v11297_v51 = vpop.f32.mrf.mxu0  ;;  %1466 = vst [vmem:[#allocation2 + $0x134] sm:$0xf] %v1434_v23  ;;  %v7651_v23 = vld [vmem:[#allocation2 + $0x8] sm:$0xf]  ;;  %v7804_v21 = vor.u32 %v9454_v1, %v7801_v36 }
 0x117   : > { %13517 = vst [vmem:[#allocation80_spill] sm:$0xff] %v11297_v51 }
 0x118   : > { %1456 = vst [vmem:[#allocation2 + $0xbc] sm:$0xf] %v1424_v52 }
 0x119   : > { %1455 = vst [vmem:[#allocation2 + $0xb0] sm:$0xf] %v1423_v2  ;;  %v11313_v8 = vpop.permute.xlu2 %1223  ;;  %v13381_v2 = vrot.slane %v10713_v14, 1 }
 0x11a   : > { %13520 = vst [vmem:[#allocation81_spill] sm:$0xff] %v11313_v8  ;;  %v11315_v63 = vpop.permute.xlu1 %1173  ;;  %v1277_v59 = vmul.f32 %v11313_v8, %v1063_v47  ;;  %v11319_v57 = vpop.permute.xlu0 %1168  ;;  %v543_v47 = vpack.c.bf16 %v10847_v12, %v10837_v10  ;;  %v13525_v10 = vrot.slane %v10680_v37, 1  ;;  %v1048_v37 = vrot.slane %v10771_v0, 1 }
 0x11b   : > { %13521 = vst [vmem:[#allocation82_spill] sm:$0xff] %v11315_v63  ;;  %2098 = vmatmul.bf16.gmra.mxu1 %v7728_v60  ;;  %v1267_v26 = vmul.f32 %v11315_v63, %v1073_v31  ;;  %v1266_v52 = vmul.f32 %v11319_v57, %v1074_v24  ;;  %v7652_v24 = vor.u32 %v9417_v22, %v7651_v23  ;;  %v13380_v22 = vrot.slane %v10582_v11, 1 }
 0x11c   : > { %13522 = vst [vmem:[#allocation83_spill] sm:$0xff] %v11319_v57  ;;  %v1437_v5 = vpack.c.bf16 %v1277_v59, %v1277_v59  ;;  %v11325_v60 = vpop.f32.mrf.mxu2  ;;  %v1060_v45 = vsel %vm1058_vm1, %v13381_v2, %v1056_v33  ;;  %v1070_v59 = vsel %vm1058_vm1, %v1045_v30, %v13524_v27  ;;  %v1071_v12 = vsel %vm1058_vm1, %v13525_v10, %v1045_v30  ;;  %v7931_v2 = vld [vmem:[#allocation2 + $0x18] sm:$0xf] }
 0x11d   : > { %v1427_v53 = vpack.c.bf16 %v1267_v26, %v1267_v26  ;;  %v1426_v31 = vpack.c.bf16 %v1266_v52, %v1266_v52  ;;  %v13530_v27 = vrot.slane %v11006_v13, 1  ;;  %v13531_v10 = vrot.slane %v10768_v34, 1 }
 0x11e   : > { %v11329_v29 = vpop.f32.mrf.mxu0  ;;  %1469 = vst [vmem:[#allocation2 + $0x158] sm:$0xf] %v1437_v5  ;;  %v1051_v34 = vrot.slane %v10856_v54, 1  ;;  %v13536_v54 = vrot.slane %v10864_v35, 1 }
 0x11f   : > { %13523 = vst [vmem:[#allocation84_spill] sm:$0xff] %v11329_v29  ;;  %v1067_v0 = vsel %vm1058_vm1, %v1048_v37, %v13530_v27  ;;  %v7939_v27 = vld [vmem:[#allocation2 + $0x20] sm:$0xf]  ;;  %v11384_v29 = vpop.f32.mrf.mxu1 }
 0x120   : > { %1459 = vst [vmem:[#allocation2 + $0xe0] sm:$0xf] %v1427_v53 }
 0x121   : > { %1458 = vst [vmem:[#allocation2 + $0xd4] sm:$0xf] %v1426_v31  ;;  %687 = vmatmul.bf16.gmra.mxu0 %v543_v47  ;;  %2217 = vmatmul.bf16.gmra.mxu2 %v7804_v21  ;;  %v11343_v26 = vpop.permute.xlu2 %1238  ;;  %v9440_v31 = vld [vmem:[#allocation2 + $0xc8] sm:$0xf0] }
 0x122   : > { %13526 = vst [vmem:[#allocation85_spill] sm:$0xff] %v11343_v26  ;;  %v11345_v1 = vpop.permute.xlu1 %1188  ;;  %v1280_v36 = vmul.f32 %v11343_v26, %v1060_v45  ;;  %v11349_v23 = vpop.permute.xlu0 %1183  ;;  %v7739_v45 = vld [vmem:[#allocation2 + $0xc0] sm:$0xf] }
 0x123   : > { %13527 = vst [vmem:[#allocation86_spill] sm:$0xff] %v11345_v1  ;;  %2241 = vmatmul.bf16.vlgmr.msrb.gmra.mxu3 %v7652_v24  ;;  %v1270_v25 = vmul.f32 %v11345_v1, %v1070_v59  ;;  %v1269_v52 = vmul.f32 %v11349_v23, %v1071_v12  ;;  %v1059_v24 = vsel %vm1058_vm1, %v1056_v33, %v13380_v22 }
 0x124   : > { %13528 = vst [vmem:[#allocation87_spill] sm:$0xff] %v11349_v23  ;;  %v1440_v5 = vpack.c.bf16 %v1280_v36, %v1280_v36  ;;  %v11354_v21 = vpop.f32.mrf.mxu2  ;;  %v7740_v59 = vor.u32 %v9440_v31, %v7739_v45  ;;  %v1068_v12 = vsel %vm1058_vm1, %v13531_v10, %v1048_v37  ;;  %v9489_v10 = vld [vmem:[#allocation2 + $0x28] sm:$0xf0] }
 0x125   : > { %v1430_v30 = vpack.c.bf16 %v1270_v25, %v1270_v25  ;;  %v1429_v53 = vpack.c.bf16 %v1269_v52, %v1269_v52 }
 0x126   : > { %v11356_v47 = vpop.f32.mrf.mxu0  ;;  %1472 = vst [vmem:[#allocation2 + $0x17c] sm:$0xf] %v1440_v5  ;;  %v9550_v5 = vld [vmem:[#allocation8 + $0x138] sm:$0xff] }
 0x127   : > { %13529 = vst [vmem:[#allocation88_spill] sm:$0xff] %v11356_v47  ;;  %3020 = vmatpush.bf16.msrb.mxu1 %v9550_v5  ;;  %v13537_v5 = vrot.slane %v10844_v16, 1 }
 0x128   : > { %1462 = vst [vmem:[#allocation2 + $0x104] sm:$0xf] %v1430_v30 }
 0x129   : > { %1461 = vst [vmem:[#allocation2 + $0xf8] sm:$0xf] %v1429_v53  ;;  %v11370_v36 = vpop.permute.xlu2 %1243  ;;  %v9488_v53 = vld [vmem:[#allocation2 + $0x20] sm:$0xf0] }
 0x12a   : > { %13532 = vst [vmem:[#allocation89_spill] sm:$0xff] %v11370_v36  ;;  %v11372_v25 = vpop.permute.xlu1 %1203  ;;  %v1281_v52 = vmul.f32 %v11370_v36, %v1059_v24  ;;  %v11376_v13 = vpop.permute.xlu0 %1198  ;;  %v7663_v24 = vld [vmem:[#allocation2 + $0x20] sm:$0xf]  ;;  %v7932_v47 = vor.u32 %v9488_v53, %v7931_v2 }
 0x12b   : > { %13533 = vst [vmem:[#allocation90_spill] sm:$0xff] %v11372_v25  ;;  %2103 = vmatmul.bf16.gmra.mxu1 %v7740_v59  ;;  %v1273_v33 = vmul.f32 %v11372_v25, %v1067_v0  ;;  %v1272_v30 = vmul.f32 %v11376_v13, %v1068_v12  ;;  %v9420_v0 = vld [vmem:[#allocation2 + $0x28] sm:$0xf0]  ;;  %v7940_v12 = vor.u32 %v9489_v10, %v7939_v27 }
 0x12c   : > { %13534 = vst [vmem:[#allocation91_spill] sm:$0xff] %v11376_v13  ;;  %v1441_v31 = vpack.c.bf16 %v1281_v52, %v1281_v52  ;;  %v11380_v37 = vpop.f32.mrf.mxu2  ;;  %v1064_v52 = vsel %vm1058_vm1, %v1051_v34, %v13536_v54 }
 0x12d   : > { %v1433_v45 = vpack.c.bf16 %v1273_v33, %v1273_v33  ;;  %v1432_v59 = vpack.c.bf16 %v1272_v30, %v1272_v30  ;;  %v7664_v33 = vor.u32 %v9420_v0, %v7663_v24  ;;  %v1065_v30 = vsel %vm1058_vm1, %v13537_v5, %v1051_v34  ;;  %v9443_v24 = vld [vmem:[#allocation2 + $0xe0] sm:$0xf0] }
 0x12e   : > { %v11382_v22 = vpop.f32.mrf.mxu0  ;;  %1473 = vst [vmem:[#allocation2 + $0x188] sm:$0xf] %v1441_v31  ;;  %v13541_v0 = vrot.slane %v10713_v14, 1 }
 0x12f   : > { %13535 = vst [vmem:[#allocation92_spill] sm:$0xff] %v11382_v22 }
 0x130   : > { %1465 = vst [vmem:[#allocation2 + $0x128] sm:$0xf] %v1433_v45  ;;  %v1054_v45 = vrot.slane %v10711_v9, 1  ;;  %v13542_v9 = vrot.slane %v10870_v41, 1  ;;  %v9492_v41 = vld [vmem:[#allocation2 + $0x40] sm:$0xf0] }
 0x131   : > { %1464 = vst [vmem:[#allocation2 + $0x11c] sm:$0xf] %v1432_v59  ;;  %2939 = vmatmul.bf16.vlgmr.msrb.gmra.mxu0 %v7932_v47  ;;  %3117 = vmatmul.bf16.vlgmr.msrb.gmra.mxu2 %v7940_v12  ;;  %v7751_v59 = vld [vmem:[#allocation2 + $0xd8] sm:$0xf] }
 0x132   : > { %v11394_v31 = vpop.permute.xlu1 %1218  ;;  %v11397_v53 = vpop.permute.xlu0 %1213  ;;  %v1061_v12 = vsel %vm1058_vm1, %v1054_v45, %v13541_v0  ;;  %v7752_v54 = vor.u32 %v9443_v24, %v7751_v59 }
 0x133   : > { %13538 = vst [vmem:[#allocation93_spill] sm:$0xff] %v11394_v31  ;;  %2246 = vmatmul.bf16.gmra.mxu3 %v7664_v33  ;;  %v1276_v2 = vmul.f32 %v11394_v31, %v1064_v52  ;;  %v1275_v35 = vmul.f32 %v11397_v53, %v1065_v30  ;;  %v1062_v52 = vsel %vm1058_vm1, %v13542_v9, %v1054_v45  ;;  %v9423_v45 = vld [vmem:[#allocation2 + $0x40] sm:$0xf0]  ;;  %v11426_v9 = vpop.f32.mrf.mxu3 }
 0x134   : > { %13539 = vst [vmem:[#allocation94_spill] sm:$0xff] %v11397_v53  ;;  %v11401_v10 = vpop.f32.mrf.mxu2 }
 0x135   : > { %v1436_v27 = vpack.c.bf16 %v1276_v2, %v1276_v2  ;;  %v1435_v47 = vpack.c.bf16 %v1275_v35, %v1275_v35  ;;  %v7943_v35 = vld [vmem:[#allocation2 + $0x30] sm:$0xf]  ;;  %13546 = vst [vmem:[#allocation99_spill] sm:$0xff] %v11426_v9 }
 0x136   : > { %v11403_v16 = vpop.f32.mrf.mxu0 }
 0x137   : > { %13540 = vst [vmem:[#allocation95_spill] sm:$0xff] %v11403_v16 }
 0x138   : > { %1468 = vst [vmem:[#allocation2 + $0x14c] sm:$0xf] %v1436_v27  ;;  %v11405_v34 = vpop.f32.mrf.mxu1  ;;  %v9491_v27 = vld [vmem:[#allocation2 + $0x38] sm:$0xf0] }
 0x139   : > { %1467 = vst [vmem:[#allocation2 + $0x140] sm:$0xf] %v1435_v47  ;;  %v797_v47 = vrot.slane %v10825_v44, 7  ;;  %v13547_v44 = vrot.slane %v10582_v11, 7  ;;  %v2159_v15 = vadd.f32 %v11099_v49, %v11405_v34  ;;  %v7771_v49 = vld [vmem:[#allocation2 + $0xf8] sm:$0xf] }
 0x13a   : > { %v11415_v33 = vpop.permute.xlu1 %1233  ;;  %v11418_v30 = vpop.permute.xlu0 %1228  ;;  %v9447_v34 = vld [vmem:[#allocation2 + $0x100] sm:$0xf0] }
 0x13b   : > { %13543 = vst [vmem:[#allocation96_spill] sm:$0xff] %v11415_v33  ;;  %2108 = vmatmul.bf16.gmra.mxu1 %v7752_v54  ;;  %v1279_v5 = vmul.f32 %v11415_v33, %v1061_v12  ;;  %v1278_v2 = vmul.f32 %v11418_v30, %v1062_v52  ;;  %v7944_v12 = vor.u32 %v9491_v27, %v7943_v35  ;;  %v7951_v54 = vld [vmem:[#allocation2 + $0x38] sm:$0xf] }
 0x13c   : > { %13544 = vst [vmem:[#allocation97_spill] sm:$0xff] %v11418_v30  ;;  %v11422_v59 = vpop.f32.mrf.mxu2  ;;  %v7675_v52 = vld [vmem:[#allocation2 + $0x38] sm:$0xf]  ;;  %v7952_v51 = vor.u32 %v9492_v41, %v7951_v54  ;;  %v7711_v30 = vld [vmem:[#allocation2 + $0x80] sm:$0xf] }
 0x13d   : > { %v1439_v0 = vpack.c.bf16 %v1279_v5, %v1279_v5  ;;  %v1438_v24 = vpack.c.bf16 %v1278_v2, %v1278_v2  ;;  %v802_v5 = vsel %vm801_vm0, %v797_v47, %v13547_v44  ;;  %v7676_v58 = vor.u32 %v9423_v45, %v7675_v52  ;;  %v11450_v52 = vpop.f32.mrf.mxu3 }
 0x13e   : > { %v11424_v16 = vpop.f32.mrf.mxu0  ;;  %v13548_v2 = vrot.slane %v10713_v14, 7  ;;  %v9446_v14 = vld [vmem:[#allocation2 + $0xf8] sm:$0xf0]  ;;  %13552 = vst [vmem:[#allocation103_spill] sm:$0xff] %v11450_v52  ;;  %v13553_v44 = vrot.slane %v10374_v17, 1 }
 0x13f   : > { %13545 = vst [vmem:[#allocation98_spill] sm:$0xff] %v11424_v16  ;;  %v7963_v52 = vld [vmem:[#allocation2 + $0x50] sm:$0xf]  ;;  %v9495_v16 = vld [vmem:[#allocation2 + $0x58] sm:$0xf0] }
 0x140   : > { %1471 = vst [vmem:[#allocation2 + $0x170] sm:$0xf] %v1439_v0  ;;  %v11428_v22 = vpop.f32.mrf.mxu1  ;;  %v803_v9 = vsel %vm801_vm0, %v13548_v2, %v797_v47  ;;  %v9549_v2 = vld [vmem:[#allocation8 + $0x130] sm:$0xff]  ;;  %v7687_v17 = vld [vmem:[#allocation2 + $0x50] sm:$0xf] }
 0x141   : > { %1470 = vst [vmem:[#allocation2 + $0x164] sm:$0xf] %v1438_v24  ;;  %2944 = vmatmul.bf16.gmra.mxu0 %v7944_v12  ;;  %3122 = vmatmul.bf16.gmra.mxu2 %v7952_v51  ;;  %v7763_v51 = vld [vmem:[#allocation2 + $0xf0] sm:$0xf] }
 0x142   : > { %v11438_v35 = vpop.permute.xlu1 %991  ;;  %v11441_v0 = vpop.permute.xlu0 %986  ;;  %3021 = vmatpush.bf16.msrb.mxu1 %v9549_v2  ;;  %v9548_v2 = vld [vmem:[#allocation8 + $0x128] sm:$0xff] }
 0x143   : > { %13549 = vst [vmem:[#allocation100_spill] sm:$0xff] %v11438_v35  ;;  %2251 = vmatmul.bf16.gmra.mxu3 %v7676_v58  ;;  %v1025_v27 = vmul.f32 %v11438_v35, %v802_v5  ;;  %v1024_v41 = vmul.f32 %v11441_v0, %v803_v9  ;;  %v7764_v58 = vor.u32 %v9446_v14, %v7763_v51  ;;  %v13554_v5 = vrot.slane %v10582_v11, 1 }
 0x144   : > { %13550 = vst [vmem:[#allocation101_spill] sm:$0xff] %v11441_v0  ;;  %v11444_v54 = vpop.f32.mrf.mxu2  ;;  %v9452_v0 = vld [vmem:[#allocation2 + $0x128] sm:$0xf0] }
 0x145   : > { %v1314_v24 = vpack.c.bf16 %v1025_v27, %v1025_v27  ;;  %v1313_v45 = vpack.c.bf16 %v1024_v41, %v1024_v41  ;;  %v1090_v9 = vsel %vm1058_vm1, %v13554_v5, %v13553_v44  ;;  %v7964_v5 = vor.u32 %v9495_v16, %v7963_v52  ;;  %v7967_v52 = vld [vmem:[#allocation2 + $0x60] sm:$0xf] }
 0x146   : > { %v11446_v12 = vpop.f32.mrf.mxu0  ;;  %3022 = vmatpush.bf16.msrb.mxu1 %v9548_v2 }
 0x147   : > { %13551 = vst [vmem:[#allocation102_spill] sm:$0xff] %v11446_v12 }
 0x148   : > { %1346 = vst [vmem:[#allocation2 + $0x18c] sm:$0xf] %v1314_v24  ;;  %v11448_v47 = vpop.f32.mrf.mxu1  ;;  %v7955_v24 = vld [vmem:[#allocation2 + $0x48] sm:$0xf] }
 0x149   : > { %1345 = vst [vmem:[#allocation2 + $0x180] sm:$0xf] %v1313_v45  ;;  %v9494_v45 = vld [vmem:[#allocation2 + $0x50] sm:$0xf0] }
 0x14a   : > { %v11458_v27 = vpop.permute.xlu0 %1248  ;;  %v7956_v11 = vor.u32 %v9494_v45, %v7955_v24  ;;  %v9449_v24 = vld [vmem:[#allocation2 + $0x110] sm:$0xf0] }
 0x14b   : > { %2113 = vmatmul.bf16.gmra.mxu1 %v7764_v58  ;;  %13555 = vst [vmem:[#allocation104_spill] sm:$0xff] %v11458_v27  ;;  %v1282_v41 = vmul.f32 %v11458_v27, %v1090_v9  ;;  %v9426_v58 = vld [vmem:[#allocation2 + $0x58] sm:$0xf0]  ;;  %v11467_v9 = vpop.f32.mrf.mxu3  ;;  %v9547_v27 = vld [vmem:[#allocation8 + $0x120] sm:$0xff] }
 0x14c   : > { %v11461_v12 = vpop.f32.mrf.mxu2  ;;  %v7688_v3 = vor.u32 %v9426_v58, %v7687_v17  ;;  %13557 = vst [vmem:[#allocation106_spill] sm:$0xff] %v11467_v9  ;;  %v9497_v17 = vld [vmem:[#allocation2 + $0x68] sm:$0xf0]  ;;  %3023 = vmatpush.bf16.msrb.mxu1 %v9547_v27  ;;  %v7975_v58 = vld [vmem:[#allocation2 + $0x68] sm:$0xf]  ;;  %v9544_v27 = vld [vmem:[#allocation8 + $0x108] sm:$0xff] }
 0x14d   : > { %v1442_v14 = vpack.c.bf16 %v1282_v41, %v1282_v41  ;;  %v7699_v9 = vld [vmem:[#allocation2 + $0x68] sm:$0xf]  ;;  %v7968_v36 = vor.u32 %v9497_v17, %v7967_v52  ;;  %v7787_v52 = vld [vmem:[#allocation2 + $0x120] sm:$0xf] }
 0x14e   : > { %v11463_v51 = vpop.f32.mrf.mxu0  ;;  %v7788_v17 = vor.u32 %v9452_v0, %v7787_v52 }
 0x14f   : > { %13556 = vst [vmem:[#allocation105_spill] sm:$0xff] %v11463_v51  ;;  %v7775_v51 = vld [vmem:[#allocation2 + $0x108] sm:$0xf] }
 0x150   : > { %1474 = vst [vmem:[#allocation2 + $0x194] sm:$0xf] %v1442_v14  ;;  %v11465_v44 = vpop.f32.mrf.mxu1  ;;  %v7776_v14 = vor.u32 %v9449_v24, %v7775_v51 }
 0x151   : > { %2949 = vmatmul.bf16.gmra.mxu0 %v7956_v11  ;;  %3127 = vmatmul.bf16.gmra.mxu2 %v7964_v5  ;;  %v9546_v11 = vld [vmem:[#allocation8 + $0x118] sm:$0xff]  ;;  %v9498_v5 = vld [vmem:[#allocation2 + $0x70] sm:$0xf0] }
 0x152   : > { %v7976_v51 = vor.u32 %v9498_v5, %v7975_v58  ;;  %3024 = vmatpush.bf16.msrb.mxu1 %v9546_v11  ;;  %v9543_v58 = vld [vmem:[#allocation8 + $0x100] sm:$0xff] }
 0x153   : > { %2256 = vmatmul.bf16.gmra.mxu3 %v7688_v3  ;;  %v11475_v16 = vpop.f32.mrf.mxu3 }
 0x154   : > { %v11469_v18 = vpop.f32.mrf.mxu2  ;;  %13559 = vst [vmem:[#allocation108_spill] sm:$0xff] %v11475_v16 }
 0x156   : > { %v11471_v41 = vpop.f32.mrf.mxu0 }
 0x157   : > { %13558 = vst [vmem:[#allocation107_spill] sm:$0xff] %v11471_v41  ;;  %v9429_v41 = vld [vmem:[#allocation2 + $0x70] sm:$0xf0] }
 0x158   : > { %v11473_v45 = vpop.f32.mrf.mxu1  ;;  %v7700_v24 = vor.u32 %v9429_v41, %v7699_v9  ;;  %v7979_v9 = vld [vmem:[#allocation2 + $0x78] sm:$0xf]  ;;  %v9501_v41 = vld [vmem:[#allocation2 + $0x88] sm:$0xf0] }
 0x15b   : > { %2118 = vmatmul.bf16.gmra.mxu1 %v7776_v14  ;;  %v9545_v14 = vld [vmem:[#allocation8 + $0x110] sm:$0xff] }
 0x15c   : > { %v11477_v3 = vpop.f32.mrf.mxu2  ;;  %3025 = vmatpush.bf16.msrb.mxu1 %v9545_v14  ;;  %v7987_v14 = vld [vmem:[#allocation2 + $0x80] sm:$0xf] }
 0x15d   : > { %v7988_v8 = vor.u32 %v9501_v41, %v7987_v14  ;;  %v7999_v41 = vld [vmem:[#allocation2 + $0x98] sm:$0xf] }
 0x15e   : > { %v11479_v2 = vpop.f32.mrf.mxu0 }
 0x15f   : > { %13560 = vst [vmem:[#allocation109_spill] sm:$0xff] %v11479_v2 }
 0x160   : > { %v11481_v35 = vpop.f32.mrf.mxu1  ;;  %3026 = vmatpush.bf16.msrb.mxu1 %v9544_v27 }
 0x161   : > { %2954 = vmatmul.bf16.gmra.mxu0 %v7968_v36  ;;  %3132 = vmatmul.bf16.gmra.mxu2 %v7976_v51  ;;  %v9500_v36 = vld [vmem:[#allocation2 + $0x80] sm:$0xf0]  ;;  %v9432_v51 = vld [vmem:[#allocation2 + $0x88] sm:$0xf0] }
 0x162   : > { %v7712_v27 = vor.u32 %v9432_v51, %v7711_v30  ;;  %v7723_v30 = vld [vmem:[#allocation2 + $0x98] sm:$0xf]  ;;  %v9504_v51 = vld [vmem:[#allocation2 + $0xa0] sm:$0xf0] }
 0x163   : > { %2261 = vmatmul.bf16.gmra.mxu3 %v7700_v24  ;;  %v7980_v24 = vor.u32 %v9500_v36, %v7979_v9  ;;  %v7991_v36 = vld [vmem:[#allocation2 + $0x90] sm:$0xf] }
 0x164   : > { %v11485_v33 = vpop.f32.mrf.mxu2  ;;  %3027 = vmatpush.bf16.msrb.mxu1 %v9543_v58 }
 0x166   : > { %v2134_v16 = vpop.f32.mrf.mxu3  ;;  %v11483_v26 = vpop.f32.mrf.mxu0 }
 0x167   : > { %13561 = vst [vmem:[#allocation110_spill] sm:$0xff] %v11483_v26 }
 0x168   : > { %v11487_v2 = vpop.f32.mrf.mxu1 }
 0x16b   : > { %2123 = vmatmul.bf16.gmra.mxu1 %v7788_v17  ;;  %v7799_v17 = vld [vmem:[#allocation2 + $0x138] sm:$0xf] }
 0x16c   : > { %v11493_v31 = vpop.f32.mrf.mxu2 }
 0x16e   : > { %v2136_v11 = vpop.f32.mrf.mxu3  ;;  %v11489_v5 = vpop.f32.mrf.mxu0 }
 0x16f   : > { %13562 = vst [vmem:[#allocation111_spill] sm:$0xff] %v11489_v5  ;;  %v9455_v5 = vld [vmem:[#allocation2 + $0x140] sm:$0xf0] }
 0x170   : > { %v11491_v26 = vpop.f32.mrf.mxu1  ;;  %v7800_v53 = vor.u32 %v9455_v5, %v7799_v17  ;;  %v9487_v5 = vld [vmem:[#allocation2 + $0x1c] sm:$0xf]  ;;  %v7933_v17 = vld [vmem:[#allocation2 + $0x24] sm:$0xf0] }
 0x171   : > { %2959 = vmatmul.bf16.gmra.mxu0 %v7980_v24  ;;  %3137 = vmatmul.bf16.gmra.mxu2 %v7988_v8  ;;  %v7992_v8 = vor.u32 %v9503_v56, %v7991_v36  ;;  %v8003_v36 = vld [vmem:[#allocation2 + $0xa8] sm:$0xf] }
 0x173   : > { %2266 = vmatmul.bf16.gmra.mxu3 %v7712_v27  ;;  %v9435_v27 = vld [vmem:[#allocation2 + $0xa0] sm:$0xf0] }
 0x174   : > { %v11499_v9 = vpop.f32.mrf.mxu2  ;;  %v7724_v13 = vor.u32 %v9435_v27, %v7723_v30  ;;  %v9507_v30 = vld [vmem:[#allocation2 + $0xb8] sm:$0xf0] }
 0x176   : > { %v2139_v0 = vpop.f32.mrf.mxu3  ;;  %v11495_v52 = vpop.f32.mrf.mxu0 }
 0x177   : > { %13563 = vst [vmem:[#allocation112_spill] sm:$0xff] %v11495_v52  ;;  %v8000_v52 = vor.u32 %v9504_v51, %v7999_v41  ;;  %v8011_v41 = vld [vmem:[#allocation2 + $0xb0] sm:$0xf]  ;;  %v9438_v51 = vld [vmem:[#allocation2 + $0xb8] sm:$0xf0] }
 0x178   : > { %v11497_v58 = vpop.f32.mrf.mxu1 }
 0x17b   : > { %2128 = vmatmul.bf16.gmra.mxu1 %v7800_v53 }
 0x17c   : > { %v11505_v53 = vpop.f32.mrf.mxu2 }
 0x17d   : > { %13565 = vst [vmem:[#allocation114_spill] sm:$0xff] %v11505_v53  ;;  %v8017_v53 = vld [vmem:[#allocation2 + $0xcc] sm:$0xf0] }
 0x17e   : > { %v2141_v14 = vpop.f32.mrf.mxu3  ;;  %v11501_v25 = vpop.f32.mrf.mxu0 }
 0x17f   : > { %13564 = vst [vmem:[#allocation113_spill] sm:$0xff] %v11501_v25  ;;  %v7936_v25 = vor.u32 %v9487_v5, %v7933_v17  ;;  %v7945_v17 = vld [vmem:[#allocation2 + $0x3c] sm:$0xf0] }
 0x180   : > { %v11503_v24 = vpop.f32.mrf.mxu1 }
 0x181   : > { %2964 = vmatmul.bf16.gmra.mxu0 %v7992_v8  ;;  %3142 = vmatmul.bf16.gmra.mxu2 %v8000_v52 }
 0x183   : > { %2271 = vmatmul.bf16.gmra.mxu3 %v7724_v13  ;;  %v7735_v13 = vld [vmem:[#allocation2 + $0xb0] sm:$0xf] }
 0x184   : > { %v11515_v27 = vpop.f32.mrf.mxu2  ;;  %v7736_v5 = vor.u32 %v9438_v51, %v7735_v13 }
 0x185   : > { %13569 = vst [vmem:[#allocation118_spill] sm:$0xff] %v11515_v27 }
 0x186   : > { %v2223_v32 = vpop.f32.mrf.mxu3  ;;  %v11507_v1 = vpop.f32.mrf.mxu0 }
 0x187   : > { %13566 = vst [vmem:[#allocation115_spill] sm:$0xff] %v11507_v1  ;;  %v11509_v23 = vadd.f32 %v2223_v32, %v2134_v16  ;;  %v8004_v1 = vor.u32 %v9506_v28, %v8003_v36  ;;  %v8012_v16 = vor.u32 %v9507_v30, %v8011_v41  ;;  %v9509_v28 = vld [vmem:[#allocation2 + $0xc8] sm:$0xf0]  ;;  %v9510_v36 = vld [vmem:[#allocation2 + $0xd0] sm:$0xf0] }
 0x188   : > { %v11511_v56 = vpop.f32.mrf.mxu1 }
 0x189   : > { %13567 = vst [vmem:[#allocation116_spill] sm:$0xff] %v11509_v23 }
 0x18b   : > { %3028 = vmatmul.bf16.vlgmr.msrb.gmra.mxu1 %v7936_v25  ;;  %v9490_v25 = vld [vmem:[#allocation2 + $0x34] sm:$0xf] }
 0x18c   : > { %v7948_v38 = vor.u32 %v9490_v25, %v7945_v17 }
 0x18e   : > { %v2225_v8 = vpop.f32.mrf.mxu3  ;;  %v11513_v52 = vpop.f32.mrf.mxu0 }
 0x18f   : > { %13568 = vst [vmem:[#allocation117_spill] sm:$0xff] %v11513_v52  ;;  %v11517_v63 = vadd.f32 %v2225_v8, %v2136_v11  ;;  %v11527_v11 = vpop.f32.mrf.mxu2  ;;  %v8015_v8 = vld [vmem:[#allocation2 + $0xc0] sm:$0xf] }
 0x190   : > { %v11519_v32 = vpop.f32.mrf.mxu1  ;;  %13573 = vst [vmem:[#allocation122_spill] sm:$0xff] %v11527_v11  ;;  %v8016_v51 = vor.u32 %v9509_v28, %v8015_v8  ;;  %v8027_v8 = vld [vmem:[#allocation2 + $0xd8] sm:$0xf]  ;;  %v2174_v11 = vadd.f32 %v11295_v20, %v11487_v2  ;;  %v8083_v20 = vld [vmem:[#allocation2 + $0x140] sm:$0xf] }
 0x191   : > { %13570 = vst [vmem:[#allocation119_spill] sm:$0xff] %v11517_v63  ;;  %2969 = vmatmul.bf16.gmra.mxu0 %v8004_v1  ;;  %3147 = vmatmul.bf16.gmra.mxu2 %v8012_v16  ;;  %v9441_v1 = vld [vmem:[#allocation2 + $0xd0] sm:$0xf0]  ;;  %v8023_v16 = vld [vmem:[#allocation2 + $0xc8] sm:$0xf] }
 0x192   : > { %v9525_v2 = vld [vmem:[#allocation2 + $0x148] sm:$0xf0] }
 0x193   : > { %2276 = vmatmul.bf16.gmra.mxu3 %v7736_v5 }
 0x196   : > { %v2228_v57 = vpop.f32.mrf.mxu3  ;;  %v11521_v42 = vpop.f32.mrf.mxu0 }
 0x197   : > { %13571 = vst [vmem:[#allocation120_spill] sm:$0xff] %v11521_v42  ;;  %v11523_v52 = vadd.f32 %v2228_v57, %v2139_v0  ;;  %v7747_v57 = vld [vmem:[#allocation2 + $0xc8] sm:$0xf]  ;;  %v8024_v0 = vor.u32 %v9510_v36, %v8023_v16  ;;  %v11535_v17 = vpop.f32.mrf.mxu2  ;;  %v7957_v42 = vld [vmem:[#allocation2 + $0x54] sm:$0xf0]  ;;  %v2156_v36 = vadd.f32 %v11069_v19, %v11384_v29 }
 0x198   : > { %v11525_v50 = vpop.f32.mrf.mxu1  ;;  %v7748_v25 = vor.u32 %v9441_v1, %v7747_v57  ;;  %13576 = vst [vmem:[#allocation125_spill] sm:$0xff] %v11535_v17  ;;  %v9496_v19 = vld [vmem:[#allocation2 + $0x64] sm:$0xf]  ;;  %v7969_v29 = vld [vmem:[#allocation2 + $0x6c] sm:$0xf0] }
 0x199   : > { %13572 = vst [vmem:[#allocation121_spill] sm:$0xff] %v11523_v52  ;;  %v8005_v17 = vld [vmem:[#allocation2 + $0xb4] sm:$0xf0] }
 0x19b   : > { %3033 = vmatmul.bf16.gmra.mxu1 %v7948_v38  ;;  %v9493_v38 = vld [vmem:[#allocation2 + $0x4c] sm:$0xf] }
 0x19c   : > { %v7960_v28 = vor.u32 %v9493_v38, %v7957_v42  ;;  %v9444_v38 = vld [vmem:[#allocation2 + $0xe8] sm:$0xf0] }
 0x19e   : > { %v2230_v41 = vpop.f32.mrf.mxu3  ;;  %v11529_v30 = vpop.f32.mrf.mxu0 }
 0x19f   : > { %13574 = vst [vmem:[#allocation123_spill] sm:$0xff] %v11529_v30  ;;  %v11531_v13 = vadd.f32 %v2230_v41, %v2141_v14  ;;  %v11546_v1 = vpop.f32.mrf.mxu2 }
 0x1a0   : > { %v11533_v5 = vpop.f32.mrf.mxu1  ;;  %13578 = vst [vmem:[#allocation127_spill] sm:$0xff] %v11546_v1 }
 0x1a1   : > { %13575 = vst [vmem:[#allocation124_spill] sm:$0xff] %v11531_v13  ;;  %2974 = vmatmul.bf16.gmra.mxu0 %v8016_v51  ;;  %3152 = vmatmul.bf16.gmra.mxu2 %v8024_v0  ;;  %v8035_v51 = vld [vmem:[#allocation2 + $0xe0] sm:$0xf]  ;;  %v2164_v13 = vadd.f32 %v11166_v6, %v11448_v47  ;;  %v9450_v6 = vld [vmem:[#allocation2 + $0x118] sm:$0xf0] }
 0x1a2   : > { %v7759_v0 = vld [vmem:[#allocation2 + $0xe0] sm:$0xf] }
 0x1a3   : > { %2281 = vmatmul.bf16.gmra.mxu3 %v7748_v25  ;;  %v9512_v25 = vld [vmem:[#allocation2 + $0xe0] sm:$0xf0]  ;;  %v7760_v39 = vor.u32 %v9444_v38, %v7759_v0  ;;  %v8047_v0 = vld [vmem:[#allocation2 + $0xf8] sm:$0xf] }
 0x1a6   : > { %v2242_v48 = vpop.f32.mrf.mxu3  ;;  %v11537_v30 = vpop.f32.mrf.mxu0 }
 0x1a7   : > { %13577 = vst [vmem:[#allocation126_spill] sm:$0xff] %v11537_v30  ;;  %v11540_v14 = vadd.f32 %v2242_v48, %v11237_v40  ;;  %v8028_v40 = vor.u32 %v9512_v25, %v8027_v8  ;;  %v9513_v48 = vld [vmem:[#allocation2 + $0xe8] sm:$0xf0] }
 0x1a8   : > { %v11542_v41 = vpop.f32.mrf.mxu1 }
 0x1ab   : > { %3038 = vmatmul.bf16.gmra.mxu1 %v7960_v28  ;;  %v8036_v28 = vor.u32 %v9513_v48, %v8035_v51  ;;  %v9515_v51 = vld [vmem:[#allocation2 + $0xf8] sm:$0xf0] }
 0x1ae   : > { %v2244_v16 = vpop.f32.mrf.mxu3  ;;  %v11548_v57 = vpop.f32.mrf.mxu0 }
 0x1af   : > { %v11550_v30 = vadd.f32 %v2244_v16, %v2156_v36  ;;  %v11558_v36 = vpop.f32.mrf.mxu2  ;;  %v7972_v16 = vor.u32 %v9496_v19, %v7969_v29 }
 0x1b0   : > { %v11552_v42 = vpop.f32.mrf.mxu1  ;;  %13579 = vst [vmem:[#allocation128_spill] sm:$0xff] %v11558_v36 }
 0x1b1   : > { %2979 = vmatmul.bf16.gmra.mxu0 %v8028_v40  ;;  %3157 = vmatmul.bf16.gmra.mxu2 %v8036_v28  ;;  %v9516_v40 = vld [vmem:[#allocation2 + $0x100] sm:$0xf0]  ;;  %v8039_v28 = vld [vmem:[#allocation2 + $0xf0] sm:$0xf] }
 0x1b2   : > { %v8048_v19 = vor.u32 %v9516_v40, %v8047_v0  ;;  %v8051_v40 = vld [vmem:[#allocation2 + $0x108] sm:$0xf] }
 0x1b3   : > { %2286 = vmatmul.bf16.gmra.mxu3 %v7760_v39  ;;  %v2161_v39 = vadd.f32 %v11129_v4, %v11428_v22  ;;  %v9499_v4 = vld [vmem:[#allocation2 + $0x7c] sm:$0xf]  ;;  %v7981_v22 = vld [vmem:[#allocation2 + $0x84] sm:$0xf0] }
 0x1b6   : > { %v2247_v55 = vpop.f32.mrf.mxu3  ;;  %v11556_v43 = vpop.f32.mrf.mxu0 }
 0x1b7   : > { %v11560_v8 = vadd.f32 %v2247_v55, %v2159_v15  ;;  %v8040_v55 = vor.u32 %v9515_v51, %v8039_v28  ;;  %v11572_v29 = vpop.f32.mrf.mxu2  ;;  %v7984_v51 = vor.u32 %v9499_v4, %v7981_v22  ;;  %v9519_v28 = vld [vmem:[#allocation2 + $0x118] sm:$0xf0]  ;;  %v7783_v4 = vld [vmem:[#allocation2 + $0x110] sm:$0xf] }
 0x1b8   : > { %v11562_v25 = vpop.f32.mrf.mxu1  ;;  %13580 = vst [vmem:[#allocation129_spill] sm:$0xff] %v11572_v29  ;;  %v7784_v23 = vor.u32 %v9450_v6, %v7783_v4  ;;  %v7993_v29 = vld [vmem:[#allocation2 + $0x9c] sm:$0xf0]  ;;  %v8071_v6 = vld [vmem:[#allocation2 + $0x128] sm:$0xf] }
 0x1bb   : > { %3043 = vmatmul.bf16.gmra.mxu1 %v7972_v16  ;;  %v7772_v16 = vor.u32 %v9447_v34, %v7771_v49  ;;  %v9518_v49 = vld [vmem:[#allocation2 + $0x110] sm:$0xf0]  ;;  %v2166_v34 = vadd.f32 %v11204_v61, %v11465_v44  ;;  %v2169_v61 = vadd.f32 %v11239_v7, %v11473_v45  ;;  %v7795_v7 = vld [vmem:[#allocation2 + $0x128] sm:$0xf]  ;;  %v8063_v45 = vld [vmem:[#allocation2 + $0x120] sm:$0xf] }
 0x1be   : > { %v2249_v48 = vpop.f32.mrf.mxu3  ;;  %v11566_v38 = vpop.f32.mrf.mxu0 }
 0x1bf   : > { %v11568_v62 = vadd.f32 %v2249_v48, %v2161_v39  ;;  %v11582_v0 = vpop.f32.mrf.mxu2 }
 0x1c0   : > { %v11570_v15 = vpop.f32.mrf.mxu1 }
 0x1c1   : > { %2984 = vmatmul.bf16.gmra.mxu0 %v8040_v55  ;;  %3162 = vmatmul.bf16.gmra.mxu2 %v8048_v19 }
 0x1c3   : > { %2291 = vmatmul.bf16.gmra.mxu3 %v7772_v16 }
 0x1c6   : > { %v2252_v52 = vpop.f32.mrf.mxu3  ;;  %v11576_v63 = vpop.f32.mrf.mxu0 }
 0x1c7   : > { %v11578_v39 = vadd.f32 %v2252_v52, %v2164_v13  ;;  %v8052_v52 = vor.u32 %v9518_v49, %v8051_v40  ;;  %v8059_v13 = vld [vmem:[#allocation2 + $0x110] sm:$0xf]  ;;  %v11594_v44 = vpop.f32.mrf.mxu2 }
 0x1c8   : > { %v11580_v48 = vpop.f32.mrf.mxu1  ;;  %v8060_v22 = vor.u32 %v9519_v28, %v8059_v13  ;;  %v9521_v28 = vld [vmem:[#allocation2 + $0x128] sm:$0xf0] }
 0x1cb   : > { %3048 = vmatmul.bf16.gmra.mxu1 %v7984_v51  ;;  %v9502_v51 = vld [vmem:[#allocation2 + $0x94] sm:$0xf] }
 0x1cc   : > { %v7996_v49 = vor.u32 %v9502_v51, %v7993_v29  ;;  %v9453_v51 = vld [vmem:[#allocation2 + $0x130] sm:$0xf0] }
 0x1cd   : > { %v7796_v1 = vor.u32 %v9453_v51, %v7795_v7  ;;  %v9613_v7 = vld [vmem:[#allocation8 + $0x1b0] sm:$0xff] }
 0x1ce   : > { %v2254_v55 = vpop.f32.mrf.mxu3  ;;  %v11586_v19 = vpop.f32.mrf.mxu0 }
 0x1cf   : > { %v11588_v47 = vadd.f32 %v2254_v55, %v2166_v34  ;;  %v11606_v4 = vpop.f32.mrf.mxu2 }
 0x1d0   : > { %v11590_v16 = vpop.f32.mrf.mxu1 }
 0x1d1   : > { %13581 = vst [vmem:[#allocation130_spill] sm:$0xff] %v11590_v16  ;;  %2989 = vmatmul.bf16.gmra.mxu0 %v8052_v52  ;;  %3167 = vmatmul.bf16.gmra.mxu2 %v8060_v22  ;;  %v9610_v16 = vld [vmem:[#allocation8 + $0x198] sm:$0xff] }
 0x1d3   : > { %2296 = vmatmul.bf16.gmra.mxu3 %v7784_v23  ;;  %v2171_v23 = vadd.f32 %v11267_v46, %v11481_v35  ;;  %v9614_v46 = vld [vmem:[#allocation8 + $0x1b8] sm:$0xff] }
 0x1d4   : > { %v9505_v35 = vld [vmem:[#allocation2 + $0xac] sm:$0xf]  ;;  %3807 = vmatpush.bf16.msra.mxu3 %v9614_v46 }
 0x1d6   : > { %v2257_v36 = vpop.f32.mrf.mxu3  ;;  %v11596_v34 = vpop.f32.mrf.mxu0 }
 0x1d7   : > { %v11598_v40 = vadd.f32 %v2257_v36, %v2169_v61  ;;  %v8064_v36 = vor.u32 %v9521_v28, %v8063_v45  ;;  %v9522_v61 = vld [vmem:[#allocation2 + $0x130] sm:$0xf0] }
 0x1d8   : > { %v11600_v55 = vpop.f32.mrf.mxu1  ;;  %3808 = vmatpush.bf16.msra.mxu3 %v9613_v7 }
 0x1d9   : > { %13582 = vst [vmem:[#allocation131_spill] sm:$0xff] %v11600_v55  ;;  %v9508_v55 = vld [vmem:[#allocation2 + $0xc4] sm:$0xf] }
 0x1db   : > { %3053 = vmatmul.bf16.gmra.mxu1 %v7996_v49  ;;  %v8072_v49 = vor.u32 %v9522_v61, %v8071_v6  ;;  %v11620_v6 = vpop.f32.mrf.mxu2  ;;  %v2176_v61 = vadd.f32 %v11325_v60, %v11491_v26  ;;  %v9622_v26 = vld [vmem:[#allocation8 + $0x1f8] sm:$0xff] }
 0x1dc   : > { %3896 = vmatpush.bf16.msra.mxu0 %v9622_v26 }
 0x1de   : > { %v2259_v52 = vpop.f32.mrf.mxu3  ;;  %v11604_v13 = vpop.f32.mrf.mxu0 }
 0x1df   : > { %v11608_v22 = vadd.f32 %v2259_v52, %v2171_v23  ;;  %v8008_v52 = vor.u32 %v9505_v35, %v8005_v17  ;;  %v9524_v17 = vld [vmem:[#allocation2 + $0x140] sm:$0xf0] }
 0x1e0   : > { %v11610_v29 = vpop.f32.mrf.mxu1 }
 0x1e1   : > { %13583 = vst [vmem:[#allocation132_spill] sm:$0xff] %v11610_v29  ;;  %2994 = vmatmul.bf16.gmra.mxu0 %v8064_v36  ;;  %3172 = vmatmul.bf16.gmra.mxu2 %v8072_v49  ;;  %v9612_v36 = vld [vmem:[#allocation8 + $0x1a8] sm:$0xff]  ;;  %v9611_v29 = vld [vmem:[#allocation8 + $0x1a0] sm:$0xff] }
 0x1e2   : > { %3809 = vmatpush.bf16.msra.mxu3 %v9612_v36 }
 0x1e3   : > { %2301 = vmatmul.bf16.gmra.mxu3 %v7796_v1  ;;  %v8075_v1 = vld [vmem:[#allocation2 + $0x138] sm:$0xf]  ;;  %v11630_v60 = vpop.f32.mrf.mxu2 }
 0x1e4   : > { %v8076_v35 = vor.u32 %v9524_v17, %v8075_v1  ;;  %v9527_v17 = vld [vmem:[#allocation2 + $0x158] sm:$0xf0] }
 0x1e6   : > { %v2262_v27 = vpop.f32.mrf.mxu3  ;;  %v11614_v23 = vpop.f32.mrf.mxu0  ;;  %3810 = vmatpush.bf16.msra.mxu3 %v9611_v29  ;;  %v8087_v29 = vld [vmem:[#allocation2 + $0x150] sm:$0xf] }
 0x1e7   : > { %v11616_v28 = vadd.f32 %v2262_v27, %v2174_v11  ;;  %v7807_v27 = vld [vmem:[#allocation2 + $0x140] sm:$0xf]  ;;  %v9456_v11 = vld [vmem:[#allocation2 + $0x148] sm:$0xf0] }
 0x1e8   : > { %v11618_v45 = vpop.f32.mrf.mxu1  ;;  %v7808_v7 = vor.u32 %v9456_v11, %v7807_v27  ;;  %v9621_v27 = vld [vmem:[#allocation8 + $0x1f0] sm:$0xff] }
 0x1e9   : > { %13584 = vst [vmem:[#allocation133_spill] sm:$0xff] %v11618_v45  ;;  %v9609_v11 = vld [vmem:[#allocation8 + $0x190] sm:$0xff]  ;;  %3897 = vmatpush.bf16.msra.mxu0 %v9621_v27  ;;  %v7819_v27 = vld [vmem:[#allocation2 + $0x158] sm:$0xf] }
 0x1ea   : > { %3811 = vmatpush.bf16.msra.mxu3 %v9610_v16 }
 0x1eb   : > { %3058 = vmatmul.bf16.gmra.mxu1 %v8008_v52  ;;  %v8084_v52 = vor.u32 %v9525_v2, %v8083_v20  ;;  %v8020_v20 = vor.u32 %v9508_v55, %v8017_v53  ;;  %v9459_v55 = vld [vmem:[#allocation2 + $0x160] sm:$0xf0] }
 0x1ee   : > { %v2264_v51 = vpop.f32.mrf.mxu3  ;;  %v11624_v49 = vpop.f32.mrf.mxu0  ;;  %3812 = vmatpush.bf16.msra.mxu3 %v9609_v11 }
 0x1ef   : > { %v11626_v46 = vadd.f32 %v2264_v51, %v2176_v61  ;;  %v2179_v61 = vadd.f32 %v11354_v21, %v11497_v58  ;;  %v2181_v21 = vadd.f32 %v11380_v37, %v11503_v24  ;;  %v11642_v58 = vpop.f32.mrf.mxu2  ;;  %v9619_v37 = vld [vmem:[#allocation8 + $0x1e0] sm:$0xff] }
 0x1f0   : > { %v11628_v45 = vpop.f32.mrf.mxu1  ;;  %v9607_v24 = vld [vmem:[#allocation8 + $0x180] sm:$0xff] }
 0x1f1   : > { %13585 = vst [vmem:[#allocation134_spill] sm:$0xff] %v11628_v45  ;;  %2999 = vmatmul.bf16.gmra.mxu0 %v8076_v35  ;;  %3177 = vmatmul.bf16.gmra.mxu2 %v8084_v52  ;;  %v9608_v35 = vld [vmem:[#allocation8 + $0x188] sm:$0xff]  ;;  %v9618_v45 = vld [vmem:[#allocation8 + $0x1d8] sm:$0xff] }
 0x1f2   : > { %v9620_v52 = vld [vmem:[#allocation8 + $0x1e8] sm:$0xff]  ;;  %3813 = vmatpush.bf16.msra.mxu3 %v9608_v35  ;;  %v11657_v35 = vld [vmem:[%s13306_s4] ss:$0 sm:$0xff] }
 0x1f3   : > { %2306 = vmatmul.bf16.gmra.mxu3 %v7808_v7  ;;  %v9528_v7 = vld [vmem:[#allocation2 + $0x160] sm:$0xf0]  ;;  %3898 = vmatpush.bf16.msra.mxu0 %v9620_v52 }
 0x1f6   : > { %v2267_v1 = vpop.f32.mrf.mxu3  ;;  %v11634_v51 = vpop.f32.mrf.mxu0  ;;  %3814 = vmatpush.bf16.msra.mxu3 %v9607_v24  ;;  %v8107_v24 = vld [vmem:[#allocation2 + $0x170] sm:$0xf] }
 0x1f7   : > { %v11636_v36 = vadd.f32 %v2267_v1, %v2179_v61  ;;  %v8088_v61 = vor.u32 %v9527_v17, %v8087_v29  ;;  %v8095_v1 = vld [vmem:[#allocation2 + $0x158] sm:$0xf]  ;;  %3899 = vmatpush.bf16.msra.mxu0 %v9619_v37  ;;  %v2184_v17 = vadd.f32 %v11401_v10, %v11511_v56  ;;  %v2322_v10 = vadd.f32 %v11657_v35, %v11540_v14 }
 0x1f8   : > { %v11638_v2 = vpop.f32.mrf.mxu1  ;;  %v8096_v11 = vor.u32 %v9528_v7, %v8095_v1  ;;  %v9616_v1 = vld [vmem:[#allocation8 + $0x1c8] sm:$0xff]  ;;  %v2186_v37 = vadd.f32 %v11422_v59, %v11519_v32 }
 0x1f9   : > { %13586 = vst [vmem:[#allocation135_spill] sm:$0xff] %v11636_v36  ;;  %v9511_v36 = vld [vmem:[#allocation2 + $0xdc] sm:$0xf] }
 0x1fa   : > { %13587 = vst [vmem:[#allocation136_spill] sm:$0xff] %v11638_v2  ;;  %v7820_v2 = vor.u32 %v9459_v55, %v7819_v27  ;;  %v8099_v27 = vld [vmem:[#allocation2 + $0x168] sm:$0xf] }
 0x1fb   : > { %3063 = vmatmul.bf16.gmra.mxu1 %v8020_v20  ;;  %3900 = vmatpush.bf16.msra.mxu0 %v9618_v45 }
 0x1fe   : > { %v2269_v26 = vpop.f32.mrf.mxu3  ;;  %v11644_v53 = vpop.f32.mrf.mxu0 }
 0x1ff   : > { %13588 = vst [vmem:[#allocation137_spill] sm:$0xff] %v11644_v53  ;;  %v11646_v16 = vadd.f32 %v2269_v26, %v2181_v21  ;;  %v8029_v53 = vld [vmem:[#allocation2 + $0xe4] sm:$0xf0]  ;;  %v11659_v21 = vpop.f32.mrf.mxu2 }
 0x200   : > { %v11648_v20 = vpop.f32.mrf.mxu1 }
 0x201   : > { %3004 = vmatmul.bf16.gmra.mxu0 %v8088_v61  ;;  %3182 = vmatmul.bf16.gmra.mxu2 %v8096_v11  ;;  %v9617_v61 = vld [vmem:[#allocation8 + $0x1d0] sm:$0xff]  ;;  %v9630_v11 = vld [vmem:[#allocation8 + $0x238] sm:$0xff] }
 0x202   : > { %3901 = vmatpush.bf16.msra.mxu0 %v9617_v61  ;;  %3985 = vmatpush.bf16.msra.mxu1 %v9630_v11 }
 0x203   : > { %2311 = vmatmul.bf16.gmra.mxu3 %v7820_v2  ;;  %v8032_v2 = vor.u32 %v9511_v36, %v8029_v53 }
 0x206   : > { %v2272_v29 = vpop.f32.mrf.mxu3  ;;  %v11652_v52 = vpop.f32.mrf.mxu0  ;;  %3902 = vmatpush.bf16.msra.mxu0 %v9616_v1  ;;  %v8041_v1 = vld [vmem:[#allocation2 + $0xfc] sm:$0xf0] }
 0x207   : > { %v11661_v7 = vadd.f32 %v2272_v29, %v2184_v17  ;;  %v9530_v17 = vld [vmem:[#allocation2 + $0x170] sm:$0xf0]  ;;  %v9531_v29 = vld [vmem:[#allocation2 + $0x178] sm:$0xf0]  ;;  %v11675_v61 = vpop.f32.mrf.mxu2 }
 0x208   : > { %v3029_v26 = vpop.f32.mrf.mxu1 }
 0x209   : > { %v3030_v55 = vadd.f32 %v3029_v26, %v11548_v57  ;;  %v7831_v57 = vld [vmem:[#allocation2 + $0x170] sm:$0xf]  ;;  %v9462_v26 = vld [vmem:[#allocation2 + $0x178] sm:$0xf0] }
 0x20a   : > { %v7832_v32 = vor.u32 %v9462_v26, %v7831_v57  ;;  %v2191_v26 = vadd.f32 %v11461_v12, %v11533_v5  ;;  %v2325_v12 = vadd.f32 %v11657_v35, %v11568_v62 }
 0x20b   : > { %v3119_v56 = vadd.f32 %v11582_v0, %v3030_v55  ;;  %3068 = vmatmul.bf16.gmra.mxu1 %v8032_v2  ;;  %v8100_v0 = vor.u32 %v9530_v17, %v8099_v27  ;;  %v8108_v55 = vor.u32 %v9531_v29, %v8107_v24  ;;  %v9514_v27 = vld [vmem:[#allocation2 + $0xf4] sm:$0xf] }
 0x20c   : > { %v8044_v17 = vor.u32 %v9514_v27, %v8041_v1  ;;  %v8119_v27 = vld [vmem:[#allocation2 + $0x188] sm:$0xf] }
 0x20d   : > { %v11669_v36 = vadd.f32 %v3119_v56, %v2322_v10  ;;  %v9615_v10 = vld [vmem:[#allocation8 + $0x1c0] sm:$0xff]  ;;  %v2323_v56 = vadd.f32 %v11657_v35, %v11550_v30 }
 0x20e   : > { %v2274_v45 = vpop.f32.mrf.mxu3  ;;  %v11671_v53 = vpop.f32.mrf.mxu0  ;;  %3903 = vmatpush.bf16.msra.mxu0 %v9615_v10 }
 0x20f   : > { %v11673_v14 = vadd.f32 %v2274_v45, %v2186_v37  ;;  %v2189_v37 = vadd.f32 %v11444_v54, %v11525_v50  ;;  %v11692_v29 = vpop.f32.mrf.mxu2  ;;  %v8111_v50 = vld [vmem:[#allocation2 + $0x180] sm:$0xf]  ;;  %v9533_v54 = vld [vmem:[#allocation2 + $0x188] sm:$0xf0] }
 0x210   : > { %v3031_v2 = vpop.f32.mrf.mxu1 }
 0x211   : > { %v3032_v59 = vadd.f32 %v3031_v2, %v11556_v43  ;;  %3009 = vmatmul.bf16.gmra.mxu0 %v8100_v0  ;;  %3187 = vmatmul.bf16.gmra.mxu2 %v8108_v55  ;;  %v9534_v55 = vld [vmem:[#allocation2 + $0x190] sm:$0xf0] }
 0x213   : > { %v3121_v11 = vadd.f32 %v11594_v44, %v3032_v59  ;;  %2316 = vmatmul.bf16.gmra.mxu3 %v7832_v32  ;;  %v2324_v44 = vadd.f32 %v11657_v35, %v11560_v8  ;;  %v8112_v8 = vor.u32 %v9533_v54, %v8111_v50 }
 0x215   : > { %v11683_v24 = vadd.f32 %v3121_v11, %v2323_v56  ;;  %v9560_v56 = vld [vmem:[#allocation2 + $0x38] sm:$0xf0] }
 0x216   : > { %v2277_v45 = vpop.f32.mrf.mxu3  ;;  %v11685_v43 = vpop.f32.mrf.mxu0 }
 0x217   : > { %v11687_v57 = vadd.f32 %v2277_v45, %v2189_v37 }
 0x218   : > { %v3034_v0 = vpop.f32.mrf.mxu1 }
 0x219   : > { %v3035_v30 = vadd.f32 %v3034_v0, %v11566_v38  ;;  %v8219_v38 = vld [vmem:[#allocation2 + $0x30] sm:$0xf]  ;;  %v8053_v0 = vld [vmem:[#allocation2 + $0x114] sm:$0xf0] }
 0x21a   : > { %v8220_v45 = vor.u32 %v9560_v56, %v8219_v38  ;;  %v2326_v38 = vadd.f32 %v11657_v35, %v11578_v39  ;;  %v2196_v56 = vadd.f32 %v11477_v3, %v11552_v42  ;;  %v2327_v3 = vadd.f32 %v11657_v35, %v11588_v47 }
 0x21b   : > { %v3124_v2 = vadd.f32 %v11606_v4, %v3035_v30  ;;  %3073 = vmatmul.bf16.gmra.mxu1 %v8044_v17  ;;  %v8120_v4 = vor.u32 %v9534_v55, %v8119_v27  ;;  %v9517_v17 = vld [vmem:[#allocation2 + $0x10c] sm:$0xf]  ;;  %v2194_v30 = vadd.f32 %v11469_v18, %v11542_v41  ;;  %v9629_v41 = vld [vmem:[#allocation8 + $0x230] sm:$0xff] }
 0x21c   : > { %3986 = vmatpush.bf16.msra.mxu1 %v9629_v41 }
 0x21d   : > { %v11697_v59 = vadd.f32 %v3124_v2, %v2324_v44  ;;  %v11709_v44 = vpop.f32.mrf.mxu2 }
 0x21e   : > { %v2279_v32 = vpop.f32.mrf.mxu3  ;;  %v11699_v10 = vpop.f32.mrf.mxu0 }
 0x21f   : > { %v11701_v11 = vadd.f32 %v2279_v32, %v2191_v26  ;;  %v8056_v26 = vor.u32 %v9517_v17, %v8053_v0  ;;  %v8221_v32 = vld [vmem:[#allocation2 + $0x3c] sm:$0xf0]  ;;  %v9520_v17 = vld [vmem:[#allocation2 + $0x124] sm:$0xf]  ;;  %v8065_v0 = vld [vmem:[#allocation2 + $0x12c] sm:$0xf0] }
 0x220   : > { %v3036_v1 = vpop.f32.mrf.mxu1 }
 0x221   : > { %v3037_v37 = vadd.f32 %v3036_v1, %v11576_v63  ;;  %3014 = vmatmul.bf16.gmra.mxu0 %v8112_v8  ;;  %3192 = vmatmul.bf16.gmra.mxu2 %v8120_v4 }
 0x223   : > { %v3126_v5 = vadd.f32 %v11620_v6, %v3037_v37  ;;  %3815 = vmatmul.bf16.vlgmr.msra.gmra.mxu3 %v8220_v45  ;;  %v9559_v6 = vld [vmem:[#allocation2 + $0x34] sm:$0xf] }
 0x224   : > { %v8224_v8 = vor.u32 %v9559_v6, %v8221_v32  ;;  %v9563_v37 = vld [vmem:[#allocation2 + $0x50] sm:$0xf0] }
 0x225   : > { %v11711_v2 = vadd.f32 %v3126_v5, %v2325_v12  ;;  %v11727_v45 = vpop.f32.mrf.mxu2 }
 0x226   : > { %v2282_v50 = vpop.f32.mrf.mxu3  ;;  %v11713_v63 = vpop.f32.mrf.mxu0 }
 0x227   : > { %v11715_v54 = vadd.f32 %v2282_v50, %v2194_v30  ;;  %v2199_v30 = vadd.f32 %v11485_v33, %v11562_v25  ;;  %v2201_v25 = vadd.f32 %v11493_v31, %v11570_v15  ;;  %v9523_v15 = vld [vmem:[#allocation2 + $0x13c] sm:$0xf] }
 0x228   : > { %v3039_v55 = vpop.f32.mrf.mxu1 }
 0x229   : > { %v3040_v62 = vadd.f32 %v3039_v55, %v11586_v19  ;;  %v8231_v19 = vld [vmem:[#allocation2 + $0x48] sm:$0xf] }
 0x22a   : > { %v8232_v5 = vor.u32 %v9563_v37, %v8231_v19  ;;  %v8243_v19 = vld [vmem:[#allocation2 + $0x60] sm:$0xf]  ;;  %v9566_v37 = vld [vmem:[#allocation2 + $0x68] sm:$0xf0] }
 0x22b   : > { %v3129_v18 = vadd.f32 %v11630_v60, %v3040_v62  ;;  %3078 = vmatmul.bf16.gmra.mxu1 %v8056_v26 }
 0x22d   : > { %v11723_v27 = vadd.f32 %v3129_v18, %v2326_v38  ;;  %v11743_v32 = vpop.f32.mrf.mxu2  ;;  %v8233_v38 = vld [vmem:[#allocation2 + $0x54] sm:$0xf0]  ;;  %v2328_v18 = vadd.f32 %v11657_v35, %v11598_v40  ;;  %v8244_v40 = vor.u32 %v9566_v37, %v8243_v19  ;;  %v9569_v37 = vld [vmem:[#allocation2 + $0x80] sm:$0xf0] }
 0x22e   : > { %v2284_v1 = vpop.f32.mrf.mxu3  ;;  %v11725_v4 = vpop.f32.mrf.mxu0  ;;  %v8255_v19 = vld [vmem:[#allocation2 + $0x78] sm:$0xf] }
 0x22f   : > { %v11729_v12 = vadd.f32 %v2284_v1, %v2196_v56 }
 0x230   : > { %v3041_v39 = vpop.f32.mrf.mxu1 }
 0x231   : > { %v3042_v60 = vadd.f32 %v3041_v39, %v11596_v34  ;;  %3904 = vmatmul.bf16.vlgmr.msra.gmra.mxu0 %v8224_v8  ;;  %v8068_v34 = vor.u32 %v9520_v17, %v8065_v0 }
 0x233   : > { %v3131_v42 = vadd.f32 %v11642_v58, %v3042_v60  ;;  %3820 = vmatmul.bf16.gmra.mxu3 %v8232_v5  ;;  %v9562_v58 = vld [vmem:[#allocation2 + $0x4c] sm:$0xf] }
 0x234   : > { %v8236_v41 = vor.u32 %v9562_v58, %v8233_v38  ;;  %v13590_v38 = vld [vmem:[#allocation114_spill] sm:$0xff] }
 0x235   : > { %v11737_v50 = vadd.f32 %v3131_v42, %v2327_v3  ;;  %v11760_v5 = vpop.f32.mrf.mxu2  ;;  %v8077_v3 = vld [vmem:[#allocation2 + $0x144] sm:$0xf0]  ;;  %v2204_v42 = vadd.f32 %v11499_v9, %v11580_v48  ;;  %v9628_v9 = vld [vmem:[#allocation8 + $0x228] sm:$0xff]  ;;  %v13589_v48 = vld [vmem:[#allocation130_spill] sm:$0xff] }
 0x236   : > { %v2287_v26 = vpop.f32.mrf.mxu3  ;;  %v11739_v55 = vpop.f32.mrf.mxu0  ;;  %3987 = vmatpush.bf16.msra.mxu1 %v9628_v9  ;;  %v8257_v9 = vld [vmem:[#allocation2 + $0x84] sm:$0xf0] }
 0x237   : > { %v11741_v62 = vadd.f32 %v2287_v26, %v2199_v30  ;;  %v8080_v26 = vor.u32 %v9523_v15, %v8077_v3  ;;  %v8089_v15 = vld [vmem:[#allocation2 + $0x15c] sm:$0xf0]  ;;  %v13591_v3 = vld [vmem:[#allocation131_spill] sm:$0xff] }
 0x238   : > { %v3044_v6 = vpop.f32.mrf.mxu1 }
 0x239   : > { %v3045_v47 = vadd.f32 %v3044_v6, %v11604_v13  ;;  %v9565_v6 = vld [vmem:[#allocation2 + $0x64] sm:$0xf] }
 0x23b   : > { %v3134_v33 = vadd.f32 %v11659_v21, %v3045_v47  ;;  %3083 = vmatmul.bf16.gmra.mxu1 %v8068_v34  ;;  %v2329_v21 = vadd.f32 %v11657_v35, %v11608_v22  ;;  %v8245_v47 = vld [vmem:[#allocation2 + $0x6c] sm:$0xf0] }
 0x23d   : > { %v11751_v56 = vadd.f32 %v3134_v33, %v2328_v18  ;;  %v2206_v18 = vadd.f32 %v13590_v38, %v13589_v48  ;;  %v11777_v33 = vpop.f32.mrf.mxu2  ;;  %v13594_v48 = vld [vmem:[#allocation135_spill] sm:$0xff] }
 0x23e   : > { %v2289_v8 = vpop.f32.mrf.mxu3  ;;  %v11753_v1 = vpop.f32.mrf.mxu0  ;;  %v2332_v38 = vadd.f32 %v11657_v35, %v13594_v48  ;;  %v13598_v48 = vld [vmem:[#allocation125_spill] sm:$0xff] }
 0x23f   : > { %v11755_v13 = vadd.f32 %v2289_v8, %v2201_v25  ;;  %v8248_v25 = vor.u32 %v9565_v6, %v8245_v47 }
 0x240   : > { %v3046_v39 = vpop.f32.mrf.mxu1 }
 0x241   : > { %v3047_v60 = vadd.f32 %v3046_v39, %v11614_v23  ;;  %3909 = vmatmul.bf16.gmra.mxu0 %v8236_v41 }
 0x243   : > { %v3136_v31 = vadd.f32 %v11675_v61, %v3047_v60  ;;  %3825 = vmatmul.bf16.gmra.mxu3 %v8244_v40  ;;  %v2330_v61 = vadd.f32 %v11657_v35, %v11616_v28  ;;  %v8256_v60 = vor.u32 %v9569_v37, %v8255_v19  ;;  %v2331_v40 = vadd.f32 %v11657_v35, %v11626_v46  ;;  %v13593_v46 = vld [vmem:[#allocation137_spill] sm:$0xff]  ;;  %v13596_v19 = vld [vmem:[#allocation122_spill] sm:$0xff] }
 0x245   : > { %v11765_v17 = vadd.f32 %v3136_v31, %v2329_v21  ;;  %v9526_v31 = vld [vmem:[#allocation2 + $0x154] sm:$0xf]  ;;  %v11795_v6 = vpop.f32.mrf.mxu2 }
 0x246   : > { %v2292_v0 = vpop.f32.mrf.mxu3  ;;  %v11767_v30 = vpop.f32.mrf.mxu0  ;;  %v8092_v47 = vor.u32 %v9526_v31, %v8089_v15  ;;  %v8267_v31 = vld [vmem:[#allocation2 + $0x90] sm:$0xf]  ;;  %v9572_v15 = vld [vmem:[#allocation2 + $0x98] sm:$0xf0] }
 0x247   : > { %v11769_v23 = vadd.f32 %v2292_v0, %v2204_v42  ;;  %v13592_v42 = vld [vmem:[#allocation118_spill] sm:$0xff] }
 0x248   : > { %v3049_v34 = vpop.f32.mrf.mxu1  ;;  %v2209_v0 = vadd.f32 %v13592_v42, %v13591_v3 }
 0x249   : > { %v3050_v22 = vadd.f32 %v3049_v34, %v11624_v49 }
 0x24b   : > { %v3139_v58 = vadd.f32 %v11692_v29, %v3050_v22  ;;  %3088 = vmatmul.bf16.gmra.mxu1 %v8080_v26 }
 0x24d   : > { %v11779_v41 = vadd.f32 %v3139_v58, %v2330_v61 }
 0x24e   : > { %v2294_v8 = vpop.f32.mrf.mxu3  ;;  %v11781_v49 = vpop.f32.mrf.mxu0 }
 0x24f   : > { %v11783_v39 = vadd.f32 %v2294_v8, %v2206_v18  ;;  %v13595_v8 = vld [vmem:[#allocation132_spill] sm:$0xff] }
 0x250   : > { %v3051_v28 = vpop.f32.mrf.mxu1  ;;  %v2211_v37 = vadd.f32 %v13596_v19, %v13595_v8 }
 0x251   : > { %v3052_v29 = vadd.f32 %v3051_v28, %v11634_v51  ;;  %3914 = vmatmul.bf16.gmra.mxu0 %v8248_v25  ;;  %v9627_v25 = vld [vmem:[#allocation8 + $0x220] sm:$0xff] }
 0x252   : > { %3988 = vmatpush.bf16.msra.mxu1 %v9627_v25 }
 0x253   : > { %v3141_v21 = vadd.f32 %v11709_v44, %v3052_v29  ;;  %3830 = vmatmul.bf16.gmra.mxu3 %v8256_v60  ;;  %v9568_v44 = vld [vmem:[#allocation2 + $0x7c] sm:$0xf]  ;;  %v9626_v29 = vld [vmem:[#allocation8 + $0x218] sm:$0xff] }
 0x254   : > { %v8260_v28 = vor.u32 %v9568_v44, %v8257_v9  ;;  %v8101_v44 = vld [vmem:[#allocation2 + $0x174] sm:$0xf0]  ;;  %v13597_v9 = vld [vmem:[#allocation133_spill] sm:$0xff] }
 0x255   : > { %v11791_v26 = vadd.f32 %v3141_v21, %v2331_v40 }
 0x256   : > { %v2297_v34 = vpop.f32.mrf.mxu3  ;;  %v11793_v22 = vpop.f32.mrf.mxu0  ;;  %3989 = vmatpush.bf16.msra.mxu1 %v9626_v29  ;;  %v8269_v29 = vld [vmem:[#allocation2 + $0x9c] sm:$0xf0] }
 0x257   : > { %v11797_v51 = vadd.f32 %v2297_v34, %v2209_v0  ;;  %v11811_v0 = vpop.f32.mrf.mxu2  ;;  %v8268_v34 = vor.u32 %v9572_v15, %v8267_v31 }
 0x258   : > { %v3054_v61 = vpop.f32.mrf.mxu1 }
 0x259   : > { %v3055_v58 = vadd.f32 %v3054_v61, %v13593_v46  ;;  %v9625_v46 = vld [vmem:[#allocation8 + $0x210] sm:$0xff] }
 0x25a   : > { %3990 = vmatpush.bf16.msra.mxu1 %v9625_v46 }
 0x25b   : > { %v3144_v18 = vadd.f32 %v11727_v45, %v3055_v58  ;;  %3093 = vmatmul.bf16.gmra.mxu1 %v8092_v47  ;;  %v2333_v47 = vadd.f32 %v11657_v35, %v11646_v16  ;;  %v9529_v58 = vld [vmem:[#allocation2 + $0x16c] sm:$0xf] }
 0x25d   : > { %v11805_v60 = vadd.f32 %v3144_v18, %v2332_v38  ;;  %v2214_v38 = vadd.f32 %v13598_v48, %v13597_v9  ;;  %v9624_v18 = vld [vmem:[#allocation8 + $0x208] sm:$0xff]  ;;  %v9575_v9 = vld [vmem:[#allocation2 + $0xb0] sm:$0xf0] }
 0x25e   : > { %v2299_v40 = vpop.f32.mrf.mxu3  ;;  %v11807_v21 = vpop.f32.mrf.mxu0  ;;  %3991 = vmatpush.bf16.msra.mxu1 %v9624_v18  ;;  %v2335_v18 = vadd.f32 %v11657_v35, %v11673_v14 }
 0x25f   : > { %v11809_v3 = vadd.f32 %v2299_v40, %v2211_v37  ;;  %v8104_v37 = vor.u32 %v9529_v58, %v8101_v44  ;;  %v2334_v40 = vadd.f32 %v11657_v35, %v11661_v7  ;;  %v11828_v31 = vpop.f32.mrf.mxu2  ;;  %v8279_v44 = vld [vmem:[#allocation2 + $0xa8] sm:$0xf] }
 0x260   : > { %v3056_v42 = vpop.f32.mrf.mxu1 }
 0x261   : > { %v3057_v45 = vadd.f32 %v3056_v42, %v11652_v52  ;;  %3919 = vmatmul.bf16.gmra.mxu0 %v8260_v28  ;;  %v9571_v28 = vld [vmem:[#allocation2 + $0x94] sm:$0xf] }
 0x262   : > { %v9623_v42 = vld [vmem:[#allocation8 + $0x200] sm:$0xff] }
 0x263   : > { %v3146_v61 = vadd.f32 %v11743_v32, %v3057_v45  ;;  %3835 = vmatmul.bf16.gmra.mxu3 %v8268_v34  ;;  %v13599_v45 = vld [vmem:[#allocation134_spill] sm:$0xff]  ;;  %v13600_v34 = vld [vmem:[#allocation127_spill] sm:$0xff]  ;;  %3992 = vmatpush.bf16.msra.mxu1 %v9623_v42 }
 0x265   : > { %v11819_v25 = vadd.f32 %v3146_v61, %v2333_v47  ;;  %v2216_v47 = vadd.f32 %v13600_v34, %v13599_v45  ;;  %v8272_v61 = vor.u32 %v9571_v28, %v8269_v29  ;;  %v13602_v28 = vld [vmem:[#allocation128_spill] sm:$0xff] }
 0x266   : > { %v2302_v52 = vpop.f32.mrf.mxu3  ;;  %v11821_v8 = vpop.f32.mrf.mxu0 }
 0x267   : > { %v11823_v19 = vadd.f32 %v2302_v52, %v2214_v38 }
 0x268   : > { %v3059_v16 = vpop.f32.mrf.mxu1 }
 0x269   : > { %v3060_v32 = vadd.f32 %v3059_v16, %v11671_v53  ;;  %v8113_v16 = vld [vmem:[#allocation2 + $0x18c] sm:$0xf0] }
 0x26b   : > { %v3149_v15 = vadd.f32 %v11760_v5, %v3060_v32  ;;  %3098 = vmatmul.bf16.gmra.mxu1 %v8104_v37  ;;  %v8280_v5 = vor.u32 %v9575_v9, %v8279_v44  ;;  %v9532_v37 = vld [vmem:[#allocation2 + $0x184] sm:$0xf]  ;;  %v13603_v9 = vld [vmem:[#allocation129_spill] sm:$0xff] }
 0x26c   : > { %v13601_v32 = vld [vmem:[#allocation136_spill] sm:$0xff]  ;;  %v8116_v34 = vor.u32 %v9532_v37, %v8113_v16  ;;  %v9578_v37 = vld [vmem:[#allocation2 + $0xc8] sm:$0xf0] }
 0x26d   : > { %v11833_v46 = vadd.f32 %v3149_v15, %v2334_v40  ;;  %v2219_v29 = vadd.f32 %v13602_v28, %v13601_v32  ;;  %v3160_v40 = vpop.f32.mrf.mxu2  ;;  %v8291_v28 = vld [vmem:[#allocation2 + $0xc0] sm:$0xf] }
 0x26e   : > { %v2304_v53 = vpop.f32.mrf.mxu3  ;;  %v11835_v58 = vpop.f32.mrf.mxu0 }
 0x26f   : > { %v11837_v48 = vadd.f32 %v2304_v53, %v2216_v47  ;;  %v2336_v53 = vadd.f32 %v11657_v35, %v11687_v57 }
 0x270   : > { %v3061_v7 = vpop.f32.mrf.mxu1 }
 0x271   : > { %v3062_v38 = vadd.f32 %v3061_v7, %v11685_v43  ;;  %3924 = vmatmul.bf16.gmra.mxu0 %v8272_v61  ;;  %v9574_v61 = vld [vmem:[#allocation2 + $0xac] sm:$0xf]  ;;  %v2221_v7 = vadd.f32 %v13603_v9, %v11648_v20 }
 0x273   : > { %v3151_v52 = vadd.f32 %v11777_v33, %v3062_v38  ;;  %3840 = vmatmul.bf16.gmra.mxu3 %v8280_v5  ;;  %v8281_v33 = vld [vmem:[#allocation2 + $0xb4] sm:$0xf0] }
 0x274   : > { %v8284_v38 = vor.u32 %v9574_v61, %v8281_v33  ;;  %v13604_v61 = vld [vmem:[#allocation116_spill] sm:$0xff] }
 0x275   : > { %v11845_v15 = vadd.f32 %v3151_v52, %v2335_v18  ;;  %v3163_v16 = vpop.f32.mrf.mxu2 }
 0x276   : > { %v2307_v42 = vpop.f32.mrf.mxu3  ;;  %v11847_v45 = vpop.f32.mrf.mxu0 }
 0x277   : > { %v11849_v43 = vadd.f32 %v2307_v42, %v2219_v29  ;;  %v8292_v29 = vor.u32 %v9578_v37, %v8291_v28 }
 0x278   : > { %v3064_v47 = vpop.f32.mrf.mxu1 }
 0x279   : > { %v3065_v14 = vadd.f32 %v3064_v47, %v11699_v10 }
 0x27b   : > { %v3154_v44 = vadd.f32 %v11795_v6, %v3065_v14  ;;  %3103 = vmatmul.bf16.gmra.mxu1 %v8116_v34  ;;  %v2337_v6 = vadd.f32 %v11657_v35, %v11701_v11  ;;  %v9561_v14 = vld [vmem:[#allocation2 + $0x40] sm:$0xf0]  ;;  %v8293_v11 = vld [vmem:[#allocation2 + $0xcc] sm:$0xf0] }
 0x27d   : > { %v11857_v5 = vadd.f32 %v3154_v44, %v2336_v53  ;;  %v8227_v44 = vld [vmem:[#allocation2 + $0x38] sm:$0xf] }
 0x27e   : > { %v2309_v18 = vpop.f32.mrf.mxu3  ;;  %v11859_v52 = vpop.f32.mrf.mxu0 }
 0x27f   : > { %v11861_v10 = vadd.f32 %v2309_v18, %v2221_v7  ;;  %v8228_v7 = vor.u32 %v9561_v14, %v8227_v44 }
 0x280   : > { %v3066_v32 = vpop.f32.mrf.mxu1 }
 0x281   : > { %v3067_v57 = vadd.f32 %v3066_v32, %v11713_v63  ;;  %3929 = vmatmul.bf16.gmra.mxu0 %v8284_v38  ;;  %v3165_v63 = vpop.f32.mrf.mxu2  ;;  %v9577_v38 = vld [vmem:[#allocation2 + $0xc4] sm:$0xf] }
 0x282   : > { %v8296_v37 = vor.u32 %v9577_v38, %v8293_v11  ;;  %v8239_v38 = vld [vmem:[#allocation2 + $0x50] sm:$0xf]  ;;  %v13607_v11 = vld [vmem:[#allocation121_spill] sm:$0xff] }
 0x283   : > { %v3156_v20 = vadd.f32 %v11811_v0, %v3067_v57  ;;  %3845 = vmatmul.bf16.gmra.mxu3 %v8292_v29  ;;  %v2338_v0 = vadd.f32 %v11657_v35, %v11715_v54  ;;  %v8303_v29 = vld [vmem:[#allocation2 + $0xd8] sm:$0xf]  ;;  %v2339_v54 = vadd.f32 %v11657_v35, %v11729_v12  ;;  %v2340_v12 = vadd.f32 %v11657_v35, %v11741_v62 }
 0x284   : > { %v2341_v62 = vadd.f32 %v11657_v35, %v11755_v13  ;;  %v2342_v13 = vadd.f32 %v11657_v35, %v11769_v23  ;;  %v2343_v23 = vadd.f32 %v11657_v35, %v11783_v39 }
 0x285   : > { %v11867_v42 = vadd.f32 %v3156_v20, %v2337_v6  ;;  %v13605_v6 = vld [vmem:[#allocation119_spill] sm:$0xff] }
 0x286   : > { %v2312_v34 = vpop.f32.mrf.mxu3  ;;  %v11869_v47 = vpop.f32.mrf.mxu0 }
 0x287   : > { %v11872_v33 = vadd.f32 %v2312_v34, %v13604_v61  ;;  %v9581_v34 = vld [vmem:[#allocation2 + $0xe0] sm:$0xf0] }
 0x288   : > { %v3069_v53 = vpop.f32.mrf.mxu1  ;;  %v8304_v61 = vor.u32 %v9581_v34, %v8303_v29  ;;  %v9580_v29 = vld [vmem:[#allocation2 + $0xdc] sm:$0xf] }
 0x289   : > { %v3070_v9 = vadd.f32 %v3069_v53, %v11725_v4 }
 0x28b   : > { %v3159_v18 = vadd.f32 %v11828_v31, %v3070_v9  ;;  %3993 = vmatmul.bf16.vlgmr.msra.gmra.mxu1 %v8228_v7  ;;  %v3168_v31 = vpop.f32.mrf.mxu2 }
 0x28d   : > { %v11878_v32 = vadd.f32 %v3159_v18, %v2338_v0 }
 0x28e   : > { %v2314_v28 = vpop.f32.mrf.mxu3  ;;  %v11880_v57 = vpop.f32.mrf.mxu0 }
 0x28f   : > { %v11883_v20 = vadd.f32 %v2314_v28, %v13605_v6  ;;  %v9564_v28 = vld [vmem:[#allocation2 + $0x58] sm:$0xf0]  ;;  %v8305_v6 = vld [vmem:[#allocation2 + $0xe4] sm:$0xf0] }
 0x290   : > { %v3071_v4 = vpop.f32.mrf.mxu1  ;;  %v8308_v34 = vor.u32 %v9580_v29, %v8305_v6  ;;  %v8251_v6 = vld [vmem:[#allocation2 + $0x68] sm:$0xf] }
 0x291   : > { %v3072_v14 = vadd.f32 %v3071_v4, %v11739_v55  ;;  %3934 = vmatmul.bf16.gmra.mxu0 %v8296_v37  ;;  %v8240_v37 = vor.u32 %v9564_v28, %v8239_v38  ;;  %v8315_v38 = vld [vmem:[#allocation2 + $0xf0] sm:$0xf] }
 0x293   : > { %v3161_v53 = vadd.f32 %v3160_v40, %v3072_v14  ;;  %3850 = vmatmul.bf16.gmra.mxu3 %v8304_v61  ;;  %v3170_v4 = vpop.f32.mrf.mxu2 }
 0x295   : > { %v11888_v44 = vadd.f32 %v3161_v53, %v2339_v54  ;;  %v9584_v53 = vld [vmem:[#allocation2 + $0xf8] sm:$0xf0] }
 0x296   : > { %v2317_v9 = vpop.f32.mrf.mxu3  ;;  %v11890_v7 = vpop.f32.mrf.mxu0  ;;  %v8316_v28 = vor.u32 %v9584_v53, %v8315_v38  ;;  %v9583_v53 = vld [vmem:[#allocation2 + $0xf4] sm:$0xf] }
 0x297   : > { %13606 = vst [vmem:[#allocation130_spill] sm:$0xff] %v11888_v44  ;;  %v11893_v0 = vadd.f32 %v2317_v9, %v13607_v11  ;;  %v13609_v9 = vld [vmem:[#allocation124_spill] sm:$0xff] }
 0x298   : > { %v3074_v18 = vpop.f32.mrf.mxu1 }
 0x299   : > { %v3075_v55 = vadd.f32 %v3074_v18, %v11753_v1 }
 0x29b   : > { %v3164_v40 = vadd.f32 %v3163_v16, %v3075_v55  ;;  %3998 = vmatmul.bf16.gmra.mxu1 %v8240_v37 }
 0x29d   : > { %v11898_v14 = vadd.f32 %v3164_v40, %v2340_v12  ;;  %v9567_v12 = vld [vmem:[#allocation2 + $0x70] sm:$0xf0]  ;;  %v3173_v40 = vpop.f32.mrf.mxu2 }
 0x29e   : > { %v2319_v61 = vpop.f32.mrf.mxu3  ;;  %v11900_v54 = vpop.f32.mrf.mxu0 }
 0x29f   : > { %13608 = vst [vmem:[#allocation114_spill] sm:$0xff] %v11898_v14  ;;  %v11903_v11 = vadd.f32 %v2319_v61, %v13609_v9 }
 0x2a0   : > { %v3076_v1 = vpop.f32.mrf.mxu1 }
 0x2a1   : > { %v3077_v18 = vadd.f32 %v3076_v1, %v11767_v30  ;;  %3939 = vmatmul.bf16.gmra.mxu0 %v8308_v34  ;;  %v8252_v30 = vor.u32 %v9567_v12, %v8251_v6  ;;  %v8317_v34 = vld [vmem:[#allocation2 + $0xfc] sm:$0xf0] }
 0x2a2   : > { %v8320_v1 = vor.u32 %v9583_v53, %v8317_v34  ;;  %v8263_v34 = vld [vmem:[#allocation2 + $0x80] sm:$0xf] }
 0x2a3   : > { %v3166_v16 = vadd.f32 %v3165_v63, %v3077_v18  ;;  %3855 = vmatmul.bf16.gmra.mxu3 %v8316_v28 }
 0x2a5   : > { %v11908_v55 = vadd.f32 %v3166_v16, %v2341_v62  ;;  %v8327_v62 = vld [vmem:[#allocation2 + $0x108] sm:$0xf]  ;;  %v9587_v16 = vld [vmem:[#allocation2 + $0x110] sm:$0xf0]  ;;  %v3175_v14 = vpop.f32.mrf.mxu2 }
 0x2a6   : > { %v11910_v37 = vpop.f32.mrf.mxu3  ;;  %v11912_v29 = vpop.f32.mrf.mxu0  ;;  %v8328_v6 = vor.u32 %v9587_v16, %v8327_v62 }
 0x2a7   : > { %13610 = vst [vmem:[#allocation131_spill] sm:$0xff] %v11908_v55 }
 0x2a8   : > { %v3079_v61 = vpop.f32.mrf.mxu1 }
 0x2a9   : > { %v3080_v9 = vadd.f32 %v3079_v61, %v11781_v49 }
 0x2ab   : > { %v3169_v63 = vadd.f32 %v3168_v31, %v3080_v9  ;;  %4003 = vmatmul.bf16.gmra.mxu1 %v8252_v30  ;;  %v9570_v30 = vld [vmem:[#allocation2 + $0x88] sm:$0xf0] }
 0x2ad   : > { %v11917_v38 = vadd.f32 %v3169_v63, %v2342_v13  ;;  %v8264_v63 = vor.u32 %v9570_v30, %v8263_v34  ;;  %v3178_v39 = vpop.f32.mrf.mxu2 }
 0x2ae   : > { %v11919_v18 = vpop.f32.mrf.mxu3  ;;  %v11921_v28 = vpop.f32.mrf.mxu0 }
 0x2af   : > { %13611 = vst [vmem:[#allocation118_spill] sm:$0xff] %v11917_v38  ;;  %v8509_v38 = vld [vmem:[#allocation2 + $0xc] sm:$0xf0] }
 0x2b0   : > { %v3081_v55 = vpop.f32.mrf.mxu1 }
 0x2b1   : > { %v3082_v49 = vadd.f32 %v3081_v55, %v11793_v22  ;;  %3944 = vmatmul.bf16.gmra.mxu0 %v8320_v1  ;;  %v9586_v22 = vld [vmem:[#allocation2 + $0x10c] sm:$0xf]  ;;  %v8329_v55 = vld [vmem:[#allocation2 + $0x114] sm:$0xf0]  ;;  %v2344_v1 = vadd.f32 %v11657_v35, %v11797_v51  ;;  %v2345_v51 = vadd.f32 %v11657_v35, %v11809_v3  ;;  %v2346_v3 = vadd.f32 %v11657_v35, %v11823_v19 }
 0x2b2   : > { %v8332_v62 = vor.u32 %v9586_v22, %v8329_v55  ;;  %v8275_v22 = vld [vmem:[#allocation2 + $0x98] sm:$0xf]  ;;  %v2347_v19 = vadd.f32 %v11657_v35, %v11837_v48  ;;  %v2348_v48 = vadd.f32 %v11657_v35, %v11849_v43 }
 0x2b3   : > { %v3171_v31 = vadd.f32 %v3170_v4, %v3082_v49  ;;  %3860 = vmatmul.bf16.gmra.mxu3 %v8328_v6 }
 0x2b5   : > { %v11926_v12 = vadd.f32 %v3171_v31, %v2343_v23  ;;  %v9590_v23 = vld [vmem:[#allocation2 + $0x128] sm:$0xf0] }
 0x2b6   : > { %v11928_v61 = vpop.f32.mrf.mxu3  ;;  %v11930_v9 = vpop.f32.mrf.mxu0 }
 0x2b7   : > { %13612 = vst [vmem:[#allocation137_spill] sm:$0xff] %v11926_v12  ;;  %v8339_v12 = vld [vmem:[#allocation2 + $0x120] sm:$0xf] }
 0x2b8   : > { %v3084_v53 = vpop.f32.mrf.mxu1  ;;  %v8340_v30 = vor.u32 %v9590_v23, %v8339_v12  ;;  %v9589_v12 = vld [vmem:[#allocation2 + $0x124] sm:$0xf] }
 0x2b9   : > { %v3085_v13 = vadd.f32 %v3084_v53, %v11807_v21 }
 0x2bb   : > { %v3174_v4 = vadd.f32 %v3173_v40, %v3085_v13  ;;  %4008 = vmatmul.bf16.gmra.mxu1 %v8264_v63  ;;  %v3180_v40 = vpop.f32.mrf.mxu2 }
 0x2bd   : > { %v11935_v16 = vadd.f32 %v3174_v4, %v2344_v1  ;;  %v9573_v1 = vld [vmem:[#allocation2 + $0xa0] sm:$0xf0] }
 0x2be   : > { %v11937_v49 = vpop.f32.mrf.mxu3  ;;  %v11939_v6 = vpop.f32.mrf.mxu0 }
 0x2bf   : > { %13613 = vst [vmem:[#allocation135_spill] sm:$0xff] %v11935_v16  ;;  %v9593_v16 = vld [vmem:[#allocation2 + $0x140] sm:$0xf0] }
 0x2c0   : > { %v3086_v31 = vpop.f32.mrf.mxu1 }
 0x2c1   : > { %v3087_v21 = vadd.f32 %v3086_v31, %v11821_v8  ;;  %3949 = vmatmul.bf16.gmra.mxu0 %v8332_v62  ;;  %v8276_v8 = vor.u32 %v9573_v1, %v8275_v22  ;;  %v8341_v62 = vld [vmem:[#allocation2 + $0x12c] sm:$0xf0] }
 0x2c2   : > { %v8344_v23 = vor.u32 %v9589_v12, %v8341_v62  ;;  %v9576_v12 = vld [vmem:[#allocation2 + $0xb8] sm:$0xf0] }
 0x2c3   : > { %v3176_v53 = vadd.f32 %v3175_v14, %v3087_v21  ;;  %3865 = vmatmul.bf16.gmra.mxu3 %v8340_v30 }
 0x2c5   : > { %v11944_v34 = vadd.f32 %v3176_v53, %v2345_v51  ;;  %v8351_v51 = vld [vmem:[#allocation2 + $0x138] sm:$0xf]  ;;  %v3183_v53 = vpop.f32.mrf.mxu2 }
 0x2c6   : > { %v11946_v13 = vpop.f32.mrf.mxu3  ;;  %v11948_v63 = vpop.f32.mrf.mxu0  ;;  %v8352_v22 = vor.u32 %v9593_v16, %v8351_v51  ;;  %v9592_v16 = vld [vmem:[#allocation2 + $0x13c] sm:$0xf] }
 0x2c7   : > { %13614 = vst [vmem:[#allocation132_spill] sm:$0xff] %v11944_v34 }
 0x2c8   : > { %v3089_v55 = vpop.f32.mrf.mxu1 }
 0x2c9   : > { %v3090_v4 = vadd.f32 %v3089_v55, %v11835_v58 }
 0x2cb   : > { %v3179_v14 = vadd.f32 %v3178_v39, %v3090_v4  ;;  %4013 = vmatmul.bf16.gmra.mxu1 %v8276_v8  ;;  %v8287_v8 = vld [vmem:[#allocation2 + $0xb0] sm:$0xf] }
 0x2cd   : > { %v11953_v31 = vadd.f32 %v3179_v14, %v2346_v3  ;;  %v3185_v3 = vpop.f32.mrf.mxu2 }
 0x2ce   : > { %v11955_v21 = vpop.f32.mrf.mxu3  ;;  %v11957_v30 = vpop.f32.mrf.mxu0 }
 0x2cf   : > { %13615 = vst [vmem:[#allocation122_spill] sm:$0xff] %v11953_v31 }
 0x2d0   : > { %v3091_v34 = vpop.f32.mrf.mxu1 }
 0x2d1   : > { %v3092_v58 = vadd.f32 %v3091_v34, %v11847_v45  ;;  %3954 = vmatmul.bf16.gmra.mxu0 %v8344_v23  ;;  %v8288_v45 = vor.u32 %v9576_v12, %v8287_v8  ;;  %v8353_v34 = vld [vmem:[#allocation2 + $0x144] sm:$0xf0]  ;;  %v2349_v12 = vadd.f32 %v11657_v35, %v11861_v10  ;;  %v2350_v10 = vadd.f32 %v11657_v35, %v11872_v33 }
 0x2d2   : > { %v8356_v23 = vor.u32 %v9592_v16, %v8353_v34  ;;  %v9579_v34 = vld [vmem:[#allocation2 + $0xd0] sm:$0xf0]  ;;  %v2351_v33 = vadd.f32 %v11657_v35, %v11883_v20 }
 0x2d3   : > { %v3181_v39 = vadd.f32 %v3180_v40, %v3092_v58  ;;  %3870 = vmatmul.bf16.gmra.mxu3 %v8352_v22 }
 0x2d5   : > { %v11962_v55 = vadd.f32 %v3181_v39, %v2347_v19  ;;  %v8363_v19 = vld [vmem:[#allocation2 + $0x150] sm:$0xf]  ;;  %v9596_v39 = vld [vmem:[#allocation2 + $0x158] sm:$0xf0]  ;;  %v3188_v43 = vpop.f32.mrf.mxu2 }
 0x2d6   : > { %v11964_v1 = vpop.f32.mrf.mxu3  ;;  %v11966_v4 = vpop.f32.mrf.mxu0  ;;  %v8364_v8 = vor.u32 %v9596_v39, %v8363_v19  ;;  %v8365_v19 = vld [vmem:[#allocation2 + $0x15c] sm:$0xf0] }
 0x2d7   : > { %13616 = vst [vmem:[#allocation133_spill] sm:$0xff] %v11962_v55  ;;  %v9693_v39 = vld [vmem:[#allocation10 + $0x70] sm:$0xff] }
 0x2d8   : > { %v3094_v62 = vpop.f32.mrf.mxu1 }
 0x2d9   : > { %v3095_v14 = vadd.f32 %v3094_v62, %v11859_v52  ;;  %v9694_v62 = vld [vmem:[#allocation10 + $0x78] sm:$0xff] }
 0x2da   : > { %5255 = vmatpush.bf16.msrb.mxu3 %v9694_v62 }
 0x2db   : > { %v3184_v40 = vadd.f32 %v3183_v53, %v3095_v14  ;;  %4018 = vmatmul.bf16.gmra.mxu1 %v8288_v45 }
 0x2dd   : > { %v11971_v51 = vadd.f32 %v3184_v40, %v2348_v48  ;;  %v8299_v40 = vld [vmem:[#allocation2 + $0xc8] sm:$0xf] }
 0x2de   : > { %v11973_v58 = vpop.f32.mrf.mxu3  ;;  %v11975_v22 = vpop.f32.mrf.mxu0  ;;  %5256 = vmatpush.bf16.msrb.mxu3 %v9693_v39  ;;  %v9690_v39 = vld [vmem:[#allocation10 + $0x58] sm:$0xff] }
 0x2df   : > { %13617 = vst [vmem:[#allocation125_spill] sm:$0xff] %v11971_v51 }
 0x2e0   : > { %v3096_v55 = vpop.f32.mrf.mxu1 }
 0x2e1   : > { %v3097_v52 = vadd.f32 %v3096_v55, %v11869_v47  ;;  %3959 = vmatmul.bf16.gmra.mxu0 %v8356_v23  ;;  %v8300_v55 = vor.u32 %v9579_v34, %v8299_v40  ;;  %v9595_v23 = vld [vmem:[#allocation2 + $0x154] sm:$0xf] }
 0x2e3   : > { %v3186_v53 = vadd.f32 %v3185_v3, %v3097_v52  ;;  %3875 = vmatmul.bf16.gmra.mxu3 %v8364_v8  ;;  %v3190_v52 = vpop.f32.mrf.mxu2  ;;  %v8368_v8 = vor.u32 %v9595_v23, %v8365_v19 }
 0x2e5   : > { %v11980_v14 = vadd.f32 %v3186_v53, %v2349_v12 }
 0x2e6   : > { %v11982_v45 = vpop.f32.mrf.mxu3  ;;  %v11984_v16 = vpop.f32.mrf.mxu0 }
 0x2e7   : > { %13618 = vst [vmem:[#allocation134_spill] sm:$0xff] %v11980_v14  ;;  %v8375_v14 = vld [vmem:[#allocation2 + $0x168] sm:$0xf] }
 0x2e8   : > { %v3099_v48 = vpop.f32.mrf.mxu1 }
 0x2e9   : > { %v3100_v47 = vadd.f32 %v3099_v48, %v11880_v57  ;;  %v9692_v57 = vld [vmem:[#allocation10 + $0x68] sm:$0xff]  ;;  %v9599_v48 = vld [vmem:[#allocation2 + $0x170] sm:$0xf0] }
 0x2ea   : > { %v8376_v51 = vor.u32 %v9599_v48, %v8375_v14  ;;  %5257 = vmatpush.bf16.msrb.mxu3 %v9692_v57  ;;  %v2352_v48 = vadd.f32 %v11657_v35, %v11893_v0 }
 0x2eb   : > { %v3189_v3 = vadd.f32 %v3188_v43, %v3100_v47  ;;  %4023 = vmatmul.bf16.gmra.mxu1 %v8300_v55  ;;  %v9691_v47 = vld [vmem:[#allocation10 + $0x60] sm:$0xff] }
 0x2ed   : > { %v11989_v12 = vadd.f32 %v3189_v3, %v2350_v10  ;;  %v8311_v10 = vld [vmem:[#allocation2 + $0xe0] sm:$0xf]  ;;  %v9702_v3 = vld [vmem:[#allocation10 + $0xb8] sm:$0xff] }
 0x2ee   : > { %v11991_v53 = vpop.f32.mrf.mxu3  ;;  %v11993_v62 = vpop.f32.mrf.mxu0  ;;  %5258 = vmatpush.bf16.msrb.mxu3 %v9691_v47  ;;  %5344 = vmatpush.bf16.msrb.mxu0 %v9702_v3 }
 0x2ef   : > { %13619 = vst [vmem:[#allocation127_spill] sm:$0xff] %v11989_v12 }
 0x2f0   : > { %v3101_v34 = vpop.f32.mrf.mxu1 }
 0x2f1   : > { %v3102_v40 = vadd.f32 %v3101_v34, %v11890_v7  ;;  %3964 = vmatmul.bf16.gmra.mxu0 %v8368_v8  ;;  %v3193_v7 = vpop.f32.mrf.mxu2  ;;  %v9582_v8 = vld [vmem:[#allocation2 + $0xe8] sm:$0xf0]  ;;  %v9701_v34 = vld [vmem:[#allocation10 + $0xb0] sm:$0xff] }
 0x2f2   : > { %v8312_v20 = vor.u32 %v9582_v8, %v8311_v10  ;;  %5259 = vmatpush.bf16.msrb.mxu3 %v9690_v39  ;;  %5345 = vmatpush.bf16.msrb.mxu0 %v9701_v34  ;;  %v9602_v10 = vld [vmem:[#allocation2 + $0x188] sm:$0xf0]  ;;  %v9700_v39 = vld [vmem:[#allocation10 + $0xa8] sm:$0xff]  ;;  %v9687_v34 = vld [vmem:[#allocation10 + $0x40] sm:$0xff] }
 0x2f3   : > { %v3191_v43 = vadd.f32 %v3190_v52, %v3102_v40  ;;  %3880 = vmatmul.bf16.gmra.mxu3 %v8376_v51  ;;  %v9598_v51 = vld [vmem:[#allocation2 + $0x16c] sm:$0xf]  ;;  %v8377_v52 = vld [vmem:[#allocation2 + $0x174] sm:$0xf0] }
 0x2f5   : > { %v11998_v55 = vadd.f32 %v3191_v43, %v2351_v33  ;;  %v9689_v33 = vld [vmem:[#allocation10 + $0x50] sm:$0xff]  ;;  %v8380_v43 = vor.u32 %v9598_v51, %v8377_v52 }
 0x2f6   : > { %v12000_v23 = vpop.f32.mrf.mxu3  ;;  %v12002_v19 = vpop.f32.mrf.mxu0  ;;  %5260 = vmatpush.bf16.msrb.mxu3 %v9689_v33  ;;  %5346 = vmatpush.bf16.msrb.mxu0 %v9700_v39  ;;  %v8323_v33 = vld [vmem:[#allocation2 + $0xf8] sm:$0xf] }
 0x2f7   : > { %13620 = vst [vmem:[#allocation136_spill] sm:$0xff] %v11998_v55 }
 0x2f8   : > { %v3104_v14 = vpop.f32.mrf.mxu1 }
 0x2f9   : > { %v3105_v57 = vadd.f32 %v3104_v14, %v11900_v54  ;;  %v8387_v54 = vld [vmem:[#allocation2 + $0x180] sm:$0xf]  ;;  %v9688_v14 = vld [vmem:[#allocation10 + $0x48] sm:$0xff] }
 0x2fa   : > { %v8388_v0 = vor.u32 %v9602_v10, %v8387_v54  ;;  %5261 = vmatpush.bf16.msrb.mxu3 %v9688_v14  ;;  %v9698_v54 = vld [vmem:[#allocation10 + $0x98] sm:$0xff]  ;;  %v3906_v10 = vadd.f32 %v11921_v28, %v11910_v37  ;;  %v9696_v37 = vld [vmem:[#allocation10 + $0x88] sm:$0xff]  ;;  %v3908_v28 = vadd.f32 %v11930_v9, %v11919_v18 }
 0x2fb   : > { %v3194_v40 = vadd.f32 %v3193_v7, %v3105_v57  ;;  %4028 = vmatmul.bf16.gmra.mxu1 %v8312_v20  ;;  %v3195_v7 = vpop.f32.mrf.mxu2  ;;  %v9699_v57 = vld [vmem:[#allocation10 + $0xa0] sm:$0xff]  ;;  %v9973_v20 = vld [vmem:[%s13306_s4] ss:$0 sm:$0xff] }
 0x2fc   : > { %v2353_v51 = vadd.f32 %v9973_v20, %v11903_v11  ;;  %5347 = vmatpush.bf16.msrb.mxu0 %v9699_v57  ;;  %v8399_v57 = vld [vmem:[#allocation2 + $0x198] sm:$0xf]  ;;  %v9605_v20 = vld [vmem:[#allocation2 + $0x1a0] sm:$0xf0] }
 0x2fd   : > { %v12007_v47 = vadd.f32 %v3194_v40, %v2352_v48 }
 0x2fe   : > { %v12009_v55 = vpop.f32.mrf.mxu3  ;;  %v12011_v3 = vpop.f32.mrf.mxu0  ;;  %5262 = vmatpush.bf16.msrb.mxu3 %v9687_v34 }
 0x2ff   : > { %13621 = vst [vmem:[#allocation128_spill] sm:$0xff] %v12007_v47 }
 0x300   : > { %v3106_v8 = vpop.f32.mrf.mxu1  ;;  %5348 = vmatpush.bf16.msrb.mxu0 %v9698_v54 }
 0x301   : > { %v3107_v35 = vadd.f32 %v3106_v8, %v11912_v29  ;;  %3969 = vmatmul.bf16.gmra.mxu0 %v8380_v43  ;;  %v9585_v43 = vld [vmem:[#allocation2 + $0x100] sm:$0xf0] }
 0x302   : > { %v8324_v14 = vor.u32 %v9585_v43, %v8323_v33  ;;  %v9601_v8 = vld [vmem:[#allocation2 + $0x184] sm:$0xf]  ;;  %v8400_v43 = vor.u32 %v9605_v20, %v8399_v57 }
 0x303   : > { %v3196_v52 = vadd.f32 %v3195_v7, %v3107_v35  ;;  %3885 = vmatmul.bf16.gmra.mxu3 %v8388_v0  ;;  %v8389_v35 = vld [vmem:[#allocation2 + $0x18c] sm:$0xf0]  ;;  %v9697_v0 = vld [vmem:[#allocation10 + $0x90] sm:$0xff] }
 0x304   : > { %5349 = vmatpush.bf16.msrb.mxu0 %v9697_v0 }
 0x305   : > { %v12018_v48 = vadd.f32 %v3196_v52, %v2353_v51  ;;  %v8392_v52 = vor.u32 %v9601_v8, %v8389_v35  ;;  %v9588_v35 = vld [vmem:[#allocation2 + $0x118] sm:$0xf0] }
 0x306   : > { %v12020_v40 = vpop.f32.mrf.mxu3  ;;  %v12022_v29 = vpop.f32.mrf.mxu0 }
 0x307   : > { %13622 = vst [vmem:[#allocation129_spill] sm:$0xff] %v12018_v48 }
 0x308   : > { %v3994_v39 = vpop.f32.mrf.mxu1  ;;  %5350 = vmatpush.bf16.msrb.mxu0 %v9696_v37 }
 0x309   : > { %v3995_v11 = vadd.f32 %v3994_v39, %v3906_v10  ;;  %v9695_v10 = vld [vmem:[#allocation10 + $0x80] sm:$0xff] }
 0x30b   : > { %v4074_v7 = vadd.f32 %v3995_v11, %v11669_v36  ;;  %4033 = vmatmul.bf16.gmra.mxu1 %v8324_v14  ;;  %v3911_v14 = vadd.f32 %v11939_v6, %v11928_v61 }
 0x30c   : > { %5351 = vmatpush.bf16.msrb.mxu0 %v9695_v10 }
 0x30d   : > { %v12027_v51 = vmax.f32 %v4074_v7, 0.0 }
 0x30e   : > { %v12029_v34 = vpop.f32.mrf.mxu3  ;;  %v12031_v48 = vpop.f32.mrf.mxu0 }
 0x30f   : > { %13623 = vst [vmem:[#allocation116_spill] sm:$0xff] %v12027_v51  ;;  %v4458_v33 = vpack.c.bf16 %v12027_v51, %v12027_v51  ;;  %v13411_v18 = vrot.slane %v12027_v51, 7  ;;  %v4298_v0 = vrot.slane %v12027_v51, 1 }
 0x310   : > { %v3996_v36 = vpop.f32.mrf.mxu1 }
 0x311   : > { %4490 = vst [vmem:[#allocation2 + $0x1c] sm:$0xf] %v4458_v33  ;;  %v3997_v54 = vadd.f32 %v3996_v36, %v3908_v28  ;;  %3974 = vmatmul.bf16.gmra.mxu0 %v8392_v52 }
 0x313   : > { %v4075_v39 = vadd.f32 %v3997_v54, %v11683_v24  ;;  %3890 = vmatmul.bf16.gmra.mxu3 %v8400_v43  ;;  %v8335_v24 = vld [vmem:[#allocation2 + $0x110] sm:$0xf]  ;;  %v13625_v43 = vld [vmem:[#allocation31_spill] sm:$0xff] }
 0x314   : > { %v8336_v33 = vor.u32 %v9588_v35, %v8335_v24  ;;  %v13626_v54 = vld [vmem:[#allocation63_spill] sm:$0xff] }
 0x315   : > { %v4171_v11 = vmax.f32 %v4075_v39, 0.0  ;;  %v9604_v39 = vld [vmem:[#allocation2 + $0x19c] sm:$0xf] }
 0x316   : > { %v12041_v9 = vpop.f32.mrf.mxu3  ;;  %v12043_v8 = vpop.f32.mrf.mxu0 }
 0x317   : > { %v4203_v7 = vrot.slane %v4171_v11, 7  ;;  %v4299_v57 = vrot.slane %v4171_v11, 1  ;;  %v4459_v20 = vpack.c.bf16 %v4171_v11, %v4171_v11  ;;  %v8401_v11 = vld [vmem:[#allocation2 + $0x1a4] sm:$0xf0] }
 0x318   : > { %v3999_v52 = vpop.f32.mrf.mxu1  ;;  %v8404_v44 = vor.u32 %v9604_v39, %v8401_v11 }
 0x319   : > { %v4264_v28 = vsel %vm801_vm0, %v13411_v18, %v4203_v7  ;;  %v4360_v61 = vsel %vm1058_vm1, %v4298_v0, %v4299_v57  ;;  %4491 = vst [vmem:[#allocation2 + $0x28] sm:$0xf] %v4459_v20  ;;  %v4000_v6 = vadd.f32 %v3999_v52, %v3911_v14  ;;  %v9631_v18 = vld [vmem:[#allocation2 + $0x4] sm:$0xf]  ;;  %v3913_v20 = vadd.f32 %v11948_v63, %v11937_v49  ;;  %v13627_v49 = vld [vmem:[#allocation27_spill] sm:$0xff] }
 0x31a   : > { %v4267_v36 = vmul.f32 %v4264_v28, %v13625_v43  ;;  %v4362_v10 = vmul.f32 %v4360_v61, %v13626_v54  ;;  %v8347_v54 = vld [vmem:[#allocation2 + $0x128] sm:$0xf] }
 0x31b   : > { %v4076_v47 = vadd.f32 %v4000_v6, %v11697_v59  ;;  %4038 = vmatmul.bf16.gmra.mxu1 %v8336_v33  ;;  %v8512_v59 = vor.u32 %v9631_v18, %v8509_v38 }
 0x31c   : > { %v4395_v12 = vpack.c.bf16 %v4267_v36, %v4267_v36  ;;  %v4522_v31 = vpack.c.bf16 %v4362_v10, %v4362_v10 }
 0x31d   : > { %v4172_v51 = vmax.f32 %v4076_v47, 0.0 }
 0x31e   : > { %4427 = vst [vmem:[#allocation2 + $0x24] sm:$0xf] %v4395_v12  ;;  %v12059_v14 = vpop.f32.mrf.mxu3  ;;  %v12061_v35 = vpop.f32.mrf.mxu0  ;;  %v13628_v12 = vld [vmem:[#allocation62_spill] sm:$0xff] }
 0x31f   : > { %4554 = vst [vmem:[#allocation2 + $0x20] sm:$0xf] %v4522_v31  ;;  %v4204_v52 = vrot.slane %v4172_v51, 7  ;;  %v4300_v24 = vrot.slane %v4172_v51, 1  ;;  %v4460_v28 = vpack.c.bf16 %v4172_v51, %v4172_v51 }
 0x320   : > { %v4001_v61 = vpop.f32.mrf.mxu1 }
 0x321   : > { %v4263_v6 = vsel %vm801_vm0, %v4203_v7, %v4204_v52  ;;  %v4359_v47 = vsel %vm1058_vm1, %v4299_v57, %v4300_v24  ;;  %4492 = vst [vmem:[#allocation2 + $0x34] sm:$0xf] %v4460_v28  ;;  %v4002_v33 = vadd.f32 %v4001_v61, %v3913_v20  ;;  %3979 = vmatmul.bf16.gmra.mxu0 %v8404_v44  ;;  %v9591_v20 = vld [vmem:[#allocation2 + $0x130] sm:$0xf0] }
 0x322   : > { %v4268_v63 = vmul.f32 %v4263_v6, %v13627_v49  ;;  %v4363_v43 = vmul.f32 %v4359_v47, %v13628_v12  ;;  %v3916_v57 = vadd.f32 %v11957_v30, %v11946_v13  ;;  %v8348_v61 = vor.u32 %v9591_v20, %v8347_v54  ;;  %v13629_v6 = vld [vmem:[#allocation30_spill] sm:$0xff]  ;;  %v8515_v13 = vld [vmem:[#allocation2 + $0x8] sm:$0xf] }
 0x323   : > { %v4077_v31 = vadd.f32 %v4002_v33, %v11711_v2  ;;  %5263 = vmatmul.bf16.vlgmr.msrb.gmra.mxu3 %v8512_v59  ;;  %v13630_v33 = vld [vmem:[#allocation49_spill] sm:$0xff]  ;;  %v9633_v30 = vld [vmem:[#allocation2 + $0x10] sm:$0xf0] }
 0x324   : > { %v4396_v36 = vpack.c.bf16 %v4268_v63, %v4268_v63  ;;  %v4523_v51 = vpack.c.bf16 %v4363_v43, %v4363_v43 }
 0x325   : > { %v4173_v38 = vmax.f32 %v4077_v31, 0.0 }
 0x326   : > { %4428 = vst [vmem:[#allocation2 + $0x30] sm:$0xf] %v4396_v36  ;;  %v12070_v18 = vpop.f32.mrf.mxu3  ;;  %v12072_v7 = vpop.f32.mrf.mxu0  ;;  %v8521_v36 = vld [vmem:[#allocation2 + $0x24] sm:$0xf0] }
 0x327   : > { %4555 = vst [vmem:[#allocation2 + $0x2c] sm:$0xf] %v4523_v51  ;;  %v4205_v44 = vrot.slane %v4173_v38, 7  ;;  %v4301_v10 = vrot.slane %v4173_v38, 1  ;;  %v4461_v39 = vpack.c.bf16 %v4173_v38, %v4173_v38  ;;  %v3918_v38 = vadd.f32 %v11966_v4, %v11955_v21 }
 0x328   : > { %v4004_v11 = vpop.f32.mrf.mxu1 }
 0x329   : > { %v4262_v2 = vsel %vm801_vm0, %v4204_v52, %v4205_v44  ;;  %v4358_v28 = vsel %vm1058_vm1, %v4300_v24, %v4301_v10  ;;  %4493 = vst [vmem:[#allocation2 + $0x40] sm:$0xf] %v4461_v39  ;;  %v4005_v59 = vadd.f32 %v4004_v11, %v3916_v57  ;;  %v8516_v52 = vor.u32 %v9633_v30, %v8515_v13  ;;  %v9634_v11 = vld [vmem:[#allocation2 + $0x1c] sm:$0xf] }
 0x32a   : > { %v4269_v47 = vmul.f32 %v4262_v2, %v13629_v6  ;;  %v4364_v49 = vmul.f32 %v4358_v28, %v13630_v33  ;;  %v8524_v20 = vor.u32 %v9634_v11, %v8521_v36 }
 0x32b   : > { %v4078_v63 = vadd.f32 %v4005_v59, %v11723_v27  ;;  %4043 = vmatmul.bf16.gmra.mxu1 %v8348_v61  ;;  %v13631_v61 = vld [vmem:[#allocation23_spill] sm:$0xff] }
 0x32c   : > { %v4397_v12 = vpack.c.bf16 %v4269_v47, %v4269_v47  ;;  %v4524_v43 = vpack.c.bf16 %v4364_v49, %v4364_v49  ;;  %v13632_v47 = vld [vmem:[#allocation67_spill] sm:$0xff] }
 0x32d   : > { %v4174_v31 = vmax.f32 %v4078_v63, 0.0  ;;  %v8359_v63 = vld [vmem:[#allocation2 + $0x140] sm:$0xf] }
 0x32e   : > { %4429 = vst [vmem:[#allocation2 + $0x3c] sm:$0xf] %v4397_v12  ;;  %v12083_v51 = vpop.f32.mrf.mxu3  ;;  %v12085_v24 = vpop.f32.mrf.mxu0  ;;  %v3921_v12 = vadd.f32 %v11975_v22, %v11964_v1 }
 0x32f   : > { %4556 = vst [vmem:[#allocation2 + $0x38] sm:$0xf] %v4524_v43  ;;  %v4206_v54 = vrot.slane %v4174_v31, 7  ;;  %v4302_v57 = vrot.slane %v4174_v31, 1  ;;  %v4462_v39 = vpack.c.bf16 %v4174_v31, %v4174_v31 }
 0x330   : > { %v4006_v27 = vpop.f32.mrf.mxu1 }
 0x331   : > { %v4261_v2 = vsel %vm801_vm0, %v4205_v44, %v4206_v54  ;;  %v4357_v28 = vsel %vm1058_vm1, %v4301_v10, %v4302_v57  ;;  %4494 = vst [vmem:[#allocation2 + $0x4c] sm:$0xf] %v4462_v39  ;;  %v4007_v59 = vadd.f32 %v4006_v27, %v3918_v38  ;;  %5352 = vmatmul.bf16.vlgmr.msrb.gmra.mxu0 %v8516_v52  ;;  %v9594_v10 = vld [vmem:[#allocation2 + $0x148] sm:$0xf0]  ;;  %v13633_v27 = vld [vmem:[#allocation24_spill] sm:$0xff] }
 0x332   : > { %v4270_v6 = vmul.f32 %v4261_v2, %v13631_v61  ;;  %v4365_v21 = vmul.f32 %v4357_v28, %v13632_v47  ;;  %v8360_v11 = vor.u32 %v9594_v10, %v8359_v63  ;;  %v13634_v2 = vld [vmem:[#allocation66_spill] sm:$0xff]  ;;  %v9636_v61 = vld [vmem:[#allocation2 + $0x28] sm:$0xf0]  ;;  %v8533_v47 = vld [vmem:[#allocation2 + $0x3c] sm:$0xf0] }
 0x333   : > { %v4079_v4 = vadd.f32 %v4007_v59, %v11737_v50  ;;  %5268 = vmatmul.bf16.gmra.mxu3 %v8524_v20 }
 0x334   : > { %v4398_v33 = vpack.c.bf16 %v4270_v6, %v4270_v6  ;;  %v4525_v49 = vpack.c.bf16 %v4365_v21, %v4365_v21 }
 0x335   : > { %v4175_v13 = vmax.f32 %v4079_v4, 0.0  ;;  %v8527_v4 = vld [vmem:[#allocation2 + $0x20] sm:$0xf] }
 0x336   : > { %4430 = vst [vmem:[#allocation2 + $0x48] sm:$0xf] %v4398_v33  ;;  %v12096_v30 = vpop.f32.mrf.mxu3  ;;  %v12098_v44 = vpop.f32.mrf.mxu0  ;;  %v8528_v63 = vor.u32 %v9636_v61, %v8527_v4 }
 0x337   : > { %4557 = vst [vmem:[#allocation2 + $0x44] sm:$0xf] %v4525_v49  ;;  %v4207_v43 = vrot.slane %v4175_v13, 7  ;;  %v4303_v31 = vrot.slane %v4175_v13, 1  ;;  %v4463_v36 = vpack.c.bf16 %v4175_v13, %v4175_v13 }
 0x338   : > { %v4009_v52 = vpop.f32.mrf.mxu1 }
 0x339   : > { %v4260_v50 = vsel %vm801_vm0, %v4206_v54, %v4207_v43  ;;  %v4356_v38 = vsel %vm1058_vm1, %v4302_v57, %v4303_v31  ;;  %4495 = vst [vmem:[#allocation2 + $0x58] sm:$0xf] %v4463_v36  ;;  %v4010_v39 = vadd.f32 %v4009_v52, %v3921_v12  ;;  %v3923_v54 = vadd.f32 %v11984_v16, %v11973_v58  ;;  %v13635_v52 = vld [vmem:[#allocation34_spill] sm:$0xff] }
 0x33a   : > { %v4271_v20 = vmul.f32 %v4260_v50, %v13633_v27  ;;  %v4366_v28 = vmul.f32 %v4356_v38, %v13634_v2  ;;  %v13636_v38 = vld [vmem:[#allocation53_spill] sm:$0xff] }
 0x33b   : > { %v4080_v1 = vadd.f32 %v4010_v39, %v11751_v56  ;;  %4048 = vmatmul.bf16.gmra.mxu1 %v8360_v11  ;;  %v9637_v56 = vld [vmem:[#allocation2 + $0x34] sm:$0xf] }
 0x33c   : > { %v4399_v22 = vpack.c.bf16 %v4271_v20, %v4271_v20  ;;  %v4526_v59 = vpack.c.bf16 %v4366_v28, %v4366_v28  ;;  %v8536_v12 = vor.u32 %v9637_v56, %v8533_v47  ;;  %v8371_v47 = vld [vmem:[#allocation2 + $0x158] sm:$0xf]  ;;  %v13637_v56 = vld [vmem:[#allocation33_spill] sm:$0xff] }
 0x33d   : > { %v4176_v6 = vmax.f32 %v4080_v1, 0.0  ;;  %v9597_v1 = vld [vmem:[#allocation2 + $0x160] sm:$0xf0] }
 0x33e   : > { %4431 = vst [vmem:[#allocation2 + $0x54] sm:$0xf] %v4399_v22  ;;  %v12111_v57 = vpop.f32.mrf.mxu3  ;;  %v12113_v21 = vpop.f32.mrf.mxu0 }
 0x33f   : > { %4558 = vst [vmem:[#allocation2 + $0x50] sm:$0xf] %v4526_v59  ;;  %v4208_v33 = vrot.slane %v4176_v6, 7  ;;  %v4304_v49 = vrot.slane %v4176_v6, 1  ;;  %v4464_v13 = vpack.c.bf16 %v4176_v6, %v4176_v6 }
 0x340   : > { %v4011_v10 = vpop.f32.mrf.mxu1 }
 0x341   : > { %v4259_v36 = vsel %vm801_vm0, %v4207_v43, %v4208_v33  ;;  %v4355_v58 = vsel %vm1058_vm1, %v4303_v31, %v4304_v49  ;;  %4496 = vst [vmem:[#allocation2 + $0x64] sm:$0xf] %v4464_v13  ;;  %v4012_v16 = vadd.f32 %v4011_v10, %v3923_v54  ;;  %5357 = vmatmul.bf16.gmra.mxu0 %v8528_v63  ;;  %v13638_v10 = vld [vmem:[#allocation71_spill] sm:$0xff] }
 0x342   : > { %v4272_v50 = vmul.f32 %v4259_v36, %v13635_v52  ;;  %v4367_v39 = vmul.f32 %v4355_v58, %v13636_v38  ;;  %v3926_v31 = vadd.f32 %v11993_v62, %v11982_v45  ;;  %v8372_v13 = vor.u32 %v9597_v1, %v8371_v47  ;;  %v9639_v58 = vld [vmem:[#allocation2 + $0x40] sm:$0xf0]  ;;  %v8545_v52 = vld [vmem:[#allocation2 + $0x54] sm:$0xf0]  ;;  %v13640_v47 = vld [vmem:[#allocation70_spill] sm:$0xff] }
 0x343   : > { %v4081_v11 = vadd.f32 %v4012_v16, %v11765_v17  ;;  %5273 = vmatmul.bf16.gmra.mxu3 %v8536_v12  ;;  %v8539_v38 = vld [vmem:[#allocation2 + $0x38] sm:$0xf] }
 0x344   : > { %v4400_v27 = vpack.c.bf16 %v4272_v50, %v4272_v50  ;;  %v4527_v20 = vpack.c.bf16 %v4367_v39, %v4367_v39 }
 0x345   : > { %v4177_v2 = vmax.f32 %v4081_v11, 0.0 }
 0x346   : > { %4432 = vst [vmem:[#allocation2 + $0x60] sm:$0xf] %v4400_v27  ;;  %v12122_v28 = vpop.f32.mrf.mxu3  ;;  %v12124_v43 = vpop.f32.mrf.mxu0 }
 0x347   : > { %4559 = vst [vmem:[#allocation2 + $0x5c] sm:$0xf] %v4527_v20  ;;  %v4209_v22 = vrot.slane %v4177_v2, 7  ;;  %v4305_v59 = vrot.slane %v4177_v2, 1  ;;  %v4465_v61 = vpack.c.bf16 %v4177_v2, %v4177_v2  ;;  %v8540_v20 = vor.u32 %v9639_v58, %v8539_v38  ;;  %v9600_v58 = vld [vmem:[#allocation2 + $0x178] sm:$0xf0] }
 0x348   : > { %v4014_v6 = vpop.f32.mrf.mxu1  ;;  %v13641_v38 = vld [vmem:[#allocation37_spill] sm:$0xff] }
 0x349   : > { %v4258_v17 = vsel %vm801_vm0, %v4208_v33, %v4209_v22  ;;  %v4354_v54 = vsel %vm1058_vm1, %v4304_v49, %v4305_v59  ;;  %4497 = vst [vmem:[#allocation2 + $0x70] sm:$0xf] %v4465_v61  ;;  %v4015_v4 = vadd.f32 %v4014_v6, %v3926_v31  ;;  %v3928_v33 = vadd.f32 %v12002_v19, %v11991_v53  ;;  %v13639_v61 = vld [vmem:[#allocation25_spill] sm:$0xff] }
 0x34a   : > { %v4273_v63 = vmul.f32 %v4258_v17, %v13637_v56  ;;  %v4368_v12 = vmul.f32 %v4354_v54, %v13638_v10  ;;  %v8383_v10 = vld [vmem:[#allocation2 + $0x170] sm:$0xf] }
 0x34b   : > { %v4082_v45 = vadd.f32 %v4015_v4, %v11779_v41  ;;  %4053 = vmatmul.bf16.gmra.mxu1 %v8372_v13  ;;  %v9640_v41 = vld [vmem:[#allocation2 + $0x4c] sm:$0xf] }
 0x34c   : > { %v4401_v62 = vpack.c.bf16 %v4273_v63, %v4273_v63  ;;  %v4528_v36 = vpack.c.bf16 %v4368_v12, %v4368_v12  ;;  %v8548_v1 = vor.u32 %v9640_v41, %v8545_v52  ;;  %v13642_v41 = vld [vmem:[#allocation57_spill] sm:$0xff] }
 0x34d   : > { %v4178_v16 = vmax.f32 %v4082_v45, 0.0 }
 0x34e   : > { %4433 = vst [vmem:[#allocation2 + $0x6c] sm:$0xf] %v4401_v62  ;;  %v12137_v49 = vpop.f32.mrf.mxu3  ;;  %v12139_v50 = vpop.f32.mrf.mxu0 }
 0x34f   : > { %4560 = vst [vmem:[#allocation2 + $0x68] sm:$0xf] %v4528_v36  ;;  %v4210_v39 = vrot.slane %v4178_v16, 7  ;;  %v4306_v11 = vrot.slane %v4178_v16, 1  ;;  %v4466_v27 = vpack.c.bf16 %v4178_v16, %v4178_v16 }
 0x350   : > { %v4016_v2 = vpop.f32.mrf.mxu1 }
 0x351   : > { %v4257_v31 = vsel %vm801_vm0, %v4209_v22, %v4210_v39  ;;  %v4353_v53 = vsel %vm1058_vm1, %v4305_v59, %v4306_v11  ;;  %4498 = vst [vmem:[#allocation2 + $0x7c] sm:$0xf] %v4466_v27  ;;  %v4017_v19 = vadd.f32 %v4016_v2, %v3928_v33  ;;  %5362 = vmatmul.bf16.gmra.mxu0 %v8540_v20 }
 0x352   : > { %v4274_v6 = vmul.f32 %v4257_v31, %v13639_v61  ;;  %v4369_v17 = vmul.f32 %v4353_v53, %v13640_v47  ;;  %v3931_v59 = vadd.f32 %v12011_v3, %v12000_v23  ;;  %v8384_v33 = vor.u32 %v9600_v58, %v8383_v10  ;;  %v8557_v53 = vld [vmem:[#allocation2 + $0x6c] sm:$0xf0]  ;;  %v13643_v10 = vld [vmem:[#allocation36_spill] sm:$0xff] }
 0x353   : > { %v4083_v54 = vadd.f32 %v4017_v19, %v11791_v26  ;;  %5278 = vmatmul.bf16.gmra.mxu3 %v8548_v1  ;;  %v9642_v1 = vld [vmem:[#allocation2 + $0x58] sm:$0xf0]  ;;  %v8551_v61 = vld [vmem:[#allocation2 + $0x50] sm:$0xf] }
 0x354   : > { %v4402_v4 = vpack.c.bf16 %v4274_v6, %v4274_v6  ;;  %v4529_v13 = vpack.c.bf16 %v4369_v17, %v4369_v17 }
 0x355   : > { %v4179_v56 = vmax.f32 %v4083_v54, 0.0  ;;  %v8552_v54 = vor.u32 %v9642_v1, %v8551_v61  ;;  %v13646_v61 = vld [vmem:[#allocation74_spill] sm:$0xff] }
 0x356   : > { %4434 = vst [vmem:[#allocation2 + $0x78] sm:$0xf] %v4402_v4  ;;  %v12148_v63 = vpop.f32.mrf.mxu3  ;;  %v12150_v22 = vpop.f32.mrf.mxu0 }
 0x357   : > { %4561 = vst [vmem:[#allocation2 + $0x74] sm:$0xf] %v4529_v13  ;;  %v4211_v12 = vrot.slane %v4179_v56, 7  ;;  %v4307_v45 = vrot.slane %v4179_v56, 1  ;;  %v4467_v62 = vpack.c.bf16 %v4179_v56, %v4179_v56 }
 0x358   : > { %v4019_v36 = vpop.f32.mrf.mxu1 }
 0x359   : > { %v4256_v26 = vsel %vm801_vm0, %v4210_v39, %v4211_v12  ;;  %v4352_v16 = vsel %vm1058_vm1, %v4306_v11, %v4307_v45  ;;  %4499 = vst [vmem:[#allocation2 + $0x88] sm:$0xf] %v4467_v62  ;;  %v4020_v52 = vadd.f32 %v4019_v36, %v3931_v59  ;;  %v3933_v39 = vadd.f32 %v12022_v29, %v12009_v55  ;;  %v13644_v62 = vld [vmem:[#allocation75_spill] sm:$0xff] }
 0x35a   : > { %v4275_v27 = vmul.f32 %v4256_v26, %v13641_v38  ;;  %v4370_v20 = vmul.f32 %v4352_v16, %v13642_v41  ;;  %v9603_v38 = vld [vmem:[#allocation2 + $0x190] sm:$0xf0] }
 0x35b   : > { %v4084_v23 = vadd.f32 %v4020_v52, %v11805_v60  ;;  %4058 = vmatmul.bf16.gmra.mxu1 %v8384_v33  ;;  %v9643_v60 = vld [vmem:[#allocation2 + $0x64] sm:$0xf] }
 0x35c   : > { %v4403_v3 = vpack.c.bf16 %v4275_v27, %v4275_v27  ;;  %v4530_v2 = vpack.c.bf16 %v4370_v20, %v4370_v20  ;;  %v8560_v13 = vor.u32 %v9643_v60, %v8557_v53  ;;  %v13645_v53 = vld [vmem:[#allocation26_spill] sm:$0xff] }
 0x35d   : > { %v4180_v31 = vmax.f32 %v4084_v23, 0.0 }
 0x35e   : > { %4435 = vst [vmem:[#allocation2 + $0x84] sm:$0xf] %v4403_v3  ;;  %v12163_v11 = vpop.f32.mrf.mxu3  ;;  %v12165_v19 = vpop.f32.mrf.mxu0  ;;  %v8395_v3 = vld [vmem:[#allocation2 + $0x188] sm:$0xf] }
 0x35f   : > { %4562 = vst [vmem:[#allocation2 + $0x80] sm:$0xf] %v4530_v2  ;;  %v4212_v6 = vrot.slane %v4180_v31, 7  ;;  %v4308_v47 = vrot.slane %v4180_v31, 1  ;;  %v4468_v17 = vpack.c.bf16 %v4180_v31, %v4180_v31  ;;  %v8396_v31 = vor.u32 %v9603_v38, %v8395_v3  ;;  %v13648_v38 = vld [vmem:[#allocation61_spill] sm:$0xff] }
 0x360   : > { %v4021_v4 = vpop.f32.mrf.mxu1 }
 0x361   : > { %v4255_v56 = vsel %vm801_vm0, %v4211_v12, %v4212_v6  ;;  %v4351_v55 = vsel %vm1058_vm1, %v4307_v45, %v4308_v47  ;;  %4500 = vst [vmem:[#allocation2 + $0x94] sm:$0xf] %v4468_v17  ;;  %v4022_v29 = vadd.f32 %v4021_v4, %v3933_v39  ;;  %5367 = vmatmul.bf16.gmra.mxu0 %v8552_v54  ;;  %v9645_v54 = vld [vmem:[#allocation2 + $0x70] sm:$0xf0] }
 0x362   : > { %v4276_v59 = vmul.f32 %v4255_v56, %v13643_v10  ;;  %v4371_v36 = vmul.f32 %v4351_v55, %v13644_v62  ;;  %v3936_v45 = vadd.f32 %v12031_v48, %v12020_v40  ;;  %v8563_v55 = vld [vmem:[#allocation2 + $0x68] sm:$0xf] }
 0x363   : > { %v4085_v58 = vadd.f32 %v4022_v29, %v11819_v25  ;;  %5283 = vmatmul.bf16.gmra.mxu3 %v8560_v13  ;;  %v8569_v13 = vld [vmem:[#allocation2 + $0x84] sm:$0xf0]  ;;  %v8564_v62 = vor.u32 %v9645_v54, %v8563_v55  ;;  %v13650_v54 = vld [vmem:[#allocation79_spill] sm:$0xff] }
 0x364   : > { %v4404_v26 = vpack.c.bf16 %v4276_v59, %v4276_v59  ;;  %v4531_v16 = vpack.c.bf16 %v4371_v36, %v4371_v36 }
 0x365   : > { %v4181_v52 = vmax.f32 %v4085_v58, 0.0 }
 0x366   : > { %4436 = vst [vmem:[#allocation2 + $0x90] sm:$0xf] %v4404_v26  ;;  %v12174_v33 = vpop.f32.mrf.mxu3  ;;  %v12176_v12 = vpop.f32.mrf.mxu0 }
 0x367   : > { %4563 = vst [vmem:[#allocation2 + $0x8c] sm:$0xf] %v4531_v16  ;;  %v4213_v27 = vrot.slane %v4181_v52, 7  ;;  %v4309_v41 = vrot.slane %v4181_v52, 1  ;;  %v4469_v20 = vpack.c.bf16 %v4181_v52, %v4181_v52  ;;  %v13647_v16 = vld [vmem:[#allocation40_spill] sm:$0xff] }
 0x368   : > { %v4024_v23 = vpop.f32.mrf.mxu1 }
 0x369   : > { %v4254_v25 = vsel %vm801_vm0, %v4212_v6, %v4213_v27  ;;  %v4350_v2 = vsel %vm1058_vm1, %v4308_v47, %v4309_v41  ;;  %4501 = vst [vmem:[#allocation2 + $0xa0] sm:$0xf] %v4469_v20  ;;  %v4025_v1 = vadd.f32 %v4024_v23, %v3936_v45  ;;  %v3938_v6 = vadd.f32 %v12043_v8, %v12029_v34 }
 0x36a   : > { %v4277_v39 = vmul.f32 %v4254_v25, %v13645_v53  ;;  %v4372_v17 = vmul.f32 %v4350_v2, %v13646_v61  ;;  %v8407_v25 = vld [vmem:[#allocation2 + $0x1a0] sm:$0xf]  ;;  %v9606_v2 = vld [vmem:[#allocation2 + $0x1a8] sm:$0xf0] }
 0x36b   : > { %v4086_v48 = vadd.f32 %v4025_v1, %v11833_v46  ;;  %4063 = vmatmul.bf16.gmra.mxu1 %v8396_v31  ;;  %v9646_v46 = vld [vmem:[#allocation2 + $0x7c] sm:$0xf] }
 0x36c   : > { %v4405_v40 = vpack.c.bf16 %v4277_v39, %v4277_v39  ;;  %v4532_v60 = vpack.c.bf16 %v4372_v17, %v4372_v17  ;;  %v8572_v58 = vor.u32 %v9646_v46, %v8569_v13  ;;  %v8408_v17 = vor.u32 %v9606_v2, %v8407_v25 }
 0x36d   : > { %v4182_v4 = vmax.f32 %v4086_v48, 0.0 }
 0x36e   : > { %4437 = vst [vmem:[#allocation2 + $0x9c] sm:$0xf] %v4405_v40  ;;  %v12189_v47 = vpop.f32.mrf.mxu3  ;;  %v12191_v56 = vpop.f32.mrf.mxu0 }
 0x36f   : > { %4564 = vst [vmem:[#allocation2 + $0x98] sm:$0xf] %v4532_v60  ;;  %v4214_v29 = vrot.slane %v4182_v4, 7  ;;  %v4310_v10 = vrot.slane %v4182_v4, 1  ;;  %v4470_v59 = vpack.c.bf16 %v4182_v4, %v4182_v4 }
 0x370   : > { %v4026_v36 = vpop.f32.mrf.mxu1 }
 0x371   : > { %v4253_v26 = vsel %vm801_vm0, %v4213_v27, %v4214_v29  ;;  %v4349_v34 = vsel %vm1058_vm1, %v4309_v41, %v4310_v10  ;;  %4502 = vst [vmem:[#allocation2 + $0xac] sm:$0xf] %v4470_v59  ;;  %v4027_v8 = vadd.f32 %v4026_v36, %v3938_v6  ;;  %5372 = vmatmul.bf16.gmra.mxu0 %v8564_v62  ;;  %v9648_v59 = vld [vmem:[#allocation2 + $0x88] sm:$0xf0]  ;;  %v8581_v62 = vld [vmem:[#allocation2 + $0x9c] sm:$0xf0] }
 0x372   : > { %v4278_v52 = vmul.f32 %v4253_v26, %v13647_v16  ;;  %v4373_v45 = vmul.f32 %v4349_v34, %v13648_v38  ;;  %v3941_v27 = vadd.f32 %v12061_v35, %v12041_v9  ;;  %v13649_v9 = vld [vmem:[#allocation39_spill] sm:$0xff] }
 0x373   : > { %v4087_v20 = vadd.f32 %v4027_v8, %v11845_v15  ;;  %5288 = vmatmul.bf16.gmra.mxu3 %v8572_v58  ;;  %v8575_v58 = vld [vmem:[#allocation2 + $0x80] sm:$0xf] }
 0x374   : > { %v4406_v23 = vpack.c.bf16 %v4278_v52, %v4278_v52  ;;  %v4533_v3 = vpack.c.bf16 %v4373_v45, %v4373_v45  ;;  %v8576_v16 = vor.u32 %v9648_v59, %v8575_v58 }
 0x375   : > { %v4183_v1 = vmax.f32 %v4087_v20, 0.0  ;;  %v13651_v20 = vld [vmem:[#allocation29_spill] sm:$0xff] }
 0x376   : > { %4438 = vst [vmem:[#allocation2 + $0xa8] sm:$0xf] %v4406_v23  ;;  %v12202_v41 = vpop.f32.mrf.mxu3  ;;  %v12204_v31 = vpop.f32.mrf.mxu0 }
 0x377   : > { %4565 = vst [vmem:[#allocation2 + $0xa4] sm:$0xf] %v4533_v3  ;;  %v4215_v53 = vrot.slane %v4183_v1, 7  ;;  %v4311_v39 = vrot.slane %v4183_v1, 1  ;;  %v4471_v61 = vpack.c.bf16 %v4183_v1, %v4183_v1  ;;  %v13652_v3 = vld [vmem:[#allocation78_spill] sm:$0xff] }
 0x378   : > { %v4029_v15 = vpop.f32.mrf.mxu1 }
 0x379   : > { %v4252_v48 = vsel %vm801_vm0, %v4214_v29, %v4215_v53  ;;  %v4348_v40 = vsel %vm1058_vm1, %v4310_v10, %v4311_v39  ;;  %4503 = vst [vmem:[#allocation2 + $0xb8] sm:$0xf] %v4471_v61  ;;  %v4030_v60 = vadd.f32 %v4029_v15, %v3941_v27  ;;  %v3943_v29 = vadd.f32 %v12072_v7, %v12059_v14 }
 0x37a   : > { %v4279_v35 = vmul.f32 %v4252_v48, %v13649_v9  ;;  %v4374_v4 = vmul.f32 %v4348_v40, %v13650_v54  ;;  %v13653_v54 = vld [vmem:[#allocation43_spill] sm:$0xff] }
 0x37b   : > { %v4088_v13 = vadd.f32 %v4030_v60, %v11857_v5  ;;  %4068 = vmatmul.bf16.gmra.mxu1 %v8408_v17  ;;  %v9649_v5 = vld [vmem:[#allocation2 + $0x94] sm:$0xf] }
 0x37c   : > { %v4407_v6 = vpack.c.bf16 %v4279_v35, %v4279_v35  ;;  %v4534_v55 = vpack.c.bf16 %v4374_v4, %v4374_v4  ;;  %v8584_v38 = vor.u32 %v9649_v5, %v8581_v62 }
 0x37d   : > { %v4184_v46 = vmax.f32 %v4088_v13, 0.0  ;;  %v13654_v13 = vld [vmem:[#allocation65_spill] sm:$0xff] }
 0x37e   : > { %4439 = vst [vmem:[#allocation2 + $0xb4] sm:$0xf] %v4407_v6  ;;  %v12215_v36 = vpop.f32.mrf.mxu3  ;;  %v12217_v10 = vpop.f32.mrf.mxu0  ;;  %v9651_v59 = vld [vmem:[#allocation2 + $0xa0] sm:$0xf0] }
 0x37f   : > { %4566 = vst [vmem:[#allocation2 + $0xb0] sm:$0xf] %v4534_v55  ;;  %v4216_v26 = vrot.slane %v4184_v46, 7  ;;  %v4312_v34 = vrot.slane %v4184_v46, 1  ;;  %v4472_v8 = vpack.c.bf16 %v4184_v46, %v4184_v46 }
 0x380   : > { %v4031_v52 = vpop.f32.mrf.mxu1  ;;  %v8593_v62 = vld [vmem:[#allocation2 + $0xb4] sm:$0xf0] }
 0x381   : > { %v4251_v45 = vsel %vm801_vm0, %v4215_v53, %v4216_v26  ;;  %v4347_v14 = vsel %vm1058_vm1, %v4311_v39, %v4312_v34  ;;  %4504 = vst [vmem:[#allocation2 + $0xc4] sm:$0xf] %v4472_v8  ;;  %v4032_v7 = vadd.f32 %v4031_v52, %v3943_v29  ;;  %5377 = vmatmul.bf16.gmra.mxu0 %v8576_v16  ;;  %v9652_v52 = vld [vmem:[#allocation2 + $0xac] sm:$0xf] }
 0x382   : > { %v4280_v23 = vmul.f32 %v4251_v45, %v13651_v20  ;;  %v4375_v25 = vmul.f32 %v4347_v14, %v13652_v3  ;;  %v3946_v39 = vadd.f32 %v12085_v24, %v12070_v18  ;;  %v3948_v29 = vadd.f32 %v12098_v44, %v12083_v51 }
 0x383   : > { %v4089_v2 = vadd.f32 %v4032_v7, %v11867_v42  ;;  %5293 = vmatmul.bf16.gmra.mxu3 %v8584_v38  ;;  %v8596_v45 = vor.u32 %v9652_v52, %v8593_v62  ;;  %v13655_v7 = vld [vmem:[#allocation42_spill] sm:$0xff] }
 0x384   : > { %v4408_v1 = vpack.c.bf16 %v4280_v23, %v4280_v23  ;;  %v4535_v27 = vpack.c.bf16 %v4375_v25, %v4375_v25  ;;  %v13656_v23 = vld [vmem:[#allocation83_spill] sm:$0xff]  ;;  %v13657_v25 = vld [vmem:[#allocation130_spill] sm:$0xff] }
 0x385   : > { %v4185_v61 = vmax.f32 %v4089_v2, 0.0 }
 0x386   : > { %4440 = vst [vmem:[#allocation2 + $0xc0] sm:$0xf] %v4408_v1  ;;  %v12226_v17 = vpop.f32.mrf.mxu3  ;;  %v12228_v53 = vpop.f32.mrf.mxu0  ;;  %v8599_v52 = vld [vmem:[#allocation2 + $0xb0] sm:$0xf] }
 0x387   : > { %4567 = vst [vmem:[#allocation2 + $0xbc] sm:$0xf] %v4535_v27  ;;  %v4217_v15 = vrot.slane %v4185_v61, 7  ;;  %v4313_v48 = vrot.slane %v4185_v61, 1  ;;  %v4473_v40 = vpack.c.bf16 %v4185_v61, %v4185_v61 }
 0x388   : > { %v4034_v60 = vpop.f32.mrf.mxu1 }
 0x389   : > { %v4250_v42 = vsel %vm801_vm0, %v4216_v26, %v4217_v15  ;;  %v4346_v9 = vsel %vm1058_vm1, %v4312_v34, %v4313_v48  ;;  %4505 = vst [vmem:[#allocation2 + $0xd0] sm:$0xf] %v4473_v40  ;;  %v4035_v35 = vadd.f32 %v4034_v60, %v3946_v39  ;;  %v8587_v34 = vld [vmem:[#allocation2 + $0x98] sm:$0xf] }
 0x38a   : > { %v4281_v4 = vmul.f32 %v4250_v42, %v13653_v54  ;;  %v4376_v6 = vmul.f32 %v4346_v9, %v13654_v13  ;;  %v9686_v9 = vld [vmem:[#allocation10 + $0x38] sm:$0xff] }
 0x38b   : > { %v4090_v55 = vadd.f32 %v4035_v35, %v11878_v32  ;;  %v8588_v32 = vor.u32 %v9651_v59, %v8587_v34  ;;  %5166 = vmatpush.bf16.msra.mxu2 %v9686_v9 }
 0x38c   : > { %v4409_v18 = vpack.c.bf16 %v4281_v4, %v4281_v4  ;;  %v4536_v24 = vpack.c.bf16 %v4376_v6, %v4376_v6  ;;  %v13658_v6 = vld [vmem:[#allocation32_spill] sm:$0xff] }
 0x38d   : > { %v4186_v46 = vmax.f32 %v4090_v55, 0.0 }
 0x38e   : > { %4441 = vst [vmem:[#allocation2 + $0xcc] sm:$0xf] %v4409_v18  ;;  %v12241_v58 = vpop.f32.mrf.mxu3  ;;  %v12243_v26 = vpop.f32.mrf.mxu0  ;;  %v13659_v18 = vld [vmem:[#allocation82_spill] sm:$0xff]  ;;  %v9654_v62 = vld [vmem:[#allocation2 + $0xb8] sm:$0xf0] }
 0x38f   : > { %4568 = vst [vmem:[#allocation2 + $0xc8] sm:$0xf] %v4536_v24  ;;  %v4218_v8 = vrot.slane %v4186_v46, 7  ;;  %v4314_v5 = vrot.slane %v4186_v46, 1  ;;  %v4474_v16 = vpack.c.bf16 %v4186_v46, %v4186_v46 }
 0x390   : > { %v4036_v38 = vpop.f32.mrf.mxu1  ;;  %v8605_v34 = vld [vmem:[#allocation2 + $0xcc] sm:$0xf0] }
 0x391   : > { %v4249_v14 = vsel %vm801_vm0, %v4217_v15, %v4218_v8  ;;  %v4345_v51 = vsel %vm1058_vm1, %v4313_v48, %v4314_v5  ;;  %4506 = vst [vmem:[#allocation2 + $0xdc] sm:$0xf] %v4474_v16  ;;  %v4037_v44 = vadd.f32 %v4036_v38, %v3948_v29  ;;  %5382 = vmatmul.bf16.gmra.mxu0 %v8588_v32 }
 0x392   : > { %v4282_v20 = vmul.f32 %v4249_v14, %v13655_v7  ;;  %v4377_v3 = vmul.f32 %v4345_v51, %v13656_v23  ;;  %v3951_v48 = vadd.f32 %v12113_v21, %v12096_v30  ;;  %v13660_v30 = vld [vmem:[#allocation114_spill] sm:$0xff]  ;;  %v9655_v14 = vld [vmem:[#allocation2 + $0xc4] sm:$0xf]  ;;  %v8600_v51 = vor.u32 %v9654_v62, %v8599_v52  ;;  %v13661_v23 = vld [vmem:[#allocation35_spill] sm:$0xff] }
 0x393   : > { %v4091_v2 = vadd.f32 %v4037_v44, %v13657_v25  ;;  %5298 = vmatmul.bf16.gmra.mxu3 %v8596_v45  ;;  %v8608_v7 = vor.u32 %v9655_v14, %v8605_v34  ;;  %v13662_v25 = vld [vmem:[#allocation69_spill] sm:$0xff]  ;;  %v3958_v52 = vadd.f32 %v12150_v22, %v12137_v49 }
 0x394   : > { %v4410_v1 = vpack.c.bf16 %v4282_v20, %v4282_v20  ;;  %v4537_v27 = vpack.c.bf16 %v4377_v3, %v4377_v3 }
 0x395   : > { %v4187_v61 = vmax.f32 %v4091_v2, 0.0 }
 0x396   : > { %4442 = vst [vmem:[#allocation2 + $0xd8] sm:$0xf] %v4410_v1  ;;  %v12252_v39 = vpop.f32.mrf.mxu3  ;;  %v12254_v15 = vpop.f32.mrf.mxu0  ;;  %v13663_v1 = vld [vmem:[#allocation131_spill] sm:$0xff] }
 0x397   : > { %4569 = vst [vmem:[#allocation2 + $0xd4] sm:$0xf] %v4537_v27  ;;  %v4219_v40 = vrot.slane %v4187_v61, 7  ;;  %v4315_v60 = vrot.slane %v4187_v61, 1  ;;  %v4475_v42 = vpack.c.bf16 %v4187_v61, %v4187_v61 }
 0x398   : > { %v4039_v35 = vpop.f32.mrf.mxu1 }
 0x399   : > { %v4248_v54 = vsel %vm801_vm0, %v4218_v8, %v4219_v40  ;;  %v4344_v4 = vsel %vm1058_vm1, %v4314_v5, %v4315_v60  ;;  %4507 = vst [vmem:[#allocation2 + $0xe8] sm:$0xf] %v4475_v42  ;;  %v4040_v13 = vadd.f32 %v4039_v35, %v3951_v48  ;;  %v3953_v8 = vadd.f32 %v12124_v43, %v12111_v57 }
 0x39a   : > { %v4283_v55 = vmul.f32 %v4248_v54, %v13658_v6  ;;  %v4378_v24 = vmul.f32 %v4344_v4, %v13659_v18 }
 0x39b   : > { %v4092_v21 = vadd.f32 %v4040_v13, %v13660_v30 }
 0x39c   : > { %v4411_v59 = vpack.c.bf16 %v4283_v55, %v4283_v55  ;;  %v4538_v46 = vpack.c.bf16 %v4378_v24, %v4378_v24  ;;  %v13664_v24 = vld [vmem:[#allocation51_spill] sm:$0xff] }
 0x39d   : > { %v4188_v29 = vmax.f32 %v4092_v21, 0.0  ;;  %v13665_v21 = vld [vmem:[#allocation87_spill] sm:$0xff] }
 0x39e   : > { %4443 = vst [vmem:[#allocation2 + $0xe4] sm:$0xf] %v4411_v59  ;;  %v12267_v16 = vpop.f32.mrf.mxu3  ;;  %v12269_v5 = vpop.f32.mrf.mxu0 }
 0x39f   : > { %4570 = vst [vmem:[#allocation2 + $0xe0] sm:$0xf] %v4538_v46  ;;  %v4220_v32 = vrot.slane %v4188_v29, 7  ;;  %v4316_v38 = vrot.slane %v4188_v29, 1  ;;  %v4476_v45 = vpack.c.bf16 %v4188_v29, %v4188_v29  ;;  %v13666_v46 = vld [vmem:[#allocation118_spill] sm:$0xff] }
 0x3a0   : > { %v4041_v44 = vpop.f32.mrf.mxu1  ;;  %v9657_v29 = vld [vmem:[#allocation2 + $0xd0] sm:$0xf0] }
 0x3a1   : > { %v4247_v20 = vsel %vm801_vm0, %v4219_v40, %v4220_v32  ;;  %v4343_v57 = vsel %vm1058_vm1, %v4315_v60, %v4316_v38  ;;  %4508 = vst [vmem:[#allocation2 + $0xf4] sm:$0xf] %v4476_v45  ;;  %v4042_v43 = vadd.f32 %v4041_v44, %v3953_v8  ;;  %5387 = vmatmul.bf16.gmra.mxu0 %v8600_v51  ;;  %v8617_v8 = vld [vmem:[#allocation2 + $0xe4] sm:$0xf0] }
 0x3a2   : > { %v4284_v3 = vmul.f32 %v4247_v20, %v13661_v23  ;;  %v4379_v2 = vmul.f32 %v4343_v57, %v13662_v25  ;;  %v3956_v60 = vadd.f32 %v12139_v50, %v12122_v28  ;;  %v8611_v45 = vld [vmem:[#allocation2 + $0xc8] sm:$0xf] }
 0x3a3   : > { %v4093_v27 = vadd.f32 %v4042_v43, %v13663_v1  ;;  %5303 = vmatmul.bf16.gmra.mxu3 %v8608_v7  ;;  %v9658_v7 = vld [vmem:[#allocation2 + $0xdc] sm:$0xf]  ;;  %v8612_v20 = vor.u32 %v9657_v29, %v8611_v45 }
 0x3a4   : > { %v4412_v61 = vpack.c.bf16 %v4284_v3, %v4284_v3  ;;  %v4539_v48 = vpack.c.bf16 %v4379_v2, %v4379_v2  ;;  %v8620_v43 = vor.u32 %v9658_v7, %v8617_v8  ;;  %v13668_v3 = vld [vmem:[#allocation55_spill] sm:$0xff]  ;;  %v13669_v2 = vld [vmem:[#allocation86_spill] sm:$0xff] }
 0x3a5   : > { %v4189_v42 = vmax.f32 %v4093_v27, 0.0  ;;  %v13670_v27 = vld [vmem:[#allocation137_spill] sm:$0xff] }
 0x3a6   : > { %4444 = vst [vmem:[#allocation2 + $0xf0] sm:$0xf] %v4412_v61  ;;  %v12278_v9 = vpop.f32.mrf.mxu3  ;;  %v12280_v40 = vpop.f32.mrf.mxu0  ;;  %v8623_v7 = vld [vmem:[#allocation2 + $0xe0] sm:$0xf] }
 0x3a7   : > { %4571 = vst [vmem:[#allocation2 + $0xec] sm:$0xf] %v4539_v48  ;;  %v4221_v35 = vrot.slane %v4189_v42, 7  ;;  %v4317_v54 = vrot.slane %v4189_v42, 1  ;;  %v4477_v4 = vpack.c.bf16 %v4189_v42, %v4189_v42 }
 0x3a8   : > { %v4044_v13 = vpop.f32.mrf.mxu1 }
 0x3a9   : > { %v4246_v6 = vsel %vm801_vm0, %v4220_v32, %v4221_v35  ;;  %v4342_v55 = vsel %vm1058_vm1, %v4316_v38, %v4317_v54  ;;  %4509 = vst [vmem:[#allocation2 + $0x100] sm:$0xf] %v4477_v4  ;;  %v4045_v18 = vadd.f32 %v4044_v13, %v3956_v60 }
 0x3aa   : > { %v4285_v30 = vmul.f32 %v4246_v6, %v13664_v24  ;;  %v4380_v59 = vmul.f32 %v4342_v55, %v13665_v21 }
 0x3ab   : > { %v4094_v62 = vadd.f32 %v4045_v18, %v13666_v46  ;;  %v9685_v18 = vld [vmem:[#allocation10 + $0x30] sm:$0xff]  ;;  %v13672_v46 = vld [vmem:[#allocation54_spill] sm:$0xff] }
 0x3ac   : > { %v4413_v28 = vpack.c.bf16 %v4285_v30, %v4285_v30  ;;  %v4540_v50 = vpack.c.bf16 %v4380_v59, %v4380_v59  ;;  %5167 = vmatpush.bf16.msra.mxu2 %v9685_v18 }
 0x3ad   : > { %v4190_v34 = vmax.f32 %v4094_v62, 0.0 }
 0x3ae   : > { %4445 = vst [vmem:[#allocation2 + $0xfc] sm:$0xf] %v4413_v28  ;;  %v12293_v32 = vpop.f32.mrf.mxu3  ;;  %v12295_v38 = vpop.f32.mrf.mxu0  ;;  %v13673_v28 = vld [vmem:[#allocation73_spill] sm:$0xff] }
 0x3af   : > { %13667 = vst [vmem:[#allocation119_spill] sm:$0xff] %v12293_v32  ;;  %v4222_v14 = vrot.slane %v4190_v34, 7  ;;  %v4318_v51 = vrot.slane %v4190_v34, 1  ;;  %v4478_v44 = vpack.c.bf16 %v4190_v34, %v4190_v34  ;;  %v9660_v8 = vld [vmem:[#allocation2 + $0xe8] sm:$0xf0] }
 0x3b0   : > { %4572 = vst [vmem:[#allocation2 + $0xf8] sm:$0xf] %v4540_v50  ;;  %v4046_v57 = vpop.f32.mrf.mxu1  ;;  %v8629_v45 = vld [vmem:[#allocation2 + $0xfc] sm:$0xf0] }
 0x3b1   : > { %v4245_v23 = vsel %vm801_vm0, %v4221_v35, %v4222_v14  ;;  %v4341_v49 = vsel %vm1058_vm1, %v4317_v54, %v4318_v51  ;;  %4510 = vst [vmem:[#allocation2 + $0x10c] sm:$0xf] %v4478_v44  ;;  %v4047_v22 = vadd.f32 %v4046_v57, %v3958_v52  ;;  %5392 = vmatmul.bf16.gmra.mxu0 %v8612_v20 }
 0x3b2   : > { %v4286_v25 = vmul.f32 %v4245_v23, %v13668_v3  ;;  %v4381_v1 = vmul.f32 %v4341_v49, %v13669_v2  ;;  %v3961_v54 = vadd.f32 %v12165_v19, %v12148_v63  ;;  %v13674_v63 = vld [vmem:[#allocation135_spill] sm:$0xff]  ;;  %v9661_v23 = vld [vmem:[#allocation2 + $0xf4] sm:$0xf]  ;;  %v8624_v49 = vor.u32 %v9660_v8, %v8623_v7  ;;  %v13675_v2 = vld [vmem:[#allocation41_spill] sm:$0xff] }
 0x3b3   : > { %v4095_v61 = vadd.f32 %v4047_v22, %v13670_v27  ;;  %5308 = vmatmul.bf16.gmra.mxu3 %v8620_v43  ;;  %v8632_v3 = vor.u32 %v9661_v23, %v8629_v45  ;;  %v13676_v27 = vld [vmem:[#allocation91_spill] sm:$0xff] }
 0x3b4   : > { %v4414_v48 = vpack.c.bf16 %v4286_v25, %v4286_v25  ;;  %v4541_v42 = vpack.c.bf16 %v4381_v1, %v4381_v1  ;;  %v9684_v45 = vld [vmem:[#allocation10 + $0x28] sm:$0xff] }
 0x3b5   : > { %v4191_v60 = vmax.f32 %v4095_v61, 0.0  ;;  %5168 = vmatpush.bf16.msra.mxu2 %v9684_v45  ;;  %v13685_v45 = vld [vmem:[#allocation94_spill] sm:$0xff] }
 0x3b6   : > { %4446 = vst [vmem:[#allocation2 + $0x108] sm:$0xf] %v4414_v48  ;;  %v12304_v4 = vpop.f32.mrf.mxu3  ;;  %v12306_v35 = vpop.f32.mrf.mxu0  ;;  %v13677_v48 = vld [vmem:[#allocation132_spill] sm:$0xff] }
 0x3b7   : > { %13671 = vst [vmem:[#allocation121_spill] sm:$0xff] %v12306_v35  ;;  %v4223_v13 = vrot.slane %v4191_v60, 7  ;;  %v4319_v6 = vrot.slane %v4191_v60, 1  ;;  %v4479_v55 = vpack.c.bf16 %v4191_v60, %v4191_v60  ;;  %v8635_v23 = vld [vmem:[#allocation2 + $0xf8] sm:$0xf] }
 0x3b8   : > { %4573 = vst [vmem:[#allocation2 + $0x104] sm:$0xf] %v4541_v42  ;;  %v4049_v24 = vpop.f32.mrf.mxu1 }
 0x3b9   : > { %v4244_v30 = vsel %vm801_vm0, %v4222_v14, %v4223_v13  ;;  %v4340_v21 = vsel %vm1058_vm1, %v4318_v51, %v4319_v6  ;;  %4511 = vst [vmem:[#allocation2 + $0x118] sm:$0xf] %v4479_v55  ;;  %v4050_v59 = vadd.f32 %v4049_v24, %v3961_v54  ;;  %v3963_v14 = vadd.f32 %v12176_v12, %v12163_v11 }
 0x3ba   : > { %v4287_v62 = vmul.f32 %v4244_v30, %v13672_v46  ;;  %v4382_v50 = vmul.f32 %v4340_v21, %v13673_v28 }
 0x3bb   : > { %v4096_v19 = vadd.f32 %v4050_v59, %v13674_v63 }
 0x3bc   : > { %v4415_v29 = vpack.c.bf16 %v4287_v62, %v4287_v62  ;;  %v4542_v34 = vpack.c.bf16 %v4382_v50, %v4382_v50  ;;  %v13678_v50 = vld [vmem:[#allocation59_spill] sm:$0xff] }
 0x3bd   : > { %v4192_v52 = vmax.f32 %v4096_v19, 0.0  ;;  %v13679_v19 = vld [vmem:[#allocation90_spill] sm:$0xff] }
 0x3be   : > { %4447 = vst [vmem:[#allocation2 + $0x114] sm:$0xf] %v4415_v29  ;;  %v12319_v44 = vpop.f32.mrf.mxu3  ;;  %v12321_v51 = vpop.f32.mrf.mxu0 }
 0x3bf   : > { %4574 = vst [vmem:[#allocation2 + $0x110] sm:$0xf] %v4542_v34  ;;  %v4224_v20 = vrot.slane %v4192_v52, 7  ;;  %v4320_v57 = vrot.slane %v4192_v52, 1  ;;  %v4480_v43 = vpack.c.bf16 %v4192_v52, %v4192_v52  ;;  %v13680_v34 = vld [vmem:[#allocation122_spill] sm:$0xff] }
 0x3c0   : > { %v4051_v22 = vpop.f32.mrf.mxu1  ;;  %v9663_v52 = vld [vmem:[#allocation2 + $0x100] sm:$0xf0]  ;;  %v8641_v7 = vld [vmem:[#allocation2 + $0x114] sm:$0xf0] }
 0x3c1   : > { %v4243_v25 = vsel %vm801_vm0, %v4223_v13, %v4224_v20  ;;  %v4339_v11 = vsel %vm1058_vm1, %v4319_v6, %v4320_v57  ;;  %4512 = vst [vmem:[#allocation2 + $0x124] sm:$0xf] %v4480_v43  ;;  %v4052_v12 = vadd.f32 %v4051_v22, %v3963_v14  ;;  %5397 = vmatmul.bf16.gmra.mxu0 %v8624_v49 }
 0x3c2   : > { %v4288_v1 = vmul.f32 %v4243_v25, %v13675_v2  ;;  %v4383_v61 = vmul.f32 %v4339_v11, %v13676_v27  ;;  %v3966_v6 = vadd.f32 %v12191_v56, %v12174_v33  ;;  %v9664_v25 = vld [vmem:[#allocation2 + $0x10c] sm:$0xf]  ;;  %v8636_v11 = vor.u32 %v9663_v52, %v8635_v23 }
 0x3c3   : > { %v4097_v42 = vadd.f32 %v4052_v12, %v13677_v48  ;;  %5313 = vmatmul.bf16.gmra.mxu3 %v8632_v3  ;;  %v8644_v2 = vor.u32 %v9664_v25, %v8641_v7  ;;  %v9758_v25 = vld [vmem:[#allocation10 + $0xf8] sm:$0xff] }
 0x3c4   : > { %v4416_v60 = vpack.c.bf16 %v4288_v1, %v4288_v1  ;;  %v4543_v54 = vpack.c.bf16 %v4383_v61, %v4383_v61  ;;  %v9683_v1 = vld [vmem:[#allocation10 + $0x20] sm:$0xff]  ;;  %6042 = vmatpush.bf16.msrb.mxu1 %v9758_v25 }
 0x3c5   : > { %v4193_v55 = vmax.f32 %v4097_v42, 0.0  ;;  %v13681_v61 = vld [vmem:[#allocation58_spill] sm:$0xff]  ;;  %v13682_v42 = vld [vmem:[#allocation77_spill] sm:$0xff]  ;;  %5169 = vmatpush.bf16.msra.mxu2 %v9683_v1 }
 0x3c6   : > { %4448 = vst [vmem:[#allocation2 + $0x120] sm:$0xf] %v4416_v60  ;;  %v12330_v18 = vpop.f32.mrf.mxu3  ;;  %v12332_v13 = vpop.f32.mrf.mxu0  ;;  %v8647_v1 = vld [vmem:[#allocation2 + $0x110] sm:$0xf] }
 0x3c7   : > { %4575 = vst [vmem:[#allocation2 + $0x11c] sm:$0xf] %v4543_v54  ;;  %v4225_v24 = vrot.slane %v4193_v55, 7  ;;  %v4321_v30 = vrot.slane %v4193_v55, 1  ;;  %v4481_v21 = vpack.c.bf16 %v4193_v55, %v4193_v55  ;;  %v13683_v54 = vld [vmem:[#allocation133_spill] sm:$0xff] }
 0x3c8   : > { %v4054_v59 = vpop.f32.mrf.mxu1 }
 0x3c9   : > { %v4242_v46 = vsel %vm801_vm0, %v4224_v20, %v4225_v24  ;;  %v4338_v62 = vsel %vm1058_vm1, %v4320_v57, %v4321_v30  ;;  %4513 = vst [vmem:[#allocation2 + $0x130] sm:$0xf] %v4481_v21  ;;  %v4055_v28 = vadd.f32 %v4054_v59, %v3966_v6  ;;  %v3968_v20 = vadd.f32 %v12204_v31, %v12189_v47  ;;  %v9682_v59 = vld [vmem:[#allocation10 + $0x18] sm:$0xff] }
 0x3ca   : > { %v4289_v63 = vmul.f32 %v4242_v46, %v13678_v50  ;;  %v4384_v29 = vmul.f32 %v4338_v62, %v13679_v19  ;;  %5170 = vmatpush.bf16.msra.mxu2 %v9682_v59 }
 0x3cb   : > { %v4098_v8 = vadd.f32 %v4055_v28, %v13680_v34 }
 0x3cc   : > { %v4417_v33 = vpack.c.bf16 %v4289_v63, %v4289_v63  ;;  %v4544_v56 = vpack.c.bf16 %v4384_v29, %v4384_v29  ;;  %v9681_v29 = vld [vmem:[#allocation10 + $0x10] sm:$0xff] }
 0x3cd   : > { %v4194_v14 = vmax.f32 %v4098_v8, 0.0 }
 0x3ce   : > { %4449 = vst [vmem:[#allocation2 + $0x12c] sm:$0xf] %v4417_v33  ;;  %v12345_v43 = vpop.f32.mrf.mxu3  ;;  %v12347_v57 = vpop.f32.mrf.mxu0  ;;  %5171 = vmatpush.bf16.msra.mxu2 %v9681_v29  ;;  %v9666_v23 = vld [vmem:[#allocation2 + $0x118] sm:$0xf0]  ;;  %v13689_v29 = vld [vmem:[#allocation134_spill] sm:$0xff] }
 0x3cf   : > { %4576 = vst [vmem:[#allocation2 + $0x128] sm:$0xf] %v4544_v56  ;;  %v4226_v49 = vrot.slane %v4194_v14, 7  ;;  %v4322_v22 = vrot.slane %v4194_v14, 1  ;;  %v4482_v3 = vpack.c.bf16 %v4194_v14, %v4194_v14  ;;  %v13684_v56 = vld [vmem:[#allocation45_spill] sm:$0xff] }
 0x3d0   : > { %v4056_v12 = vpop.f32.mrf.mxu1 }
 0x3d1   : > { %v4241_v27 = vsel %vm801_vm0, %v4225_v24, %v4226_v49  ;;  %v4337_v47 = vsel %vm1058_vm1, %v4321_v30, %v4322_v22  ;;  %4514 = vst [vmem:[#allocation2 + $0x13c] sm:$0xf] %v4482_v3  ;;  %v4057_v31 = vadd.f32 %v4056_v12, %v3968_v20  ;;  %5402 = vmatmul.bf16.gmra.mxu0 %v8636_v11  ;;  %v9680_v3 = vld [vmem:[#allocation10 + $0x8] sm:$0xff]  ;;  %v8653_v12 = vld [vmem:[#allocation2 + $0x12c] sm:$0xf0] }
 0x3d2   : > { %v4290_v48 = vmul.f32 %v4241_v27, %v13681_v61  ;;  %v4385_v60 = vmul.f32 %v4337_v47, %v13682_v42  ;;  %v3971_v30 = vadd.f32 %v12217_v10, %v12202_v41  ;;  %v13686_v41 = vld [vmem:[#allocation125_spill] sm:$0xff]  ;;  %5172 = vmatpush.bf16.msra.mxu2 %v9680_v3  ;;  %v9667_v61 = vld [vmem:[#allocation2 + $0x124] sm:$0xf]  ;;  %v9755_v3 = vld [vmem:[#allocation10 + $0xe0] sm:$0xff] }
 0x3d3   : > { %v4099_v55 = vadd.f32 %v4057_v31, %v13683_v54  ;;  %5318 = vmatmul.bf16.gmra.mxu3 %v8644_v2  ;;  %v9679_v54 = vld [vmem:[#allocation10] sm:$0xff] }
 0x3d4   : > { %v4418_v6 = vpack.c.bf16 %v4290_v48, %v4290_v48  ;;  %v4545_v21 = vpack.c.bf16 %v4385_v60, %v4385_v60  ;;  %v8648_v48 = vor.u32 %v9666_v23, %v8647_v1  ;;  %v8656_v60 = vor.u32 %v9667_v61, %v8653_v12 }
 0x3d5   : > { %v4195_v46 = vmax.f32 %v4099_v55, 0.0  ;;  %v9757_v55 = vld [vmem:[#allocation10 + $0xf0] sm:$0xff] }
 0x3d6   : > { %4450 = vst [vmem:[#allocation2 + $0x138] sm:$0xf] %v4418_v6  ;;  %v12356_v24 = vpop.f32.mrf.mxu3  ;;  %v12358_v62 = vpop.f32.mrf.mxu0  ;;  %5173 = vmatpush.bf16.msra.mxu2 %v9679_v54  ;;  %6043 = vmatpush.bf16.msrb.mxu1 %v9757_v55  ;;  %v9754_v55 = vld [vmem:[#allocation10 + $0xd8] sm:$0xff] }
 0x3d7   : > { %4577 = vst [vmem:[#allocation2 + $0x134] sm:$0xf] %v4545_v21  ;;  %v4227_v28 = vrot.slane %v4195_v46, 7  ;;  %v4323_v50 = vrot.slane %v4195_v46, 1  ;;  %v4483_v63 = vpack.c.bf16 %v4195_v46, %v4195_v46  ;;  %v13687_v21 = vld [vmem:[#allocation47_spill] sm:$0xff]  ;;  %v13688_v46 = vld [vmem:[#allocation93_spill] sm:$0xff] }
 0x3d8   : > { %v4059_v19 = vpop.f32.mrf.mxu1 }
 0x3d9   : > { %v4240_v34 = vsel %vm801_vm0, %v4226_v49, %v4227_v28  ;;  %v4336_v8 = vsel %vm1058_vm1, %v4322_v22, %v4323_v50  ;;  %4515 = vst [vmem:[#allocation2 + $0x148] sm:$0xf] %v4483_v63  ;;  %v4060_v33 = vadd.f32 %v4059_v19, %v3971_v30  ;;  %v3973_v49 = vadd.f32 %v12228_v53, %v12215_v36  ;;  %v8507_v63 = vld [vmem:[#allocation2] sm:$0xf]  ;;  %v9632_v19 = vld [vmem:[#allocation2 + $0x8] sm:$0xf0] }
 0x3da   : > { %v4291_v52 = vmul.f32 %v4240_v34, %v13684_v56  ;;  %v4386_v14 = vmul.f32 %v4336_v8, %v13685_v45  ;;  %v8508_v8 = vor.u32 %v9632_v19, %v8507_v63  ;;  %v9756_v56 = vld [vmem:[#allocation10 + $0xe8] sm:$0xff] }
 0x3db   : > { %v4100_v10 = vadd.f32 %v4060_v33, %v13686_v41  ;;  %6044 = vmatpush.bf16.msrb.mxu1 %v9756_v56  ;;  %v9771_v56 = vld [vmem:[#allocation10 + $0x160] sm:$0xff] }
 0x3dc   : > { %v4419_v7 = vpack.c.bf16 %v4291_v52, %v4291_v52  ;;  %v4546_v20 = vpack.c.bf16 %v4386_v14, %v4386_v14  ;;  %5174 = vmatmul.bf16.vlgmr.msra.gmra.mxu2 %v8508_v8  ;;  %v3976_v14 = vadd.f32 %v12243_v26, %v12226_v17  ;;  %v13692_v26 = vld [vmem:[#allocation127_spill] sm:$0xff] }
 0x3dd   : > { %v4196_v11 = vmax.f32 %v4100_v10, 0.0 }
 0x3de   : > { %4451 = vst [vmem:[#allocation2 + $0x144] sm:$0xf] %v4419_v7  ;;  %v12371_v22 = vpop.f32.mrf.mxu3  ;;  %v12373_v2 = vpop.f32.mrf.mxu0  ;;  %v9669_v54 = vld [vmem:[#allocation2 + $0x130] sm:$0xf0] }
 0x3df   : > { %4578 = vst [vmem:[#allocation2 + $0x140] sm:$0xf] %v4546_v20  ;;  %v4228_v27 = vrot.slane %v4196_v11, 7  ;;  %v4324_v47 = vrot.slane %v4196_v11, 1  ;;  %v4484_v31 = vpack.c.bf16 %v4196_v11, %v4196_v11  ;;  %v9774_v20 = vld [vmem:[#allocation10 + $0x178] sm:$0xff]  ;;  %6045 = vmatpush.bf16.msrb.mxu1 %v9755_v3  ;;  %v13695_v3 = vld [vmem:[#allocation136_spill] sm:$0xff] }
 0x3e0   : > { %v4061_v42 = vpop.f32.mrf.mxu1  ;;  %6220 = vmatpush.bf16.msra.mxu3 %v9774_v20 }
 0x3e1   : > { %v4239_v36 = vsel %vm801_vm0, %v4227_v28, %v4228_v27  ;;  %v4335_v53 = vsel %vm1058_vm1, %v4323_v50, %v4324_v47  ;;  %4516 = vst [vmem:[#allocation2 + $0x154] sm:$0xf] %v4484_v31  ;;  %v4062_v6 = vadd.f32 %v4061_v42, %v3973_v49  ;;  %5407 = vmatmul.bf16.gmra.mxu0 %v8648_v48  ;;  %v13690_v49 = vld [vmem:[#allocation46_spill] sm:$0xff]  ;;  %v13691_v31 = vld [vmem:[#allocation81_spill] sm:$0xff]  ;;  %v9773_v48 = vld [vmem:[#allocation10 + $0x170] sm:$0xff] }
 0x3e2   : > { %v4292_v59 = vmul.f32 %v4239_v36, %v13687_v21  ;;  %v4387_v30 = vmul.f32 %v4335_v53, %v13688_v46  ;;  %v8659_v21 = vld [vmem:[#allocation2 + $0x128] sm:$0xf] }
 0x3e3   : > { %v4101_v34 = vadd.f32 %v4062_v6, %v13689_v29  ;;  %5323 = vmatmul.bf16.gmra.mxu3 %v8656_v60  ;;  %v9670_v6 = vld [vmem:[#allocation2 + $0x13c] sm:$0xf]  ;;  %6046 = vmatpush.bf16.msrb.mxu1 %v9754_v55  ;;  %v8660_v19 = vor.u32 %v9669_v54, %v8659_v21 }
 0x3e4   : > { %v4420_v33 = vpack.c.bf16 %v4292_v59, %v4292_v59  ;;  %v4547_v28 = vpack.c.bf16 %v4387_v30, %v4387_v30  ;;  %6221 = vmatpush.bf16.msra.mxu3 %v9773_v48  ;;  %v9772_v29 = vld [vmem:[#allocation10 + $0x168] sm:$0xff] }
 0x3e5   : > { %v4197_v52 = vmax.f32 %v4101_v34, 0.0 }
 0x3e6   : > { %4452 = vst [vmem:[#allocation2 + $0x150] sm:$0xf] %v4420_v33  ;;  %v12382_v50 = vpop.f32.mrf.mxu3  ;;  %v12384_v45 = vpop.f32.mrf.mxu0  ;;  %v9753_v33 = vld [vmem:[#allocation10 + $0xd0] sm:$0xff] }
 0x3e7   : > { %4579 = vst [vmem:[#allocation2 + $0x14c] sm:$0xf] %v4547_v28  ;;  %v4229_v41 = vrot.slane %v4197_v52, 7  ;;  %v4325_v10 = vrot.slane %v4197_v52, 1  ;;  %v4485_v7 = vpack.c.bf16 %v4197_v52, %v4197_v52  ;;  %v13693_v52 = vld [vmem:[#allocation50_spill] sm:$0xff]  ;;  %6047 = vmatpush.bf16.msrb.mxu1 %v9753_v33 }
 0x3e8   : > { %v4064_v23 = vpop.f32.mrf.mxu1  ;;  %6222 = vmatpush.bf16.msra.mxu3 %v9772_v29 }
 0x3e9   : > { %v4238_v25 = vsel %vm801_vm0, %v4228_v27, %v4229_v41  ;;  %v4334_v11 = vsel %vm1058_vm1, %v4324_v47, %v4325_v10  ;;  %4517 = vst [vmem:[#allocation2 + $0x160] sm:$0xf] %v4485_v7  ;;  %v4065_v12 = vadd.f32 %v4064_v23, %v3976_v14  ;;  %v8665_v27 = vld [vmem:[#allocation2 + $0x144] sm:$0xf0]  ;;  %v3978_v47 = vadd.f32 %v12254_v15, %v12241_v58  ;;  %v9752_v23 = vld [vmem:[#allocation10 + $0xc8] sm:$0xff] }
 0x3ea   : > { %v4293_v1 = vmul.f32 %v4238_v25, %v13690_v49  ;;  %v4388_v17 = vmul.f32 %v4334_v11, %v13691_v31  ;;  %v8668_v8 = vor.u32 %v9670_v6, %v8665_v27  ;;  %v13694_v7 = vld [vmem:[#allocation97_spill] sm:$0xff]  ;;  %v13696_v27 = vld [vmem:[#allocation38_spill] sm:$0xff]  ;;  %v13697_v6 = vld [vmem:[#allocation96_spill] sm:$0xff] }
 0x3eb   : > { %v4102_v61 = vadd.f32 %v4065_v12, %v13692_v26  ;;  %v9830_v11 = vld [vmem:[#allocation10 + $0x1b8] sm:$0xff]  ;;  %6048 = vmatpush.bf16.msrb.mxu1 %v9752_v23  ;;  %v9673_v23 = vld [vmem:[#allocation2 + $0x154] sm:$0xf] }
 0x3ec   : > { %v4421_v42 = vpack.c.bf16 %v4293_v1, %v4293_v1  ;;  %v4548_v60 = vpack.c.bf16 %v4388_v17, %v4388_v17  ;;  %6223 = vmatpush.bf16.msra.mxu3 %v9771_v56  ;;  %v9770_v1 = vld [vmem:[#allocation10 + $0x158] sm:$0xff]  ;;  %6918 = vmatpush.bf16.msra.mxu0 %v9830_v11  ;;  %v9751_v17 = vld [vmem:[#allocation10 + $0xc0] sm:$0xff]  ;;  %v8671_v56 = vld [vmem:[#allocation2 + $0x140] sm:$0xf] }
 0x3ed   : > { %v4198_v36 = vmax.f32 %v4102_v61, 0.0 }
 0x3ee   : > { %4453 = vst [vmem:[#allocation2 + $0x15c] sm:$0xf] %v4421_v42  ;;  %v12397_v53 = vpop.f32.mrf.mxu3  ;;  %v12399_v63 = vpop.f32.mrf.mxu0 }
 0x3ef   : > { %4580 = vst [vmem:[#allocation2 + $0x158] sm:$0xf] %v4548_v60  ;;  %v4230_v59 = vrot.slane %v4198_v36, 7  ;;  %v4326_v46 = vrot.slane %v4198_v36, 1  ;;  %v4486_v30 = vpack.c.bf16 %v4198_v36, %v4198_v36  ;;  %v9829_v60 = vld [vmem:[#allocation10 + $0x1b0] sm:$0xff]  ;;  %6049 = vmatpush.bf16.msrb.mxu1 %v9751_v17 }
 0x3f0   : > { %v4066_v34 = vpop.f32.mrf.mxu1  ;;  %6224 = vmatpush.bf16.msra.mxu3 %v9770_v1  ;;  %v9769_v36 = vld [vmem:[#allocation10 + $0x150] sm:$0xff]  ;;  %6919 = vmatpush.bf16.msra.mxu0 %v9829_v60  ;;  %v13701_v1 = vld [vmem:[#allocation85_spill] sm:$0xff] }
 0x3f1   : > { %v4237_v58 = vsel %vm801_vm0, %v4229_v41, %v4230_v59  ;;  %v4333_v15 = vsel %vm1058_vm1, %v4325_v10, %v4326_v46  ;;  %4518 = vst [vmem:[#allocation2 + $0x16c] sm:$0xf] %v4486_v30  ;;  %v4067_v28 = vadd.f32 %v4066_v34, %v3978_v47  ;;  %5412 = vmatmul.bf16.gmra.mxu0 %v8660_v19  ;;  %v9828_v30 = vld [vmem:[#allocation10 + $0x1a8] sm:$0xff]  ;;  %v13698_v19 = vld [vmem:[#allocation128_spill] sm:$0xff] }
 0x3f2   : > { %v4294_v14 = vmul.f32 %v4237_v58, %v13693_v52  ;;  %v4389_v20 = vmul.f32 %v4333_v15, %v13694_v7  ;;  %v3981_v10 = vadd.f32 %v12269_v5, %v12252_v39  ;;  %v9768_v58 = vld [vmem:[#allocation10 + $0x148] sm:$0xff]  ;;  %v3983_v15 = vadd.f32 %v12280_v40, %v12267_v16  ;;  %v9827_v52 = vld [vmem:[#allocation10 + $0x1a0] sm:$0xff] }
 0x3f3   : > { %v4103_v25 = vadd.f32 %v4067_v28, %v13695_v3  ;;  %5328 = vmatmul.bf16.gmra.mxu3 %v8668_v8  ;;  %v9672_v8 = vld [vmem:[#allocation2 + $0x148] sm:$0xf0] }
 0x3f4   : > { %v4422_v12 = vpack.c.bf16 %v4294_v14, %v4294_v14  ;;  %v4549_v41 = vpack.c.bf16 %v4389_v20, %v4389_v20  ;;  %6225 = vmatpush.bf16.msra.mxu3 %v9769_v36  ;;  %6920 = vmatpush.bf16.msra.mxu0 %v9828_v30  ;;  %v8672_v3 = vor.u32 %v9672_v8, %v8671_v56  ;;  %v13704_v30 = vld [vmem:[#allocation116_spill] sm:$0xff] }
 0x3f5   : > { %v4199_v49 = vmax.f32 %v4103_v25, 0.0  ;;  %v13706_v8 = vld [vmem:[#allocation28_spill] sm:$0xff] }
 0x3f6   : > { %4454 = vst [vmem:[#allocation2 + $0x168] sm:$0xf] %v4422_v12  ;;  %v12410_v31 = vpop.f32.mrf.mxu3  ;;  %v12416_v55 = vpop.f32.mrf.mxu0  ;;  %v8683_v37 = vld [vmem:[#allocation2 + $0x158] sm:$0xf] }
 0x3f7   : > { %4581 = vst [vmem:[#allocation2 + $0x164] sm:$0xf] %v4549_v41  ;;  %v4231_v26 = vrot.slane %v4199_v49, 7  ;;  %v4327_v61 = vrot.slane %v4199_v49, 1  ;;  %v4487_v48 = vpack.c.bf16 %v4199_v49, %v4199_v49  ;;  %v9767_v41 = vld [vmem:[#allocation10 + $0x140] sm:$0xff] }
 0x3f8   : > { %v4069_v42 = vpop.f32.mrf.mxu1  ;;  %6226 = vmatpush.bf16.msra.mxu3 %v9768_v58  ;;  %6921 = vmatpush.bf16.msra.mxu0 %v9827_v52  ;;  %v13709_v52 = vld [vmem:[#allocation104_spill] sm:$0xff] }
 0x3f9   : > { %v4236_v54 = vsel %vm801_vm0, %v4230_v59, %v4231_v26  ;;  %v4332_v39 = vsel %vm1058_vm1, %v4326_v46, %v4327_v61  ;;  %4519 = vst [vmem:[#allocation2 + $0x178] sm:$0xf] %v4487_v48  ;;  %v4070_v5 = vadd.f32 %v4069_v42, %v3981_v10  ;;  %v8677_v46 = vld [vmem:[#allocation2 + $0x15c] sm:$0xf0]  ;;  %v13700_v10 = vld [vmem:[#allocation101_spill] sm:$0xff] }
 0x3fa   : > { %v4295_v47 = vmul.f32 %v4236_v54, %v13696_v27  ;;  %v4390_v21 = vmul.f32 %v4332_v39, %v13697_v6  ;;  %v8680_v11 = vor.u32 %v9673_v23, %v8677_v46  ;;  %v13702_v48 = vld [vmem:[#allocation129_spill] sm:$0xff]  ;;  %v9825_v6 = vld [vmem:[#allocation10 + $0x190] sm:$0xff] }
 0x3fb   : > { %v4104_v29 = vadd.f32 %v4070_v5, %v13698_v19  ;;  %v9826_v54 = vld [vmem:[#allocation10 + $0x198] sm:$0xff]  ;;  %v13705_v19 = vrot.slane %v13704_v30, 7  ;;  %v13707_v46 = vld [vmem:[#allocation100_spill] sm:$0xff] }
 0x3fc   : > { %v4423_v34 = vpack.c.bf16 %v4295_v47, %v4295_v47  ;;  %v4550_v59 = vpack.c.bf16 %v4390_v21, %v4390_v21  ;;  %6227 = vmatpush.bf16.msra.mxu3 %v9767_v41  ;;  %6922 = vmatpush.bf16.msra.mxu0 %v9826_v54 }
 0x3fd   : > { %v4200_v33 = vmax.f32 %v4104_v29, 0.0 }
 0x3fe   : > { %4455 = vst [vmem:[#allocation2 + $0x174] sm:$0xf] %v4423_v34  ;;  %v12423_v28 = vpop.f32.mrf.mxu3  ;;  %v12432_v60 = vpop.f32.mrf.mxu0 }
 0x3ff   : > { %13699 = vst [vmem:[#allocation124_spill] sm:$0xff] %v12423_v28  ;;  %v4232_v14 = vrot.slane %v4200_v33, 7  ;;  %v4328_v7 = vrot.slane %v4200_v33, 1  ;;  %v4488_v20 = vpack.c.bf16 %v4200_v33, %v4200_v33 }
 0x400   : > { %4582 = vst [vmem:[#allocation2 + $0x170] sm:$0xf] %v4550_v59  ;;  %v4071_v25 = vpop.f32.mrf.mxu1  ;;  %6923 = vmatpush.bf16.msra.mxu0 %v9825_v6 }
 0x401   : > { %v4235_v12 = vsel %vm801_vm0, %v4231_v26, %v4232_v14  ;;  %v4331_v16 = vsel %vm1058_vm1, %v4327_v61, %v4328_v7  ;;  %4520 = vst [vmem:[#allocation2 + $0x184] sm:$0xf] %v4488_v20  ;;  %v4072_v40 = vadd.f32 %v4071_v25, %v3983_v15  ;;  %5417 = vmatmul.bf16.gmra.mxu0 %v8672_v3  ;;  %v13708_v15 = vld [vmem:[#allocation89_spill] sm:$0xff]  ;;  %v9824_v20 = vld [vmem:[#allocation10 + $0x188] sm:$0xff] }
 0x402   : > { %v4296_v49 = vmul.f32 %v4235_v12, %v13700_v10  ;;  %v4391_v17 = vmul.f32 %v4331_v16, %v13701_v1  ;;  %v9823_v16 = vld [vmem:[#allocation10 + $0x180] sm:$0xff]  ;;  %v9676_v10 = vld [vmem:[#allocation2 + $0x16c] sm:$0xf]  ;;  %v9635_v1 = vld [vmem:[#allocation2 + $0x20] sm:$0xf0] }
 0x403   : > { %v4105_v42 = vadd.f32 %v4072_v40, %v13702_v48  ;;  %5333 = vmatmul.bf16.gmra.mxu3 %v8680_v11 }
 0x404   : > { %v4424_v26 = vpack.c.bf16 %v4296_v49, %v4296_v49  ;;  %v4551_v39 = vpack.c.bf16 %v4391_v17, %v4391_v17  ;;  %6924 = vmatpush.bf16.msra.mxu0 %v9824_v20  ;;  %v9083_v20 = vld [vmem:[#allocation2 + $0x30] sm:$0xf] }
 0x405   : > { %v4201_v5 = vmax.f32 %v4105_v42, 0.0  ;;  %v9704_v42 = vld [vmem:[#allocation2 + $0x20] sm:$0xf0] }
 0x406   : > { %4456 = vst [vmem:[#allocation2 + $0x180] sm:$0xf] %v4424_v26  ;;  %v12434_v61 = vpop.f32.mrf.mxu3  ;;  %v12452_v12 = vpop.f32.mrf.mxu0 }
 0x407   : > { %13703 = vst [vmem:[#allocation22_spill] sm:$0xff] %v12434_v61  ;;  %v4233_v36 = vrot.slane %v4201_v5, 7  ;;  %v4329_v27 = vrot.slane %v4201_v5, 1  ;;  %v4489_v47 = vpack.c.bf16 %v4201_v5, %v4201_v5  ;;  %v8687_v61 = vld [vmem:[#allocation2 + $0x168] sm:$0xf] }
 0x408   : > { %4583 = vst [vmem:[#allocation2 + $0x17c] sm:$0xf] %v4551_v39  ;;  %6925 = vmatpush.bf16.msra.mxu0 %v9823_v16  ;;  %v8819_v16 = vld [vmem:[#allocation2 + $0x48] sm:$0xf] }
 0x409   : > { %v4234_v21 = vsel %vm801_vm0, %v4232_v14, %v4233_v36  ;;  %v4265_v29 = vsel %vm801_vm0, %v4233_v36, %v13705_v19  ;;  %v4330_v34 = vsel %vm1058_vm1, %v4328_v7, %v4329_v27  ;;  %v4361_v59 = vsel %vm1058_vm1, %v4329_v27, %v4298_v0  ;;  %4521 = vst [vmem:[#allocation2 + $0x190] sm:$0xf] %v4489_v47  ;;  %v9675_v7 = vld [vmem:[#allocation2 + $0x160] sm:$0xf0]  ;;  %v8689_v0 = vld [vmem:[#allocation2 + $0x174] sm:$0xf0] }
 0x40a   : > { %v4266_v33 = vmul.f32 %v4265_v29, %v13706_v8  ;;  %v4297_v58 = vmul.f32 %v4234_v21, %v13707_v46  ;;  %v4392_v56 = vmul.f32 %v4330_v34, %v13708_v15  ;;  %v4393_v14 = vmul.f32 %v4361_v59, %v13709_v52  ;;  %13710 = vst [vmem:[#allocation31_spill] sm:$0xff] %v12452_v12  ;;  %v8695_v27 = vld [vmem:[#allocation2 + $0x170] sm:$0xf]  ;;  %v9705_v47 = vld [vmem:[#allocation2 + $0x28] sm:$0xf0] }
 0x40b   : > { %v8684_v41 = vor.u32 %v9675_v7, %v8683_v37  ;;  %v8692_v49 = vor.u32 %v9676_v10, %v8689_v0  ;;  %v8803_v21 = vld [vmem:[#allocation2 + $0x20] sm:$0xf]  ;;  %v9638_v34 = vld [vmem:[#allocation2 + $0x38] sm:$0xf0]  ;;  %v8531_v8 = vld [vmem:[#allocation2 + $0x30] sm:$0xf] }
 0x40c   : > { %v4394_v23 = vpack.c.bf16 %v4266_v33, %v4266_v33  ;;  %v4425_v3 = vpack.c.bf16 %v4297_v58, %v4297_v58  ;;  %v4552_v25 = vpack.c.bf16 %v4392_v56, %v4392_v56  ;;  %v4553_v11 = vpack.c.bf16 %v4393_v14, %v4393_v14  ;;  %v9707_v59 = vld [vmem:[#allocation2 + $0x38] sm:$0xf0]  ;;  %v8807_v33 = vld [vmem:[#allocation2 + $0x30] sm:$0xf]  ;;  %v9708_v14 = vld [vmem:[#allocation2 + $0x40] sm:$0xf0] }
 0x40d   : > { %v8804_v19 = vor.u32 %v9705_v47, %v8803_v21  ;;  %v8532_v46 = vor.u32 %v9638_v34, %v8531_v8  ;;  %v8808_v58 = vor.u32 %v9707_v59, %v8807_v33  ;;  %v9776_v56 = vld [vmem:[#allocation2 + $0x38] sm:$0xf0]  ;;  %v9641_v7 = vld [vmem:[#allocation2 + $0x50] sm:$0xf0]  ;;  %v8543_v0 = vld [vmem:[#allocation2 + $0x48] sm:$0xf] }
 0x40e   : > { %4426 = vst [vmem:[#allocation2 + $0x18] sm:$0xf] %v4394_v23  ;;  %v12454_v40 = vpop.f32.mrf.mxu3  ;;  %v12456_v39 = vpop.f32.mrf.mxu0  ;;  %v9084_v23 = vor.u32 %v9776_v56, %v9083_v20  ;;  %v9644_v47 = vld [vmem:[#allocation2 + $0x68] sm:$0xf0]  ;;  %v8555_v21 = vld [vmem:[#allocation2 + $0x60] sm:$0xf] }
 0x40f   : > { %4457 = vst [vmem:[#allocation2 + $0x18c] sm:$0xf] %v4425_v3  ;;  %v9678_v36 = vld [vmem:[#allocation2 + $0x178] sm:$0xf0]  ;;  %v8815_v3 = vld [vmem:[#allocation2 + $0x38] sm:$0xf]  ;;  %v8556_v34 = vor.u32 %v9644_v47, %v8555_v21 }
 0x410   : > { %13711 = vst [vmem:[#allocation63_spill] sm:$0xff] %v12454_v40  ;;  %v8696_v6 = vor.u32 %v9678_v36, %v8695_v27  ;;  %v9107_v56 = vld [vmem:[#allocation2 + $0x60] sm:$0xf]  ;;  %v8839_v20 = vld [vmem:[#allocation2 + $0x68] sm:$0xf] }
 0x411   : > { %4584 = vst [vmem:[#allocation2 + $0x188] sm:$0xf] %v4552_v25  ;;  %5422 = vmatmul.bf16.gmra.mxu0 %v8684_v41  ;;  %v8816_v25 = vor.u32 %v9708_v14, %v8815_v3  ;;  %v8544_v41 = vor.u32 %v9641_v7, %v8543_v0  ;;  %v9716_v7 = vld [vmem:[#allocation2 + $0x80] sm:$0xf0]  ;;  %v8567_v0 = vld [vmem:[#allocation2 + $0x78] sm:$0xf] }
 0x412   : > { %4585 = vst [vmem:[#allocation2 + $0x194] sm:$0xf] %v4553_v11  ;;  %v9710_v11 = vld [vmem:[#allocation2 + $0x50] sm:$0xf0]  ;;  %v8851_v47 = vld [vmem:[#allocation2 + $0x80] sm:$0xf] }
 0x413   : > { %5338 = vmatmul.bf16.gmra.mxu3 %v8692_v49  ;;  %13712 = vst [vmem:[#allocation27_spill] sm:$0xff] %v12456_v39  ;;  %v8820_v10 = vor.u32 %v9710_v11, %v8819_v16  ;;  %v8843_v16 = vld [vmem:[#allocation2 + $0x78] sm:$0xf]  ;;  %v9650_v21 = vld [vmem:[#allocation2 + $0x98] sm:$0xf0] }
 0x415   : > { %v8519_v17 = vld [vmem:[#allocation2 + $0x18] sm:$0xf] }
 0x416   : > { %v8795_v48 = vld [vmem:[#allocation2 + $0x18] sm:$0xf]  ;;  %v8520_v54 = vor.u32 %v9635_v1, %v8519_v17  ;;  %v12458_v5 = vpop.f32.mrf.mxu3  ;;  %v12460_v30 = vpop.f32.mrf.mxu0  ;;  %v9779_v1 = vld [vmem:[#allocation2 + $0x50] sm:$0xf0]  ;;  %v9711_v17 = vld [vmem:[#allocation2 + $0x58] sm:$0xf0] }
 0x417   : > { %v8796_v26 = vor.u32 %v9704_v42, %v8795_v48  ;;  %13713 = vst [vmem:[#allocation62_spill] sm:$0xff] %v12458_v5  ;;  %v9095_v48 = vld [vmem:[#allocation2 + $0x48] sm:$0xf]  ;;  %v9812_v5 = vld [vmem:[#allocation2 + $0x158] sm:$0xf0] }
 0x418   : > { %5179 = vmatmul.bf16.gmra.mxu2 %v8520_v54  ;;  %13714 = vst [vmem:[#allocation30_spill] sm:$0xff] %v12460_v30  ;;  %v9096_v54 = vor.u32 %v9779_v1, %v9095_v48  ;;  %v9785_v1 = vld [vmem:[#allocation2 + $0x80] sm:$0xf0]  ;;  %v9717_v48 = vld [vmem:[#allocation2 + $0x88] sm:$0xf0] }
 0x419   : > { %6050 = vmatmul.bf16.vlgmr.msrb.gmra.mxu1 %v8796_v26  ;;  %v8827_v26 = vld [vmem:[#allocation2 + $0x50] sm:$0xf] }
 0x41a   : > { %v8828_v27 = vor.u32 %v9711_v17, %v8827_v26 }
 0x41e   : > { %v12462_v29 = vpop.f32.mrf.mxu3  ;;  %v12464_v15 = vpop.f32.mrf.mxu0 }
 0x41f   : > { %13715 = vst [vmem:[#allocation49_spill] sm:$0xff] %v12462_v29  ;;  %v9743_v29 = vld [vmem:[#allocation2 + $0x158] sm:$0xf0] }
 0x420   : > { %13716 = vst [vmem:[#allocation23_spill] sm:$0xff] %v12464_v15 }
 0x421   : > { %5427 = vmatmul.bf16.gmra.mxu0 %v8696_v6  ;;  %v9713_v6 = vld [vmem:[#allocation2 + $0x68] sm:$0xf0] }
 0x423   : > { %6228 = vmatmul.bf16.vlgmr.msra.gmra.mxu3 %v8804_v19  ;;  %v8831_v19 = vld [vmem:[#allocation2 + $0x60] sm:$0xf] }
 0x424   : > { %v8832_v59 = vor.u32 %v9713_v6, %v8831_v19  ;;  %v8852_v6 = vor.u32 %v9717_v48, %v8851_v47  ;;  %v9719_v19 = vld [vmem:[#allocation2 + $0x98] sm:$0xf0]  ;;  %v9722_v48 = vld [vmem:[#allocation2 + $0xb0] sm:$0xf0] }
 0x426   : > { %v12466_v52 = vpop.f32.mrf.mxu3  ;;  %v12468_v37 = vpop.f32.mrf.mxu0 }
 0x427   : > { %13717 = vst [vmem:[#allocation67_spill] sm:$0xff] %v12466_v52 }
 0x428   : > { %5184 = vmatmul.bf16.gmra.mxu2 %v8532_v46  ;;  %13718 = vst [vmem:[#allocation24_spill] sm:$0xff] %v12468_v37  ;;  %v9782_v46 = vld [vmem:[#allocation2 + $0x68] sm:$0xf0]  ;;  %v9674_v37 = vld [vmem:[#allocation2 + $0x158] sm:$0xf0] }
 0x429   : > { %6055 = vmatmul.bf16.gmra.mxu1 %v8808_v58  ;;  %v9714_v58 = vld [vmem:[#allocation2 + $0x70] sm:$0xf0]  ;;  %v9108_v14 = vor.u32 %v9782_v46, %v9107_v56 }
 0x42e   : > { %v12470_v49 = vpop.f32.mrf.mxu3  ;;  %v12472_v42 = vpop.f32.mrf.mxu0 }
 0x42f   : > { %13719 = vst [vmem:[#allocation66_spill] sm:$0xff] %v12470_v49 }
 0x430   : > { %13720 = vst [vmem:[#allocation34_spill] sm:$0xff] %v12472_v42  ;;  %v9215_v42 = vld [vmem:[#allocation2 + $0x138] sm:$0xf] }
 0x431   : > { %6926 = vmatmul.bf16.vlgmr.msra.gmra.mxu0 %v9084_v23  ;;  %v8840_v23 = vor.u32 %v9714_v58, %v8839_v20  ;;  %v9788_v20 = vld [vmem:[#allocation2 + $0x98] sm:$0xf0] }
 0x433   : > { %6233 = vmatmul.bf16.gmra.mxu3 %v8816_v25  ;;  %v9647_v25 = vld [vmem:[#allocation2 + $0x80] sm:$0xf0] }
 0x436   : > { %v12474_v36 = vpop.f32.mrf.mxu3  ;;  %v12476_v8 = vpop.f32.mrf.mxu0 }
 0x437   : > { %13721 = vst [vmem:[#allocation53_spill] sm:$0xff] %v12474_v36 }
 0x438   : > { %5189 = vmatmul.bf16.gmra.mxu2 %v8544_v41  ;;  %13722 = vst [vmem:[#allocation33_spill] sm:$0xff] %v12476_v8  ;;  %v8568_v41 = vor.u32 %v9647_v25, %v8567_v0  ;;  %v9131_v25 = vld [vmem:[#allocation2 + $0x90] sm:$0xf]  ;;  %v8863_v0 = vld [vmem:[#allocation2 + $0x98] sm:$0xf] }
 0x439   : > { %6060 = vmatmul.bf16.gmra.mxu1 %v8820_v10  ;;  %v8844_v10 = vor.u32 %v9716_v7, %v8843_v16  ;;  %v9132_v7 = vor.u32 %v9788_v20, %v9131_v25  ;;  %v8875_v20 = vld [vmem:[#allocation2 + $0xb0] sm:$0xf]  ;;  %v9656_v25 = vld [vmem:[#allocation2 + $0xc8] sm:$0xf0] }
 0x43e   : > { %v12478_v33 = vpop.f32.mrf.mxu3  ;;  %v12480_v3 = vpop.f32.mrf.mxu0 }
 0x43f   : > { %13723 = vst [vmem:[#allocation71_spill] sm:$0xff] %v12478_v33 }
 0x440   : > { %13724 = vst [vmem:[#allocation25_spill] sm:$0xff] %v12480_v3  ;;  %v8935_v3 = vld [vmem:[#allocation2 + $0x128] sm:$0xf] }
 0x441   : > { %6931 = vmatmul.bf16.gmra.mxu0 %v9096_v54  ;;  %v9119_v54 = vld [vmem:[#allocation2 + $0x78] sm:$0xf] }
 0x443   : > { %6238 = vmatmul.bf16.gmra.mxu3 %v8828_v27  ;;  %v9120_v27 = vor.u32 %v9785_v1, %v9119_v54  ;;  %v9653_v1 = vld [vmem:[#allocation2 + $0xb0] sm:$0xf0]  ;;  %v8591_v54 = vld [vmem:[#allocation2 + $0xa8] sm:$0xf] }
 0x444   : > { %v8592_v47 = vor.u32 %v9653_v1, %v8591_v54  ;;  %v8879_v1 = vld [vmem:[#allocation2 + $0xc0] sm:$0xf] }
 0x446   : > { %v12482_v11 = vpop.f32.mrf.mxu3  ;;  %v12484_v17 = vpop.f32.mrf.mxu0 }
 0x447   : > { %13725 = vst [vmem:[#allocation70_spill] sm:$0xff] %v12482_v11 }
 0x448   : > { %5194 = vmatmul.bf16.gmra.mxu2 %v8556_v34  ;;  %13726 = vst [vmem:[#allocation37_spill] sm:$0xff] %v12484_v17  ;;  %v8579_v34 = vld [vmem:[#allocation2 + $0x90] sm:$0xf] }
 0x449   : > { %6065 = vmatmul.bf16.gmra.mxu1 %v8832_v59  ;;  %v8855_v59 = vld [vmem:[#allocation2 + $0x90] sm:$0xf]  ;;  %v8580_v46 = vor.u32 %v9650_v21, %v8579_v34 }
 0x44a   : > { %v8856_v58 = vor.u32 %v9719_v19, %v8855_v59  ;;  %v9791_v19 = vld [vmem:[#allocation2 + $0xb0] sm:$0xf0]  ;;  %v9723_v59 = vld [vmem:[#allocation2 + $0xb8] sm:$0xf0] }
 0x44e   : > { %v12486_v26 = vpop.f32.mrf.mxu3  ;;  %v12488_v56 = vpop.f32.mrf.mxu0 }
 0x44f   : > { %13727 = vst [vmem:[#allocation57_spill] sm:$0xff] %v12486_v26  ;;  %v8923_v26 = vld [vmem:[#allocation2 + $0x110] sm:$0xf] }
 0x450   : > { %13728 = vst [vmem:[#allocation36_spill] sm:$0xff] %v12488_v56 }
 0x451   : > { %6936 = vmatmul.bf16.gmra.mxu0 %v9108_v14 }
 0x453   : > { %6243 = vmatmul.bf16.gmra.mxu3 %v8840_v23  ;;  %v9720_v23 = vld [vmem:[#allocation2 + $0xa0] sm:$0xf0] }
 0x456   : > { %v12490_v14 = vpop.f32.mrf.mxu3  ;;  %v12492_v16 = vpop.f32.mrf.mxu0 }
 0x457   : > { %13729 = vst [vmem:[#allocation75_spill] sm:$0xff] %v12490_v14 }
 0x458   : > { %5199 = vmatmul.bf16.gmra.mxu2 %v8568_v41  ;;  %13730 = vst [vmem:[#allocation26_spill] sm:$0xff] %v12492_v16  ;;  %v8864_v41 = vor.u32 %v9720_v23, %v8863_v0  ;;  %v8876_v23 = vor.u32 %v9723_v59, %v8875_v20  ;;  %v9726_v59 = vld [vmem:[#allocation2 + $0xd0] sm:$0xf0] }
 0x459   : > { %6070 = vmatmul.bf16.gmra.mxu1 %v8844_v10 }
 0x45e   : > { %v12494_v10 = vpop.f32.mrf.mxu3  ;;  %v12496_v21 = vpop.f32.mrf.mxu0 }
 0x45f   : > { %13731 = vst [vmem:[#allocation74_spill] sm:$0xff] %v12494_v10 }
 0x460   : > { %13732 = vst [vmem:[#allocation40_spill] sm:$0xff] %v12496_v21  ;;  %v8911_v21 = vld [vmem:[#allocation2 + $0xf8] sm:$0xf] }
 0x461   : > { %6941 = vmatmul.bf16.gmra.mxu0 %v9120_v27  ;;  %v8867_v27 = vld [vmem:[#allocation2 + $0xa8] sm:$0xf] }
 0x463   : > { %6248 = vmatmul.bf16.gmra.mxu3 %v8852_v6  ;;  %v8868_v6 = vor.u32 %v9722_v48, %v8867_v27 }
 0x466   : > { %v12498_v34 = vpop.f32.mrf.mxu3  ;;  %v12500_v0 = vpop.f32.mrf.mxu0 }
 0x467   : > { %13733 = vst [vmem:[#allocation61_spill] sm:$0xff] %v12498_v34 }
 0x468   : > { %5204 = vmatmul.bf16.gmra.mxu2 %v8580_v46  ;;  %v9143_v46 = vld [vmem:[#allocation2 + $0xa8] sm:$0xf]  ;;  %13734 = vst [vmem:[#allocation39_spill] sm:$0xff] %v12500_v0 }
 0x469   : > { %6075 = vmatmul.bf16.gmra.mxu1 %v8856_v58  ;;  %v9144_v58 = vor.u32 %v9791_v19, %v9143_v46  ;;  %v9794_v19 = vld [vmem:[#allocation2 + $0xc8] sm:$0xf0]  ;;  %v9155_v46 = vld [vmem:[#allocation2 + $0xc0] sm:$0xf] }
 0x46a   : > { %v9156_v20 = vor.u32 %v9794_v19, %v9155_v46 }
 0x46e   : > { %v12502_v27 = vpop.f32.mrf.mxu3 }
 0x46f   : > { %13735 = vst [vmem:[#allocation79_spill] sm:$0xff] %v12502_v27 }
 0x471   : > { %6946 = vmatmul.bf16.gmra.mxu0 %v9132_v7  ;;  %v9725_v7 = vld [vmem:[#allocation2 + $0xc8] sm:$0xf0] }
 0x472   : > { %v8880_v54 = vor.u32 %v9725_v7, %v8879_v1  ;;  %v9659_v7 = vld [vmem:[#allocation2 + $0xe0] sm:$0xf0] }
 0x473   : > { %6253 = vmatmul.bf16.gmra.mxu3 %v8864_v41  ;;  %v8603_v41 = vld [vmem:[#allocation2 + $0xc0] sm:$0xf] }
 0x474   : > { %v8604_v48 = vor.u32 %v9656_v25, %v8603_v41  ;;  %v9728_v41 = vld [vmem:[#allocation2 + $0xe0] sm:$0xf0] }
 0x476   : > { %v12508_v35 = vpop.f32.mrf.mxu3 }
 0x477   : > { %13737 = vst [vmem:[#allocation78_spill] sm:$0xff] %v12508_v35  ;;  %v8899_v35 = vld [vmem:[#allocation2 + $0xe0] sm:$0xf] }
 0x478   : > { %5209 = vmatmul.bf16.gmra.mxu2 %v8592_v47  ;;  %v9766_v47 = vld [vmem:[#allocation10 + $0x138] sm:$0xff] }
 0x479   : > { %6080 = vmatmul.bf16.gmra.mxu1 %v8868_v6  ;;  %v12504_v6 = vpop.f32.mrf.mxu2  ;;  %6131 = vmatpush.bf16.msrb.mxu2 %v9766_v47 }
 0x47e   : > { %v12516_v19 = vpop.f32.mrf.mxu3 }
 0x47f   : > { %13740 = vst [vmem:[#allocation42_spill] sm:$0xff] %v12516_v19  ;;  %v8903_v19 = vld [vmem:[#allocation2 + $0xf0] sm:$0xf] }
 0x481   : > { %6951 = vmatmul.bf16.gmra.mxu0 %v9144_v58  ;;  %v12506_v58 = vpop.f32.mrf.mxu0  ;;  %v12510_v25 = vpop.f32.mrf.mxu2 }
 0x482   : > { %13736 = vst [vmem:[#allocation29_spill] sm:$0xff] %v12506_v58 }
 0x483   : > { %6258 = vmatmul.bf16.gmra.mxu3 %v8876_v23  ;;  %v8887_v23 = vld [vmem:[#allocation2 + $0xc8] sm:$0xf]  ;;  %13738 = vst [vmem:[#allocation43_spill] sm:$0xff] %v12510_v25 }
 0x484   : > { %v8888_v32 = vor.u32 %v9726_v59, %v8887_v23  ;;  %v9797_v59 = vld [vmem:[#allocation2 + $0xe0] sm:$0xf0]  ;;  %v9167_v23 = vld [vmem:[#allocation2 + $0xd8] sm:$0xf] }
 0x485   : > { %v9168_v25 = vor.u32 %v9797_v59, %v9167_v23  ;;  %v9765_v59 = vld [vmem:[#allocation10 + $0x130] sm:$0xff] }
 0x486   : > { %6132 = vmatpush.bf16.msrb.mxu2 %v9765_v59  ;;  %v9732_v23 = vld [vmem:[#allocation2 + $0x100] sm:$0xf0] }
 0x487   : > { %v8912_v14 = vor.u32 %v9732_v23, %v8911_v21 }
 0x488   : > { %5214 = vmatmul.bf16.gmra.mxu2 %v8604_v48  ;;  %v8615_v48 = vld [vmem:[#allocation2 + $0xd8] sm:$0xf] }
 0x489   : > { %6085 = vmatmul.bf16.gmra.mxu1 %v8880_v54  ;;  %v8891_v54 = vld [vmem:[#allocation2 + $0xd8] sm:$0xf]  ;;  %v8616_v47 = vor.u32 %v9659_v7, %v8615_v48  ;;  %v12514_v58 = vpop.f32.mrf.mxu0  ;;  %v12526_v48 = vpop.f32.mrf.mxu3 }
 0x48a   : > { %v8892_v27 = vor.u32 %v9728_v41, %v8891_v54  ;;  %13739 = vst [vmem:[#allocation65_spill] sm:$0xff] %v12514_v58  ;;  %v9731_v41 = vld [vmem:[#allocation2 + $0xf8] sm:$0xf0] }
 0x48b   : > { %13743 = vst [vmem:[#allocation32_spill] sm:$0xff] %v12526_v48  ;;  %v8904_v58 = vor.u32 %v9731_v41, %v8903_v19  ;;  %v8639_v41 = vld [vmem:[#allocation2 + $0x108] sm:$0xf] }
 0x491   : > { %6956 = vmatmul.bf16.gmra.mxu0 %v9156_v20  ;;  %v12522_v0 = vpop.f32.mrf.mxu0  ;;  %v12536_v48 = vpop.f32.mrf.mxu3 }
 0x492   : > { %13742 = vst [vmem:[#allocation130_spill] sm:$0xff] %v12522_v0  ;;  %v9179_v0 = vld [vmem:[#allocation2 + $0xf0] sm:$0xf] }
 0x493   : > { %6263 = vmatmul.bf16.gmra.mxu3 %v8888_v32  ;;  %v9729_v32 = vld [vmem:[#allocation2 + $0xe8] sm:$0xf0]  ;;  %13745 = vst [vmem:[#allocation114_spill] sm:$0xff] %v12536_v48 }
 0x494   : > { %v8900_v34 = vor.u32 %v9729_v32, %v8899_v35 }
 0x496   : > { %v12512_v1 = vpop.f32.mrf.mxu1 }
 0x498   : > { %5219 = vmatmul.bf16.gmra.mxu2 %v8616_v47  ;;  %v8627_v47 = vld [vmem:[#allocation2 + $0xf0] sm:$0xf] }
 0x499   : > { %6090 = vmatmul.bf16.gmra.mxu1 %v8892_v27  ;;  %v9662_v27 = vld [vmem:[#allocation2 + $0xf8] sm:$0xf0]  ;;  %v12532_v32 = vpop.f32.mrf.mxu0  ;;  %v12544_v48 = vpop.f32.mrf.mxu3 }
 0x49a   : > { %13744 = vst [vmem:[#allocation82_spill] sm:$0xff] %v12532_v32 }
 0x49b   : > { %v12518_v46 = vpop.f32.mrf.mxu2  ;;  %13747 = vst [vmem:[#allocation69_spill] sm:$0xff] %v12544_v48  ;;  %v8927_v48 = vld [vmem:[#allocation2 + $0x120] sm:$0xf] }
 0x49e   : > { %v12520_v20 = vpop.f32.mrf.mxu1 }
 0x49f   : > { %13741 = vst [vmem:[#allocation83_spill] sm:$0xff] %v12520_v20  ;;  %v8628_v20 = vor.u32 %v9662_v27, %v8627_v47  ;;  %v8915_v47 = vld [vmem:[#allocation2 + $0x108] sm:$0xf] }
 0x4a1   : > { %6961 = vmatmul.bf16.gmra.mxu0 %v9168_v25  ;;  %v9800_v25 = vld [vmem:[#allocation2 + $0xf8] sm:$0xf0]  ;;  %v12542_v16 = vpop.f32.mrf.mxu0 }
 0x4a2   : > { %v9180_v10 = vor.u32 %v9800_v25, %v9179_v0  ;;  %13746 = vst [vmem:[#allocation35_spill] sm:$0xff] %v12542_v16  ;;  %v9191_v25 = vld [vmem:[#allocation2 + $0x108] sm:$0xf] }
 0x4a3   : > { %v12524_v7 = vpop.f32.mrf.mxu2  ;;  %6268 = vmatmul.bf16.gmra.mxu3 %v8900_v34 }
 0x4a6   : > { %v12528_v54 = vpop.f32.mrf.mxu1 }
 0x4a8   : > { %5224 = vmatmul.bf16.gmra.mxu2 %v8628_v20  ;;  %v9734_v20 = vld [vmem:[#allocation2 + $0x110] sm:$0xf0] }
 0x4a9   : > { %6095 = vmatmul.bf16.gmra.mxu1 %v8904_v58  ;;  %v9665_v58 = vld [vmem:[#allocation2 + $0x110] sm:$0xf0]  ;;  %v8916_v32 = vor.u32 %v9734_v20, %v8915_v47  ;;  %v12550_v56 = vpop.f32.mrf.mxu0 }
 0x4aa   : > { %v8640_v59 = vor.u32 %v9665_v58, %v8639_v41  ;;  %13748 = vst [vmem:[#allocation131_spill] sm:$0xff] %v12550_v56  ;;  %v12552_v58 = vpop.f32.mrf.mxu3  ;;  %v9737_v41 = vld [vmem:[#allocation2 + $0x128] sm:$0xf0]  ;;  %v9203_v56 = vld [vmem:[#allocation2 + $0x120] sm:$0xf] }
 0x4ab   : > { %v12530_v35 = vpop.f32.mrf.mxu2  ;;  %13749 = vst [vmem:[#allocation51_spill] sm:$0xff] %v12552_v58  ;;  %v8928_v17 = vor.u32 %v9737_v41, %v8927_v48  ;;  %v9738_v58 = vld [vmem:[#allocation2 + $0x130] sm:$0xf0] }
 0x4ac   : > { %v8936_v36 = vor.u32 %v9738_v58, %v8935_v3  ;;  %v9838_v3 = vld [vmem:[#allocation10 + $0x1f8] sm:$0xff]  ;;  %v9809_v58 = vld [vmem:[#allocation2 + $0x140] sm:$0xf0] }
 0x4ad   : > { %7007 = vmatpush.bf16.msra.mxu1 %v9838_v3  ;;  %v9836_v3 = vld [vmem:[#allocation10 + $0x1e8] sm:$0xff] }
 0x4ae   : > { %v12534_v34 = vpop.f32.mrf.mxu1 }
 0x4b1   : > { %6966 = vmatmul.bf16.gmra.mxu0 %v9180_v10  ;;  %v9803_v10 = vld [vmem:[#allocation2 + $0x110] sm:$0xf0] }
 0x4b2   : > { %v9192_v23 = vor.u32 %v9803_v10, %v9191_v25  ;;  %v9764_v10 = vld [vmem:[#allocation10 + $0x128] sm:$0xff]  ;;  %v12558_v25 = vpop.f32.mrf.mxu0 }
 0x4b3   : > { %v12538_v19 = vpop.f32.mrf.mxu2  ;;  %6273 = vmatmul.bf16.gmra.mxu3 %v8912_v14  ;;  %v9735_v14 = vld [vmem:[#allocation2 + $0x118] sm:$0xf0]  ;;  %6133 = vmatpush.bf16.msrb.mxu2 %v9764_v10  ;;  %13750 = vst [vmem:[#allocation87_spill] sm:$0xff] %v12558_v25  ;;  %v8939_v10 = vld [vmem:[#allocation2 + $0x138] sm:$0xf] }
 0x4b4   : > { %v8924_v11 = vor.u32 %v9735_v14, %v8923_v26  ;;  %v9806_v14 = vld [vmem:[#allocation2 + $0x128] sm:$0xf0] }
 0x4b5   : > { %v9204_v33 = vor.u32 %v9806_v14, %v9203_v56  ;;  %v9763_v56 = vld [vmem:[#allocation10 + $0x120] sm:$0xff] }
 0x4b6   : > { %v12540_v27 = vpop.f32.mrf.mxu1 }
 0x4b7   : > { %6134 = vmatpush.bf16.msrb.mxu2 %v9763_v56  ;;  %v9760_v56 = vld [vmem:[#allocation10 + $0x108] sm:$0xff] }
 0x4b8   : > { %5229 = vmatmul.bf16.gmra.mxu2 %v8640_v59  ;;  %v8651_v59 = vld [vmem:[#allocation2 + $0x120] sm:$0xf] }
 0x4b9   : > { %6100 = vmatmul.bf16.gmra.mxu1 %v8916_v32  ;;  %v9668_v32 = vld [vmem:[#allocation2 + $0x128] sm:$0xf0] }
 0x4ba   : > { %v8652_v16 = vor.u32 %v9668_v32, %v8651_v59  ;;  %v12568_v32 = vpop.f32.mrf.mxu0  ;;  %v8663_v59 = vld [vmem:[#allocation2 + $0x138] sm:$0xf] }
 0x4bb   : > { %v12546_v0 = vpop.f32.mrf.mxu2  ;;  %13751 = vst [vmem:[#allocation118_spill] sm:$0xff] %v12568_v32  ;;  %v9741_v32 = vld [vmem:[#allocation2 + $0x148] sm:$0xf0] }
 0x4be   : > { %v12548_v21 = vpop.f32.mrf.mxu1 }
 0x4c1   : > { %6971 = vmatmul.bf16.gmra.mxu0 %v9192_v23  ;;  %v12562_v23 = vpop.f32.mrf.mxu3 }
 0x4c2   : > { %v12578_v52 = vpop.f32.mrf.mxu0 }
 0x4c3   : > { %v12554_v20 = vpop.f32.mrf.mxu2  ;;  %6278 = vmatmul.bf16.gmra.mxu3 %v8924_v11  ;;  %13753 = vst [vmem:[#allocation86_spill] sm:$0xff] %v12578_v52  ;;  %v8675_v52 = vld [vmem:[#allocation2 + $0x150] sm:$0xf] }
 0x4c6   : > { %v12556_v47 = vpop.f32.mrf.mxu1 }
 0x4c8   : > { %5234 = vmatmul.bf16.gmra.mxu2 %v8652_v16  ;;  %v9740_v16 = vld [vmem:[#allocation2 + $0x140] sm:$0xf0] }
 0x4c9   : > { %6105 = vmatmul.bf16.gmra.mxu1 %v8928_v17  ;;  %v9671_v17 = vld [vmem:[#allocation2 + $0x140] sm:$0xf0]  ;;  %v8940_v8 = vor.u32 %v9740_v16, %v8939_v10  ;;  %v12572_v49 = vpop.f32.mrf.mxu3  ;;  %v8947_v16 = vld [vmem:[#allocation2 + $0x140] sm:$0xf] }
 0x4ca   : > { %v8664_v25 = vor.u32 %v9671_v17, %v8663_v59  ;;  %13752 = vst [vmem:[#allocation55_spill] sm:$0xff] %v12572_v49  ;;  %v9216_v17 = vor.u32 %v9809_v58, %v9215_v42  ;;  %v9761_v59 = vld [vmem:[#allocation10 + $0x110] sm:$0xff]  ;;  %v8948_v10 = vor.u32 %v9741_v32, %v8947_v16  ;;  %v8951_v42 = vld [vmem:[#allocation2 + $0x150] sm:$0xf]  ;;  %v8676_v58 = vor.u32 %v9674_v37, %v8675_v52  ;;  %v12586_v16 = vpop.f32.mrf.mxu0 }
 0x4cb   : > { %v12560_v26 = vpop.f32.mrf.mxu2  ;;  %v8952_v15 = vor.u32 %v9743_v29, %v8951_v42  ;;  %v9759_v32 = vld [vmem:[#allocation10 + $0x100] sm:$0xff]  ;;  %13754 = vst [vmem:[#allocation137_spill] sm:$0xff] %v12586_v16  ;;  %v9744_v52 = vld [vmem:[#allocation2 + $0x160] sm:$0xf0]  ;;  %v9832_v42 = vld [vmem:[#allocation10 + $0x1c8] sm:$0xff] }
 0x4cc   : > { %v9227_v29 = vld [vmem:[#allocation2 + $0x150] sm:$0xf]  ;;  %v9746_v16 = vld [vmem:[#allocation2 + $0x170] sm:$0xf0] }
 0x4cd   : > { %v9228_v37 = vor.u32 %v9812_v5, %v9227_v29 }
 0x4ce   : > { %v12564_v11 = vpop.f32.mrf.mxu1 }
 0x4d1   : > { %6976 = vmatmul.bf16.gmra.mxu0 %v9204_v33  ;;  %v9762_v33 = vld [vmem:[#allocation10 + $0x118] sm:$0xff] }
 0x4d2   : > { %6135 = vmatpush.bf16.msrb.mxu2 %v9762_v33 }
 0x4d3   : > { %v12566_v48 = vpop.f32.mrf.mxu2  ;;  %6283 = vmatmul.bf16.gmra.mxu3 %v8936_v36 }
 0x4d6   : > { %v12570_v41 = vpop.f32.mrf.mxu1  ;;  %6136 = vmatpush.bf16.msrb.mxu2 %v9761_v59  ;;  %v9834_v59 = vld [vmem:[#allocation10 + $0x1d8] sm:$0xff] }
 0x4d8   : > { %5239 = vmatmul.bf16.gmra.mxu2 %v8664_v25  ;;  %v9837_v25 = vld [vmem:[#allocation10 + $0x1f0] sm:$0xff] }
 0x4d9   : > { %6110 = vmatmul.bf16.gmra.mxu1 %v8940_v8  ;;  %v12580_v8 = vpop.f32.mrf.mxu3 }
 0x4da   : > { %7008 = vmatpush.bf16.msra.mxu1 %v9837_v25  ;;  %6137 = vmatpush.bf16.msrb.mxu2 %v9760_v56  ;;  %v8959_v56 = vld [vmem:[#allocation2 + $0x158] sm:$0xf] }
 0x4db   : > { %v12574_v36 = vpop.f32.mrf.mxu2 }
 0x4de   : > { %v12576_v14 = vpop.f32.mrf.mxu1  ;;  %7009 = vmatpush.bf16.msra.mxu1 %v9836_v3  ;;  %6138 = vmatpush.bf16.msrb.mxu2 %v9759_v32  ;;  %v8960_v3 = vor.u32 %v9744_v52, %v8959_v56  ;;  %v9831_v52 = vld [vmem:[#allocation10 + $0x1c0] sm:$0xff] }
 0x4df   : > { %v9815_v56 = vld [vmem:[#allocation2 + $0x170] sm:$0xf0] }
 0x4e1   : > { %6981 = vmatmul.bf16.gmra.mxu0 %v9216_v17  ;;  %v9835_v17 = vld [vmem:[#allocation10 + $0x1e0] sm:$0xff]  ;;  %v12588_v25 = vpop.f32.mrf.mxu3 }
 0x4e2   : > { %7010 = vmatpush.bf16.msra.mxu1 %v9835_v17  ;;  %v9677_v17 = vld [vmem:[#allocation2 + $0x170] sm:$0xf0] }
 0x4e3   : > { %v12582_v49 = vpop.f32.mrf.mxu2  ;;  %6288 = vmatmul.bf16.gmra.mxu3 %v8948_v10  ;;  %v8688_v5 = vor.u32 %v9677_v17, %v8687_v61  ;;  %v8797_v17 = vld [vmem:[#allocation2 + $0x24] sm:$0xf0] }
 0x4e6   : > { %v12584_v33 = vpop.f32.mrf.mxu1  ;;  %7011 = vmatpush.bf16.msra.mxu1 %v9834_v59  ;;  %v8963_v59 = vld [vmem:[#allocation2 + $0x168] sm:$0xf] }
 0x4e7   : > { %v8964_v29 = vor.u32 %v9746_v16, %v8963_v59 }
 0x4e8   : > { %5244 = vmatmul.bf16.gmra.mxu2 %v8676_v58  ;;  %v12594_v58 = vpop.f32.mrf.mxu0 }
 0x4e9   : > { %6115 = vmatmul.bf16.gmra.mxu1 %v8952_v15  ;;  %v9833_v15 = vld [vmem:[#allocation10 + $0x1d0] sm:$0xff]  ;;  %13757 = vst [vmem:[#allocation135_spill] sm:$0xff] %v12594_v58  ;;  %v12598_v40 = vpop.f32.mrf.mxu3  ;;  %v9747_v58 = vld [vmem:[#allocation2 + $0x178] sm:$0xf0] }
 0x4ea   : > { %7012 = vmatpush.bf16.msra.mxu1 %v9833_v15 }
 0x4eb   : > { %v12590_v10 = vpop.f32.mrf.mxu2 }
 0x4ec   : > { %13755 = vst [vmem:[#allocation54_spill] sm:$0xff] %v12590_v10 }
 0x4ee   : > { %v12592_v30 = vpop.f32.mrf.mxu1  ;;  %7013 = vmatpush.bf16.msra.mxu1 %v9832_v42  ;;  %v9749_v42 = vld [vmem:[#allocation2 + $0x188] sm:$0xf0] }
 0x4ef   : > { %13756 = vst [vmem:[#allocation73_spill] sm:$0xff] %v12592_v30  ;;  %v8971_v30 = vld [vmem:[#allocation2 + $0x170] sm:$0xf] }
 0x4f0   : > { %v12604_v15 = vpop.f32.mrf.mxu0  ;;  %v8972_v61 = vor.u32 %v9747_v58, %v8971_v30  ;;  %v8983_v58 = vld [vmem:[#allocation2 + $0x188] sm:$0xf] }
 0x4f1   : > { %6986 = vmatmul.bf16.gmra.mxu0 %v9228_v37  ;;  %13761 = vst [vmem:[#allocation59_spill] sm:$0xff] %v12604_v15  ;;  %v12608_v10 = vpop.f32.mrf.mxu3 }
 0x4f2   : > { %7014 = vmatpush.bf16.msra.mxu1 %v9831_v52 }
 0x4f3   : > { %v12596_v32 = vpop.f32.mrf.mxu2  ;;  %6293 = vmatmul.bf16.gmra.mxu3 %v8960_v3 }
 0x4f4   : > { %13758 = vst [vmem:[#allocation41_spill] sm:$0xff] %v12596_v32  ;;  %v9239_v32 = vld [vmem:[#allocation2 + $0x168] sm:$0xf] }
 0x4f6   : > { %v12600_v39 = vpop.f32.mrf.mxu1 }
 0x4f7   : > { %13759 = vst [vmem:[#allocation91_spill] sm:$0xff] %v12600_v39  ;;  %v9240_v39 = vor.u32 %v9815_v56, %v9239_v32  ;;  %v9750_v56 = vld [vmem:[#allocation2 + $0x190] sm:$0xf0] }
 0x4f8   : > { %5249 = vmatmul.bf16.gmra.mxu2 %v8688_v5  ;;  %v8975_v5 = vld [vmem:[#allocation2 + $0x180] sm:$0xf]  ;;  %v8984_v12 = vor.u32 %v9750_v56, %v8983_v58  ;;  %v8821_v58 = vld [vmem:[#allocation2 + $0x54] sm:$0xf0] }
 0x4f9   : > { %6120 = vmatmul.bf16.gmra.mxu1 %v8964_v29  ;;  %v9703_v29 = vld [vmem:[#allocation2 + $0x1c] sm:$0xf]  ;;  %v8976_v52 = vor.u32 %v9749_v42, %v8975_v5  ;;  %v9085_v5 = vld [vmem:[#allocation2 + $0x3c] sm:$0xf0]  ;;  %v9097_v56 = vld [vmem:[#allocation2 + $0x54] sm:$0xf0] }
 0x4fa   : > { %v8800_v15 = vor.u32 %v9703_v29, %v8797_v17 }
 0x4fb   : > { %v12602_v37 = vpop.f32.mrf.mxu2 }
 0x4fc   : > { %13760 = vst [vmem:[#allocation132_spill] sm:$0xff] %v12602_v37  ;;  %v12614_v37 = vpop.f32.mrf.mxu0 }
 0x4fd   : > { %13765 = vst [vmem:[#allocation77_spill] sm:$0xff] %v12614_v37  ;;  %v9775_v37 = vld [vmem:[#allocation2 + $0x34] sm:$0xf] }
 0x4fe   : > { %v12606_v3 = vpop.f32.mrf.mxu1 }
 0x4ff   : > { %13762 = vst [vmem:[#allocation90_spill] sm:$0xff] %v12606_v3  ;;  %v12616_v3 = vpop.f32.mrf.mxu3 }
 0x501   : > { %6991 = vmatmul.bf16.gmra.mxu0 %v9240_v39  ;;  %v9818_v39 = vld [vmem:[#allocation2 + $0x188] sm:$0xf0] }
 0x503   : > { %v12610_v16 = vpop.f32.mrf.mxu2  ;;  %6298 = vmatmul.bf16.gmra.mxu3 %v8972_v61  ;;  %v9251_v61 = vld [vmem:[#allocation2 + $0x180] sm:$0xf] }
 0x504   : > { %13763 = vst [vmem:[#allocation122_spill] sm:$0xff] %v12610_v16  ;;  %v9252_v16 = vor.u32 %v9818_v39, %v9251_v61 }
 0x506   : > { %v12612_v59 = vpop.f32.mrf.mxu1 }
 0x507   : > { %13764 = vst [vmem:[#allocation58_spill] sm:$0xff] %v12612_v59  ;;  %v12622_v59 = vpop.f32.mrf.mxu0  ;;  %v12624_v42 = vpop.f32.mrf.mxu3 }
 0x508   : > { %6139 = vmatmul.bf16.vlgmr.msrb.gmra.mxu2 %v8800_v15  ;;  %13768 = vst [vmem:[#allocation94_spill] sm:$0xff] %v12622_v59  ;;  %v8809_v15 = vld [vmem:[#allocation2 + $0x3c] sm:$0xf0] }
 0x509   : > { %6125 = vmatmul.bf16.gmra.mxu1 %v8976_v52  ;;  %v9706_v52 = vld [vmem:[#allocation2 + $0x34] sm:$0xf] }
 0x50b   : > { %v12618_v32 = vpop.f32.mrf.mxu2 }
 0x50c   : > { %13766 = vst [vmem:[#allocation133_spill] sm:$0xff] %v12618_v32  ;;  %v8812_v32 = vor.u32 %v9706_v52, %v8809_v15 }
 0x50e   : > { %v12620_v30 = vpop.f32.mrf.mxu1 }
 0x50f   : > { %13767 = vst [vmem:[#allocation45_spill] sm:$0xff] %v12620_v30  ;;  %v9088_v30 = vor.u32 %v9775_v37, %v9085_v5  ;;  %v9109_v5 = vld [vmem:[#allocation2 + $0x6c] sm:$0xf0] }
 0x511   : > { %6996 = vmatmul.bf16.gmra.mxu0 %v9252_v16 }
 0x513   : > { %v12626_v17 = vpop.f32.mrf.mxu2  ;;  %6303 = vmatmul.bf16.gmra.mxu3 %v8984_v12  ;;  %v9709_v12 = vld [vmem:[#allocation2 + $0x4c] sm:$0xf] }
 0x514   : > { %13769 = vst [vmem:[#allocation125_spill] sm:$0xff] %v12626_v17  ;;  %v9778_v17 = vld [vmem:[#allocation2 + $0x4c] sm:$0xf]  ;;  %v8824_v28 = vor.u32 %v9709_v12, %v8821_v58 }
 0x516   : > { %v12628_v29 = vpop.f32.mrf.mxu1 }
 0x517   : > { %13770 = vst [vmem:[#allocation47_spill] sm:$0xff] %v12628_v29  ;;  %v9100_v29 = vor.u32 %v9778_v17, %v9097_v56  ;;  %v9121_v56 = vld [vmem:[#allocation2 + $0x84] sm:$0xf0] }
 0x518   : > { %6144 = vmatmul.bf16.gmra.mxu2 %v8812_v32 }
 0x519   : > { %7015 = vmatmul.bf16.vlgmr.msra.gmra.mxu1 %v9088_v30  ;;  %v8833_v30 = vld [vmem:[#allocation2 + $0x6c] sm:$0xf0] }
 0x51b   : > { %v12630_v39 = vpop.f32.mrf.mxu2 }
 0x51c   : > { %13771 = vst [vmem:[#allocation93_spill] sm:$0xff] %v12630_v39  ;;  %v9781_v39 = vld [vmem:[#allocation2 + $0x64] sm:$0xf] }
 0x51e   : > { %v12632_v61 = vpop.f32.mrf.mxu1 }
 0x51f   : > { %13772 = vst [vmem:[#allocation134_spill] sm:$0xff] %v12632_v61 }
 0x523   : > { %v12634_v16 = vpop.f32.mrf.mxu2 }
 0x524   : > { %13773 = vst [vmem:[#allocation46_spill] sm:$0xff] %v12634_v16  ;;  %v9712_v16 = vld [vmem:[#allocation2 + $0x64] sm:$0xf] }
 0x525   : > { %v8836_v61 = vor.u32 %v9712_v16, %v8833_v30  ;;  %v9133_v30 = vld [vmem:[#allocation2 + $0x9c] sm:$0xf0] }
 0x526   : > { %v12636_v59 = vpop.f32.mrf.mxu1 }
 0x527   : > { %13774 = vst [vmem:[#allocation81_spill] sm:$0xff] %v12636_v59  ;;  %v9112_v59 = vor.u32 %v9781_v39, %v9109_v5 }
 0x528   : > { %6149 = vmatmul.bf16.gmra.mxu2 %v8824_v28 }
 0x529   : > { %7020 = vmatmul.bf16.gmra.mxu1 %v9100_v29  ;;  %v8845_v29 = vld [vmem:[#allocation2 + $0x84] sm:$0xf0] }
 0x52b   : > { %v12638_v15 = vpop.f32.mrf.mxu2 }
 0x52c   : > { %13775 = vst [vmem:[#allocation127_spill] sm:$0xff] %v12638_v15  ;;  %v9784_v15 = vld [vmem:[#allocation2 + $0x7c] sm:$0xf] }
 0x52e   : > { %v12640_v37 = vpop.f32.mrf.mxu1 }
 0x52f   : > { %13776 = vst [vmem:[#allocation50_spill] sm:$0xff] %v12640_v37 }
 0x533   : > { %v12642_v32 = vpop.f32.mrf.mxu2 }
 0x534   : > { %13777 = vst [vmem:[#allocation97_spill] sm:$0xff] %v12642_v32  ;;  %v9715_v32 = vld [vmem:[#allocation2 + $0x7c] sm:$0xf] }
 0x535   : > { %v8848_v37 = vor.u32 %v9715_v32, %v8845_v29  ;;  %v9145_v29 = vld [vmem:[#allocation2 + $0xb4] sm:$0xf0] }
 0x536   : > { %v12644_v52 = vpop.f32.mrf.mxu1 }
 0x537   : > { %13778 = vst [vmem:[#allocation136_spill] sm:$0xff] %v12644_v52  ;;  %v9124_v52 = vor.u32 %v9784_v15, %v9121_v56 }
 0x538   : > { %6154 = vmatmul.bf16.gmra.mxu2 %v8836_v61  ;;  %v8857_v61 = vld [vmem:[#allocation2 + $0x9c] sm:$0xf0] }
 0x539   : > { %7025 = vmatmul.bf16.gmra.mxu1 %v9112_v59 }
 0x53b   : > { %v12646_v58 = vpop.f32.mrf.mxu2 }
 0x53c   : > { %13779 = vst [vmem:[#allocation38_spill] sm:$0xff] %v12646_v58  ;;  %v9787_v58 = vld [vmem:[#allocation2 + $0x94] sm:$0xf] }
 0x53e   : > { %v12648_v28 = vpop.f32.mrf.mxu1 }
 0x53f   : > { %13780 = vst [vmem:[#allocation96_spill] sm:$0xff] %v12648_v28 }
 0x543   : > { %v12650_v17 = vpop.f32.mrf.mxu2 }
 0x544   : > { %13781 = vst [vmem:[#allocation128_spill] sm:$0xff] %v12650_v17  ;;  %v9718_v17 = vld [vmem:[#allocation2 + $0x94] sm:$0xf] }
 0x545   : > { %v8860_v28 = vor.u32 %v9718_v17, %v8857_v61  ;;  %v9157_v61 = vld [vmem:[#allocation2 + $0xcc] sm:$0xf0] }
 0x546   : > { %v12652_v12 = vpop.f32.mrf.mxu1 }
 0x547   : > { %13782 = vst [vmem:[#allocation101_spill] sm:$0xff] %v12652_v12  ;;  %v9136_v12 = vor.u32 %v9787_v58, %v9133_v30 }
 0x548   : > { %6159 = vmatmul.bf16.gmra.mxu2 %v8848_v37 }
 0x549   : > { %7030 = vmatmul.bf16.gmra.mxu1 %v9124_v52  ;;  %v8869_v52 = vld [vmem:[#allocation2 + $0xb4] sm:$0xf0] }
 0x54b   : > { %v12654_v16 = vpop.f32.mrf.mxu2 }
 0x54c   : > { %13783 = vst [vmem:[#allocation85_spill] sm:$0xff] %v12654_v16  ;;  %v9790_v16 = vld [vmem:[#allocation2 + $0xac] sm:$0xf] }
 0x54e   : > { %v12656_v39 = vpop.f32.mrf.mxu1 }
 0x54f   : > { %13784 = vst [vmem:[#allocation129_spill] sm:$0xff] %v12656_v39 }
 0x553   : > { %v12658_v59 = vpop.f32.mrf.mxu2 }
 0x554   : > { %13785 = vst [vmem:[#allocation116_spill] sm:$0xff] %v12658_v59  ;;  %v9721_v59 = vld [vmem:[#allocation2 + $0xac] sm:$0xf] }
 0x555   : > { %v8872_v39 = vor.u32 %v9721_v59, %v8869_v52  ;;  %v9169_v52 = vld [vmem:[#allocation2 + $0xe4] sm:$0xf0] }
 0x556   : > { %v12660_v5 = vpop.f32.mrf.mxu1 }
 0x557   : > { %13786 = vst [vmem:[#allocation28_spill] sm:$0xff] %v12660_v5  ;;  %v9148_v5 = vor.u32 %v9790_v16, %v9145_v29 }
 0x558   : > { %6164 = vmatmul.bf16.gmra.mxu2 %v8860_v28 }
 0x559   : > { %7035 = vmatmul.bf16.gmra.mxu1 %v9136_v12  ;;  %v8881_v12 = vld [vmem:[#allocation2 + $0xcc] sm:$0xf0] }
 0x55b   : > { %v12662_v32 = vpop.f32.mrf.mxu2 }
 0x55c   : > { %13787 = vst [vmem:[#allocation100_spill] sm:$0xff] %v12662_v32  ;;  %v9793_v32 = vld [vmem:[#allocation2 + $0xc4] sm:$0xf] }
 0x55e   : > { %v12664_v15 = vpop.f32.mrf.mxu1 }
 0x55f   : > { %13788 = vst [vmem:[#allocation89_spill] sm:$0xff] %v12664_v15 }
 0x563   : > { %v12666_v37 = vpop.f32.mrf.mxu2 }
 0x564   : > { %13789 = vst [vmem:[#allocation104_spill] sm:$0xff] %v12666_v37  ;;  %v9724_v37 = vld [vmem:[#allocation2 + $0xc4] sm:$0xf] }
 0x565   : > { %v8884_v15 = vor.u32 %v9724_v37, %v8881_v12 }
 0x566   : > { %v12668_v56 = vpop.f32.mrf.mxu1 }
 0x567   : > { %13790 = vst [vmem:[#allocation138_spill] sm:$0xff] %v12668_v56  ;;  %v9160_v56 = vor.u32 %v9793_v32, %v9157_v61  ;;  %v9846_v32 = vld [vmem:[#allocation10 + $0x238] sm:$0xff] }
 0x568   : > { %6169 = vmatmul.bf16.gmra.mxu2 %v8872_v39 }
 0x569   : > { %7040 = vmatmul.bf16.gmra.mxu1 %v9148_v5  ;;  %v8893_v5 = vld [vmem:[#allocation2 + $0xe4] sm:$0xf0]  ;;  %7096 = vmatpush.bf16.msra.mxu2 %v9846_v32 }
 0x56b   : > { %v12670_v17 = vpop.f32.mrf.mxu2 }
 0x56c   : > { %13791 = vst [vmem:[#allocation139_spill] sm:$0xff] %v12670_v17  ;;  %v9796_v17 = vld [vmem:[#allocation2 + $0xdc] sm:$0xf] }
 0x56d   : > { %v9172_v37 = vor.u32 %v9796_v17, %v9169_v52 }
 0x56e   : > { %v12672_v58 = vpop.f32.mrf.mxu1 }
 0x56f   : > { %13792 = vst [vmem:[#allocation140_spill] sm:$0xff] %v12672_v58 }
 0x573   : > { %v12674_v28 = vpop.f32.mrf.mxu2 }
 0x574   : > { %13793 = vst [vmem:[#allocation141_spill] sm:$0xff] %v12674_v28  ;;  %v9727_v28 = vld [vmem:[#allocation2 + $0xdc] sm:$0xf] }
 0x575   : > { %v8896_v58 = vor.u32 %v9727_v28, %v8893_v5  ;;  %v8905_v28 = vld [vmem:[#allocation2 + $0xfc] sm:$0xf0] }
 0x576   : > { %v12676_v30 = vpop.f32.mrf.mxu1  ;;  %v9181_v5 = vld [vmem:[#allocation2 + $0xfc] sm:$0xf0] }
 0x577   : > { %13794 = vst [vmem:[#allocation142_spill] sm:$0xff] %v12676_v30  ;;  %v5265_v30 = vadd.f32 %v12278_v9, %v12504_v6 }
 0x578   : > { %6174 = vmatmul.bf16.gmra.mxu2 %v8884_v15  ;;  %v12691_v15 = vld [vmem:[%s13308_s6] ss:$0 sm:$0xff] }
 0x579   : > { %7045 = vmatmul.bf16.gmra.mxu1 %v9160_v56  ;;  %v5354_v56 = vadd.f32 %v12295_v38, %v5265_v30  ;;  %v9799_v38 = vld [vmem:[#allocation2 + $0xf4] sm:$0xf]  ;;  %v5270_v30 = vadd.f32 %v12304_v4, %v12518_v46  ;;  %v12719_v46 = vpop.f32.mrf.mxu0 }
 0x57a   : > { %v9184_v32 = vor.u32 %v9799_v38, %v9181_v5  ;;  %v9733_v38 = vld [vmem:[#allocation2 + $0x10c] sm:$0xf] }
 0x57b   : > { %v12678_v59 = vpop.f32.mrf.mxu2  ;;  %v5433_v9 = vadd.f32 %v12691_v15, %v5354_v56  ;;  %v5359_v56 = vadd.f32 %v12321_v51, %v5270_v30 }
 0x57e   : > { %v12680_v16 = vpop.f32.mrf.mxu1 }
 0x583   : > { %v12682_v39 = vpop.f32.mrf.mxu2 }
 0x584   : > { %13795 = vst [vmem:[#allocation143_spill] sm:$0xff] %v12682_v39 }
 0x586   : > { %v12684_v29 = vpop.f32.mrf.mxu1 }
 0x588   : > { %6179 = vmatmul.bf16.gmra.mxu2 %v8896_v58 }
 0x589   : > { %7050 = vmatmul.bf16.gmra.mxu1 %v9172_v37  ;;  %v9730_v37 = vld [vmem:[#allocation2 + $0xf4] sm:$0xf] }
 0x58b   : > { %v6140_v12 = vpop.f32.mrf.mxu2 }
 0x58c   : > { %v6141_v61 = vadd.f32 %v6140_v12, %v12512_v1  ;;  %v8908_v1 = vor.u32 %v9730_v37, %v8905_v28  ;;  %v8917_v28 = vld [vmem:[#allocation2 + $0x114] sm:$0xf0] }
 0x58e   : > { %v12695_v39 = vpop.f32.mrf.mxu1  ;;  %v6230_v6 = vadd.f32 %v12562_v23, %v6141_v61 }
 0x590   : > { %v12699_v17 = vadd.f32 %v6230_v6, %v5433_v9  ;;  %v5435_v9 = vadd.f32 %v12691_v15, %v5359_v56  ;;  %v5272_v6 = vadd.f32 %v12319_v44, %v12524_v7  ;;  %v9802_v44 = vld [vmem:[#allocation2 + $0x10c] sm:$0xf] }
 0x592   : > { %13796 = vst [vmem:[#allocation144_spill] sm:$0xff] %v12699_v17  ;;  %v5361_v51 = vadd.f32 %v12332_v13, %v5272_v6  ;;  %v9845_v13 = vld [vmem:[#allocation10 + $0x230] sm:$0xff] }
 0x593   : > { %v12701_v58 = vpop.f32.mrf.mxu2  ;;  %7097 = vmatpush.bf16.msra.mxu2 %v9845_v13 }
 0x594   : > { %13797 = vst [vmem:[#allocation145_spill] sm:$0xff] %v12701_v58  ;;  %v12715_v58 = vpop.f32.mrf.mxu3  ;;  %v5436_v7 = vadd.f32 %v12691_v15, %v5361_v51 }
 0x596   : > { %v12703_v52 = vpop.f32.mrf.mxu1 }
 0x598   : > { %6184 = vmatmul.bf16.gmra.mxu2 %v8908_v1  ;;  %v8920_v1 = vor.u32 %v9733_v38, %v8917_v28  ;;  %v9205_v38 = vld [vmem:[#allocation2 + $0x12c] sm:$0xf0] }
 0x599   : > { %7055 = vmatmul.bf16.gmra.mxu1 %v9184_v32 }
 0x59b   : > { %v6145_v23 = vpop.f32.mrf.mxu2 }
 0x59c   : > { %v6146_v12 = vadd.f32 %v6145_v23, %v12528_v54  ;;  %v9193_v54 = vld [vmem:[#allocation2 + $0x114] sm:$0xf0]  ;;  %v12731_v23 = vpop.f32.mrf.mxu3 }
 0x59d   : > { %v9196_v32 = vor.u32 %v9802_v44, %v9193_v54 }
 0x59e   : > { %v12709_v61 = vpop.f32.mrf.mxu1  ;;  %v6235_v17 = vadd.f32 %v12580_v8, %v6146_v12  ;;  %v5275_v8 = vadd.f32 %v12330_v18, %v12530_v35  ;;  %v12734_v12 = vpop.f32.mrf.mxu0  ;;  %v5277_v35 = vadd.f32 %v12345_v43, %v12538_v19  ;;  %v9805_v43 = vld [vmem:[#allocation2 + $0x124] sm:$0xf]  ;;  %v5280_v19 = vadd.f32 %v12356_v24, %v12546_v0 }
 0x59f   : > { %v5282_v24 = vadd.f32 %v12371_v22, %v12554_v20  ;;  %v5285_v20 = vadd.f32 %v12382_v50, %v12560_v26  ;;  %v5287_v26 = vadd.f32 %v12397_v53, %v12566_v48 }
 0x5a0   : > { %v12717_v4 = vadd.f32 %v6235_v17, %v5435_v9 }
 0x5a3   : > { %v6147_v5 = vpop.f32.mrf.mxu2 }
 0x5a4   : > { %v6148_v37 = vadd.f32 %v6147_v5, %v12534_v34  ;;  %v5364_v34 = vadd.f32 %v12347_v57, %v5275_v8  ;;  %v5366_v5 = vadd.f32 %v12358_v62, %v5277_v35  ;;  %v8929_v57 = vld [vmem:[#allocation2 + $0x12c] sm:$0xf0]  ;;  %v12746_v54 = vpop.f32.mrf.mxu3 }
 0x5a6   : > { %v12723_v30 = vpop.f32.mrf.mxu1  ;;  %v6237_v17 = vadd.f32 %v12588_v25, %v6148_v37  ;;  %v5437_v18 = vadd.f32 %v12691_v15, %v5364_v34  ;;  %v12749_v44 = vpop.f32.mrf.mxu0 }
 0x5a8   : > { %6189 = vmatmul.bf16.gmra.mxu2 %v8920_v1  ;;  %v12729_v56 = vadd.f32 %v6237_v17, %v5436_v7  ;;  %v9736_v1 = vld [vmem:[#allocation2 + $0x124] sm:$0xf]  ;;  %v9208_v17 = vor.u32 %v9805_v43, %v9205_v38 }
 0x5a9   : > { %7060 = vmatmul.bf16.gmra.mxu1 %v9196_v32  ;;  %v8932_v8 = vor.u32 %v9736_v1, %v8929_v57  ;;  %v9808_v1 = vld [vmem:[#allocation2 + $0x13c] sm:$0xf] }
 0x5ab   : > { %v6150_v9 = vpop.f32.mrf.mxu2 }
 0x5ac   : > { %v6151_v6 = vadd.f32 %v6150_v9, %v12540_v27  ;;  %v12761_v9 = vpop.f32.mrf.mxu3 }
 0x5ae   : > { %v12737_v51 = vpop.f32.mrf.mxu1  ;;  %v6240_v25 = vadd.f32 %v12598_v40, %v6151_v6  ;;  %v5438_v40 = vadd.f32 %v12691_v15, %v5366_v5 }
 0x5b0   : > { %v12743_v28 = vadd.f32 %v6240_v25, %v5437_v18  ;;  %v8941_v25 = vld [vmem:[#allocation2 + $0x144] sm:$0xf0] }
 0x5b3   : > { %v6152_v37 = vpop.f32.mrf.mxu2 }
 0x5b4   : > { %v6153_v27 = vadd.f32 %v6152_v37, %v12548_v21  ;;  %v5369_v21 = vadd.f32 %v12373_v2, %v5280_v19  ;;  %v5371_v2 = vadd.f32 %v12384_v45, %v5282_v24  ;;  %v9739_v37 = vld [vmem:[#allocation2 + $0x13c] sm:$0xf]  ;;  %v12781_v43 = vpop.f32.mrf.mxu3  ;;  %v5374_v19 = vadd.f32 %v12399_v63, %v5285_v20  ;;  %v8953_v63 = vld [vmem:[#allocation2 + $0x15c] sm:$0xf0] }
 0x5b5   : > { %v9844_v45 = vld [vmem:[#allocation10 + $0x228] sm:$0xff]  ;;  %v9229_v24 = vld [vmem:[#allocation2 + $0x15c] sm:$0xf0] }
 0x5b6   : > { %v12751_v7 = vpop.f32.mrf.mxu1  ;;  %v6242_v62 = vadd.f32 %v12608_v10, %v6153_v27  ;;  %v5439_v18 = vadd.f32 %v12691_v15, %v5369_v21  ;;  %v12769_v10 = vpop.f32.mrf.mxu0  ;;  %v8944_v27 = vor.u32 %v9739_v37, %v8941_v25  ;;  %v5440_v22 = vadd.f32 %v12691_v15, %v5371_v2  ;;  %7098 = vmatpush.bf16.msra.mxu2 %v9844_v45  ;;  %v9742_v25 = vld [vmem:[#allocation2 + $0x154] sm:$0xf] }
 0x5b7   : > { %v5441_v50 = vadd.f32 %v12691_v15, %v5374_v19 }
 0x5b8   : > { %6194 = vmatmul.bf16.gmra.mxu2 %v8932_v8  ;;  %v12757_v32 = vadd.f32 %v6242_v62, %v5438_v40 }
 0x5b9   : > { %7065 = vmatmul.bf16.gmra.mxu1 %v9208_v17 }
 0x5bb   : > { %v6155_v13 = vpop.f32.mrf.mxu2 }
 0x5bc   : > { %v6156_v34 = vadd.f32 %v6155_v13, %v12556_v47  ;;  %v9217_v47 = vld [vmem:[#allocation2 + $0x144] sm:$0xf0] }
 0x5bd   : > { %v9220_v8 = vor.u32 %v9808_v1, %v9217_v47 }
 0x5be   : > { %v12763_v6 = vpop.f32.mrf.mxu1  ;;  %v6245_v0 = vadd.f32 %v12616_v3, %v6156_v34  ;;  %v12797_v34 = vpop.f32.mrf.mxu3 }
 0x5c0   : > { %v12771_v35 = vadd.f32 %v6245_v0, %v5439_v18  ;;  %v5376_v18 = vadd.f32 %v12416_v55, %v5287_v26 }
 0x5c2   : > { %v5442_v48 = vadd.f32 %v12691_v15, %v5376_v18  ;;  %v9241_v18 = vld [vmem:[#allocation2 + $0x174] sm:$0xf0] }
 0x5c3   : > { %v6157_v5 = vpop.f32.mrf.mxu2 }
 0x5c4   : > { %v6158_v57 = vadd.f32 %v6157_v5, %v12564_v11  ;;  %v12785_v11 = vpop.f32.mrf.mxu0  ;;  %v9811_v5 = vld [vmem:[#allocation2 + $0x154] sm:$0xf] }
 0x5c5   : > { %v9232_v53 = vor.u32 %v9811_v5, %v9229_v24 }
 0x5c6   : > { %v12775_v38 = vpop.f32.mrf.mxu1  ;;  %v6247_v3 = vadd.f32 %v12624_v42, %v6158_v57  ;;  %v8956_v57 = vor.u32 %v9742_v25, %v8953_v63  ;;  %v12813_v20 = vpop.f32.mrf.mxu3  ;;  %v13800_v63 = vld [vmem:[#allocation73_spill] sm:$0xff] }
 0x5c8   : > { %6199 = vmatmul.bf16.gmra.mxu2 %v8944_v27  ;;  %v12783_v40 = vadd.f32 %v6247_v3, %v5440_v22  ;;  %v9843_v27 = vld [vmem:[#allocation10 + $0x220] sm:$0xff] }
 0x5c9   : > { %7070 = vmatmul.bf16.gmra.mxu1 %v9220_v8  ;;  %7099 = vmatpush.bf16.msra.mxu2 %v9843_v27 }
 0x5cb   : > { %v6160_v62 = vpop.f32.mrf.mxu2 }
 0x5cc   : > { %v6161_v17 = vadd.f32 %v6160_v62, %v12570_v41  ;;  %v12800_v0 = vpop.f32.mrf.mxu0  ;;  %v9841_v62 = vld [vmem:[#allocation10 + $0x210] sm:$0xff] }
 0x5ce   : > { %v12789_v21 = vpop.f32.mrf.mxu1  ;;  %v6250_v42 = vadd.f32 %v12715_v58, %v6161_v17  ;;  %v5290_v58 = vadd.f32 %v12410_v31, %v12574_v36 }
 0x5d0   : > { %v12795_v13 = vadd.f32 %v6250_v42, %v5441_v50  ;;  %v5379_v22 = vadd.f32 %v12432_v60, %v5290_v58  ;;  %v9840_v60 = vld [vmem:[#allocation10 + $0x208] sm:$0xff] }
 0x5d1   : > { %v13799_v50 = vld [vmem:[#allocation31_spill] sm:$0xff] }
 0x5d3   : > { %v6162_v41 = vpop.f32.mrf.mxu2 }
 0x5d4   : > { %v6163_v2 = vadd.f32 %v6162_v41, %v12576_v14  ;;  %v9842_v14 = vld [vmem:[#allocation10 + $0x218] sm:$0xff]  ;;  %v12816_v31 = vpop.f32.mrf.mxu0 }
 0x5d5   : > { %7100 = vmatpush.bf16.msra.mxu2 %v9842_v14  ;;  %v9745_v41 = vld [vmem:[#allocation2 + $0x16c] sm:$0xf] }
 0x5d6   : > { %v7036_v47 = vpop.f32.mrf.mxu1  ;;  %v6252_v37 = vadd.f32 %v12731_v23, %v6163_v2  ;;  %v5443_v23 = vadd.f32 %v12691_v15, %v5379_v22  ;;  %v6266_v2 = vpop.f32.mrf.mxu3  ;;  %v13803_v22 = vld [vmem:[#allocation27_spill] sm:$0xff] }
 0x5d7   : > { %v12808_v55 = vadd.f32 %v7036_v47, %v12749_v44  ;;  %v13798_v44 = vld [vmem:[#allocation124_spill] sm:$0xff]  ;;  %v13801_v47 = vld [vmem:[#allocation54_spill] sm:$0xff] }
 0x5d8   : > { %6204 = vmatmul.bf16.gmra.mxu2 %v8956_v57  ;;  %v12810_v1 = vadd.f32 %v6252_v37, %v5442_v48  ;;  %v5292_v45 = vadd.f32 %v13798_v44, %v12582_v49  ;;  %v9814_v49 = vld [vmem:[#allocation2 + $0x16c] sm:$0xf]  ;;  %v13802_v57 = vld [vmem:[#allocation22_spill] sm:$0xff] }
 0x5d9   : > { %7075 = vmatmul.bf16.gmra.mxu1 %v9232_v53  ;;  %7101 = vmatpush.bf16.msra.mxu2 %v9841_v62  ;;  %v5295_v53 = vadd.f32 %v13802_v57, %v13801_v47  ;;  %v9244_v58 = vor.u32 %v9814_v49, %v9241_v18  ;;  %v9839_v37 = vld [vmem:[#allocation10 + $0x200] sm:$0xff]  ;;  %v13805_v62 = vld [vmem:[#allocation41_spill] sm:$0xff]  ;;  %v9748_v47 = vld [vmem:[#allocation2 + $0x184] sm:$0xf] }
 0x5da   : > { %v5381_v26 = vadd.f32 %v13799_v50, %v5292_v45  ;;  %v13808_v18 = vld [vmem:[#allocation30_spill] sm:$0xff] }
 0x5db   : > { %v6165_v3 = vpop.f32.mrf.mxu2  ;;  %v13809_v49 = vld [vmem:[#allocation90_spill] sm:$0xff] }
 0x5dc   : > { %v6166_v8 = vadd.f32 %v6165_v3, %v12584_v33  ;;  %v8965_v33 = vld [vmem:[#allocation2 + $0x174] sm:$0xf0]  ;;  %v12834_v27 = vpop.f32.mrf.mxu0  ;;  %v5384_v3 = vadd.f32 %v13803_v22, %v5295_v53 }
 0x5dd   : > { %v8968_v5 = vor.u32 %v9745_v41, %v8965_v33  ;;  %7102 = vmatpush.bf16.msra.mxu2 %v9840_v60 }
 0x5de   : > { %v12818_v36 = vpop.f32.mrf.mxu1  ;;  %v6255_v19 = vadd.f32 %v12746_v54, %v6166_v8  ;;  %v5444_v54 = vadd.f32 %v12691_v15, %v5381_v26  ;;  %v6269_v26 = vpop.f32.mrf.mxu3 }
 0x5e0   : > { %v12824_v17 = vadd.f32 %v6255_v19, %v5443_v23  ;;  %v13804_v23 = vld [vmem:[#allocation91_spill] sm:$0xff]  ;;  %v5445_v19 = vadd.f32 %v12691_v15, %v5384_v3 }
 0x5e1   : > { %7103 = vmatpush.bf16.msra.mxu2 %v9839_v37  ;;  %v13811_v37 = vld [vmem:[#allocation62_spill] sm:$0xff] }
 0x5e3   : > { %v6167_v42 = vpop.f32.mrf.mxu2 }
 0x5e4   : > { %v6168_v24 = vadd.f32 %v6167_v42, %v13800_v63  ;;  %v12848_v42 = vpop.f32.mrf.mxu0 }
 0x5e5   : > { %13807 = vst [vmem:[#allocation124_spill] sm:$0xff] %v12848_v42 }
 0x5e6   : > { %v12828_v25 = vpop.f32.mrf.mxu1  ;;  %v6257_v48 = vadd.f32 %v12761_v9, %v6168_v24  ;;  %v13806_v9 = vld [vmem:[#allocation63_spill] sm:$0xff]  ;;  %v8977_v24 = vld [vmem:[#allocation2 + $0x18c] sm:$0xf0] }
 0x5e7   : > { %v5297_v60 = vadd.f32 %v13806_v9, %v13805_v62  ;;  %v8980_v53 = vor.u32 %v9748_v47, %v8977_v24  ;;  %v13818_v47 = vld [vmem:[#allocation24_spill] sm:$0xff] }
 0x5e8   : > { %6209 = vmatmul.bf16.gmra.mxu2 %v8968_v5  ;;  %v12836_v14 = vadd.f32 %v6257_v48, %v5444_v54  ;;  %v9253_v5 = vld [vmem:[#allocation2 + $0x18c] sm:$0xf0]  ;;  %v9817_v48 = vld [vmem:[#allocation2 + $0x184] sm:$0xf] }
 0x5e9   : > { %7080 = vmatmul.bf16.gmra.mxu1 %v9244_v58  ;;  %v5386_v63 = vadd.f32 %v13808_v18, %v5297_v60 }
 0x5eb   : > { %v6170_v8 = vpop.f32.mrf.mxu2  ;;  %v5446_v58 = vadd.f32 %v12691_v15, %v5386_v63 }
 0x5ec   : > { %v6171_v44 = vadd.f32 %v6170_v8, %v13804_v23  ;;  %v9256_v8 = vor.u32 %v9817_v48, %v9253_v5  ;;  %v12861_v9 = vpop.f32.mrf.mxu0 }
 0x5ed   : > { %13813 = vst [vmem:[#allocation31_spill] sm:$0xff] %v12861_v9 }
 0x5ee   : > { %v12840_v45 = vpop.f32.mrf.mxu1  ;;  %v6260_v50 = vadd.f32 %v12781_v43, %v6171_v44  ;;  %v13810_v43 = vld [vmem:[#allocation132_spill] sm:$0xff]  ;;  %v6271_v44 = vpop.f32.mrf.mxu3 }
 0x5ef   : > { %v5300_v22 = vadd.f32 %v13811_v37, %v13810_v43  ;;  %v9777_v43 = vld [vmem:[#allocation2 + $0x40] sm:$0xf0]  ;;  %v13819_v37 = vld [vmem:[#allocation45_spill] sm:$0xff] }
 0x5f0   : > { %v12846_v33 = vadd.f32 %v6260_v50, %v5445_v19  ;;  %v13812_v19 = vld [vmem:[#allocation23_spill] sm:$0xff]  ;;  %v13814_v50 = vld [vmem:[#allocation58_spill] sm:$0xff] }
 0x5f1   : > { %v5389_v62 = vadd.f32 %v13812_v19, %v5300_v22  ;;  %v9091_v19 = vld [vmem:[#allocation2 + $0x38] sm:$0xf] }
 0x5f3   : > { %v6172_v41 = vpop.f32.mrf.mxu2  ;;  %v5447_v63 = vadd.f32 %v12691_v15, %v5389_v62 }
 0x5f4   : > { %v6173_v54 = vadd.f32 %v6172_v41, %v13809_v49  ;;  %v13815_v41 = vld [vmem:[#allocation122_spill] sm:$0xff]  ;;  %v13816_v49 = vld [vmem:[#allocation49_spill] sm:$0xff] }
 0x5f6   : > { %v12852_v57 = vpop.f32.mrf.mxu1  ;;  %v6262_v3 = vadd.f32 %v12797_v34, %v6173_v54  ;;  %v5302_v34 = vadd.f32 %v13816_v49, %v13815_v41  ;;  %v6274_v48 = vpop.f32.mrf.mxu3  ;;  %v13825_v49 = vld [vmem:[#allocation34_spill] sm:$0xff] }
 0x5f8   : > { %6214 = vmatmul.bf16.gmra.mxu2 %v8980_v53  ;;  %v12858_v23 = vadd.f32 %v6262_v3, %v5446_v58  ;;  %v5391_v53 = vadd.f32 %v13818_v47, %v5302_v34  ;;  %v12874_v3 = vpop.f32.mrf.mxu0  ;;  %v13826_v47 = vld [vmem:[#allocation47_spill] sm:$0xff] }
 0x5f9   : > { %7085 = vmatmul.bf16.gmra.mxu1 %v9256_v8  ;;  %13820 = vst [vmem:[#allocation54_spill] sm:$0xff] %v12874_v3 }
 0x5fa   : > { %v5448_v62 = vadd.f32 %v12691_v15, %v5391_v53  ;;  %v13828_v53 = vld [vmem:[#allocation66_spill] sm:$0xff] }
 0x5fb   : > { %v6175_v60 = vpop.f32.mrf.mxu2 }
 0x5fc   : > { %v6176_v18 = vadd.f32 %v6175_v60, %v13814_v50  ;;  %v13822_v60 = vld [vmem:[#allocation133_spill] sm:$0xff]  ;;  %v13823_v50 = vld [vmem:[#allocation67_spill] sm:$0xff] }
 0x5fd   : > { %v5305_v41 = vadd.f32 %v13823_v50, %v13822_v60  ;;  %v13832_v50 = vld [vmem:[#allocation134_spill] sm:$0xff] }
 0x5fe   : > { %v12864_v24 = vpop.f32.mrf.mxu1  ;;  %v6265_v5 = vadd.f32 %v12813_v20, %v6176_v18  ;;  %v9092_v18 = vor.u32 %v9777_v43, %v9091_v19  ;;  %v13831_v43 = vld [vmem:[#allocation33_spill] sm:$0xff] }
 0x5ff   : > { %v5394_v34 = vadd.f32 %v13825_v49, %v5305_v41 }
 0x600   : > { %v12870_v54 = vadd.f32 %v6265_v5, %v5447_v63  ;;  %v12890_v60 = vpop.f32.mrf.mxu0 }
 0x601   : > { %v5449_v9 = vadd.f32 %v12691_v15, %v5394_v34  ;;  %13829 = vst [vmem:[#allocation91_spill] sm:$0xff] %v12890_v60  ;;  %v13834_v34 = vld [vmem:[#allocation93_spill] sm:$0xff] }
 0x602   : > { %13817 = vst [vmem:[#allocation73_spill] sm:$0xff] %v12870_v54  ;;  %v13827_v54 = vld [vmem:[#allocation125_spill] sm:$0xff] }
 0x603   : > { %v6177_v58 = vpop.f32.mrf.mxu2 }
 0x604   : > { %v6178_v22 = vadd.f32 %v6177_v58, %v13819_v37  ;;  %v6276_v37 = vpop.f32.mrf.mxu3 }
 0x606   : > { %v12876_v8 = vpop.f32.mrf.mxu1  ;;  %v6267_v20 = vadd.f32 %v6266_v2, %v6178_v22 }
 0x607   : > { %13821 = vst [vmem:[#allocation22_spill] sm:$0xff] %v12876_v8  ;;  %v5307_v8 = vadd.f32 %v13828_v53, %v13827_v54 }
 0x608   : > { %7104 = vmatmul.bf16.vlgmr.msra.gmra.mxu2 %v9092_v18  ;;  %v12881_v63 = vadd.f32 %v6267_v20, %v5448_v62  ;;  %v9780_v62 = vld [vmem:[#allocation2 + $0x58] sm:$0xf0]  ;;  %v9103_v18 = vld [vmem:[#allocation2 + $0x50] sm:$0xf] }
 0x609   : > { %v5396_v22 = vadd.f32 %v13831_v43, %v5307_v8  ;;  %v13838_v8 = vld [vmem:[#allocation25_spill] sm:$0xff] }
 0x60a   : > { %13824 = vst [vmem:[#allocation27_spill] sm:$0xff] %v12881_v63 }
 0x60b   : > { %v6180_v5 = vpop.f32.mrf.mxu2  ;;  %v5450_v49 = vadd.f32 %v12691_v15, %v5396_v22 }
 0x60c   : > { %v6181_v58 = vadd.f32 %v6180_v5, %v13826_v47  ;;  %v13835_v5 = vld [vmem:[#allocation53_spill] sm:$0xff] }
 0x60d   : > { %v5310_v47 = vadd.f32 %v13835_v5, %v13834_v34 }
 0x60e   : > { %v12885_v3 = vpop.f32.mrf.mxu1  ;;  %v6270_v42 = vadd.f32 %v6269_v26, %v6181_v58  ;;  %v9104_v26 = vor.u32 %v9780_v62, %v9103_v18  ;;  %v6279_v58 = vpop.f32.mrf.mxu3  ;;  %v13844_v18 = vld [vmem:[#allocation37_spill] sm:$0xff] }
 0x60f   : > { %v5399_v53 = vadd.f32 %v13838_v8, %v5310_v47  ;;  %v9783_v47 = vld [vmem:[#allocation2 + $0x70] sm:$0xf0] }
 0x610   : > { %v12892_v2 = vadd.f32 %v6270_v42, %v5449_v9  ;;  %v12903_v9 = vpop.f32.mrf.mxu0 }
 0x611   : > { %13837 = vst [vmem:[#allocation90_spill] sm:$0xff] %v12903_v9  ;;  %v5451_v22 = vadd.f32 %v12691_v15, %v5399_v53  ;;  %v13848_v9 = vld [vmem:[#allocation127_spill] sm:$0xff] }
 0x612   : > { %13830 = vst [vmem:[#allocation41_spill] sm:$0xff] %v12892_v2  ;;  %v13841_v2 = vld [vmem:[#allocation46_spill] sm:$0xff] }
 0x613   : > { %v6182_v19 = vpop.f32.mrf.mxu2 }
 0x614   : > { %v6183_v41 = vadd.f32 %v6182_v19, %v13832_v50  ;;  %v13839_v19 = vld [vmem:[#allocation81_spill] sm:$0xff] }
 0x616   : > { %v12896_v20 = vpop.f32.mrf.mxu1  ;;  %v6272_v54 = vadd.f32 %v6271_v44, %v6183_v41  ;;  %v6281_v41 = vpop.f32.mrf.mxu3 }
 0x617   : > { %13833 = vst [vmem:[#allocation63_spill] sm:$0xff] %v12896_v20  ;;  %v13842_v20 = vld [vmem:[#allocation71_spill] sm:$0xff] }
 0x618   : > { %7109 = vmatmul.bf16.gmra.mxu2 %v9104_v26  ;;  %v12901_v42 = vadd.f32 %v6272_v54, %v5450_v49  ;;  %v5312_v34 = vadd.f32 %v13842_v20, %v13841_v2  ;;  %v12915_v5 = vpop.f32.mrf.mxu0  ;;  %v13846_v26 = vld [vmem:[#allocation50_spill] sm:$0xff] }
 0x619   : > { %13845 = vst [vmem:[#allocation23_spill] sm:$0xff] %v12915_v5  ;;  %v13852_v5 = vld [vmem:[#allocation136_spill] sm:$0xff] }
 0x61a   : > { %13836 = vst [vmem:[#allocation30_spill] sm:$0xff] %v12901_v42  ;;  %v5401_v49 = vadd.f32 %v13844_v18, %v5312_v34  ;;  %v13849_v42 = vld [vmem:[#allocation70_spill] sm:$0xff] }
 0x61b   : > { %v6185_v43 = vpop.f32.mrf.mxu2  ;;  %v5315_v2 = vadd.f32 %v13849_v42, %v13848_v9 }
 0x61c   : > { %v6186_v50 = vadd.f32 %v6185_v43, %v13839_v19  ;;  %v9115_v19 = vld [vmem:[#allocation2 + $0x68] sm:$0xf]  ;;  %v5452_v53 = vadd.f32 %v12691_v15, %v5401_v49 }
 0x61d   : > { %v9116_v20 = vor.u32 %v9783_v47, %v9115_v19  ;;  %v13858_v47 = vld [vmem:[#allocation26_spill] sm:$0xff] }
 0x61e   : > { %v12907_v60 = vpop.f32.mrf.mxu1  ;;  %v6275_v44 = vadd.f32 %v6274_v48, %v6186_v50 }
 0x61f   : > { %13840 = vst [vmem:[#allocation132_spill] sm:$0xff] %v12907_v60  ;;  %v13856_v60 = vld [vmem:[#allocation57_spill] sm:$0xff] }
 0x620   : > { %v12912_v62 = vadd.f32 %v6275_v44, %v5451_v22  ;;  %v13851_v22 = vld [vmem:[#allocation36_spill] sm:$0xff]  ;;  %v6284_v44 = vpop.f32.mrf.mxu3 }
 0x621   : > { %v5404_v34 = vadd.f32 %v13851_v22, %v5315_v2  ;;  %v13859_v2 = vld [vmem:[#allocation96_spill] sm:$0xff] }
 0x622   : > { %13843 = vst [vmem:[#allocation62_spill] sm:$0xff] %v12912_v62  ;;  %v9127_v22 = vld [vmem:[#allocation2 + $0x80] sm:$0xf] }
 0x623   : > { %v6187_v54 = vpop.f32.mrf.mxu2  ;;  %v5453_v49 = vadd.f32 %v12691_v15, %v5404_v34  ;;  %v13862_v34 = vld [vmem:[#allocation75_spill] sm:$0xff] }
 0x624   : > { %v6188_v8 = vadd.f32 %v6187_v54, %v13846_v26  ;;  %v12927_v54 = vpop.f32.mrf.mxu0 }
 0x625   : > { %13853 = vst [vmem:[#allocation49_spill] sm:$0xff] %v12927_v54  ;;  %v13861_v54 = vld [vmem:[#allocation38_spill] sm:$0xff] }
 0x626   : > { %v12918_v43 = vpop.f32.mrf.mxu1  ;;  %v6277_v48 = vadd.f32 %v6276_v37, %v6188_v8 }
 0x627   : > { %13847 = vst [vmem:[#allocation58_spill] sm:$0xff] %v12918_v43  ;;  %v13855_v43 = vld [vmem:[#allocation97_spill] sm:$0xff] }
 0x628   : > { %7114 = vmatmul.bf16.gmra.mxu2 %v9116_v20  ;;  %v12923_v50 = vadd.f32 %v6277_v48, %v5452_v53  ;;  %v5317_v42 = vadd.f32 %v13856_v60, %v13855_v43  ;;  %v9786_v53 = vld [vmem:[#allocation2 + $0x88] sm:$0xf0]  ;;  %v6286_v20 = vpop.f32.mrf.mxu3  ;;  %v13865_v43 = vld [vmem:[#allocation40_spill] sm:$0xff] }
 0x629   : > { %v9128_v60 = vor.u32 %v9786_v53, %v9127_v22 }
 0x62a   : > { %13850 = vst [vmem:[#allocation122_spill] sm:$0xff] %v12923_v50  ;;  %v5406_v8 = vadd.f32 %v13858_v47, %v5317_v42  ;;  %v5320_v50 = vadd.f32 %v13862_v34, %v13861_v54  ;;  %v13873_v34 = vld [vmem:[#allocation129_spill] sm:$0xff] }
 0x62b   : > { %v6190_v18 = vpop.f32.mrf.mxu2 }
 0x62c   : > { %v6191_v62 = vadd.f32 %v6190_v18, %v13852_v5  ;;  %v5454_v18 = vadd.f32 %v12691_v15, %v5406_v8  ;;  %v13868_v8 = vld [vmem:[#allocation128_spill] sm:$0xff] }
 0x62e   : > { %v12929_v26 = vpop.f32.mrf.mxu1  ;;  %v6280_v37 = vadd.f32 %v6279_v58, %v6191_v62  ;;  %v12943_v58 = vpop.f32.mrf.mxu0 }
 0x62f   : > { %13854 = vst [vmem:[#allocation24_spill] sm:$0xff] %v12929_v26 }
 0x630   : > { %v12934_v9 = vadd.f32 %v6280_v37, %v5453_v49  ;;  %13863 = vst [vmem:[#allocation67_spill] sm:$0xff] %v12943_v58  ;;  %v5409_v49 = vadd.f32 %v13865_v43, %v5320_v50  ;;  %v13866_v37 = vld [vmem:[#allocation101_spill] sm:$0xff]  ;;  %v9789_v50 = vld [vmem:[#allocation2 + $0xa0] sm:$0xf0] }
 0x632   : > { %13857 = vst [vmem:[#allocation45_spill] sm:$0xff] %v12934_v9  ;;  %v13869_v9 = vld [vmem:[#allocation74_spill] sm:$0xff] }
 0x633   : > { %v6192_v19 = vpop.f32.mrf.mxu2 }
 0x634   : > { %v6193_v48 = vadd.f32 %v6192_v19, %v13859_v2  ;;  %v5455_v2 = vadd.f32 %v12691_v15, %v5409_v49 }
 0x636   : > { %v12938_v5 = vpop.f32.mrf.mxu1  ;;  %v6282_v26 = vadd.f32 %v6281_v41, %v6193_v48  ;;  %v6289_v41 = vpop.f32.mrf.mxu3 }
 0x637   : > { %13860 = vst [vmem:[#allocation133_spill] sm:$0xff] %v12938_v5  ;;  %v5322_v5 = vadd.f32 %v13869_v9, %v13868_v8  ;;  %v12956_v48 = vpop.f32.mrf.mxu0 }
 0x638   : > { %7119 = vmatmul.bf16.gmra.mxu2 %v9128_v60  ;;  %v12945_v62 = vadd.f32 %v6282_v26, %v5454_v18  ;;  %13871 = vst [vmem:[#allocation66_spill] sm:$0xff] %v12956_v48  ;;  %v13872_v26 = vld [vmem:[#allocation39_spill] sm:$0xff]  ;;  %v13882_v48 = vld [vmem:[#allocation116_spill] sm:$0xff] }
 0x639   : > { %v5411_v22 = vadd.f32 %v13872_v26, %v5322_v5 }
 0x63a   : > { %13864 = vst [vmem:[#allocation34_spill] sm:$0xff] %v12945_v62  ;;  %v13876_v62 = vld [vmem:[#allocation61_spill] sm:$0xff] }
 0x63b   : > { %v6195_v42 = vpop.f32.mrf.mxu2  ;;  %v5456_v49 = vadd.f32 %v12691_v15, %v5411_v22 }
 0x63c   : > { %v6196_v47 = vadd.f32 %v6195_v42, %v13866_v37  ;;  %v9139_v42 = vld [vmem:[#allocation2 + $0x98] sm:$0xf]  ;;  %v13875_v37 = vld [vmem:[#allocation85_spill] sm:$0xff] }
 0x63d   : > { %v5325_v9 = vadd.f32 %v13876_v62, %v13875_v37 }
 0x63e   : > { %v12949_v19 = vpop.f32.mrf.mxu1  ;;  %v6285_v54 = vadd.f32 %v6284_v44, %v6196_v47  ;;  %v9140_v47 = vor.u32 %v9789_v50, %v9139_v42  ;;  %v6291_v8 = vpop.f32.mrf.mxu3 }
 0x63f   : > { %13867 = vst [vmem:[#allocation47_spill] sm:$0xff] %v12949_v19  ;;  %v12968_v26 = vpop.f32.mrf.mxu0  ;;  %v13883_v19 = vld [vmem:[#allocation79_spill] sm:$0xff] }
 0x640   : > { %v12954_v53 = vadd.f32 %v6285_v54, %v5455_v2  ;;  %v13878_v54 = vld [vmem:[#allocation29_spill] sm:$0xff]  ;;  %13879 = vst [vmem:[#allocation93_spill] sm:$0xff] %v12968_v26  ;;  %v5327_v62 = vadd.f32 %v13883_v19, %v13882_v48  ;;  %v13888_v26 = vld [vmem:[#allocation78_spill] sm:$0xff] }
 0x641   : > { %v5414_v5 = vadd.f32 %v13878_v54, %v5325_v9  ;;  %v9151_v54 = vld [vmem:[#allocation2 + $0xb0] sm:$0xf] }
 0x642   : > { %13870 = vst [vmem:[#allocation125_spill] sm:$0xff] %v12954_v53 }
 0x643   : > { %v6197_v18 = vpop.f32.mrf.mxu2  ;;  %v5457_v22 = vadd.f32 %v12691_v15, %v5414_v5  ;;  %v13887_v5 = vld [vmem:[#allocation100_spill] sm:$0xff] }
 0x644   : > { %v6198_v60 = vadd.f32 %v6197_v18, %v13873_v34  ;;  %v13880_v18 = vld [vmem:[#allocation28_spill] sm:$0xff]  ;;  %v5330_v58 = vadd.f32 %v13888_v26, %v13887_v5  ;;  %v13896_v5 = vld [vmem:[#allocation139_spill] sm:$0xff] }
 0x646   : > { %v12960_v43 = vpop.f32.mrf.mxu1  ;;  %v6287_v44 = vadd.f32 %v6286_v20, %v6198_v60  ;;  %v13885_v60 = vld [vmem:[#allocation65_spill] sm:$0xff]  ;;  %v6294_v37 = vpop.f32.mrf.mxu3 }
 0x647   : > { %13874 = vst [vmem:[#allocation33_spill] sm:$0xff] %v12960_v43  ;;  %v5416_v42 = vadd.f32 %v13885_v60, %v5327_v62 }
 0x648   : > { %7124 = vmatmul.bf16.gmra.mxu2 %v9140_v47  ;;  %v12965_v2 = vadd.f32 %v6287_v44, %v5456_v49  ;;  %v9792_v49 = vld [vmem:[#allocation2 + $0xb8] sm:$0xf0]  ;;  %v13886_v44 = vld [vmem:[#allocation89_spill] sm:$0xff] }
 0x64a   : > { %13877 = vst [vmem:[#allocation134_spill] sm:$0xff] %v12965_v2  ;;  %v6987_v2 = vpop.f32.mrf.mxu0 }
 0x64b   : > { %v6200_v53 = vpop.f32.mrf.mxu2 }
 0x64c   : > { %v6201_v34 = vadd.f32 %v6200_v53, %v13880_v18  ;;  %v9152_v18 = vor.u32 %v9792_v49, %v9151_v54  ;;  %v13891_v49 = vld [vmem:[#allocation104_spill] sm:$0xff]  ;;  %v13892_v54 = vld [vmem:[#allocation42_spill] sm:$0xff] }
 0x64e   : > { %v12971_v43 = vpop.f32.mrf.mxu1  ;;  %v6290_v20 = vadd.f32 %v6289_v41, %v6201_v34  ;;  %v13889_v34 = vld [vmem:[#allocation130_spill] sm:$0xff] }
 0x64f   : > { %13881 = vst [vmem:[#allocation53_spill] sm:$0xff] %v12971_v43  ;;  %v5458_v43 = vadd.f32 %v12691_v15, %v5416_v42  ;;  %v5332_v42 = vadd.f32 %v13892_v54, %v13891_v49 }
 0x650   : > { %v12976_v50 = vadd.f32 %v6290_v20, %v5457_v22  ;;  %v5419_v22 = vadd.f32 %v13889_v34, %v5330_v58  ;;  %v13890_v20 = vld [vmem:[#allocation138_spill] sm:$0xff] }
 0x652   : > { %13884 = vst [vmem:[#allocation25_spill] sm:$0xff] %v12976_v50 }
 0x653   : > { %v6202_v9 = vpop.f32.mrf.mxu2 }
 0x654   : > { %v6203_v47 = vadd.f32 %v6202_v9, %v13886_v44  ;;  %v6296_v9 = vpop.f32.mrf.mxu3  ;;  %v5459_v44 = vadd.f32 %v12691_v15, %v5419_v22 }
 0x656   : > { %v7076_v53 = vpop.f32.mrf.mxu1  ;;  %v6292_v19 = vadd.f32 %v6291_v8, %v6203_v47  ;;  %v13894_v8 = vld [vmem:[#allocation82_spill] sm:$0xff] }
 0x657   : > { %v12983_v41 = vadd.f32 %v7076_v53, %v6987_v2  ;;  %v5421_v2 = vadd.f32 %v13894_v8, %v5332_v42  ;;  %v9795_v47 = vld [vmem:[#allocation2 + $0xd0] sm:$0xf0]  ;;  %v13900_v8 = vld [vmem:[#allocation141_spill] sm:$0xff] }
 0x658   : > { %7129 = vmatmul.bf16.gmra.mxu2 %v9152_v18  ;;  %v12985_v48 = vadd.f32 %v6292_v19, %v5458_v43  ;;  %v13895_v43 = vld [vmem:[#allocation140_spill] sm:$0xff]  ;;  %v9163_v18 = vld [vmem:[#allocation2 + $0xc8] sm:$0xf] }
 0x659   : > { %v5460_v58 = vadd.f32 %v12691_v15, %v5421_v2  ;;  %v13897_v19 = vld [vmem:[#allocation32_spill] sm:$0xff]  ;;  %v9164_v22 = vor.u32 %v9795_v47, %v9163_v18  ;;  %v9798_v18 = vld [vmem:[#allocation2 + $0xe8] sm:$0xf0] }
 0x65a   : > { %v5335_v34 = vadd.f32 %v13897_v19, %v13896_v5  ;;  %v9175_v19 = vld [vmem:[#allocation2 + $0xe0] sm:$0xf] }
 0x65b   : > { %v6205_v62 = vpop.f32.mrf.mxu2 }
 0x65c   : > { %v6206_v60 = vadd.f32 %v6205_v62, %v13890_v20  ;;  %v6299_v20 = vpop.f32.mrf.mxu3 }
 0x65e   : > { %v6295_v50 = vadd.f32 %v6294_v37, %v6206_v60 }
 0x660   : > { %v12992_v63 = vadd.f32 %v6295_v50, %v5459_v44  ;;  %v13898_v50 = vld [vmem:[#allocation35_spill] sm:$0xff]  ;;  %v13899_v44 = vld [vmem:[#allocation142_spill] sm:$0xff] }
 0x661   : > { %v5424_v37 = vadd.f32 %v13898_v50, %v5335_v34 }
 0x662   : > { %13893 = vst [vmem:[#allocation81_spill] sm:$0xff] %v12992_v63 }
 0x663   : > { %v6207_v26 = vpop.f32.mrf.mxu2  ;;  %v5461_v42 = vadd.f32 %v12691_v15, %v5424_v37  ;;  %v9176_v37 = vor.u32 %v9798_v18, %v9175_v19  ;;  %v9801_v18 = vld [vmem:[#allocation2 + $0x100] sm:$0xf0] }
 0x664   : > { %v6208_v53 = vadd.f32 %v6207_v26, %v13895_v43  ;;  %v13901_v26 = vld [vmem:[#allocation114_spill] sm:$0xff]  ;;  %v6301_v5 = vpop.f32.mrf.mxu3 }
 0x665   : > { %v5337_v43 = vadd.f32 %v13901_v26, %v13900_v8 }
 0x666   : > { %v6297_v62 = vadd.f32 %v6296_v9, %v6208_v53  ;;  %v13902_v9 = vld [vmem:[#allocation131_spill] sm:$0xff] }
 0x667   : > { %v5426_v47 = vadd.f32 %v13902_v9, %v5337_v43  ;;  %v13906_v43 = vld [vmem:[#allocation51_spill] sm:$0xff] }
 0x668   : > { %7134 = vmatmul.bf16.gmra.mxu2 %v9164_v22  ;;  %v12999_v49 = vadd.f32 %v6297_v62, %v5460_v58  ;;  %v13903_v62 = vld [vmem:[#allocation69_spill] sm:$0xff] }
 0x669   : > { %v5462_v34 = vadd.f32 %v12691_v15, %v5426_v47  ;;  %v5340_v22 = vadd.f32 %v13903_v62, %v12678_v59  ;;  %v13907_v59 = vld [vmem:[#allocation118_spill] sm:$0xff] }
 0x66b   : > { %v6210_v60 = vpop.f32.mrf.mxu2 }
 0x66c   : > { %v6211_v54 = vadd.f32 %v6210_v60, %v13899_v44 }
 0x66e   : > { %v6300_v2 = vadd.f32 %v6299_v20, %v6211_v54  ;;  %v13904_v20 = vld [vmem:[#allocation87_spill] sm:$0xff]  ;;  %v6304_v54 = vpop.f32.mrf.mxu3 }
 0x66f   : > { %v5429_v44 = vadd.f32 %v13904_v20, %v5340_v22  ;;  %v13908_v20 = vld [vmem:[#allocation43_spill] sm:$0xff] }
 0x670   : > { %v13006_v63 = vadd.f32 %v6300_v2, %v5461_v42 }
 0x671   : > { %v5463_v26 = vadd.f32 %v12691_v15, %v5429_v44  ;;  %v13909_v44 = vld [vmem:[#allocation119_spill] sm:$0xff] }
 0x673   : > { %v6212_v53 = vpop.f32.mrf.mxu2 }
 0x674   : > { %v6213_v58 = vadd.f32 %v6212_v53, %v12680_v16  ;;  %v13905_v16 = vld [vmem:[#allocation143_spill] sm:$0xff] }
 0x675   : > { %v5342_v2 = vadd.f32 %v13906_v43, %v13905_v16  ;;  %v13912_v16 = vld [vmem:[#allocation145_spill] sm:$0xff] }
 0x676   : > { %v6302_v50 = vadd.f32 %v6301_v5, %v6213_v58  ;;  %v6306_v19 = vpop.f32.mrf.mxu3 }
 0x677   : > { %v5431_v5 = vadd.f32 %v13907_v59, %v5342_v2 }
 0x678   : > { %7139 = vmatmul.bf16.gmra.mxu2 %v9176_v37  ;;  %v13013_v60 = vadd.f32 %v6302_v50, %v5462_v34  ;;  %v9187_v34 = vld [vmem:[#allocation2 + $0xf8] sm:$0xf]  ;;  %v13030_v37 = vld [vmem:[%s13304_s2] ss:$0 sm:$0xff] }
 0x679   : > { %v5464_v62 = vadd.f32 %v12691_v15, %v5431_v5  ;;  %v13914_v5 = vld [vmem:[#allocation121_spill] sm:$0xff] }
 0x67b   : > { %v6215_v42 = vpop.f32.mrf.mxu2 }
 0x67c   : > { %v6216_v8 = vadd.f32 %v6215_v42, %v12684_v29  ;;  %v9188_v29 = vor.u32 %v9801_v18, %v9187_v34  ;;  %v13910_v42 = vld [vmem:[#allocation86_spill] sm:$0xff]  ;;  %v13915_v18 = vld [vmem:[#allocation144_spill] sm:$0xff] }
 0x67e   : > { %v6305_v9 = vadd.f32 %v6304_v54, %v6216_v8  ;;  %v5267_v54 = vadd.f32 %v13909_v44, %v13908_v20  ;;  %v9804_v44 = vld [vmem:[#allocation2 + $0x118] sm:$0xf0] }
 0x680   : > { %v13020_v47 = vadd.f32 %v6305_v9, %v5463_v26  ;;  %v13911_v26 = vld [vmem:[#allocation83_spill] sm:$0xff]  ;;  %v13913_v9 = vld [vmem:[#allocation44_spill] sm:$0xff] }
 0x681   : > { %v6143_v43 = vadd.f32 %v13912_v16, %v13911_v26  ;;  %v624_v59 = vadd.f32 %v13030_v37, %v13913_v9  ;;  %v13918_v26 = vld [vmem:[#allocation48_spill] sm:$0xff] }
 0x682   : > { %v626_v16 = vadd.f32 %v13030_v37, %v13918_v26 }
 0x683   : > { %v6217_v53 = vpop.f32.mrf.mxu2 }
 0x684   : > { %v6218_v58 = vadd.f32 %v6217_v53, %v12695_v39  ;;  %v7017_v39 = vadd.f32 %v12703_v52, %v13910_v42  ;;  %v5356_v53 = vadd.f32 %v13914_v5, %v5267_v54 }
 0x686   : > { %v6307_v22 = vadd.f32 %v6306_v19, %v6218_v58  ;;  %v13916_v19 = vld [vmem:[#allocation55_spill] sm:$0xff] }
 0x687   : > { %v6232_v34 = vadd.f32 %v13916_v19, %v6143_v43  ;;  %v13919_v43 = vld [vmem:[#allocation135_spill] sm:$0xff] }
 0x688   : > { %7144 = vmatmul.bf16.gmra.mxu2 %v9188_v29  ;;  %v13025_v50 = vadd.f32 %v6307_v22, %v5464_v62  ;;  %v5434_v22 = vadd.f32 %v12691_v15, %v5356_v53  ;;  %v13917_v29 = vld [vmem:[#allocation137_spill] sm:$0xff]  ;;  %v13920_v53 = vld [vmem:[#allocation52_spill] sm:$0xff] }
 0x689   : > { %v7019_v52 = vadd.f32 %v12709_v61, %v13917_v29 }
 0x68a   : > { %v6310_v42 = vadd.f32 %v6232_v34, %v5434_v22  ;;  %v13921_v34 = vld [vmem:[#allocation59_spill] sm:$0xff] }
 0x68b   : > { %v7105_v8 = vpop.f32.mrf.mxu2  ;;  %v7024_v22 = vadd.f32 %v12737_v51, %v13921_v34 }
 0x68c   : > { %v7106_v2 = vadd.f32 %v7105_v8, %v7017_v39  ;;  %v9199_v8 = vld [vmem:[#allocation2 + $0x110] sm:$0xf] }
 0x68d   : > { %v9200_v9 = vor.u32 %v9804_v44, %v9199_v8  ;;  %v9211_v44 = vld [vmem:[#allocation2 + $0x128] sm:$0xf] }
 0x68e   : > { %v7185_v58 = vadd.f32 %v7106_v2, %v13915_v18  ;;  %v629_v18 = vadd.f32 %v13030_v37, %v13920_v53 }
 0x690   : > { %v13043_v62 = vadd.f32 %v7185_v58, %v624_v59  ;;  %v7022_v59 = vadd.f32 %v12723_v30, %v13919_v43  ;;  %v13922_v30 = vld [vmem:[#allocation56_spill] sm:$0xff] }
 0x691   : > { %v13924_v43 = vld [vmem:[#allocation60_spill] sm:$0xff] }
 0x693   : > { %v7107_v20 = vpop.f32.mrf.mxu2 }
 0x694   : > { %v7108_v39 = vadd.f32 %v7107_v20, %v7019_v52  ;;  %v9807_v52 = vld [vmem:[#allocation2 + $0x130] sm:$0xf0] }
 0x695   : > { %v9212_v8 = vor.u32 %v9807_v52, %v9211_v44 }
 0x696   : > { %v7186_v54 = vadd.f32 %v7108_v39, %v6310_v42  ;;  %v631_v42 = vadd.f32 %v13030_v37, %v13922_v30 }
 0x698   : > { %v13050_v2 = vadd.f32 %v7186_v54, %v626_v16  ;;  %7149 = vmatmul.bf16.gmra.mxu2 %v9200_v9  ;;  %v13923_v16 = vld [vmem:[#allocation77_spill] sm:$0xff] }
 0x69a   : > { %v7345_v15 = vpack.c.bf16 %v13050_v2, %v13043_v62 }
 0x69b   : > { %v7110_v61 = vpop.f32.mrf.mxu2 }
 0x69c   : > { %v7111_v5 = vadd.f32 %v7110_v61, %v7022_v59  ;;  %v634_v59 = vadd.f32 %v13030_v37, %v13924_v43 }
 0x69e   : > { %v7187_v58 = vadd.f32 %v7111_v5, %v12717_v4  ;;  %v7027_v4 = vadd.f32 %v12751_v7, %v13923_v16  ;;  %v13926_v7 = vld [vmem:[#allocation64_spill] sm:$0xff] }
 0x6a0   : > { %v13059_v19 = vadd.f32 %v7187_v58, %v629_v18  ;;  %v9810_v58 = vld [vmem:[#allocation2 + $0x148] sm:$0xf0] }
 0x6a3   : > { %v7112_v29 = vpop.f32.mrf.mxu2 }
 0x6a4   : > { %v7113_v20 = vadd.f32 %v7112_v29, %v7024_v22  ;;  %v9223_v22 = vld [vmem:[#allocation2 + $0x140] sm:$0xf]  ;;  %v636_v29 = vadd.f32 %v13030_v37, %v13926_v7 }
 0x6a6   : > { %v7188_v39 = vadd.f32 %v7113_v20, %v12729_v56  ;;  %v13925_v56 = vld [vmem:[#allocation94_spill] sm:$0xff]  ;;  %v9224_v20 = vor.u32 %v9810_v58, %v9223_v22 }
 0x6a7   : > { %v7029_v53 = vadd.f32 %v12763_v6, %v13925_v56 }
 0x6a8   : > { %v13066_v26 = vadd.f32 %v7188_v39, %v631_v42  ;;  %7154 = vmatmul.bf16.gmra.mxu2 %v9212_v8  ;;  %v13927_v39 = vld [vmem:[#allocation68_spill] sm:$0xff] }
 0x6a9   : > { %v639_v8 = vadd.f32 %v13030_v37, %v13927_v39  ;;  %v9263_v39 = vld [vmem:[#allocation2 + $0x198] sm:$0xf] }
 0x6aa   : > { %v7346_v54 = vpack.c.bf16 %v13066_v26, %v13059_v19  ;;  %v13960_v26 = vld [vmem:[#allocation111_spill] sm:$0xff] }
 0x6ab   : > { %v7115_v51 = vpop.f32.mrf.mxu2 }
 0x6ac   : > { %v7116_v9 = vadd.f32 %v7115_v51, %v7027_v4 }
 0x6ae   : > { %v7189_v61 = vadd.f32 %v7116_v9, %v12743_v28  ;;  %v7032_v28 = vadd.f32 %v12775_v38, %v12719_v46  ;;  %v9813_v9 = vld [vmem:[#allocation2 + $0x160] sm:$0xf0] }
 0x6af   : > { %v13928_v46 = vld [vmem:[#allocation72_spill] sm:$0xff] }
 0x6b0   : > { %v13075_v5 = vadd.f32 %v7189_v61, %v634_v59  ;;  %v9235_v59 = vld [vmem:[#allocation2 + $0x158] sm:$0xf]  ;;  %v641_v38 = vadd.f32 %v13030_v37, %v13928_v46 }
 0x6b1   : > { %v9236_v56 = vor.u32 %v9813_v9, %v9235_v59  ;;  %v13931_v59 = vld [vmem:[#allocation84_spill] sm:$0xff] }
 0x6b2   : > { %v649_v46 = vadd.f32 %v13030_v37, %v13931_v59 }
 0x6b3   : > { %v7117_v18 = vpop.f32.mrf.mxu2 }
 0x6b4   : > { %v7118_v34 = vadd.f32 %v7117_v18, %v7029_v53 }
 0x6b6   : > { %v7190_v52 = vadd.f32 %v7118_v34, %v12757_v32  ;;  %v7034_v32 = vadd.f32 %v12789_v21, %v12734_v12  ;;  %v13929_v12 = vld [vmem:[#allocation76_spill] sm:$0xff] }
 0x6b7   : > { %v644_v21 = vadd.f32 %v13030_v37, %v13929_v12  ;;  %v9819_v12 = vld [vmem:[#allocation2 + $0x190] sm:$0xf0] }
 0x6b8   : > { %v13082_v44 = vadd.f32 %v7190_v52, %v636_v29  ;;  %7159 = vmatmul.bf16.gmra.mxu2 %v9224_v20  ;;  %v9816_v29 = vld [vmem:[#allocation2 + $0x178] sm:$0xf0]  ;;  %v9247_v20 = vld [vmem:[#allocation2 + $0x170] sm:$0xf] }
 0x6ba   : > { %v7347_v30 = vpack.c.bf16 %v13082_v44, %v13075_v5  ;;  %v13958_v5 = vld [vmem:[#allocation49_spill] sm:$0xff] }
 0x6bb   : > { %v7120_v6 = vpop.f32.mrf.mxu2  ;;  %v13959_v44 = vld [vmem:[#allocation133_spill] sm:$0xff] }
 0x6bc   : > { %v7121_v42 = vadd.f32 %v7120_v6, %v7032_v28  ;;  %v13930_v28 = vld [vmem:[#allocation80_spill] sm:$0xff] }
 0x6bd   : > { %v646_v6 = vadd.f32 %v13030_v37, %v13930_v28  ;;  %v13933_v28 = vld [vmem:[#allocation92_spill] sm:$0xff] }
 0x6be   : > { %v7191_v16 = vadd.f32 %v7121_v42, %v12771_v35 }
 0x6c0   : > { %v13091_v4 = vadd.f32 %v7191_v16, %v639_v8  ;;  %v9821_v8 = vld [vmem:[#allocation2 + $0x1a0] sm:$0xf0]  ;;  %v9820_v16 = vld [vmem:[#allocation2 + $0x19c] sm:$0xf] }
 0x6c3   : > { %v7122_v51 = vpop.f32.mrf.mxu2 }
 0x6c4   : > { %v7123_v43 = vadd.f32 %v7122_v51, %v7034_v32  ;;  %v9265_v51 = vld [vmem:[#allocation2 + $0x1a4] sm:$0xf0] }
 0x6c5   : > { %v9268_v9 = vor.u32 %v9820_v16, %v9265_v51 }
 0x6c6   : > { %v7192_v61 = vadd.f32 %v7123_v43, %v12783_v40  ;;  %v7039_v40 = vadd.f32 %v12818_v36, %v12769_v10  ;;  %v7042_v10 = vadd.f32 %v12828_v25, %v12785_v11  ;;  %v13932_v25 = vld [vmem:[#allocation88_spill] sm:$0xff] }
 0x6c7   : > { %7090 = vmatmul.bf16.gmra.mxu1 %v9268_v9  ;;  %v13935_v9 = vld [vmem:[#allocation124_spill] sm:$0xff] }
 0x6c8   : > { %v13098_v53 = vadd.f32 %v7192_v61, %v641_v38  ;;  %7164 = vmatmul.bf16.gmra.mxu2 %v9236_v56  ;;  %v7044_v56 = vadd.f32 %v12840_v45, %v12800_v0  ;;  %v654_v0 = vadd.f32 %v13030_v37, %v13933_v28 }
 0x6ca   : > { %v7348_v35 = vpack.c.bf16 %v13098_v53, %v13091_v4  ;;  %v13956_v4 = vld [vmem:[#allocation110_spill] sm:$0xff] }
 0x6cb   : > { %v7125_v18 = vpop.f32.mrf.mxu2  ;;  %v671_v53 = vadd.f32 %v13030_v37, %v13956_v4 }
 0x6cc   : > { %v7126_v58 = vadd.f32 %v7125_v18, %v12808_v55  ;;  %v9248_v55 = vor.u32 %v9816_v29, %v9247_v20  ;;  %v7047_v29 = vadd.f32 %v12852_v57, %v12816_v31 }
 0x6ce   : > { %v7193_v34 = vadd.f32 %v7126_v58, %v12795_v13  ;;  %v9264_v13 = vor.u32 %v9821_v8, %v9263_v39  ;;  %v9259_v58 = vld [vmem:[#allocation2 + $0x188] sm:$0xf] }
 0x6d0   : > { %v13106_v22 = vadd.f32 %v7193_v34, %v644_v21  ;;  %7001 = vmatmul.bf16.gmra.mxu0 %v9264_v13  ;;  %v651_v21 = vadd.f32 %v13030_v37, %v13932_v25  ;;  %v13934_v13 = vld [vmem:[#allocation95_spill] sm:$0xff] }
 0x6d1   : > { %v656_v31 = vadd.f32 %v13030_v37, %v13934_v13  ;;  %v13941_v25 = vld [vmem:[#allocation27_spill] sm:$0xff] }
 0x6d2   : > { %v13948_v13 = vld [vmem:[#allocation107_spill] sm:$0xff] }
 0x6d3   : > { %v7127_v7 = vpop.f32.mrf.mxu2 }
 0x6d4   : > { %v7128_v52 = vadd.f32 %v7127_v7, %v7039_v40  ;;  %v9260_v40 = vor.u32 %v9819_v12, %v9259_v58 }
 0x6d6   : > { %v7194_v42 = vadd.f32 %v7128_v52, %v12810_v1 }
 0x6d8   : > { %v13113_v32 = vadd.f32 %v7194_v42, %v646_v6  ;;  %7169 = vmatmul.bf16.gmra.mxu2 %v9248_v55  ;;  %v9271_v42 = vld [vmem:[#allocation2 + $0x1a0] sm:$0xf]  ;;  %v9822_v55 = vld [vmem:[#allocation2 + $0x1a8] sm:$0xf0] }
 0x6d9   : > { %v9272_v16 = vor.u32 %v9822_v55, %v9271_v42  ;;  %v13946_v55 = vld [vmem:[#allocation91_spill] sm:$0xff] }
 0x6da   : > { %v7349_v36 = vpack.c.bf16 %v13113_v32, %v13106_v22  ;;  %v13954_v22 = vld [vmem:[#allocation23_spill] sm:$0xff]  ;;  %v13955_v32 = vld [vmem:[#allocation24_spill] sm:$0xff] }
 0x6db   : > { %v7130_v43 = vpop.f32.mrf.mxu2 }
 0x6dc   : > { %v7131_v1 = vadd.f32 %v7130_v43, %v7042_v10  ;;  %v13936_v10 = vld [vmem:[#allocation22_spill] sm:$0xff] }
 0x6dd   : > { %v7052_v43 = vadd.f32 %v13936_v10, %v13935_v9  ;;  %v13950_v10 = vld [vmem:[#allocation90_spill] sm:$0xff] }
 0x6de   : > { %v7195_v38 = vadd.f32 %v7131_v1, %v12824_v17 }
 0x6e0   : > { %v7323_v61 = vadd.f32 %v7195_v38, %v649_v46  ;;  %v13937_v46 = vld [vmem:[#allocation98_spill] sm:$0xff] }
 0x6e1   : > { %v659_v38 = vadd.f32 %v13030_v37, %v13937_v46 }
 0x6e3   : > { %v7132_v18 = vpop.f32.mrf.mxu2 }
 0x6e4   : > { %v7133_v11 = vadd.f32 %v7132_v18, %v7044_v56  ;;  %v13939_v56 = vld [vmem:[#allocation31_spill] sm:$0xff] }
 0x6e5   : > { %v7054_v18 = vadd.f32 %v12885_v3, %v13939_v56 }
 0x6e6   : > { %v7196_v34 = vadd.f32 %v7133_v11, %v12836_v14  ;;  %v7049_v14 = vadd.f32 %v12864_v24, %v12834_v27  ;;  %v13938_v27 = vld [vmem:[#allocation73_spill] sm:$0xff] }
 0x6e8   : > { %v7324_v7 = vadd.f32 %v7196_v34, %v651_v21  ;;  %7174 = vmatmul.bf16.gmra.mxu2 %v9260_v40  ;;  %v13942_v40 = vld [vmem:[#allocation54_spill] sm:$0xff] }
 0x6ea   : > { %v7350_v17 = vpack.c.bf16 %v7324_v7, %v7323_v61  ;;  %v13943_v7 = vld [vmem:[#allocation63_spill] sm:$0xff] }
 0x6eb   : > { %v7135_v52 = vpop.f32.mrf.mxu2 }
 0x6ec   : > { %v7136_v20 = vadd.f32 %v7135_v52, %v7047_v29  ;;  %v7057_v29 = vadd.f32 %v13943_v7, %v13942_v40  ;;  %v13962_v40 = vld [vmem:[#allocation67_spill] sm:$0xff] }
 0x6ed   : > { %v13963_v7 = vld [vmem:[#allocation47_spill] sm:$0xff] }
 0x6ee   : > { %v7197_v45 = vadd.f32 %v7136_v20, %v12846_v33 }
 0x6f0   : > { %v7325_v6 = vadd.f32 %v7197_v45, %v654_v0  ;;  %v13944_v0 = vld [vmem:[#allocation105_spill] sm:$0xff] }
 0x6f1   : > { %v664_v45 = vadd.f32 %v13030_v37, %v13944_v0 }
 0x6f3   : > { %v7137_v39 = vpop.f32.mrf.mxu2 }
 0x6f4   : > { %v7138_v8 = vadd.f32 %v7137_v39, %v7049_v14  ;;  %v13947_v14 = vld [vmem:[#allocation132_spill] sm:$0xff] }
 0x6f5   : > { %v7059_v39 = vadd.f32 %v13947_v14, %v13946_v55 }
 0x6f6   : > { %v7198_v57 = vadd.f32 %v7138_v8, %v12858_v23  ;;  %v13940_v23 = vld [vmem:[#allocation102_spill] sm:$0xff] }
 0x6f7   : > { %v661_v11 = vadd.f32 %v13030_v37, %v13940_v23 }
 0x6f8   : > { %v7326_v51 = vadd.f32 %v7198_v57, %v656_v31  ;;  %7179 = vmatmul.bf16.gmra.mxu2 %v9272_v16  ;;  %v666_v31 = vadd.f32 %v13030_v37, %v13948_v13  ;;  %v13949_v57 = vld [vmem:[#allocation30_spill] sm:$0xff]  ;;  %v13969_v13 = vld [vmem:[#allocation125_spill] sm:$0xff] }
 0x6fa   : > { %v7351_v33 = vpack.c.bf16 %v7326_v51, %v7325_v6  ;;  %v13945_v6 = vld [vmem:[#allocation41_spill] sm:$0xff] }
 0x6fb   : > { %v7140_v1 = vpop.f32.mrf.mxu2 }
 0x6fc   : > { %v7141_v59 = vadd.f32 %v7140_v1, %v7052_v43  ;;  %v13951_v43 = vld [vmem:[#allocation58_spill] sm:$0xff] }
 0x6fe   : > { %v7199_v24 = vadd.f32 %v7141_v59, %v13938_v27  ;;  %v13953_v27 = vld [vmem:[#allocation62_spill] sm:$0xff] }
 0x700   : > { %v7327_v61 = vadd.f32 %v7199_v24, %v659_v38 }
 0x703   : > { %v7142_v58 = vpop.f32.mrf.mxu2 }
 0x704   : > { %v7143_v12 = vadd.f32 %v7142_v58, %v7054_v18 }
 0x706   : > { %v7200_v21 = vadd.f32 %v7143_v12, %v13941_v25  ;;  %v13961_v25 = vld [vmem:[#allocation45_spill] sm:$0xff] }
 0x708   : > { %v7328_v34 = vadd.f32 %v7200_v21, %v661_v11 }
 0x70a   : > { %v7352_v52 = vpack.c.bf16 %v7328_v34, %v7327_v61 }
 0x70b   : > { %v7145_v20 = vpop.f32.mrf.mxu2 }
 0x70c   : > { %v7146_v28 = vadd.f32 %v7145_v20, %v7057_v29  ;;  %7409 = vmatpush.bf16.msrb.mxu3 %v7352_v52  ;;  %v7069_v29 = vadd.f32 %v13963_v7, %v13962_v40  ;;  %v13965_v20 = vld [vmem:[#allocation34_spill] sm:$0xff]  ;;  %v13976_v40 = vld [vmem:[#allocation120_spill] sm:$0xff] }
 0x70d   : > { %v686_v7 = vadd.f32 %v13030_v37, %v13976_v40 }
 0x70e   : > { %v7201_v3 = vadd.f32 %v7146_v28, %v13945_v6  ;;  %v13967_v6 = vld [vmem:[#allocation33_spill] sm:$0xff] }
 0x710   : > { %v13152_v42 = vadd.f32 %v7201_v3, %v664_v45  ;;  %7410 = vmatpush.bf16.msrb.mxu3 %v7351_v33  ;;  %v7062_v33 = vadd.f32 %v13951_v43, %v13950_v10  ;;  %v13966_v45 = vld [vmem:[#allocation66_spill] sm:$0xff]  ;;  %v13971_v10 = vld [vmem:[#allocation53_spill] sm:$0xff] }
 0x711   : > { %v7072_v3 = vadd.f32 %v13967_v6, %v13966_v45 }
 0x713   : > { %v7147_v8 = vpop.f32.mrf.mxu2 }
 0x714   : > { %v7148_v16 = vadd.f32 %v7147_v8, %v7059_v39  ;;  %7411 = vmatpush.bf16.msrb.mxu3 %v7350_v17  ;;  %v13952_v17 = vld [vmem:[#allocation109_spill] sm:$0xff] }
 0x715   : > { %v669_v38 = vadd.f32 %v13030_v37, %v13952_v17  ;;  %v13968_v8 = vld [vmem:[#allocation113_spill] sm:$0xff]  ;;  %v7078_v17 = vpop.f32.mrf.mxu1 }
 0x716   : > { %v7202_v51 = vadd.f32 %v7148_v16, %v13949_v57  ;;  %v679_v16 = vadd.f32 %v13030_v37, %v13968_v8  ;;  %v13978_v8 = vld [vmem:[#allocation81_spill] sm:$0xff] }
 0x718   : > { %v13159_v9 = vadd.f32 %v7202_v51, %v666_v31  ;;  %7412 = vmatpush.bf16.msrb.mxu3 %v7349_v36  ;;  %v7064_v36 = vadd.f32 %v13955_v32, %v13954_v22  ;;  %v13970_v51 = vld [vmem:[#allocation93_spill] sm:$0xff]  ;;  %v9371_v32 = vld [vmem:[#allocation11] sm:$0xf] }
 0x719   : > { %v7074_v43 = vadd.f32 %v13971_v10, %v13970_v51 }
 0x71a   : > { %v7353_v1 = vpack.c.bf16 %v13159_v9, %v13152_v42 }
 0x71b   : > { %v7150_v59 = vpop.f32.mrf.mxu2 }
 0x71c   : > { %v7151_v46 = vadd.f32 %v7150_v59, %v7062_v33  ;;  %7413 = vmatpush.bf16.msrb.mxu3 %v7348_v35  ;;  %v13957_v35 = vld [vmem:[#allocation122_spill] sm:$0xff]  ;;  %v6989_v59 = vpop.f32.mrf.mxu0 }
 0x71e   : > { %v7203_v24 = vadd.f32 %v7151_v46, %v13953_v27 }
 0x720   : > { %v13174_v61 = vadd.f32 %v7203_v24, %v669_v38  ;;  %7414 = vmatpush.bf16.msrb.mxu3 %v7347_v30  ;;  %v7067_v30 = vadd.f32 %v13959_v44, %v13958_v5  ;;  %v13972_v38 = vld [vmem:[#allocation115_spill] sm:$0xff]  ;;  %v13973_v24 = vld [vmem:[#allocation134_spill] sm:$0xff] }
 0x721   : > { %v681_v27 = vadd.f32 %v13030_v37, %v13972_v38  ;;  %v9852_v38 = vld [vmem:[#allocation11 + $0x24] sm:$0xf0] }
 0x723   : > { %v7152_v56 = vpop.f32.mrf.mxu2 }
 0x724   : > { %v7153_v18 = vadd.f32 %v7152_v56, %v7064_v36  ;;  %7415 = vmatpush.bf16.msrb.mxu3 %v7346_v54  ;;  %v674_v54 = vadd.f32 %v13030_v37, %v13960_v26  ;;  %v9848_v36 = vld [vmem:[#allocation11 + $0x4] sm:$0xf0]  ;;  %v6992_v44 = vpop.f32.mrf.mxu0 }
 0x725   : > { %v9372_v56 = vor.u32 %v9848_v36, %v9371_v32 }
 0x726   : > { %v7204_v58 = vadd.f32 %v7153_v18, %v13957_v35 }
 0x728   : > { %v13187_v12 = vadd.f32 %v7204_v58, %v671_v53  ;;  %7416 = vmatpush.bf16.msrb.mxu3 %v7345_v15  ;;  %v13964_v15 = vld [vmem:[#allocation112_spill] sm:$0xff]  ;;  %v13974_v58 = vld [vmem:[#allocation117_spill] sm:$0xff] }
 0x729   : > { %v676_v52 = vadd.f32 %v13030_v37, %v13964_v15  ;;  %v684_v5 = vadd.f32 %v13030_v37, %v13974_v58  ;;  %v13980_v58 = vld [vmem:[#allocation99_spill] sm:$0xff] }
 0x72a   : > { %v7354_v23 = vpack.c.bf16 %v13187_v12, %v13174_v61  ;;  %v9853_v61 = vld [vmem:[#allocation11 + $0x34] sm:$0xf]  ;;  %v9397_v12 = vld [vmem:[#allocation11 + $0x38] sm:$0xf0] }
 0x72b   : > { %v7155_v11 = vpop.f32.mrf.mxu2  ;;  %7417 = vmatmul.bf16.vlgmr.msrb.gmra.mxu3 %v9372_v56 }
 0x72c   : > { %v7156_v19 = vadd.f32 %v7155_v11, %v7067_v30  ;;  %v13975_v30 = vld [vmem:[#allocation25_spill] sm:$0xff]  ;;  %v6994_v15 = vpop.f32.mrf.mxu0 }
 0x72e   : > { %v7205_v21 = vadd.f32 %v7156_v19, %v13961_v25  ;;  %v7081_v19 = vpop.f32.mrf.mxu1 }
 0x730   : > { %v13199_v34 = vadd.f32 %v7205_v21, %v674_v54  ;;  %v7079_v54 = vadd.f32 %v7078_v17, %v6989_v59  ;;  %v9387_v17 = vld [vmem:[#allocation11 + $0x20] sm:$0xf] }
 0x733   : > { %v7157_v62 = vpop.f32.mrf.mxu2 }
 0x734   : > { %v7158_v2 = vadd.f32 %v7157_v62, %v7069_v29  ;;  %v9379_v62 = vld [vmem:[#allocation11 + $0x10] sm:$0xf] }
 0x736   : > { %v7206_v28 = vadd.f32 %v7158_v2, %v13965_v20  ;;  %v9850_v2 = vld [vmem:[#allocation11 + $0x14] sm:$0xf0]  ;;  %v7083_v20 = vpop.f32.mrf.mxu1 }
 0x738   : > { %v13206_v0 = vadd.f32 %v7206_v28, %v676_v52  ;;  %v7082_v28 = vadd.f32 %v7081_v19, %v6992_v44 }
 0x73a   : > { %v7355_v55 = vpack.c.bf16 %v13206_v0, %v13199_v34  ;;  %v9389_v34 = vld [vmem:[#allocation11 + $0x28] sm:$0xf0] }
 0x73b   : > { %v7160_v14 = vpop.f32.mrf.mxu2 }
 0x73c   : > { %v7161_v39 = vadd.f32 %v7160_v14, %v7072_v3  ;;  %v13977_v14 = vld [vmem:[#allocation123_spill] sm:$0xff] }
 0x73e   : > { %v7207_v31 = vadd.f32 %v7161_v39, %v13969_v13  ;;  %v689_v39 = vadd.f32 %v13030_v37, %v13977_v14  ;;  %v7086_v51 = vpop.f32.mrf.mxu1 }
 0x740   : > { %v13215_v57 = vadd.f32 %v7207_v31, %v679_v16  ;;  %v6997_v31 = vpop.f32.mrf.mxu0 }
 0x743   : > { %v7162_v33 = vpop.f32.mrf.mxu2 }
 0x744   : > { %v7163_v46 = vadd.f32 %v7162_v33, %v7074_v43  ;;  %v13979_v33 = vld [vmem:[#allocation126_spill] sm:$0xff] }
 0x745   : > { %v691_v59 = vadd.f32 %v13030_v37, %v13979_v33 }
 0x746   : > { %v7208_v22 = vadd.f32 %v7163_v46, %v13973_v24 }
 0x748   : > { %v13222_v18 = vadd.f32 %v7208_v22, %v681_v27  ;;  %v9388_v27 = vor.u32 %v9852_v38, %v9387_v17  ;;  %v7087_v22 = vadd.f32 %v7086_v51, %v6997_v31 }
 0x74a   : > { %v7356_v4 = vpack.c.bf16 %v13222_v18, %v13215_v57  ;;  %v9851_v18 = vld [vmem:[#allocation11 + $0x24] sm:$0xf] }
 0x74b   : > { %v7165_v53 = vpop.f32.mrf.mxu2  ;;  %v9392_v0 = vor.u32 %v9851_v18, %v9389_v34 }
 0x74c   : > { %v7166_v35 = vadd.f32 %v7165_v53, %v12983_v41  ;;  %v9380_v41 = vor.u32 %v9850_v2, %v9379_v62  ;;  %v6999_v53 = vpop.f32.mrf.mxu0 }
 0x74e   : > { %v7209_v11 = vadd.f32 %v7166_v35, %v13975_v30  ;;  %7422 = vmatmul.bf16.gmra.mxu3 %v9380_v41  ;;  %v7088_v35 = vpop.f32.mrf.mxu1 }
 0x750   : > { %v13230_v26 = vadd.f32 %v7209_v11, %v684_v5  ;;  %v694_v5 = vadd.f32 %v13030_v37, %v13980_v58  ;;  %v7089_v11 = vadd.f32 %v7088_v35, %v6999_v53 }
 0x753   : > { %v7167_v25 = vpop.f32.mrf.mxu2 }
 0x754   : > { %v7168_v21 = vadd.f32 %v7167_v25, %v7079_v54  ;;  %v13981_v25 = vld [vmem:[#allocation103_spill] sm:$0xff] }
 0x756   : > { %v7210_v29 = vadd.f32 %v7168_v21, %v12985_v48  ;;  %v7084_v48 = vadd.f32 %v7083_v20, %v6994_v15  ;;  %v7091_v54 = vpop.f32.mrf.mxu1  ;;  %v696_v21 = vadd.f32 %v13030_v37, %v13981_v25  ;;  %v13982_v20 = vld [vmem:[#allocation106_spill] sm:$0xff] }
 0x758   : > { %v7338_v52 = vadd.f32 %v7210_v29, %v686_v7  ;;  %v9395_v7 = vld [vmem:[#allocation11 + $0x30] sm:$0xf]  ;;  %v9854_v29 = vld [vmem:[#allocation11 + $0x34] sm:$0xf0] }
 0x759   : > { %v9396_v62 = vor.u32 %v9854_v29, %v9395_v7 }
 0x75a   : > { %v7357_v45 = vpack.c.bf16 %v7338_v52, %v13230_v26  ;;  %v7002_v26 = vpop.f32.mrf.mxu0 }
 0x75b   : > { %v7170_v6 = vpop.f32.mrf.mxu2  ;;  %v7092_v41 = vadd.f32 %v7091_v54, %v7002_v26 }
 0x75c   : > { %v7171_v3 = vadd.f32 %v7170_v6, %v7082_v28  ;;  %v699_v28 = vadd.f32 %v13030_v37, %v13982_v20 }
 0x75e   : > { %v7211_v16 = vadd.f32 %v7171_v3, %v13978_v8  ;;  %7427 = vmatmul.bf16.gmra.mxu3 %v9388_v27  ;;  %v7093_v14 = vpop.f32.mrf.mxu1 }
 0x760   : > { %v7339_v13 = vadd.f32 %v7211_v16, %v689_v39 }
 0x762   : > { %v7004_v3 = vpop.f32.mrf.mxu0 }
 0x763   : > { %v7172_v10 = vpop.f32.mrf.mxu2  ;;  %v7094_v8 = vadd.f32 %v7093_v14, %v7004_v3 }
 0x764   : > { %v7173_v43 = vadd.f32 %v7172_v10, %v7084_v48 }
 0x766   : > { %v7212_v46 = vadd.f32 %v7173_v43, %v12999_v49  ;;  %v9381_v43 = vld [vmem:[#allocation11 + $0x18] sm:$0xf0] }
 0x768   : > { %v7340_v24 = vadd.f32 %v7212_v46, %v691_v59 }
 0x76a   : > { %v7358_v32 = vpack.c.bf16 %v7340_v24, %v7339_v13  ;;  %v13983_v13 = vld [vmem:[#allocation108_spill] sm:$0xff] }
 0x76b   : > { %v7175_v36 = vpop.f32.mrf.mxu2  ;;  %v701_v31 = vadd.f32 %v13030_v37, %v13983_v13 }
 0x76c   : > { %v7176_v56 = vadd.f32 %v7175_v36, %v7087_v22 }
 0x76e   : > { %v7213_v44 = vadd.f32 %v7176_v56, %v13006_v63  ;;  %7432 = vmatmul.bf16.gmra.mxu3 %v9396_v62 }
 0x770   : > { %v7341_v30 = vadd.f32 %v7213_v44, %v694_v5 }
 0x773   : > { %v7177_v19 = vpop.f32.mrf.mxu2 }
 0x774   : > { %v7178_v49 = vadd.f32 %v7177_v19, %v7089_v11 }
 0x776   : > { %v7214_v40 = vadd.f32 %v7178_v49, %v13013_v60 }
 0x778   : > { %v7342_v2 = vadd.f32 %v7214_v40, %v696_v21 }
 0x77a   : > { %v7359_v15 = vpack.c.bf16 %v7342_v2, %v7341_v30 }
 0x77b   : > { %v7180_v52 = vpop.f32.mrf.mxu2 }
 0x77c   : > { %v7181_v63 = vadd.f32 %v7180_v52, %v7092_v41 }
 0x77e   : > { %v7215_v6 = vadd.f32 %v7181_v63, %v13020_v47  ;;  %v9847_v47 = vld [vmem:[#allocation11 + $0x4] sm:$0xf] }
 0x780   : > { %v7343_v39 = vadd.f32 %v7215_v6, %v699_v28 }
 0x783   : > { %v7182_v16 = vpop.f32.mrf.mxu2 }
 0x784   : > { %v7183_v60 = vadd.f32 %v7182_v16, %v7094_v8 }
 0x786   : > { %v7216_v48 = vadd.f32 %v7183_v60, %v13025_v50  ;;  %v9373_v50 = vld [vmem:[#allocation11 + $0x8] sm:$0xf0] }
 0x787   : > { %v9376_v37 = vor.u32 %v9847_v47, %v9373_v50 }
 0x788   : > { %v7344_v51 = vadd.f32 %v7216_v48, %v701_v31 }
 0x78a   : > { %v7360_v10 = vpack.c.bf16 %v7344_v51, %v7343_v39 }
 0x78c   : > { %7438 = vmatpush.bf16.msra.mxu3 %v7360_v10 }
 0x790   : > { %7439 = vmatpush.bf16.msra.mxu3 %v7359_v15 }
 0x794   : > { %7440 = vmatpush.bf16.msra.mxu3 %v7358_v32 }
 0x798   : > { %7441 = vmatpush.bf16.msra.mxu3 %v7357_v45  ;;  %v9849_v45 = vld [vmem:[#allocation11 + $0x14] sm:$0xf] }
 0x799   : > { %v9384_v57 = vor.u32 %v9849_v45, %v9381_v43 }
 0x79c   : > { %7442 = vmatpush.bf16.msra.mxu3 %v7356_v4 }
 0x7a0   : > { %7443 = vmatpush.bf16.msra.mxu3 %v7355_v55 }
 0x7a4   : > { %7444 = vmatpush.bf16.msra.mxu3 %v7354_v23  ;;  %v9400_v23 = vor.u32 %v9853_v61, %v9397_v12 }
 0x7a8   : > { %7445 = vmatpush.bf16.msra.mxu3 %v7353_v1 }
 0x7ab   : > { %7446 = vmatmul.bf16.vlgmr.msra.gmra.mxu3 %v9376_v37 }
 0x7ae   : > { %v7418_v55 = vpop.f32.mrf.mxu3 }
 0x7b6   : > { %v7420_v4 = vpop.f32.mrf.mxu3 }
 0x7bb   : > { %7451 = vmatmul.bf16.gmra.mxu3 %v9384_v57 }
 0x7cb   : > { %7456 = vmatmul.bf16.gmra.mxu3 %v9392_v0 }
 0x7d1   : > { %v7423_v33 = vpop.f32.mrf.mxu3 }
 0x7d9   : > { %v7425_v42 = vpop.f32.mrf.mxu3 }
 0x7db   : > { %7461 = vmatmul.bf16.gmra.mxu3 %v9400_v23 }
 0x7e1   : > { %v7428_v9 = vpop.f32.mrf.mxu3 }
 0x7e9   : > { %v7430_v1 = vpop.f32.mrf.mxu3 }
 0x7f1   : > { %v7433_v59 = vpop.f32.mrf.mxu3 }
 0x7f9   : > { %v7435_v46 = vpop.f32.mrf.mxu3 }
 0x82e   : > { %v7447_v17 = vpop.f32.mrf.mxu3 }
 0x82f   : > { %v7448_v38 = vadd.f32 %v7447_v17, %v7418_v55 }
 0x831   : > { %7467 = vst [vmem:[%s419_s18] sm:$0xff] %v7448_v38 }
 0x836   : > { %v7449_v27 = vpop.f32.mrf.mxu3 }
 0x837   : > { %v7450_v24 = vadd.f32 %v7449_v27, %v7420_v4 }
 0x839   : > { %7468 = vst [vmem:[%s419_s18 + $0x8] sm:$0xff] %v7450_v24 }
 0x83e   : > { %v7452_v22 = vpop.f32.mrf.mxu3 }
 0x83f   : > { %v7453_v32 = vadd.f32 %v7452_v22, %v7423_v33 }
 0x841   : > { %7469 = vst [vmem:[%s419_s18 + $0x10] sm:$0xff] %v7453_v32 }
 0x846   : > { %v7454_v36 = vpop.f32.mrf.mxu3 }
 0x847   : > { %v7455_v56 = vadd.f32 %v7454_v36, %v7425_v42 }
 0x849   : > { %7470 = vst [vmem:[%s419_s18 + $0x18] sm:$0xff] %v7455_v56 }
 0x84e   : > { %v7457_v53 = vpop.f32.mrf.mxu3 }
 0x84f   : > { %v7458_v35 = vadd.f32 %v7457_v53, %v7428_v9 }
 0x851   : > { %7471 = vst [vmem:[%s419_s18 + $0x20] sm:$0xff] %v7458_v35 }
 0x856   : > { %v7459_v58 = vpop.f32.mrf.mxu3 }
 0x857   : > { %v7460_v5 = vadd.f32 %v7459_v58, %v7430_v1 }
 0x859   : > { %7472 = vst [vmem:[%s419_s18 + $0x28] sm:$0xff] %v7460_v5 }
 0x85e   : > { %v7462_v44 = vpop.f32.mrf.mxu3 }
 0x85f   : > { %v7463_v30 = vadd.f32 %v7462_v44, %v7433_v59 }
 0x861   : > { %7473 = vst [vmem:[%s419_s18 + $0x30] sm:$0xff] %v7463_v30 }
 0x866   : > { %v7464_v11 = vpop.f32.mrf.mxu3 }
 0x867   : > { %v7465_v19 = vadd.f32 %v7464_v11, %v7435_v46 }
 0x869   : > { %7474 = vst [vmem:[%s419_s18 + $0x38] sm:$0xff] %v7465_v19 }
 0x86a   : > { %10121 = shalt.err (!%p10118_p8)
}
 0x86b   : > { %s10179_s26 = smov 128   ;;  %s10180_s30 = smov 8  }
 0x86c   : > { %9896 = dma.vmem_to_hbm [thread:$0]  (%p10274_p5), %s7489_s3, 1024, %s7491_s15, %s7476_s19, %s10179_s26, %s10179_s26, %s10180_s30  }
 0x86d PF: > { %p9923_p9 = scmp.ge.s32.totalorder %s10168_s16, 2  ;;  %s7505_s18 = sand.u32 1, %s10156_s13  }
 0x86e   : > { %s7506_s28 = scalar_lea.sflag [#allocation7], %s7505_s18 }
 0x86f   : > { %p9912_p10 = pnand %p9923_p9, %p10278_p6 }
 0x871   : > { %p9913_p11 = pneg %p9912_p10 }
 0x873   : > { %10151 = dma.done.wait (%p9913_p11), %s7506_s28, 1024  }
 0x874   : > { %10153 = vsyncadd (%p9913_p11), %s7506_s28, 4294966272  ;;  %s13985_s16 = sld [smem:[#allocation19_spill]]  ;;  %s13988_s13 = smov %s10160_s14 }
 0x875   : > { %s13986_s20 = sld [smem:[#allocation18_spill]] }
 0x876   : > { %s13987_s15 = sld [smem:[#allocation20_spill]] }
 0x87a   : > { %p23_p12 = scmp.ge.s32.totalorder %s13985_s16, 4  }
 0x87b   : > { %s13989_s14 = smov %s13986_s20 }
 0x87c   :  { %25 = sbr.rel (!%p23_p12) target bundleno = 9 (0x9), region = 116 }
 0x881   :  { %7512 = vsyncpa [#allocation6], 1 }
 0x882   :  { %7514 = vsyncpa [#allocation6 + $0x1], 1 }
 0x883   :  { %7515 = vsyncpa [#allocation9], 1 }
 0x884   :  { %7516 = vsyncpa [#allocation12], 1 }
 0x885   :  { %7517 = vsyncpa [#allocation7], 1 }
 0x886   :  { %7519 = vsyncpa [#allocation7 + $0x1], 1 }

</bundles_post_ra>
